<compile_context>
chip_gen: v5e
topology: v5e:2x2
jax: 0.10.0
libtpu: 0.0.40
codegen_flags: <defaults>
</compile_context>

<pallas_src>
import jax
import jax.numpy as jnp
from jax.experimental import pallas as pl
from jax.experimental.pallas import tpu as pltpu

IN_DIM = 28 * 28   # 784
HID = 512
OUT_DIM = 10
OUT_PAD = 128      # lane-dense padded width for the last layer
TB = 256           # batch tile (multiple of 16 for bf16 sublane packing)


def mlp_kernel(x_ref, w1_ref, b1_ref, w2_ref, b2_ref, w3_ref, b3_ref, o_ref):
    # fc1 (bf16 MXU, f32 acc) + bias/ReLU in f32
    h1 = jnp.dot(x_ref[...], w1_ref[...], preferred_element_type=jnp.float32)
    h1 = jnp.maximum(h1 + b1_ref[...], 0.0)
    # dropout -> identity (eval mode)
    # fc2
    h2 = jnp.dot(h1.astype(jnp.bfloat16), w2_ref[...],
                 preferred_element_type=jnp.float32)
    h2 = jnp.maximum(h2 + b2_ref[...], 0.0)
    # dropout -> identity (eval mode)
    # fc3 (padded to 128 output lanes, no activation)
    o = jnp.dot(h2.astype(jnp.bfloat16), w3_ref[...],
                preferred_element_type=jnp.float32)
    o_ref[...] = (o + b3_ref[...]).astype(o_ref.dtype)


def mlp_forward(x, w1, b1, w2, b2, w3, b3):
    """x: (B, 1, 28, 28) or (B, 784) float32. Returns (B, 10) float32."""
    x2d = x.reshape(-1, IN_DIM).astype(jnp.float32)
    B = x2d.shape[0]

    # Pad batch up to a multiple of the tile; padded rows are discarded later.
    Bp = ((B + TB - 1) // TB) * TB
    if Bp != B:
        x2d = jnp.pad(x2d, ((0, Bp - B), (0, 0)))

    # bf16 operands for the MXU; biases stay f32 for the VPU bias-add/ReLU.
    x_bf = x2d.astype(jnp.bfloat16)
    w1b = w1.astype(jnp.bfloat16)
    w2b = w2.astype(jnp.bfloat16)
    w3b = jnp.pad(w3, ((0, 0), (0, OUT_PAD - OUT_DIM))).astype(jnp.bfloat16)
    b1r = b1.reshape(1, HID).astype(jnp.float32)
    b2r = b2.reshape(1, HID).astype(jnp.float32)
    b3r = jnp.pad(b3, (0, OUT_PAD - OUT_DIM)).reshape(1, OUT_PAD).astype(jnp.float32)

    grid = (Bp // TB,)

    # Weights/biases: same block for every grid step -> VMEM-resident.
    def resident(shape):
        return pl.BlockSpec(shape, lambda i: tuple(0 for _ in shape))

    out = pl.pallas_call(
        mlp_kernel,
        out_shape=jax.ShapeDtypeStruct((Bp, OUT_PAD), jnp.float32),
        grid=grid,
        in_specs=[
            pl.BlockSpec((TB, IN_DIM), lambda i: (i, 0)),   # streamed x tiles
            resident((IN_DIM, HID)),
            resident((1, HID)),
            resident((HID, HID)),
            resident((1, HID)),
            resident((HID, OUT_PAD)),
            resident((1, OUT_PAD)),
        ],
        out_specs=pl.BlockSpec((TB, OUT_PAD), lambda i: (i, 0)),
        compiler_params=pltpu.CompilerParams(
            dimension_semantics=("parallel",),
            vmem_limit_bytes=16 << 20,
        ),
    )(x_bf, w1b, b1r, w2b, b2r, w3b, b3r)

    return out[:B, :OUT_DIM]


def init_params(key):
    """Deterministic init mimicking nn.Linear's U(-1/sqrt(fan_in), 1/sqrt(fan_in))."""
    ks = jax.random.split(key, 6)

    def linear(kw, kb, fan_in, fan_out):
        bound = 1.0 / (fan_in ** 0.5)
        w = jax.random.uniform(kw, (fan_in, fan_out), jnp.float32, -bound, bound)
        b = jax.random.uniform(kb, (fan_out,), jnp.float32, -bound, bound)
        return w, b

    w1, b1 = linear(ks[0], ks[1], IN_DIM, HID)
    w2, b2 = linear(ks[2], ks[3], HID, HID)
    w3, b3 = linear(ks[4], ks[5], HID, OUT_DIM)
    return w1, b1, w2, b2, w3, b3


if __name__ == "__main__":
    key = jax.random.PRNGKey(0)
    k_params, k_x = jax.random.split(key)

    w1, b1, w2, b2, w3, b3 = init_params(k_params)

    # Small MNIST-like batch: NCHW (8, 1, 28, 28). Note: at B=8 the MXU M-dim
    # is <7% utilized and runtime is call-overhead dominated; the tiling above
    # pays off at realistic batch sizes (>=128).
    x = jax.random.normal(k_x, (8, 1, 28, 28), jnp.float32)

    y = mlp_forward(x, w1, b1, w2, b2, w3, b3)
    y = jax.block_until_ready(y)

    # Reference with the same bf16-operand / f32-accumulate math.
    xr = x.reshape(-1, IN_DIM).astype(jnp.bfloat16)
    w1b = w1.astype(jnp.bfloat16)
    w2b = w2.astype(jnp.bfloat16)
    w3b = w3.astype(jnp.bfloat16)
    h1 = jnp.maximum(jnp.dot(xr, w1b, preferred_element_type=jnp.float32) + b1, 0.0)
    h2 = jnp.maximum(
        jnp.dot(h1.astype(jnp.bfloat16), w2b, preferred_element_type=jnp.float32) + b2,
        0.0)
    ref = jnp.dot(h2.astype(jnp.bfloat16), w3b, preferred_element_type=jnp.float32) + b3

    assert y.shape == (8, OUT_DIM)
    assert jnp.allclose(y, ref, atol=2e-2, rtol=2e-2), float(jnp.max(jnp.abs(y - ref)))

    print("KERNEL_OK")
</pallas_src>

<mosaic_0001>
module attributes {stable_mosaic.version = 11 : i64} {
  func.func @mlp_kernel(%arg0: i32, %arg1: memref<256x784xbf16, #tpu.memory_space<vmem>>, %arg2: memref<784x512xbf16, #tpu.memory_space<vmem>>, %arg3: memref<1x512xf32, #tpu.memory_space<vmem>>, %arg4: memref<512x512xbf16, #tpu.memory_space<vmem>>, %arg5: memref<1x512xf32, #tpu.memory_space<vmem>>, %arg6: memref<512x128xbf16, #tpu.memory_space<vmem>>, %arg7: memref<1x128xf32, #tpu.memory_space<vmem>>, %arg8: memref<256x128xf32, #tpu.memory_space<vmem>>) attributes {dimension_semantics = [#tpu.dimension_semantics<parallel>], iteration_bounds = array<i64: 1>, scalar_prefetch = 0 : i64, scratch_operands = 0 : i64, tpu.core_type = #tpu.core_type<tc>, window_params = [{transform_indices = @transform_0, window_bounds = array<i64: 256, 784>}, {pipeline_mode = #tpu.pipeline_mode<synchronous>, transform_indices = @transform_1, window_bounds = array<i64: 784, 512>}, {pipeline_mode = #tpu.pipeline_mode<synchronous>, transform_indices = @transform_2, window_bounds = array<i64: 1, 512>}, {pipeline_mode = #tpu.pipeline_mode<synchronous>, transform_indices = @transform_3, window_bounds = array<i64: 512, 512>}, {pipeline_mode = #tpu.pipeline_mode<synchronous>, transform_indices = @transform_4, window_bounds = array<i64: 1, 512>}, {pipeline_mode = #tpu.pipeline_mode<synchronous>, transform_indices = @transform_5, window_bounds = array<i64: 512, 128>}, {pipeline_mode = #tpu.pipeline_mode<synchronous>, transform_indices = @transform_6, window_bounds = array<i64: 1, 128>}, {transform_indices = @transform_7, window_bounds = array<i64: 256, 128>}]} {
    %c0 = arith.constant 0 : index
    %c0_0 = arith.constant 0 : index
    %0 = vector.load %arg1[%c0, %c0_0] : memref<256x784xbf16, #tpu.memory_space<vmem>>, vector<256x784xbf16>
    %c0_1 = arith.constant 0 : index
    %c0_2 = arith.constant 0 : index
    %1 = vector.load %arg2[%c0_1, %c0_2] : memref<784x512xbf16, #tpu.memory_space<vmem>>, vector<784x512xbf16>
    %cst = arith.constant dense<0.000000e+00> : vector<256x512xf32>
    %2 = tpu.matmul %0, %1, %cst {dimension_numbers = #tpu.dot_dimension_numbers<[1], [0], [0], [1], [0, 0, 1, 1], [], []>} : vector<256x784xbf16>, vector<784x512xbf16>, vector<256x512xf32> -> vector<256x512xf32>
    %c0_3 = arith.constant 0 : index
    %c0_4 = arith.constant 0 : index
    %3 = vector.load %arg3[%c0_3, %c0_4] : memref<1x512xf32, #tpu.memory_space<vmem>>, vector<1x512xf32>
    %4 = vector.broadcast %3 : vector<1x512xf32> to vector<256x512xf32>
    %5 = arith.addf %2, %4 : vector<256x512xf32>
    %cst_5 = arith.constant 0.000000e+00 : f32
    %6 = vector.broadcast %cst_5 : f32 to vector<256x512xf32>
    %7 = arith.maximumf %5, %6 : vector<256x512xf32>
    %8 = arith.truncf %7 : vector<256x512xf32> to vector<256x512xbf16>
    %c0_6 = arith.constant 0 : index
    %c0_7 = arith.constant 0 : index
    %9 = vector.load %arg4[%c0_6, %c0_7] : memref<512x512xbf16, #tpu.memory_space<vmem>>, vector<512x512xbf16>
    %cst_8 = arith.constant dense<0.000000e+00> : vector<256x512xf32>
    %10 = tpu.matmul %8, %9, %cst_8 {dimension_numbers = #tpu.dot_dimension_numbers<[1], [0], [0], [1], [0, 0, 1, 1], [], []>} : vector<256x512xbf16>, vector<512x512xbf16>, vector<256x512xf32> -> vector<256x512xf32>
    %c0_9 = arith.constant 0 : index
    %c0_10 = arith.constant 0 : index
    %11 = vector.load %arg5[%c0_9, %c0_10] : memref<1x512xf32, #tpu.memory_space<vmem>>, vector<1x512xf32>
    %12 = vector.broadcast %11 : vector<1x512xf32> to vector<256x512xf32>
    %13 = arith.addf %10, %12 : vector<256x512xf32>
    %cst_11 = arith.constant 0.000000e+00 : f32
    %14 = vector.broadcast %cst_11 : f32 to vector<256x512xf32>
    %15 = arith.maximumf %13, %14 : vector<256x512xf32>
    %16 = arith.truncf %15 : vector<256x512xf32> to vector<256x512xbf16>
    %c0_12 = arith.constant 0 : index
    %c0_13 = arith.constant 0 : index
    %17 = vector.load %arg6[%c0_12, %c0_13] : memref<512x128xbf16, #tpu.memory_space<vmem>>, vector<512x128xbf16>
    %cst_14 = arith.constant dense<0.000000e+00> : vector<256x128xf32>
    %18 = tpu.matmul %16, %17, %cst_14 {dimension_numbers = #tpu.dot_dimension_numbers<[1], [0], [0], [1], [0, 0, 1, 1], [], []>} : vector<256x512xbf16>, vector<512x128xbf16>, vector<256x128xf32> -> vector<256x128xf32>
    %c0_15 = arith.constant 0 : index
    %c0_16 = arith.constant 0 : index
    %19 = vector.load %arg7[%c0_15, %c0_16] : memref<1x128xf32, #tpu.memory_space<vmem>>, vector<1x128xf32>
    %20 = vector.broadcast %19 : vector<1x128xf32> to vector<256x128xf32>
    %21 = arith.addf %18, %20 : vector<256x128xf32>
    %c0_17 = arith.constant 0 : index
    %c0_18 = arith.constant 0 : index
    %22 = vector.load %arg8[%c0_17, %c0_18] : memref<256x128xf32, #tpu.memory_space<vmem>>, vector<256x128xf32>
    tpu.vector_store %arg8[%c0_17, %c0_18], %21 {strides = array<i32>} : memref<256x128xf32, #tpu.memory_space<vmem>>, vector<256x128xf32>,
    return
  }
  func.func @transform_0(%arg0: i32) -> (i32, i32) {
    %c0_i32 = arith.constant 0 : i32
    %c0_i32_0 = arith.constant 0 : i32
    return %arg0, %c0_i32 : i32, i32
  }
  func.func @transform_1(%arg0: i32) -> (i32, i32) {
    %c0_i32 = arith.constant 0 : i32
    %c0_i32_0 = arith.constant 0 : i32
    %c0_i32_1 = arith.constant 0 : i32
    return %c0_i32, %c0_i32_0 : i32, i32
  }
  func.func @transform_2(%arg0: i32) -> (i32, i32) {
    %c0_i32 = arith.constant 0 : i32
    %c0_i32_0 = arith.constant 0 : i32
    %c0_i32_1 = arith.constant 0 : i32
    return %c0_i32, %c0_i32_0 : i32, i32
  }
  func.func @transform_3(%arg0: i32) -> (i32, i32) {
    %c0_i32 = arith.constant 0 : i32
    %c0_i32_0 = arith.constant 0 : i32
    %c0_i32_1 = arith.constant 0 : i32
    return %c0_i32, %c0_i32_0 : i32, i32
  }
  func.func @transform_4(%arg0: i32) -> (i32, i32) {
    %c0_i32 = arith.constant 0 : i32
    %c0_i32_0 = arith.constant 0 : i32
    %c0_i32_1 = arith.constant 0 : i32
    return %c0_i32, %c0_i32_0 : i32, i32
  }
  func.func @transform_5(%arg0: i32) -> (i32, i32) {
    %c0_i32 = arith.constant 0 : i32
    %c0_i32_0 = arith.constant 0 : i32
    %c0_i32_1 = arith.constant 0 : i32
    return %c0_i32, %c0_i32_0 : i32, i32
  }
  func.func @transform_6(%arg0: i32) -> (i32, i32) {
    %c0_i32 = arith.constant 0 : i32
    %c0_i32_0 = arith.constant 0 : i32
    %c0_i32_1 = arith.constant 0 : i32
    return %c0_i32, %c0_i32_0 : i32, i32
  }
  func.func @transform_7(%arg0: i32) -> (i32, i32) {
    %c0_i32 = arith.constant 0 : i32
    %c0_i32_0 = arith.constant 0 : i32
    return %arg0, %c0_i32 : i32, i32
  }
}

</mosaic_0001>

<bundles_post_ra>
// kernel: tpu_custom_call.1
= control target key start
LH: loop header
LB: loop body
LE: loop exit
PB: predicated region body
PF: predicated region fallthrough
CT: control target
= control target key end

     0   :  { %12 = vsyncpa [#allocation3], 0  ;;  %s14354_s0 = inlined_call_operand.vmem [shape: bf16[256,784], index: 0, kind: input, shape index: {}]   ;;  %s14355_s1 = inlined_call_operand.vmem [shape: bf16[784,512], index: 1, kind: input, shape index: {}]   ;;  %s14356_s2 = inlined_call_operand.vmem [shape: f32[1,512], index: 2, kind: input, shape index: {}]   ;;  %s14357_s3 = inlined_call_operand.hbm [shape: bf16[512,512], index: 3, kind: input, shape index: {}]   ;;  %s14358_s4 = inlined_call_operand.vmem [shape: f32[1,512], index: 4, kind: input, shape index: {}]   ;;  %s14359_s5 = inlined_call_operand.hbm [shape: bf16[512,128], index: 5, kind: input, shape index: {}]   ;;  %s14360_s6 = inlined_call_operand.vmem [shape: f32[1,128], index: 6, kind: input, shape index: {}]   ;;  %s14361_s7 = inlined_call_operand.hbm [shape: f32[256,128], index: 7, kind: output, shape index: {}]  }
   0x1   :  { %13 = vsyncpa [#allocation6], 0 }
   0x2   :  { %14 = vsyncpa [#allocation4], 0  ;;  %s25_s26 = sshll.u32 %s14357_s3, 4  ;;  %s10224_s27 = smov [#allocation2]   ;;  %s26_s26 = int_to_ptr.hbm [resolvable:$true] %s25_s26 }
   0x3   :  { %s27_s28 = sshll.u32 %s10224_s27, 4  ;;  %s40_s8 = sshll.u32 %s14359_s5, 4  ;;  %s28_s28 = int_to_ptr.vmem [resolvable:$true] %s27_s28  ;;  %s41_s8 = int_to_ptr.hbm [resolvable:$true] %s40_s8 }
   0x4   :  { %s10225_s9 = smov 256   ;;  %s10226_s10 = smov 16  }
   0x5   :  { %33 = dma.hbm_to_vmem [thread:$0]  %s26_s26, 16384, %s28_s28, [#allocation3], %s10225_s9, %s10225_s9, %s10226_s10  }
   0x6   :  { %s10227_s11 = smov [#allocation5]   ;;  %s10228_s13 = smov 64  }
   0x7   :  { %s42_s12 = sshll.u32 %s10227_s11, 4  ;;  %s10229_s14 = smov 4   ;;  %s43_s12 = int_to_ptr.vmem [resolvable:$true] %s42_s12 }
   0x8   :  { %48 = dma.hbm_to_vmem [thread:$0]  %s41_s8, 4096, %s43_s12, [#allocation6], %s10228_s13, %s10228_s13, %s10229_s14  }
   0x9   :  { %10218 = dma.done.wait [#allocation3], 16384  }
   0xa   :  { %10219 = vsyncadd [#allocation3], 4294950912 }
   0xb   :  { %10220 = dma.done.wait [#allocation6], 4096  }
   0xc   :  { %10221 = vsyncadd [#allocation6], 4294963200  ;;  %v8291_v0 = vld [vmem:[%s14355_s1 + $0xe0] sm:$0xf]  ;;  %v9807_v1 = vld [vmem:[%s14355_s1 + $0xec] sm:$0xf0] }
   0xd   :  { %v8419_v2 = vld [vmem:[%s14355_s1 + $0x1e0] sm:$0xf]  ;;  %v8292_v3 = vor.u32 %v9807_v1, %v8291_v0  ;;  %v9839_v4 = vld [vmem:[%s14355_s1 + $0x1ec] sm:$0xf0]  ;;  %vm1934_vm0 = vcmask 130048   ;;  %s7715_s15 = sshll.u32 %s14361_s7, 4  ;;  %s7716_s15 = int_to_ptr.hbm [resolvable:$true] %s7715_s15 }
   0xe   :  { %v8547_v5 = vld [vmem:[%s14355_s1 + $0x2e0] sm:$0xf]  ;;  %v9871_v6 = vld [vmem:[%s14355_s1 + $0x2ec] sm:$0xf0]  ;;  %v8420_v7 = vor.u32 %v9839_v4, %v8419_v2  ;;  %s10231_s16 = smov 128   ;;  %s10232_s5 = smov 8  }
   0xf   :  { %v8548_v8 = vor.u32 %v9871_v6, %v8547_v5  ;;  %v8675_v9 = vld [vmem:[%s14355_s1 + $0x3e0] sm:$0xf]  ;;  %v9903_v10 = vld [vmem:[%s14355_s1 + $0x3ec] sm:$0xf0]  ;;  %1983 = vmatpush.bf16.msra.mxu0 %v8292_v3 }
  0x10   :  { %v8275_v11 = vld [vmem:[%s14355_s1 + $0xc0] sm:$0xf]  ;;  %v8676_v12 = vor.u32 %v9903_v10, %v8675_v9  ;;  %v9803_v13 = vld [vmem:[%s14355_s1 + $0xcc] sm:$0xf0]  ;;  %2072 = vmatpush.bf16.msra.mxu1 %v8420_v7 }
  0x11   :  { %v8403_v14 = vld [vmem:[%s14355_s1 + $0x1c0] sm:$0xf]  ;;  %v9835_v15 = vld [vmem:[%s14355_s1 + $0x1cc] sm:$0xf0]  ;;  %2161 = vmatpush.bf16.msra.mxu2 %v8548_v8  ;;  %v8276_v16 = vor.u32 %v9803_v13, %v8275_v11 }
  0x12   :  { %v8404_v17 = vor.u32 %v9835_v15, %v8403_v14  ;;  %v8531_v18 = vld [vmem:[%s14355_s1 + $0x2c0] sm:$0xf]  ;;  %v9867_v19 = vld [vmem:[%s14355_s1 + $0x2cc] sm:$0xf0]  ;;  %2250 = vmatpush.bf16.msra.mxu3 %v8676_v12 }
  0x13   :  { %v8659_v20 = vld [vmem:[%s14355_s1 + $0x3c0] sm:$0xf]  ;;  %v8532_v21 = vor.u32 %v9867_v19, %v8531_v18  ;;  %v9899_v22 = vld [vmem:[%s14355_s1 + $0x3cc] sm:$0xf0]  ;;  %1984 = vmatpush.bf16.msra.mxu0 %v8276_v16 }
  0x14   :  { %v8259_v23 = vld [vmem:[%s14355_s1 + $0xa0] sm:$0xf]  ;;  %v9799_v24 = vld [vmem:[%s14355_s1 + $0xac] sm:$0xf0]  ;;  %v8660_v25 = vor.u32 %v9899_v22, %v8659_v20  ;;  %2073 = vmatpush.bf16.msra.mxu1 %v8404_v17 }
  0x15   :  { %v8387_v26 = vld [vmem:[%s14355_s1 + $0x1a0] sm:$0xf]  ;;  %v9831_v27 = vld [vmem:[%s14355_s1 + $0x1ac] sm:$0xf0]  ;;  %v8260_v29 = vor.u32 %v9799_v24, %v8259_v23  ;;  %2162 = vmatpush.bf16.msra.mxu2 %v8532_v21 }
  0x16   :  { %v8515_v28 = vld [vmem:[%s14355_s1 + $0x2a0] sm:$0xf]  ;;  %v9863_v30 = vld [vmem:[%s14355_s1 + $0x2ac] sm:$0xf0]  ;;  %v8388_v33 = vor.u32 %v9831_v27, %v8387_v26  ;;  %2251 = vmatpush.bf16.msra.mxu3 %v8660_v25 }
  0x17   :  { %v8643_v31 = vld [vmem:[%s14355_s1 + $0x3a0] sm:$0xf]  ;;  %v9895_v32 = vld [vmem:[%s14355_s1 + $0x3ac] sm:$0xf0]  ;;  %v8516_v34 = vor.u32 %v9863_v30, %v8515_v28  ;;  %1985 = vmatpush.bf16.msra.mxu0 %v8260_v29  ;;  %v9668_v29 = vld [vmem:[%s14354_s0 + $0x18] sm:$0xf0] }
  0x18   :  { %v8243_v35 = vld [vmem:[%s14355_s1 + $0x80] sm:$0xf]  ;;  %v9795_v36 = vld [vmem:[%s14355_s1 + $0x8c] sm:$0xf0]  ;;  %v8644_v38 = vor.u32 %v9895_v32, %v8643_v31  ;;  %2074 = vmatpush.bf16.msra.mxu1 %v8388_v33  ;;  %v9665_v30 = vld [vmem:[%s14354_s0 + $0x4] sm:$0xf] }
  0x19   :  { %v8371_v37 = vld [vmem:[%s14355_s1 + $0x180] sm:$0xf]  ;;  %v9827_v39 = vld [vmem:[%s14355_s1 + $0x18c] sm:$0xf0]  ;;  %v8244_v44 = vor.u32 %v9795_v36, %v8243_v35  ;;  %2163 = vmatpush.bf16.msra.mxu2 %v8516_v34  ;;  %v9805_v35 = vld [vmem:[%s14355_s1 + $0xe4] sm:$0xf] }
  0x1a   :  { %v8499_v40 = vld [vmem:[%s14355_s1 + $0x280] sm:$0xf]  ;;  %v9859_v41 = vld [vmem:[%s14355_s1 + $0x28c] sm:$0xf0]  ;;  %v8372_v45 = vor.u32 %v9827_v39, %v8371_v37  ;;  %2252 = vmatpush.bf16.msra.mxu3 %v8644_v38  ;;  %v8293_v36 = vld [vmem:[%s14355_s1 + $0xf0] sm:$0xf0] }
  0x1b   :  { %v8627_v42 = vld [vmem:[%s14355_s1 + $0x380] sm:$0xf]  ;;  %v9891_v43 = vld [vmem:[%s14355_s1 + $0x38c] sm:$0xf0]  ;;  %v8500_v46 = vor.u32 %v9859_v41, %v8499_v40  ;;  %1986 = vmatpush.bf16.msra.mxu0 %v8244_v44  ;;  %v7739_v39 = vld [vmem:[%s14354_s0 + $0x8] sm:$0xf] }
  0x1c   :  { %v8227_v47 = vld [vmem:[%s14355_s1 + $0x60] sm:$0xf]  ;;  %v9791_v48 = vld [vmem:[%s14355_s1 + $0x6c] sm:$0xf0]  ;;  %v8628_v50 = vor.u32 %v9891_v43, %v8627_v42  ;;  %2075 = vmatpush.bf16.msra.mxu1 %v8372_v45  ;;  %v9669_v40 = vld [vmem:[%s14354_s0 + $0x20] sm:$0xf0] }
  0x1d   :  { %v8355_v49 = vld [vmem:[%s14355_s1 + $0x160] sm:$0xf]  ;;  %v9823_v51 = vld [vmem:[%s14355_s1 + $0x16c] sm:$0xf0]  ;;  %v8228_v56 = vor.u32 %v9791_v48, %v8227_v47  ;;  %2164 = vmatpush.bf16.msra.mxu2 %v8500_v46  ;;  %v9666_v41 = vld [vmem:[%s14354_s0 + $0xc] sm:$0xf]  ;;  %v8296_v48 = vor.u32 %v9805_v35, %v8293_v36 }
  0x1e   :  { %v8483_v52 = vld [vmem:[%s14355_s1 + $0x260] sm:$0xf]  ;;  %v9855_v53 = vld [vmem:[%s14355_s1 + $0x26c] sm:$0xf0]  ;;  %v8356_v57 = vor.u32 %v9823_v51, %v8355_v49  ;;  %2253 = vmatpush.bf16.msra.mxu3 %v8628_v50  ;;  %v7741_v43 = vld [vmem:[%s14354_s0 + $0x24] sm:$0xf0] }
  0x1f   :  { %v8611_v54 = vld [vmem:[%s14355_s1 + $0x360] sm:$0xf]  ;;  %v9887_v55 = vld [vmem:[%s14355_s1 + $0x36c] sm:$0xf0]  ;;  %v8484_v58 = vor.u32 %v9855_v53, %v8483_v52  ;;  %1987 = vmatpush.bf16.msra.mxu0 %v8228_v56  ;;  %v10523_v52 = vor.u32 %v9669_v40, %v7739_v39  ;;  %v10525_v53 = vor.u32 %v9666_v41, %v7741_v43  ;;  %v9689_v35 = vld [vmem:[%s14354_s0 + $0xc0] sm:$0xf0] }
  0x20   :  { %v8211_v59 = vld [vmem:[%s14355_s1 + $0x40] sm:$0xf]  ;;  %v9787_v60 = vld [vmem:[%s14355_s1 + $0x4c] sm:$0xf0]  ;;  %v8612_v62 = vor.u32 %v9887_v55, %v8611_v54  ;;  %2076 = vmatpush.bf16.msra.mxu1 %v8356_v57  ;;  %v9686_v36 = vld [vmem:[%s14354_s0 + $0xac] sm:$0xf] }
  0x21   :  { %v8339_v61 = vld [vmem:[%s14355_s1 + $0x140] sm:$0xf]  ;;  %v9819_v63 = vld [vmem:[%s14355_s1 + $0x14c] sm:$0xf0]  ;;  %v8212_v4 = vor.u32 %v9787_v60, %v8211_v59  ;;  %2165 = vmatpush.bf16.msra.mxu2 %v8484_v58  ;;  %14681 = vst [vmem:[#allocation13_spill] sm:$0xff] %v10523_v52 }
  0x22   :  { %v8467_v0 = vld [vmem:[%s14355_s1 + $0x240] sm:$0xf]  ;;  %v9851_v1 = vld [vmem:[%s14355_s1 + $0x24c] sm:$0xf0]  ;;  %v8340_v5 = vor.u32 %v9819_v63, %v8339_v61  ;;  %2254 = vmatpush.bf16.msra.mxu3 %v8612_v62  ;;  %14682 = vst [vmem:[#allocation14_spill] sm:$0xff] %v10525_v53 }
  0x23   :  { %v8595_v2 = vld [vmem:[%s14355_s1 + $0x340] sm:$0xf]  ;;  %v9883_v3 = vld [vmem:[%s14355_s1 + $0x34c] sm:$0xf0]  ;;  %v8468_v6 = vor.u32 %v9851_v1, %v8467_v0  ;;  %1988 = vmatpush.bf16.msra.mxu0 %v8212_v4  ;;  %v9801_v58 = vld [vmem:[%s14355_s1 + $0xc4] sm:$0xf] }
  0x24   :  { %v8195_v7 = vld [vmem:[%s14355_s1 + $0x20] sm:$0xf]  ;;  %v9783_v8 = vld [vmem:[%s14355_s1 + $0x2c] sm:$0xf0]  ;;  %v8596_v10 = vor.u32 %v9883_v3, %v8595_v2  ;;  %2077 = vmatpush.bf16.msra.mxu1 %v8340_v5  ;;  %v8277_v60 = vld [vmem:[%s14355_s1 + $0xd0] sm:$0xf0] }
  0x25   :  { %v8323_v9 = vld [vmem:[%s14355_s1 + $0x120] sm:$0xf]  ;;  %v9815_v11 = vld [vmem:[%s14355_s1 + $0x12c] sm:$0xf0]  ;;  %v8196_v17 = vor.u32 %v9783_v8, %v8195_v7  ;;  %2166 = vmatpush.bf16.msra.mxu2 %v8468_v6  ;;  %v8280_v63 = vor.u32 %v9801_v58, %v8277_v60  ;;  %v7759_v1 = vld [vmem:[%s14354_s0 + $0x38] sm:$0xf] }
  0x26   :  { %v8451_v12 = vld [vmem:[%s14355_s1 + $0x220] sm:$0xf]  ;;  %v9847_v13 = vld [vmem:[%s14355_s1 + $0x22c] sm:$0xf0]  ;;  %v8324_v21 = vor.u32 %v9815_v11, %v8323_v9  ;;  %2255 = vmatpush.bf16.msra.mxu3 %v8596_v10  ;;  %v9675_v2 = vld [vmem:[%s14354_s0 + $0x50] sm:$0xf0] }
  0x27   :  { %v8579_v14 = vld [vmem:[%s14355_s1 + $0x320] sm:$0xf]  ;;  %v9879_v15 = vld [vmem:[%s14355_s1 + $0x32c] sm:$0xf0]  ;;  %v8452_v22 = vor.u32 %v9847_v13, %v8451_v12  ;;  %1989 = vmatpush.bf16.msra.mxu0 %v8196_v17  ;;  %v9672_v3 = vld [vmem:[%s14354_s0 + $0x3c] sm:$0xf]  ;;  %v10573_v9 = vor.u32 %v9675_v2, %v7759_v1 }
  0x28   :  { %v8179_v16 = vld [vmem:[%s14355_s1] sm:$0xf]  ;;  %v9779_v18 = vld [vmem:[%s14355_s1 + $0xc] sm:$0xf0]  ;;  %v8580_v26 = vor.u32 %v9879_v15, %v8579_v14  ;;  %2078 = vmatpush.bf16.msra.mxu1 %v8324_v21  ;;  %v7761_v4 = vld [vmem:[%s14354_s0 + $0x54] sm:$0xf0] }
  0x29   :  { %v8307_v19 = vld [vmem:[%s14355_s1 + $0x100] sm:$0xf]  ;;  %v9811_v20 = vld [vmem:[%s14355_s1 + $0x10c] sm:$0xf0]  ;;  %v8180_v33 = vor.u32 %v9779_v18, %v8179_v16  ;;  %2167 = vmatpush.bf16.msra.mxu2 %v8452_v22  ;;  %v9676_v6 = vld [vmem:[%s14354_s0 + $0x58] sm:$0xf0]  ;;  %v10575_v10 = vor.u32 %v9672_v3, %v7761_v4 }
  0x2a   :  { %v8435_v23 = vld [vmem:[%s14355_s1 + $0x200] sm:$0xf]  ;;  %v9843_v24 = vld [vmem:[%s14355_s1 + $0x20c] sm:$0xf0]  ;;  %v8308_v37 = vor.u32 %v9811_v20, %v8307_v19  ;;  %2256 = vmatpush.bf16.msra.mxu3 %v8580_v26  ;;  %v9673_v7 = vld [vmem:[%s14354_s0 + $0x44] sm:$0xf] }
  0x2b   :  { %v8563_v25 = vld [vmem:[%s14355_s1 + $0x300] sm:$0xf]  ;;  %v9875_v27 = vld [vmem:[%s14355_s1 + $0x30c] sm:$0xf0]  ;;  %v8436_v38 = vor.u32 %v9843_v24, %v8435_v23  ;;  %1990 = vmatpush.bf16.msra.mxu0 %v8180_v33  ;;  %14683 = vst [vmem:[#allocation15_spill] sm:$0xff] %v10573_v9 }
  0x2c   :  { %v7731_v28 = vld [vmem:[%s14354_s0] sm:$0xf]  ;;  %v9971_v32 = vld [vmem:[%s14355_s1 + $0x60c] sm:$0xf0]  ;;  %v8564_v42 = vor.u32 %v9875_v27, %v8563_v25  ;;  %2079 = vmatpush.bf16.msra.mxu1 %v8308_v37  ;;  %14684 = vst [vmem:[#allocation16_spill] sm:$0xff] %v10575_v10 }
  0x2d   :  { %v8947_v31 = vld [vmem:[%s14355_s1 + $0x600] sm:$0xf]  ;;  %v9935_v46 = vld [vmem:[%s14355_s1 + $0x4ec] sm:$0xf0]  ;;  %v10513_v47 = vor.u32 %v9668_v29, %v7731_v28  ;;  %2168 = vmatpush.bf16.msra.mxu2 %v8436_v38  ;;  %v9682_v14 = vld [vmem:[%s14354_s0 + $0x88] sm:$0xf0] }
  0x2e   :  { %v7733_v34 = vld [vmem:[%s14354_s0 + $0x1c] sm:$0xf0]  ;;  %v8948_v44 = vor.u32 %v9971_v32, %v8947_v31  ;;  %v9967_v50 = vld [vmem:[%s14355_s1 + $0x5ec] sm:$0xf0]  ;;  %2257 = vmatpush.bf16.msra.mxu3 %v8564_v42  ;;  %v9679_v15 = vld [vmem:[%s14354_s0 + $0x74] sm:$0xf] }
  0x2f   :  { %v8803_v45 = vld [vmem:[%s14355_s1 + $0x4e0] sm:$0xf]  ;;  %14679 = vst [vmem:[#allocation11_spill] sm:$0xff] %v10513_v47  ;;  %v10521_v51 = vor.u32 %v9665_v30, %v7733_v34  ;;  %1991 = vmatmul.bf16.vlgmr.msra.gmra.mxu0 %v10513_v47  ;;  %v9931_v57 = vld [vmem:[%s14355_s1 + $0x4cc] sm:$0xf0] }
  0x30   :  { %v8931_v49 = vld [vmem:[%s14355_s1 + $0x5e0] sm:$0xf]  ;;  %v8804_v54 = vor.u32 %v9935_v46, %v8803_v45  ;;  %2169 = vmatmul.bf16.vlgmr.msra.gmra.mxu2 %v10523_v52  ;;  %v9963_v62 = vld [vmem:[%s14355_s1 + $0x5cc] sm:$0xf0]  ;;  %v7795_v17 = vld [vmem:[%s14354_s0 + $0x78] sm:$0xf] }
  0x31   :  { %14680 = vst [vmem:[#allocation12_spill] sm:$0xff] %v10521_v51  ;;  %2524 = vmatpush.bf16.msrb.mxu2 %v8948_v44  ;;  %v8932_v55 = vor.u32 %v9967_v50, %v8931_v49  ;;  %2080 = vmatmul.bf16.vlgmr.msra.gmra.mxu1 %v10521_v51  ;;  %v8787_v56 = vld [vmem:[%s14355_s1 + $0x4c0] sm:$0xf]  ;;  %v7787_v13 = vld [vmem:[%s14354_s0 + $0x70] sm:$0xf] }
  0x32   :  { %2606 = vmatpush.bf16.msrb.mxu3 %v8296_v48  ;;  %2339 = vmatpush.bf16.msrb.mxu0 %v8804_v54  ;;  %v8788_v59 = vor.u32 %v9931_v57, %v8787_v56  ;;  %v8915_v61 = vld [vmem:[%s14355_s1 + $0x5c0] sm:$0xf]  ;;  %v7789_v16 = vld [vmem:[%s14354_s0 + $0x8c] sm:$0xf0]  ;;  %v9683_v18 = vld [vmem:[%s14354_s0 + $0x90] sm:$0xf0]  ;;  %v10609_v21 = vor.u32 %v9682_v14, %v7787_v13 }
  0x33   :  { %2258 = vmatmul.bf16.vlgmr.msra.gmra.mxu3 %v10525_v53  ;;  %2428 = vmatpush.bf16.msrb.mxu1 %v8932_v55  ;;  %v8916_v0 = vor.u32 %v9963_v62, %v8915_v61  ;;  %v7767_v5 = vld [vmem:[%s14354_s0 + $0x40] sm:$0xf]  ;;  %v9680_v19 = vld [vmem:[%s14354_s0 + $0x7c] sm:$0xf]  ;;  %v7797_v20 = vld [vmem:[%s14354_s0 + $0x94] sm:$0xf0]  ;;  %v10611_v22 = vor.u32 %v9679_v15, %v7789_v16  ;;  %v10613_v23 = vor.u32 %v9683_v18, %v7795_v17 }
  0x34   :  { %v7769_v8 = vld [vmem:[%s14354_s0 + $0x5c] sm:$0xf0]  ;;  %v10577_v11 = vor.u32 %v9676_v6, %v7767_v5  ;;  %14687 = vst [vmem:[#allocation19_spill] sm:$0xff] %v10609_v21  ;;  %v10615_v24 = vor.u32 %v9680_v19, %v7797_v20  ;;  %v9927_v26 = vld [vmem:[%s14355_s1 + $0x4ac] sm:$0xf0] }
  0x35   :  { %v10579_v12 = vor.u32 %v9673_v7, %v7769_v8  ;;  %14688 = vst [vmem:[#allocation20_spill] sm:$0xff] %v10611_v22  ;;  %v8771_v25 = vld [vmem:[%s14355_s1 + $0x4a0] sm:$0xf]  ;;  %v9797_v27 = vld [vmem:[%s14355_s1 + $0xa4] sm:$0xf] }
  0x36   :  { %2340 = vmatpush.bf16.msrb.mxu0 %v8788_v59  ;;  %2607 = vmatpush.bf16.msrb.mxu3 %v8280_v63  ;;  %14685 = vst [vmem:[#allocation17_spill] sm:$0xff] %v10577_v11  ;;  %v8772_v28 = vor.u32 %v9927_v26, %v8771_v25  ;;  %v8261_v29 = vld [vmem:[%s14355_s1 + $0xb0] sm:$0xf0]  ;;  %v8899_v30 = vld [vmem:[%s14355_s1 + $0x5a0] sm:$0xf] }
  0x37   :  { %2429 = vmatpush.bf16.msrb.mxu1 %v8916_v0  ;;  %14686 = vst [vmem:[#allocation18_spill] sm:$0xff] %v10579_v12  ;;  %v9959_v31 = vld [vmem:[%s14355_s1 + $0x5ac] sm:$0xf0]  ;;  %v8264_v32 = vor.u32 %v9797_v27, %v8261_v29  ;;  %v7815_v34 = vld [vmem:[%s14354_s0 + $0xa8] sm:$0xf] }
  0x38   :  { %14689 = vst [vmem:[#allocation21_spill] sm:$0xff] %v10613_v23  ;;  %v8900_v33 = vor.u32 %v9959_v31, %v8899_v30  ;;  %v7817_v37 = vld [vmem:[%s14354_s0 + $0xc4] sm:$0xf0]  ;;  %v7823_v38 = vld [vmem:[%s14354_s0 + $0xb0] sm:$0xf]  ;;  %v10663_v42 = vor.u32 %v9689_v35, %v7815_v34 }
  0x39   :  { %14690 = vst [vmem:[#allocation22_spill] sm:$0xff] %v10615_v24  ;;  %v9690_v39 = vld [vmem:[%s14354_s0 + $0xc8] sm:$0xf0]  ;;  %v9687_v40 = vld [vmem:[%s14354_s0 + $0xb4] sm:$0xf]  ;;  %v10665_v43 = vor.u32 %v9686_v36, %v7817_v37 }
  0x3a   :  { %2341 = vmatpush.bf16.msrb.mxu0 %v8772_v28  ;;  %2608 = vmatpush.bf16.msrb.mxu3 %v8264_v32  ;;  %v7825_v41 = vld [vmem:[%s14354_s0 + $0xcc] sm:$0xf0]  ;;  %14691 = vst [vmem:[#allocation23_spill] sm:$0xff] %v10663_v42  ;;  %v10667_v44 = vor.u32 %v9690_v39, %v7823_v38  ;;  %v7843_v46 = vld [vmem:[%s14354_s0 + $0xe0] sm:$0xf] }
  0x3b   :  { %2430 = vmatpush.bf16.msrb.mxu1 %v8900_v33  ;;  %14692 = vst [vmem:[#allocation24_spill] sm:$0xff] %v10665_v43  ;;  %v10669_v45 = vor.u32 %v9687_v40, %v7825_v41  ;;  %v9696_v48 = vld [vmem:[%s14354_s0 + $0xf8] sm:$0xf0]  ;;  %v9693_v49 = vld [vmem:[%s14354_s0 + $0xe4] sm:$0xf] }
  0x3c   :  { %14693 = vst [vmem:[#allocation25_spill] sm:$0xff] %v10667_v44  ;;  %v7845_v50 = vld [vmem:[%s14354_s0 + $0xfc] sm:$0xf0]  ;;  %v7851_v54 = vld [vmem:[%s14354_s0 + $0xe8] sm:$0xf]  ;;  %v10699_v58 = vor.u32 %v9696_v48, %v7843_v46 }
  0x3d   :  { %14694 = vst [vmem:[#allocation26_spill] sm:$0xff] %v10669_v45  ;;  %v9697_v55 = vld [vmem:[%s14354_s0 + $0x100] sm:$0xf0]  ;;  %v9694_v56 = vld [vmem:[%s14354_s0 + $0xec] sm:$0xf]  ;;  %v10701_v59 = vor.u32 %v9693_v49, %v7845_v50 }
  0x3e   :  { %v7853_v57 = vld [vmem:[%s14354_s0 + $0x104] sm:$0xf0]  ;;  %14695 = vst [vmem:[#allocation27_spill] sm:$0xff] %v10699_v58  ;;  %v10703_v60 = vor.u32 %v9697_v55, %v7851_v54  ;;  %v8755_v62 = vld [vmem:[%s14355_s1 + $0x480] sm:$0xf] }
  0x3f   :  { %1996 = vmatmul.bf16.gmra.mxu0 %v10573_v9  ;;  %14696 = vst [vmem:[#allocation28_spill] sm:$0xff] %v10701_v59  ;;  %v10705_v61 = vor.u32 %v9694_v56, %v7853_v57  ;;  %v9923_v63 = vld [vmem:[%s14355_s1 + $0x48c] sm:$0xf0]  ;;  %v9793_v0 = vld [vmem:[%s14355_s1 + $0x84] sm:$0xf] }
  0x40   :  { %2174 = vmatmul.bf16.gmra.mxu2 %v10577_v11  ;;  %14697 = vst [vmem:[#allocation29_spill] sm:$0xff] %v10703_v60  ;;  %v8756_v1 = vor.u32 %v9923_v63, %v8755_v62  ;;  %v8245_v2 = vld [vmem:[%s14355_s1 + $0x90] sm:$0xf0]  ;;  %v8883_v3 = vld [vmem:[%s14355_s1 + $0x580] sm:$0xf] }
  0x41   :  { %2085 = vmatmul.bf16.gmra.mxu1 %v10575_v10  ;;  %14698 = vst [vmem:[#allocation30_spill] sm:$0xff] %v10705_v61  ;;  %v9955_v4 = vld [vmem:[%s14355_s1 + $0x58c] sm:$0xf0]  ;;  %v8248_v5 = vor.u32 %v9793_v0, %v8245_v2  ;;  %v7871_v7 = vld [vmem:[%s14354_s0 + $0x118] sm:$0xf] }
  0x42   :  { %v8884_v6 = vor.u32 %v9955_v4, %v8883_v3  ;;  %2342 = vmatpush.bf16.msrb.mxu0 %v8756_v1  ;;  %v9703_v8 = vld [vmem:[%s14354_s0 + $0x130] sm:$0xf0]  ;;  %v9700_v13 = vld [vmem:[%s14354_s0 + $0x11c] sm:$0xf]  ;;  %v7873_v14 = vld [vmem:[%s14354_s0 + $0x134] sm:$0xf0] }
  0x43   :  { %2263 = vmatmul.bf16.gmra.mxu3 %v10579_v12  ;;  %v7879_v15 = vld [vmem:[%s14354_s0 + $0x120] sm:$0xf]  ;;  %v9704_v16 = vld [vmem:[%s14354_s0 + $0x138] sm:$0xf0]  ;;  %v9701_v17 = vld [vmem:[%s14354_s0 + $0x124] sm:$0xf]  ;;  %v10753_v19 = vor.u32 %v9703_v8, %v7871_v7  ;;  %v10755_v20 = vor.u32 %v9700_v13, %v7873_v14 }
  0x44   :  { %2609 = vmatpush.bf16.msrb.mxu3 %v8248_v5  ;;  %2431 = vmatpush.bf16.msrb.mxu1 %v8884_v6  ;;  %v7881_v18 = vld [vmem:[%s14354_s0 + $0x13c] sm:$0xf0]  ;;  %v10757_v25 = vor.u32 %v9704_v16, %v7879_v15  ;;  %v7899_v27 = vld [vmem:[%s14354_s0 + $0x150] sm:$0xf]  ;;  %v9710_v28 = vld [vmem:[%s14354_s0 + $0x168] sm:$0xf0] }
  0x45   :  { %14699 = vst [vmem:[#allocation31_spill] sm:$0xff] %v10753_v19  ;;  %v10759_v26 = vor.u32 %v9701_v17, %v7881_v18  ;;  %v9707_v29 = vld [vmem:[%s14354_s0 + $0x154] sm:$0xf]  ;;  %v7901_v30 = vld [vmem:[%s14354_s0 + $0x16c] sm:$0xf0]  ;;  %v10789_v35 = vor.u32 %v9710_v28, %v7899_v27 }
  0x46   :  { %14700 = vst [vmem:[#allocation32_spill] sm:$0xff] %v10755_v20  ;;  %v7907_v31 = vld [vmem:[%s14354_s0 + $0x158] sm:$0xf]  ;;  %v9711_v32 = vld [vmem:[%s14354_s0 + $0x170] sm:$0xf0]  ;;  %v10791_v36 = vor.u32 %v9707_v29, %v7901_v30 }
  0x47   :  { %14701 = vst [vmem:[#allocation33_spill] sm:$0xff] %v10757_v25  ;;  %v9708_v33 = vld [vmem:[%s14354_s0 + $0x15c] sm:$0xf]  ;;  %v7909_v34 = vld [vmem:[%s14354_s0 + $0x174] sm:$0xf0]  ;;  %v10793_v37 = vor.u32 %v9711_v32, %v7907_v31 }
  0x48   :  { %14702 = vst [vmem:[#allocation34_spill] sm:$0xff] %v10759_v26  ;;  %v10795_v38 = vor.u32 %v9708_v33, %v7909_v34  ;;  %v8739_v39 = vld [vmem:[%s14355_s1 + $0x460] sm:$0xf]  ;;  %v9919_v40 = vld [vmem:[%s14355_s1 + $0x46c] sm:$0xf0] }
  0x49   :  { %14703 = vst [vmem:[#allocation35_spill] sm:$0xff] %v10789_v35  ;;  %v9789_v41 = vld [vmem:[%s14355_s1 + $0x64] sm:$0xf]  ;;  %v8740_v46 = vor.u32 %v9919_v40, %v8739_v39  ;;  %v8229_v48 = vld [vmem:[%s14355_s1 + $0x70] sm:$0xf0] }
  0x4a   :  { %14704 = vst [vmem:[#allocation36_spill] sm:$0xff] %v10791_v36  ;;  %v8232_v49 = vor.u32 %v9789_v41, %v8229_v48  ;;  %v8867_v50 = vld [vmem:[%s14355_s1 + $0x560] sm:$0xf]  ;;  %v9951_v54 = vld [vmem:[%s14355_s1 + $0x56c] sm:$0xf0] }
  0x4b   :  { %14705 = vst [vmem:[#allocation37_spill] sm:$0xff] %v10793_v37  ;;  %2343 = vmatpush.bf16.msrb.mxu0 %v8740_v46  ;;  %v8868_v55 = vor.u32 %v9951_v54, %v8867_v50  ;;  %v7927_v56 = vld [vmem:[%s14354_s0 + $0x188] sm:$0xf]  ;;  %v9717_v57 = vld [vmem:[%s14354_s0 + $0x1a0] sm:$0xf0] }
  0x4c   :  { %14706 = vst [vmem:[#allocation38_spill] sm:$0xff] %v10795_v38  ;;  %2610 = vmatpush.bf16.msrb.mxu3 %v8232_v49  ;;  %v9714_v62 = vld [vmem:[%s14354_s0 + $0x18c] sm:$0xf]  ;;  %v7929_v63 = vld [vmem:[%s14354_s0 + $0x1a4] sm:$0xf0]  ;;  %v10843_v4 = vor.u32 %v9717_v57, %v7927_v56 }
  0x4d   :  { %v7935_v0 = vld [vmem:[%s14354_s0 + $0x190] sm:$0xf]  ;;  %v9718_v1 = vld [vmem:[%s14354_s0 + $0x1a8] sm:$0xf0]  ;;  %2432 = vmatpush.bf16.msrb.mxu1 %v8868_v55  ;;  %v9715_v2 = vld [vmem:[%s14354_s0 + $0x194] sm:$0xf]  ;;  %v10845_v5 = vor.u32 %v9714_v62, %v7929_v63 }
  0x4e   :  { %v7937_v3 = vld [vmem:[%s14354_s0 + $0x1ac] sm:$0xf0]  ;;  %14707 = vst [vmem:[#allocation39_spill] sm:$0xff] %v10843_v4  ;;  %v10847_v6 = vor.u32 %v9718_v1, %v7935_v0  ;;  %v384_v8 = vld [vmem:[%s14356_s2] sm:$0xf] }
  0x4f   :  { %2001 = vmatmul.bf16.gmra.mxu0 %v10609_v21  ;;  %14708 = vst [vmem:[#allocation40_spill] sm:$0xff] %v10845_v5  ;;  %v10849_v7 = vor.u32 %v9715_v2, %v7937_v3  ;;  %v10858_v13 = vperm.slane %v384_v8, 0  ;;  %v7955_v14 = vld [vmem:[%s14354_s0 + $0x1c0] sm:$0xf]  ;;  %v9724_v15 = vld [vmem:[%s14354_s0 + $0x1d8] sm:$0xf0] }
  0x50   :  { %2179 = vmatmul.bf16.gmra.mxu2 %v10613_v23  ;;  %14709 = vst [vmem:[#allocation41_spill] sm:$0xff] %v10847_v6  ;;  %v9721_v16 = vld [vmem:[%s14354_s0 + $0x1c4] sm:$0xf]  ;;  %v7957_v17 = vld [vmem:[%s14354_s0 + $0x1dc] sm:$0xf0]  ;;  %v10884_v30 = vor.u32 %v9724_v15, %v7955_v14 }
  0x51   :  { %2090 = vmatmul.bf16.gmra.mxu1 %v10611_v22  ;;  %14710 = vst [vmem:[#allocation42_spill] sm:$0xff] %v10849_v7  ;;  %v7963_v18 = vld [vmem:[%s14354_s0 + $0x1c8] sm:$0xf]  ;;  %v9725_v27 = vld [vmem:[%s14354_s0 + $0x1e0] sm:$0xf0]  ;;  %v10886_v32 = vor.u32 %v9721_v16, %v7957_v17 }
  0x52   :  { %v9722_v28 = vld [vmem:[%s14354_s0 + $0x1cc] sm:$0xf]  ;;  %v7965_v29 = vld [vmem:[%s14354_s0 + $0x1e4] sm:$0xf0]  ;;  %14711 = vst [vmem:[#allocation43_spill] sm:$0xff] %v10884_v30  ;;  %v10888_v33 = vor.u32 %v9725_v27, %v7963_v18 }
  0x53   :  { %2268 = vmatmul.bf16.gmra.mxu3 %v10615_v24  ;;  %14712 = vst [vmem:[#allocation44_spill] sm:$0xff] %v10886_v32  ;;  %v10891_v40 = vor.u32 %v9722_v28, %v7965_v29  ;;  %v8723_v46 = vld [vmem:[%s14355_s1 + $0x440] sm:$0xf]  ;;  %v9915_v48 = vld [vmem:[%s14355_s1 + $0x44c] sm:$0xf0] }
  0x54   :  { %14713 = vst [vmem:[#allocation45_spill] sm:$0xff] %v10888_v33  ;;  %v9785_v49 = vld [vmem:[%s14355_s1 + $0x44] sm:$0xf]  ;;  %v8724_v50 = vor.u32 %v9915_v48, %v8723_v46  ;;  %v8213_v54 = vld [vmem:[%s14355_s1 + $0x50] sm:$0xf0] }
  0x55   :  { %14714 = vst [vmem:[#allocation46_spill] sm:$0xff] %v10891_v40  ;;  %v8216_v56 = vor.u32 %v9785_v49, %v8213_v54  ;;  %v8851_v3 = vld [vmem:[%s14355_s1 + $0x540] sm:$0xf]  ;;  %v9947_v8 = vld [vmem:[%s14355_s1 + $0x54c] sm:$0xf0] }
  0x56   :  { %2344 = vmatpush.bf16.msrb.mxu0 %v8724_v50  ;;  %v8852_v15 = vor.u32 %v9947_v8, %v8851_v3  ;;  %v7983_v16 = vld [vmem:[%s14354_s0 + $0x1f8] sm:$0xf]  ;;  %v9731_v17 = vld [vmem:[%s14354_s0 + $0x210] sm:$0xf0]  ;;  %v9728_v18 = vld [vmem:[%s14354_s0 + $0x1fc] sm:$0xf] }
  0x57   :  { %2611 = vmatpush.bf16.msrb.mxu3 %v8216_v56  ;;  %v7985_v27 = vld [vmem:[%s14354_s0 + $0x214] sm:$0xf0]  ;;  %v7991_v28 = vld [vmem:[%s14354_s0 + $0x200] sm:$0xf]  ;;  %v9732_v29 = vld [vmem:[%s14354_s0 + $0x218] sm:$0xf0] }
  0x58   :  { %2433 = vmatpush.bf16.msrb.mxu1 %v8852_v15  ;;  %v10944_v50 = vor.u32 %v9728_v18, %v7985_v27  ;;  %v10946_v54 = vor.u32 %v9732_v29, %v7991_v28  ;;  %v8011_v18 = vld [vmem:[%s14354_s0 + $0x230] sm:$0xf]  ;;  %v9738_v27 = vld [vmem:[%s14354_s0 + $0x248] sm:$0xf0]  ;;  %v9735_v28 = vld [vmem:[%s14354_s0 + $0x234] sm:$0xf] }
  0x59   :  { %v8013_v29 = vld [vmem:[%s14354_s0 + $0x24c] sm:$0xf0] }
  0x5a   :  { %14716 = vst [vmem:[#allocation48_spill] sm:$0xff] %v10944_v50 }
  0x5b   :  { %14717 = vst [vmem:[#allocation49_spill] sm:$0xff] %v10946_v54 }
  0x5f   :  { %2006 = vmatmul.bf16.gmra.mxu0 %v10663_v42 }
  0x60   :  { %2184 = vmatmul.bf16.gmra.mxu2 %v10667_v44 }
  0x61   :  { %2095 = vmatmul.bf16.gmra.mxu1 %v10665_v43 }
  0x63   :  { %2273 = vmatmul.bf16.gmra.mxu3 %v10669_v45 }
  0x6f   :  { %2011 = vmatmul.bf16.gmra.mxu0 %v10699_v58 }
  0x70   :  { %2189 = vmatmul.bf16.gmra.mxu2 %v10703_v60 }
  0x71   :  { %2100 = vmatmul.bf16.gmra.mxu1 %v10701_v59 }
  0x73   :  { %2278 = vmatmul.bf16.gmra.mxu3 %v10705_v61 }
  0x7f   :  { %2016 = vmatmul.bf16.gmra.mxu0 %v10753_v19 }
  0x80   :  { %2194 = vmatmul.bf16.gmra.mxu2 %v10757_v25 }
  0x81   :  { %2105 = vmatmul.bf16.gmra.mxu1 %v10755_v20 }
  0x83   :  { %2283 = vmatmul.bf16.gmra.mxu3 %v10759_v26 }
  0x8f   :  { %2021 = vmatmul.bf16.gmra.mxu0 %v10789_v35 }
  0x90   :  { %2199 = vmatmul.bf16.gmra.mxu2 %v10793_v37 }
  0x91   :  { %2110 = vmatmul.bf16.gmra.mxu1 %v10791_v36 }
  0x93   :  { %2288 = vmatmul.bf16.gmra.mxu3 %v10795_v38 }
  0x9f   :  { %2026 = vmatmul.bf16.gmra.mxu0 %v10843_v4 }
  0xa0   :  { %2204 = vmatmul.bf16.gmra.mxu2 %v10847_v6 }
  0xa1   :  { %2115 = vmatmul.bf16.gmra.mxu1 %v10845_v5 }
  0xa3   :  { %2293 = vmatmul.bf16.gmra.mxu3 %v10849_v7 }
  0xac   :  { %v1992_v31 = vpop.f32.mrf.mxu0 }
  0xad   :  { %v1993_v34 = vadd.f32 %v1992_v31, %v10858_v13  ;;  %v9729_v31 = vld [vmem:[%s14354_s0 + $0x204] sm:$0xf] }
  0xae   :  { %v2081_v39 = vpop.f32.mrf.mxu1 }
  0xaf   :  { %v2082_v41 = vadd.f32 %v2081_v39, %v1993_v34  ;;  %2031 = vmatmul.bf16.gmra.mxu0 %v10884_v30  ;;  %v7993_v34 = vld [vmem:[%s14354_s0 + $0x21c] sm:$0xf0] }
  0xb0   :  { %2209 = vmatmul.bf16.gmra.mxu2 %v10888_v33 }
  0xb1   :  { %2120 = vmatmul.bf16.gmra.mxu1 %v10886_v32 }
  0xb3   :  { %2298 = vmatmul.bf16.gmra.mxu3 %v10891_v40  ;;  %v2170_v55 = vpop.f32.mrf.mxu2 }
  0xb4   :  { %v2171_v57 = vadd.f32 %v2170_v55, %v2082_v41  ;;  %v1994_v63 = vpop.f32.mrf.mxu0  ;;  %v10942_v41 = vor.u32 %v9731_v17, %v7983_v16 }
  0xb5   :  { %v1995_v0 = vadd.f32 %v1994_v63, %v10858_v13 }
  0xb6   :  { %v2259_v62 = vpop.f32.mrf.mxu3  ;;  %v2083_v1 = vpop.f32.mrf.mxu1  ;;  %14715 = vst [vmem:[#allocation47_spill] sm:$0xff] %v10942_v41 }
  0xb7   :  { %v10910_v2 = vadd.f32 %v2259_v62, %v2171_v57  ;;  %v2084_v14 = vadd.f32 %v2083_v1, %v1995_v0  ;;  %v10949_v57 = vor.u32 %v9729_v31, %v7993_v34  ;;  %v8019_v31 = vld [vmem:[%s14354_s0 + $0x238] sm:$0xf]  ;;  %v9739_v34 = vld [vmem:[%s14354_s0 + $0x250] sm:$0xf0] }
  0xb9   :  { %14718 = vst [vmem:[#allocation50_spill] sm:$0xff] %v10949_v57 }
  0xbb   :  { %v2172_v39 = vpop.f32.mrf.mxu2 }
  0xbc   :  { %v2173_v46 = vadd.f32 %v2172_v39, %v2084_v14  ;;  %v1997_v49 = vpop.f32.mrf.mxu0  ;;  %v9736_v39 = vld [vmem:[%s14354_s0 + $0x23c] sm:$0xf] }
  0xbd   :  { %v1998_v55 = vadd.f32 %v1997_v49, %v10858_v13  ;;  %v10984_v49 = vor.u32 %v9738_v27, %v8011_v18  ;;  %v9911_v18 = vld [vmem:[%s14355_s1 + $0x42c] sm:$0xf0]  ;;  %v9781_v27 = vld [vmem:[%s14355_s1 + $0x24] sm:$0xf] }
  0xbe   :  { %v2261_v48 = vpop.f32.mrf.mxu3  ;;  %v2086_v56 = vpop.f32.mrf.mxu1 }
  0xbf   :  { %v10951_v62 = vadd.f32 %v2261_v48, %v2173_v46  ;;  %v2087_v63 = vadd.f32 %v2086_v56, %v1998_v55  ;;  %2036 = vmatmul.bf16.gmra.mxu0 %v10942_v41  ;;  %v8021_v46 = vld [vmem:[%s14354_s0 + $0x254] sm:$0xf0]  ;;  %14719 = vst [vmem:[#allocation51_spill] sm:$0xff] %v10984_v49 }
  0xc0   :  { %2214 = vmatmul.bf16.gmra.mxu2 %v10946_v54 }
  0xc1   :  { %2125 = vmatmul.bf16.gmra.mxu1 %v10944_v50 }
  0xc3   :  { %2303 = vmatmul.bf16.gmra.mxu3 %v10949_v57  ;;  %v2175_v0 = vpop.f32.mrf.mxu2 }
  0xc4   :  { %v2176_v1 = vadd.f32 %v2175_v0, %v2087_v63  ;;  %v1999_v8 = vpop.f32.mrf.mxu0  ;;  %v10986_v0 = vor.u32 %v9735_v28, %v8013_v29  ;;  %v8197_v29 = vld [vmem:[%s14355_s1 + $0x30] sm:$0xf0] }
  0xc5   :  { %v2000_v14 = vadd.f32 %v1999_v8, %v10858_v13 }
  0xc6   :  { %v2264_v3 = vpop.f32.mrf.mxu3  ;;  %v2088_v15 = vpop.f32.mrf.mxu1  ;;  %14720 = vst [vmem:[#allocation52_spill] sm:$0xff] %v10986_v0 }
  0xc7   :  { %v10958_v16 = vadd.f32 %v2264_v3, %v2176_v1  ;;  %v2089_v17 = vadd.f32 %v2088_v15, %v2000_v14  ;;  %v10988_v1 = vor.u32 %v9739_v34, %v8019_v31  ;;  %v10991_v14 = vor.u32 %v9736_v39, %v8021_v46 }
  0xc8   :  { %v8200_v34 = vor.u32 %v9781_v27, %v8197_v29  ;;  %v9745_v27 = vld [vmem:[%s14354_s0 + $0x280] sm:$0xf0]  ;;  %v8041_v29 = vld [vmem:[%s14354_s0 + $0x284] sm:$0xf0] }
  0xc9   :  { %14721 = vst [vmem:[#allocation53_spill] sm:$0xff] %v10988_v1 }
  0xca   :  { %14722 = vst [vmem:[#allocation54_spill] sm:$0xff] %v10991_v14  ;;  %2612 = vmatpush.bf16.msrb.mxu3 %v8200_v34  ;;  %v9746_v34 = vld [vmem:[%s14354_s0 + $0x288] sm:$0xf0] }
  0xcb   :  { %v2177_v48 = vpop.f32.mrf.mxu2 }
  0xcc   :  { %v2178_v55 = vadd.f32 %v2177_v48, %v2089_v17  ;;  %v2002_v63 = vpop.f32.mrf.mxu0  ;;  %v8707_v17 = vld [vmem:[%s14355_s1 + $0x420] sm:$0xf] }
  0xcd   :  { %v2003_v3 = vadd.f32 %v2002_v63, %v10858_v13  ;;  %v8708_v28 = vor.u32 %v9911_v18, %v8707_v17 }
  0xce   :  { %v2266_v56 = vpop.f32.mrf.mxu3  ;;  %v2091_v8 = vpop.f32.mrf.mxu1 }
  0xcf   :  { %v10993_v15 = vadd.f32 %v2266_v56, %v2178_v55  ;;  %v2092_v57 = vadd.f32 %v2091_v8, %v2003_v3  ;;  %2041 = vmatmul.bf16.gmra.mxu0 %v10984_v49  ;;  %v8835_v3 = vld [vmem:[%s14355_s1 + $0x520] sm:$0xf]  ;;  %v9943_v8 = vld [vmem:[%s14355_s1 + $0x52c] sm:$0xf0] }
  0xd0   :  { %2219 = vmatmul.bf16.gmra.mxu2 %v10988_v1  ;;  %2345 = vmatpush.bf16.msrb.mxu0 %v8708_v28  ;;  %v8836_v18 = vor.u32 %v9943_v8, %v8835_v3  ;;  %v9742_v28 = vld [vmem:[%s14354_s0 + $0x26c] sm:$0xf] }
  0xd1   :  { %2130 = vmatmul.bf16.gmra.mxu1 %v10986_v0 }
  0xd2   :  { %2434 = vmatpush.bf16.msrb.mxu1 %v8836_v18 }
  0xd3   :  { %2308 = vmatmul.bf16.gmra.mxu3 %v10991_v14  ;;  %v2180_v31 = vpop.f32.mrf.mxu2  ;;  %v11046_v14 = vor.u32 %v9742_v28, %v8041_v29 }
  0xd4   :  { %v2181_v39 = vadd.f32 %v2180_v31, %v2092_v57  ;;  %v2004_v48 = vpop.f32.mrf.mxu0  ;;  %v8039_v57 = vld [vmem:[%s14354_s0 + $0x268] sm:$0xf]  ;;  %v8047_v31 = vld [vmem:[%s14354_s0 + $0x270] sm:$0xf] }
  0xd5   :  { %v2005_v55 = vadd.f32 %v2004_v48, %v10858_v13  ;;  %14724 = vst [vmem:[#allocation56_spill] sm:$0xff] %v11046_v14  ;;  %v11048_v1 = vor.u32 %v9746_v34, %v8047_v31 }
  0xd6   :  { %v2269_v46 = vpop.f32.mrf.mxu3  ;;  %v2093_v56 = vpop.f32.mrf.mxu1 }
  0xd7   :  { %v11012_v63 = vadd.f32 %v2269_v46, %v2181_v39  ;;  %v2094_v17 = vadd.f32 %v2093_v56, %v2005_v55  ;;  %v9743_v39 = vld [vmem:[%s14354_s0 + $0x274] sm:$0xf]  ;;  %v8049_v46 = vld [vmem:[%s14354_s0 + $0x28c] sm:$0xf0]  ;;  %v11044_v55 = vor.u32 %v9745_v27, %v8039_v57  ;;  %14725 = vst [vmem:[#allocation57_spill] sm:$0xff] %v11048_v1 }
  0xd8   :  { %v11051_v54 = vor.u32 %v9743_v39, %v8049_v46  ;;  %v9752_v46 = vld [vmem:[%s14354_s0 + $0x2b8] sm:$0xf0] }
  0xd9   :  { %14723 = vst [vmem:[#allocation55_spill] sm:$0xff] %v11044_v55 }
  0xda   :  { %14726 = vst [vmem:[#allocation58_spill] sm:$0xff] %v11051_v54 }
  0xdb   :  { %v2182_v48 = vpop.f32.mrf.mxu2 }
  0xdc   :  { %v2183_v56 = vadd.f32 %v2182_v48, %v2094_v17  ;;  %v2007_v8 = vpop.f32.mrf.mxu0  ;;  %v8069_v48 = vld [vmem:[%s14354_s0 + $0x2bc] sm:$0xf0] }
  0xdd   :  { %v2008_v18 = vadd.f32 %v2007_v8, %v10858_v13  ;;  %v9750_v8 = vld [vmem:[%s14354_s0 + $0x2ac] sm:$0xf] }
  0xde   :  { %v2271_v3 = vpop.f32.mrf.mxu3  ;;  %v2096_v0 = vpop.f32.mrf.mxu1 }
  0xdf   :  { %v11053_v50 = vadd.f32 %v2271_v3, %v2183_v56  ;;  %v2097_v40 = vadd.f32 %v2096_v0, %v2008_v18  ;;  %2046 = vmatmul.bf16.gmra.mxu0 %v11044_v55  ;;  %v8067_v0 = vld [vmem:[%s14354_s0 + $0x2a0] sm:$0xf]  ;;  %v8075_v56 = vld [vmem:[%s14354_s0 + $0x2a8] sm:$0xf]  ;;  %v9753_v3 = vld [vmem:[%s14354_s0 + $0x2c0] sm:$0xf0] }
  0xe0   :  { %2224 = vmatmul.bf16.gmra.mxu2 %v11048_v1  ;;  %v8077_v18 = vld [vmem:[%s14354_s0 + $0x2c4] sm:$0xf0] }
  0xe1   :  { %2135 = vmatmul.bf16.gmra.mxu1 %v11046_v14  ;;  %v11093_v33 = vor.u32 %v9750_v8, %v8077_v18 }
  0xe3   :  { %2313 = vmatmul.bf16.gmra.mxu3 %v11051_v54  ;;  %v2185_v17 = vpop.f32.mrf.mxu2  ;;  %v11090_v54 = vor.u32 %v9753_v3, %v8075_v56  ;;  %14730 = vst [vmem:[#allocation62_spill] sm:$0xff] %v11093_v33 }
  0xe4   :  { %v2186_v57 = vadd.f32 %v2185_v17, %v2097_v40  ;;  %v2009_v28 = vpop.f32.mrf.mxu0  ;;  %v9749_v40 = vld [vmem:[%s14354_s0 + $0x2a4] sm:$0xf] }
  0xe5   :  { %v2010_v29 = vadd.f32 %v2009_v28, %v10858_v13  ;;  %14729 = vst [vmem:[#allocation61_spill] sm:$0xff] %v11090_v54 }
  0xe6   :  { %v2274_v27 = vpop.f32.mrf.mxu3  ;;  %v2098_v31 = vpop.f32.mrf.mxu1 }
  0xe7   :  { %v11060_v34 = vadd.f32 %v2274_v27, %v2186_v57  ;;  %v2099_v39 = vadd.f32 %v2098_v31, %v2010_v29  ;;  %v11086_v57 = vor.u32 %v9752_v46, %v8067_v0  ;;  %v11088_v31 = vor.u32 %v9749_v40, %v8069_v48  ;;  %v9907_v0 = vld [vmem:[%s14355_s1 + $0x40c] sm:$0xf0]  ;;  %v8181_v46 = vld [vmem:[%s14355_s1 + $0x10] sm:$0xf0] }
  0xe9   :  { %14727 = vst [vmem:[#allocation59_spill] sm:$0xff] %v11086_v57 }
  0xea   :  { %14728 = vst [vmem:[#allocation60_spill] sm:$0xff] %v11088_v31 }
  0xeb   :  { %v2187_v17 = vpop.f32.mrf.mxu2 }
  0xec   :  { %v2188_v27 = vadd.f32 %v2187_v17, %v2099_v39  ;;  %v2012_v29 = vpop.f32.mrf.mxu0  ;;  %v8691_v39 = vld [vmem:[%s14355_s1 + $0x400] sm:$0xf] }
  0xed   :  { %v2013_v1 = vadd.f32 %v2012_v29, %v10858_v13  ;;  %v9939_v29 = vld [vmem:[%s14355_s1 + $0x50c] sm:$0xf0] }
  0xee   :  { %v2276_v28 = vpop.f32.mrf.mxu3  ;;  %v2101_v14 = vpop.f32.mrf.mxu1 }
  0xef   :  { %v11095_v32 = vadd.f32 %v2276_v28, %v2188_v27  ;;  %v2102_v7 = vadd.f32 %v2101_v14, %v2013_v1  ;;  %2051 = vmatmul.bf16.gmra.mxu0 %v11086_v57  ;;  %v9777_v1 = vld [vmem:[%s14355_s1 + $0x4] sm:$0xf]  ;;  %v8692_v14 = vor.u32 %v9907_v0, %v8691_v39  ;;  %v8819_v28 = vld [vmem:[%s14355_s1 + $0x500] sm:$0xf] }
  0xf0   :  { %2229 = vmatmul.bf16.gmra.mxu2 %v11090_v54  ;;  %v8184_v48 = vor.u32 %v9777_v1, %v8181_v46  ;;  %v8820_v0 = vor.u32 %v9939_v29, %v8819_v28  ;;  %v9759_v1 = vld [vmem:[%s14354_s0 + $0x2f0] sm:$0xf0]  ;;  %v8097_v46 = vld [vmem:[%s14354_s0 + $0x2f4] sm:$0xf0] }
  0xf1   :  { %2140 = vmatmul.bf16.gmra.mxu1 %v11088_v31  ;;  %2346 = vmatpush.bf16.msrb.mxu0 %v8692_v14  ;;  %v9756_v14 = vld [vmem:[%s14354_s0 + $0x2dc] sm:$0xf] }
  0xf2   :  { %2613 = vmatpush.bf16.msrb.mxu3 %v8184_v48  ;;  %v9760_v48 = vld [vmem:[%s14354_s0 + $0x2f8] sm:$0xf0]  ;;  %2435 = vmatpush.bf16.msrb.mxu1 %v8820_v0 }
  0xf3   :  { %2318 = vmatmul.bf16.gmra.mxu3 %v11093_v33  ;;  %v2190_v40 = vpop.f32.mrf.mxu2  ;;  %v11148_v33 = vor.u32 %v9756_v14, %v8097_v46 }
  0xf4   :  { %v2191_v56 = vadd.f32 %v2190_v40, %v2102_v7  ;;  %v2014_v8 = vpop.f32.mrf.mxu0  ;;  %v8095_v7 = vld [vmem:[%s14354_s0 + $0x2d8] sm:$0xf]  ;;  %v8103_v40 = vld [vmem:[%s14354_s0 + $0x2e0] sm:$0xf] }
  0xf5   :  { %v2015_v18 = vadd.f32 %v2014_v8, %v10858_v13  ;;  %14732 = vst [vmem:[#allocation64_spill] sm:$0xff] %v11148_v33  ;;  %v11150_v54 = vor.u32 %v9760_v48, %v8103_v40 }
  0xf6   :  { %v2279_v3 = vpop.f32.mrf.mxu3  ;;  %v2103_v17 = vpop.f32.mrf.mxu1 }
  0xf7   :  { %v11114_v27 = vadd.f32 %v2279_v3, %v2191_v56  ;;  %v2104_v39 = vadd.f32 %v2103_v17, %v2015_v18  ;;  %v9757_v56 = vld [vmem:[%s14354_s0 + $0x2e4] sm:$0xf]  ;;  %v8105_v3 = vld [vmem:[%s14354_s0 + $0x2fc] sm:$0xf0]  ;;  %v11146_v18 = vor.u32 %v9759_v1, %v8095_v7  ;;  %14733 = vst [vmem:[#allocation65_spill] sm:$0xff] %v11150_v54 }
  0xf8   :  { %v11153_v6 = vor.u32 %v9757_v56, %v8105_v3  ;;  %v9766_v3 = vld [vmem:[%s14354_s0 + $0x328] sm:$0xf0] }
  0xf9   :  { %14731 = vst [vmem:[#allocation63_spill] sm:$0xff] %v11146_v18 }
  0xfa   :  { %14734 = vst [vmem:[#allocation66_spill] sm:$0xff] %v11153_v6 }
  0xfb   :  { %v2192_v8 = vpop.f32.mrf.mxu2 }
  0xfc   :  { %v2193_v17 = vadd.f32 %v2192_v8, %v2104_v39  ;;  %v2017_v29 = vpop.f32.mrf.mxu0  ;;  %v8125_v8 = vld [vmem:[%s14354_s0 + $0x32c] sm:$0xf0] }
  0xfd   :  { %v2018_v0 = vadd.f32 %v2017_v29, %v10858_v13  ;;  %v9764_v29 = vld [vmem:[%s14354_s0 + $0x31c] sm:$0xf] }
  0xfe   :  { %v2281_v28 = vpop.f32.mrf.mxu3  ;;  %v2106_v31 = vpop.f32.mrf.mxu1 }
  0xff   :  { %v11155_v5 = vadd.f32 %v2281_v28, %v2193_v17  ;;  %v2107_v38 = vadd.f32 %v2106_v31, %v2018_v0  ;;  %2056 = vmatmul.bf16.gmra.mxu0 %v11146_v18  ;;  %v8123_v31 = vld [vmem:[%s14354_s0 + $0x310] sm:$0xf]  ;;  %v8131_v17 = vld [vmem:[%s14354_s0 + $0x318] sm:$0xf]  ;;  %v9767_v28 = vld [vmem:[%s14354_s0 + $0x330] sm:$0xf0] }
 0x100   :  { %2234 = vmatmul.bf16.gmra.mxu2 %v11150_v54  ;;  %v8133_v0 = vld [vmem:[%s14354_s0 + $0x334] sm:$0xf0] }
 0x101   :  { %2145 = vmatmul.bf16.gmra.mxu1 %v11148_v33  ;;  %v11195_v37 = vor.u32 %v9764_v29, %v8133_v0 }
 0x103   :  { %2323 = vmatmul.bf16.gmra.mxu3 %v11153_v6  ;;  %v2195_v39 = vpop.f32.mrf.mxu2  ;;  %v11192_v6 = vor.u32 %v9767_v28, %v8131_v17  ;;  %14738 = vst [vmem:[#allocation70_spill] sm:$0xff] %v11195_v37 }
 0x104   :  { %v2196_v7 = vadd.f32 %v2195_v39, %v2107_v38  ;;  %v2019_v14 = vpop.f32.mrf.mxu0  ;;  %v9763_v38 = vld [vmem:[%s14354_s0 + $0x314] sm:$0xf] }
 0x105   :  { %v2020_v46 = vadd.f32 %v2019_v14, %v10858_v13  ;;  %14737 = vst [vmem:[#allocation69_spill] sm:$0xff] %v11192_v6 }
 0x106   :  { %v2284_v1 = vpop.f32.mrf.mxu3  ;;  %v2108_v40 = vpop.f32.mrf.mxu1 }
 0x107   :  { %v11162_v48 = vadd.f32 %v2284_v1, %v2196_v7  ;;  %v2109_v56 = vadd.f32 %v2108_v40, %v2020_v46  ;;  %v11188_v7 = vor.u32 %v9766_v3, %v8123_v31  ;;  %v11190_v40 = vor.u32 %v9763_v38, %v8125_v8  ;;  %v8677_v31 = vld [vmem:[%s14355_s1 + $0x3f0] sm:$0xf0]  ;;  %v9933_v38 = vld [vmem:[%s14355_s1 + $0x4e4] sm:$0xf] }
 0x108   :  { %v8421_v3 = vld [vmem:[%s14355_s1 + $0x1f0] sm:$0xf0] }
 0x109   :  { %14735 = vst [vmem:[#allocation67_spill] sm:$0xff] %v11188_v7  ;;  %v8805_v8 = vld [vmem:[%s14355_s1 + $0x4f0] sm:$0xf0] }
 0x10a   :  { %14736 = vst [vmem:[#allocation68_spill] sm:$0xff] %v11190_v40  ;;  %v8808_v29 = vor.u32 %v9933_v38, %v8805_v8  ;;  %v9773_v38 = vld [vmem:[%s14354_s0 + $0x360] sm:$0xf0]  ;;  %v9770_v8 = vld [vmem:[%s14354_s0 + $0x34c] sm:$0xf] }
 0x10b   :  { %v2197_v39 = vpop.f32.mrf.mxu2 }
 0x10c   :  { %v2198_v1 = vadd.f32 %v2197_v39, %v2109_v56  ;;  %v2022_v46 = vpop.f32.mrf.mxu0  ;;  %v9901_v56 = vld [vmem:[%s14355_s1 + $0x3e4] sm:$0xf]  ;;  %2962 = vmatpush.bf16.msra.mxu3 %v8808_v29  ;;  %v9774_v29 = vld [vmem:[%s14354_s0 + $0x368] sm:$0xf0] }
 0x10d   :  { %v2023_v54 = vadd.f32 %v2022_v46, %v10858_v13 }
 0x10e   :  { %v2286_v14 = vpop.f32.mrf.mxu3  ;;  %v2111_v33 = vpop.f32.mrf.mxu1 }
 0x10f   :  { %v11197_v36 = vadd.f32 %v2286_v14, %v2198_v1  ;;  %v2112_v26 = vadd.f32 %v2111_v33, %v2023_v54  ;;  %2061 = vmatmul.bf16.gmra.mxu0 %v11188_v7  ;;  %v9837_v33 = vld [vmem:[%s14355_s1 + $0x1e4] sm:$0xf]  ;;  %v8680_v54 = vor.u32 %v9901_v56, %v8677_v31 }
 0x110   :  { %2239 = vmatmul.bf16.gmra.mxu2 %v11192_v6  ;;  %v8424_v28 = vor.u32 %v9837_v33, %v8421_v3  ;;  %v9869_v31 = vld [vmem:[%s14355_s1 + $0x2e4] sm:$0xf]  ;;  %v8549_v33 = vld [vmem:[%s14355_s1 + $0x2f0] sm:$0xf0] }
 0x111   :  { %2150 = vmatmul.bf16.gmra.mxu1 %v11190_v40  ;;  %2873 = vmatpush.bf16.msra.mxu2 %v8680_v54  ;;  %v8151_v54 = vld [vmem:[%s14354_s0 + $0x348] sm:$0xf] }
 0x112   :  { %2695 = vmatpush.bf16.msra.mxu0 %v8424_v28  ;;  %v8159_v28 = vld [vmem:[%s14354_s0 + $0x350] sm:$0xf] }
 0x113   :  { %2328 = vmatmul.bf16.gmra.mxu3 %v11195_v37  ;;  %v2200_v17 = vpop.f32.mrf.mxu2  ;;  %v11258_v6 = vor.u32 %v9774_v29, %v8159_v28 }
 0x114   :  { %v2201_v0 = vadd.f32 %v2200_v17, %v2112_v26  ;;  %v2024_v1 = vpop.f32.mrf.mxu0  ;;  %v8552_v26 = vor.u32 %v9869_v31, %v8549_v33  ;;  %v8153_v17 = vld [vmem:[%s14354_s0 + $0x364] sm:$0xf0] }
 0x115   :  { %v2025_v14 = vadd.f32 %v2024_v1, %v10858_v13  ;;  %v11256_v37 = vor.u32 %v9770_v8, %v8153_v17  ;;  %14741 = vst [vmem:[#allocation73_spill] sm:$0xff] %v11258_v6 }
 0x116   :  { %v2289_v39 = vpop.f32.mrf.mxu3  ;;  %v2113_v46 = vpop.f32.mrf.mxu1  ;;  %2784 = vmatpush.bf16.msra.mxu1 %v8552_v26 }
 0x117   :  { %v11222_v56 = vadd.f32 %v2289_v39, %v2201_v0  ;;  %v2114_v3 = vadd.f32 %v2113_v46, %v2025_v14  ;;  %v9771_v0 = vld [vmem:[%s14354_s0 + $0x354] sm:$0xf]  ;;  %v8161_v39 = vld [vmem:[%s14354_s0 + $0x36c] sm:$0xf0]  ;;  %v11254_v14 = vor.u32 %v9773_v38, %v8151_v54  ;;  %14740 = vst [vmem:[#allocation72_spill] sm:$0xff] %v11256_v37 }
 0x118   :  { %v11261_v25 = vor.u32 %v9771_v0, %v8161_v39  ;;  %v9670_v39 = vld [vmem:[%s14354_s0 + $0x28] sm:$0xf0] }
 0x119   :  { %14739 = vst [vmem:[#allocation71_spill] sm:$0xff] %v11254_v14 }
 0x11a   :  { %14742 = vst [vmem:[#allocation74_spill] sm:$0xff] %v11261_v25 }
 0x11b   :  { %v2202_v1 = vpop.f32.mrf.mxu2 }
 0x11c   :  { %v2203_v46 = vadd.f32 %v2202_v1, %v2114_v3  ;;  %v2027_v33 = vpop.f32.mrf.mxu0  ;;  %v7749_v1 = vld [vmem:[%s14354_s0 + $0x2c] sm:$0xf0] }
 0x11d   :  { %v2028_v26 = vadd.f32 %v2027_v33, %v10858_v13 }
 0x11e   :  { %v2291_v31 = vpop.f32.mrf.mxu3  ;;  %v2116_v40 = vpop.f32.mrf.mxu1 }
 0x11f   :  { %v11263_v20 = vadd.f32 %v2291_v31, %v2203_v46  ;;  %v2117_v61 = vadd.f32 %v2116_v40, %v2028_v26  ;;  %2066 = vmatmul.bf16.gmra.mxu0 %v11254_v14  ;;  %v7747_v40 = vld [vmem:[%s14354_s0 + $0x10] sm:$0xf]  ;;  %v7755_v46 = vld [vmem:[%s14354_s0 + $0x18] sm:$0xf]  ;;  %v9671_v31 = vld [vmem:[%s14354_s0 + $0x30] sm:$0xf0] }
 0x120   :  { %2244 = vmatmul.bf16.gmra.mxu2 %v11258_v6  ;;  %v11290_v26 = vor.u32 %v9670_v39, %v7747_v40  ;;  %v8661_v40 = vld [vmem:[%s14355_s1 + $0x3d0] sm:$0xf0] }
 0x121   :  { %2155 = vmatmul.bf16.gmra.mxu1 %v11256_v37 }
 0x122   :  { %14743 = vst [vmem:[#allocation75_spill] sm:$0xff] %v11290_v26 }
 0x123   :  { %2333 = vmatmul.bf16.gmra.mxu3 %v11261_v25  ;;  %v2205_v3 = vpop.f32.mrf.mxu2 }
 0x124   :  { %v2206_v54 = vadd.f32 %v2205_v3, %v2117_v61  ;;  %v2029_v8 = vpop.f32.mrf.mxu0  ;;  %v9667_v61 = vld [vmem:[%s14354_s0 + $0x14] sm:$0xf] }
 0x125   :  { %v2030_v17 = vadd.f32 %v2029_v8, %v10858_v13  ;;  %v11292_v8 = vor.u32 %v9667_v61, %v7749_v1  ;;  %v8405_v61 = vld [vmem:[%s14355_s1 + $0x1d0] sm:$0xf0]  ;;  %v9929_v1 = vld [vmem:[%s14355_s1 + $0x4c4] sm:$0xf] }
 0x126   :  { %v2294_v38 = vpop.f32.mrf.mxu3  ;;  %v2118_v28 = vpop.f32.mrf.mxu1 }
 0x127   :  { %v11270_v29 = vadd.f32 %v2294_v38, %v2206_v54  ;;  %v2119_v0 = vadd.f32 %v2118_v28, %v2030_v17  ;;  %14744 = vst [vmem:[#allocation76_spill] sm:$0xff] %v11292_v8  ;;  %v11294_v17 = vor.u32 %v9671_v31, %v7755_v46  ;;  %v8789_v46 = vld [vmem:[%s14355_s1 + $0x4d0] sm:$0xf0] }
 0x129   :  { %14745 = vst [vmem:[#allocation77_spill] sm:$0xff] %v11294_v17 }
 0x12b   :  { %v2207_v33 = vpop.f32.mrf.mxu2 }
 0x12c   :  { %v2208_v3 = vadd.f32 %v2207_v33, %v2119_v0  ;;  %v2032_v38 = vpop.f32.mrf.mxu0  ;;  %v9897_v0 = vld [vmem:[%s14355_s1 + $0x3c4] sm:$0xf] }
 0x12d   :  { %v2033_v28 = vadd.f32 %v2032_v38, %v10858_v13  ;;  %v8664_v39 = vor.u32 %v9897_v0, %v8661_v40 }
 0x12e   :  { %v2296_v54 = vpop.f32.mrf.mxu3  ;;  %v2121_v25 = vpop.f32.mrf.mxu1 }
 0x12f   :  { %v11297_v6 = vadd.f32 %v2296_v54, %v2208_v3  ;;  %v2122_v37 = vadd.f32 %v2121_v25, %v2033_v28  ;;  %2347 = vmatmul.bf16.vlgmr.msrb.gmra.mxu0 %v11290_v26  ;;  %v9833_v25 = vld [vmem:[%s14355_s1 + $0x1c4] sm:$0xf]  ;;  %v8792_v3 = vor.u32 %v9929_v1, %v8789_v46  ;;  %2874 = vmatpush.bf16.msra.mxu2 %v8664_v39  ;;  %v7775_v39 = vld [vmem:[%s14354_s0 + $0x48] sm:$0xf]  ;;  %v9674_v46 = vld [vmem:[%s14354_s0 + $0x4c] sm:$0xf] }
 0x130   :  { %8961 = vmatmul.msk.bf16.vlgmr.msrb.gmra.mxu2 %vm1934_vm0, %v11294_v17  ;;  %v8408_v33 = vor.u32 %v9833_v25, %v8405_v61  ;;  %v9865_v17 = vld [vmem:[%s14355_s1 + $0x2c4] sm:$0xf]  ;;  %v8533_v25 = vld [vmem:[%s14355_s1 + $0x2d0] sm:$0xf0] }
 0x131   :  { %2436 = vmatmul.bf16.vlgmr.msrb.gmra.mxu1 %v11292_v8  ;;  %2963 = vmatpush.bf16.msra.mxu3 %v8792_v3  ;;  %v9677_v1 = vld [vmem:[%s14354_s0 + $0x60] sm:$0xf0] }
 0x132   :  { %2696 = vmatpush.bf16.msra.mxu0 %v8408_v33  ;;  %v9678_v33 = vld [vmem:[%s14354_s0 + $0x68] sm:$0xf0] }
 0x133   :  { %2614 = vmatmul.bf16.vlgmr.msrb.gmra.mxu3 %v10513_v47  ;;  %v2210_v31 = vpop.f32.mrf.mxu2 }
 0x134   :  { %v2211_v54 = vadd.f32 %v2210_v31, %v2122_v37  ;;  %v2034_v28 = vpop.f32.mrf.mxu0  ;;  %v8536_v37 = vor.u32 %v9865_v17, %v8533_v25  ;;  %v7777_v31 = vld [vmem:[%s14354_s0 + $0x64] sm:$0xf0]  ;;  %v7783_v17 = vld [vmem:[%s14354_s0 + $0x50] sm:$0xf] }
 0x135   :  { %v2035_v0 = vadd.f32 %v2034_v28, %v10858_v13  ;;  %v11353_v25 = vor.u32 %v9678_v33, %v7783_v17 }
 0x136   :  { %v2299_v38 = vpop.f32.mrf.mxu3  ;;  %v2123_v40 = vpop.f32.mrf.mxu1  ;;  %2785 = vmatpush.bf16.msra.mxu1 %v8536_v37 }
 0x137   :  { %v11323_v47 = vadd.f32 %v2299_v38, %v2211_v54  ;;  %v2124_v61 = vadd.f32 %v2123_v40, %v2035_v0  ;;  %v11349_v54 = vor.u32 %v9677_v1, %v7775_v39  ;;  %v11351_v40 = vor.u32 %v9674_v46, %v7777_v31  ;;  %14748 = vst [vmem:[#allocation80_spill] sm:$0xff] %v11353_v25 }
 0x139   :  { %14746 = vst [vmem:[#allocation78_spill] sm:$0xff] %v11349_v54 }
 0x13a   :  { %14747 = vst [vmem:[#allocation79_spill] sm:$0xff] %v11351_v40 }
 0x13b   :  { %v2212_v3 = vpop.f32.mrf.mxu2 }
 0x13c   :  { %v2213_v38 = vadd.f32 %v2212_v3, %v2124_v61  ;;  %v2037_v0 = vpop.f32.mrf.mxu0  ;;  %v7805_v3 = vld [vmem:[%s14354_s0 + $0x9c] sm:$0xf0] }
 0x13d   :  { %v2038_v8 = vadd.f32 %v2037_v0, %v10858_v13 }
 0x13e   :  { %v2301_v28 = vpop.f32.mrf.mxu3  ;;  %v2126_v60 = vpop.f32.mrf.mxu1 }
 0x13f   :  { %v11356_v59 = vadd.f32 %v2301_v28, %v2213_v38  ;;  %v2127_v45 = vadd.f32 %v2126_v60, %v2038_v8  ;;  %2352 = vmatmul.bf16.gmra.mxu0 %v11349_v54  ;;  %v7803_v60 = vld [vmem:[%s14354_s0 + $0x80] sm:$0xf]  ;;  %v9684_v8 = vld [vmem:[%s14354_s0 + $0x98] sm:$0xf0]  ;;  %v7811_v38 = vld [vmem:[%s14354_s0 + $0x88] sm:$0xf] }
 0x140   :  { %8962 = vmatmul.msk.bf16.gmra.mxu2 %vm1934_vm0, %v11353_v25  ;;  %v9685_v28 = vld [vmem:[%s14354_s0 + $0xa0] sm:$0xf0] }
 0x141   :  { %2441 = vmatmul.bf16.gmra.mxu1 %v11351_v40 }
 0x143   :  { %2619 = vmatmul.bf16.gmra.mxu3 %v10573_v9  ;;  %v2215_v61 = vpop.f32.mrf.mxu2 }
 0x144   :  { %v2216_v37 = vadd.f32 %v2215_v61, %v2127_v45  ;;  %v2039_v1 = vpop.f32.mrf.mxu0  ;;  %v9681_v45 = vld [vmem:[%s14354_s0 + $0x84] sm:$0xf]  ;;  %v11384_v61 = vor.u32 %v9684_v8, %v7803_v60  ;;  %v8645_v60 = vld [vmem:[%s14355_s1 + $0x3b0] sm:$0xf0] }
 0x145   :  { %v2040_v46 = vadd.f32 %v2039_v1, %v10858_v13  ;;  %v8389_v8 = vld [vmem:[%s14355_s1 + $0x1b0] sm:$0xf0] }
 0x146   :  { %v2304_v39 = vpop.f32.mrf.mxu3  ;;  %v2128_v31 = vpop.f32.mrf.mxu1  ;;  %14749 = vst [vmem:[#allocation81_spill] sm:$0xff] %v11384_v61 }
 0x147   :  { %v11364_v17 = vadd.f32 %v2304_v39, %v2216_v37  ;;  %v2129_v33 = vadd.f32 %v2128_v31, %v2040_v46  ;;  %v11386_v46 = vor.u32 %v9681_v45, %v7805_v3  ;;  %v11388_v31 = vor.u32 %v9685_v28, %v7811_v38  ;;  %v9925_v45 = vld [vmem:[%s14355_s1 + $0x4a4] sm:$0xf]  ;;  %v8773_v3 = vld [vmem:[%s14355_s1 + $0x4b0] sm:$0xf0] }
 0x149   :  { %14750 = vst [vmem:[#allocation82_spill] sm:$0xff] %v11386_v46 }
 0x14a   :  { %14751 = vst [vmem:[#allocation83_spill] sm:$0xff] %v11388_v31 }
 0x14b   :  { %v2217_v0 = vpop.f32.mrf.mxu2 }
 0x14c   :  { %v2218_v37 = vadd.f32 %v2217_v0, %v2129_v33  ;;  %v2042_v1 = vpop.f32.mrf.mxu0  ;;  %v9893_v33 = vld [vmem:[%s14355_s1 + $0x3a4] sm:$0xf]  ;;  %v8776_v0 = vor.u32 %v9925_v45, %v8773_v3  ;;  %v9691_v45 = vld [vmem:[%s14354_s0 + $0xd0] sm:$0xf0]  ;;  %v9688_v3 = vld [vmem:[%s14354_s0 + $0xbc] sm:$0xf] }
 0x14d   :  { %v2043_v9 = vadd.f32 %v2042_v1, %v10858_v13 }
 0x14e   :  { %v2306_v39 = vpop.f32.mrf.mxu3  ;;  %v2131_v25 = vpop.f32.mrf.mxu1  ;;  %2964 = vmatpush.bf16.msra.mxu3 %v8776_v0 }
 0x14f   :  { %v11391_v40 = vadd.f32 %v2306_v39, %v2218_v37  ;;  %v2132_v44 = vadd.f32 %v2131_v25, %v2043_v9  ;;  %2357 = vmatmul.bf16.gmra.mxu0 %v11384_v61  ;;  %v9829_v9 = vld [vmem:[%s14355_s1 + $0x1a4] sm:$0xf]  ;;  %v8648_v25 = vor.u32 %v9893_v33, %v8645_v60 }
 0x150   :  { %8963 = vmatmul.msk.bf16.gmra.mxu2 %vm1934_vm0, %v11388_v31  ;;  %v8392_v28 = vor.u32 %v9829_v9, %v8389_v8  ;;  %v9861_v31 = vld [vmem:[%s14355_s1 + $0x2a4] sm:$0xf]  ;;  %v8517_v9 = vld [vmem:[%s14355_s1 + $0x2b0] sm:$0xf0] }
 0x151   :  { %2446 = vmatmul.bf16.gmra.mxu1 %v11386_v46  ;;  %2875 = vmatpush.bf16.msra.mxu2 %v8648_v25  ;;  %v7831_v25 = vld [vmem:[%s14354_s0 + $0xb8] sm:$0xf] }
 0x152   :  { %2697 = vmatpush.bf16.msra.mxu0 %v8392_v28  ;;  %v9692_v28 = vld [vmem:[%s14354_s0 + $0xd8] sm:$0xf0] }
 0x153   :  { %2624 = vmatmul.bf16.gmra.mxu3 %v10609_v21  ;;  %v2220_v38 = vpop.f32.mrf.mxu2 }
 0x154   :  { %v2221_v37 = vadd.f32 %v2220_v38, %v2132_v44  ;;  %v2044_v1 = vpop.f32.mrf.mxu0  ;;  %v8520_v44 = vor.u32 %v9861_v31, %v8517_v9  ;;  %v7833_v38 = vld [vmem:[%s14354_s0 + $0xd4] sm:$0xf0]  ;;  %v7839_v31 = vld [vmem:[%s14354_s0 + $0xc0] sm:$0xf] }
 0x155   :  { %v2045_v33 = vadd.f32 %v2044_v1, %v10858_v13  ;;  %v11447_v9 = vor.u32 %v9692_v28, %v7839_v31 }
 0x156   :  { %v2309_v39 = vpop.f32.mrf.mxu3  ;;  %v2133_v60 = vpop.f32.mrf.mxu1  ;;  %2786 = vmatpush.bf16.msra.mxu1 %v8520_v44 }
 0x157   :  { %v11417_v21 = vadd.f32 %v2309_v39, %v2221_v37  ;;  %v2134_v8 = vadd.f32 %v2133_v60, %v2045_v33  ;;  %v11443_v37 = vor.u32 %v9691_v45, %v7831_v25  ;;  %v11445_v60 = vor.u32 %v9688_v3, %v7833_v38  ;;  %14754 = vst [vmem:[#allocation86_spill] sm:$0xff] %v11447_v9 }
 0x159   :  { %14752 = vst [vmem:[#allocation84_spill] sm:$0xff] %v11443_v37 }
 0x15a   :  { %14753 = vst [vmem:[#allocation85_spill] sm:$0xff] %v11445_v60 }
 0x15b   :  { %v2222_v0 = vpop.f32.mrf.mxu2 }
 0x15c   :  { %v2223_v39 = vadd.f32 %v2222_v0, %v2134_v8  ;;  %v2047_v33 = vpop.f32.mrf.mxu0  ;;  %v7861_v0 = vld [vmem:[%s14354_s0 + $0x10c] sm:$0xf0] }
 0x15d   :  { %v2048_v46 = vadd.f32 %v2047_v33, %v10858_v13 }
 0x15e   :  { %v2311_v1 = vpop.f32.mrf.mxu3  ;;  %v2136_v43 = vpop.f32.mrf.mxu1 }
 0x15f   :  { %v11450_v61 = vadd.f32 %v2311_v1, %v2223_v39  ;;  %v2137_v24 = vadd.f32 %v2136_v43, %v2048_v46  ;;  %2362 = vmatmul.bf16.gmra.mxu0 %v11443_v37  ;;  %v7859_v43 = vld [vmem:[%s14354_s0 + $0xf0] sm:$0xf]  ;;  %v9698_v46 = vld [vmem:[%s14354_s0 + $0x108] sm:$0xf0]  ;;  %v7867_v39 = vld [vmem:[%s14354_s0 + $0xf8] sm:$0xf] }
 0x160   :  { %8964 = vmatmul.msk.bf16.gmra.mxu2 %vm1934_vm0, %v11447_v9  ;;  %v9699_v1 = vld [vmem:[%s14354_s0 + $0x110] sm:$0xf0] }
 0x161   :  { %2451 = vmatmul.bf16.gmra.mxu1 %v11445_v60 }
 0x163   :  { %2629 = vmatmul.bf16.gmra.mxu3 %v10663_v42  ;;  %v2225_v8 = vpop.f32.mrf.mxu2 }
 0x164   :  { %v2226_v44 = vadd.f32 %v2225_v8, %v2137_v24  ;;  %v2049_v45 = vpop.f32.mrf.mxu0  ;;  %v9695_v24 = vld [vmem:[%s14354_s0 + $0xf4] sm:$0xf]  ;;  %v11478_v8 = vor.u32 %v9698_v46, %v7859_v43 }
 0x165   :  { %v2050_v3 = vadd.f32 %v2049_v45, %v10858_v13  ;;  %v8629_v43 = vld [vmem:[%s14355_s1 + $0x390] sm:$0xf0] }
 0x166   :  { %v2314_v25 = vpop.f32.mrf.mxu3  ;;  %v2138_v38 = vpop.f32.mrf.mxu1  ;;  %14755 = vst [vmem:[#allocation87_spill] sm:$0xff] %v11478_v8  ;;  %v8373_v46 = vld [vmem:[%s14355_s1 + $0x190] sm:$0xf0] }
 0x167   :  { %v11458_v31 = vadd.f32 %v2314_v25, %v2226_v44  ;;  %v2139_v28 = vadd.f32 %v2138_v38, %v2050_v3  ;;  %v11480_v3 = vor.u32 %v9695_v24, %v7861_v0  ;;  %v11482_v38 = vor.u32 %v9699_v1, %v7867_v39  ;;  %v9921_v24 = vld [vmem:[%s14355_s1 + $0x484] sm:$0xf]  ;;  %v8757_v0 = vld [vmem:[%s14355_s1 + $0x490] sm:$0xf0] }
 0x169   :  { %14756 = vst [vmem:[#allocation88_spill] sm:$0xff] %v11480_v3 }
 0x16a   :  { %14757 = vst [vmem:[#allocation89_spill] sm:$0xff] %v11482_v38 }
 0x16b   :  { %v2227_v33 = vpop.f32.mrf.mxu2 }
 0x16c   :  { %v2228_v44 = vadd.f32 %v2227_v33, %v2139_v28  ;;  %v2052_v45 = vpop.f32.mrf.mxu0  ;;  %v9889_v28 = vld [vmem:[%s14355_s1 + $0x384] sm:$0xf]  ;;  %v8760_v33 = vor.u32 %v9921_v24, %v8757_v0  ;;  %v9702_v0 = vld [vmem:[%s14354_s0 + $0x12c] sm:$0xf] }
 0x16d   :  { %v2053_v42 = vadd.f32 %v2052_v45, %v10858_v13  ;;  %v9705_v24 = vld [vmem:[%s14354_s0 + $0x140] sm:$0xf0] }
 0x16e   :  { %v2316_v25 = vpop.f32.mrf.mxu3  ;;  %v2141_v9 = vpop.f32.mrf.mxu1  ;;  %2965 = vmatpush.bf16.msra.mxu3 %v8760_v33 }
 0x16f   :  { %v11485_v60 = vadd.f32 %v2316_v25, %v2228_v44  ;;  %v2142_v37 = vadd.f32 %v2141_v9, %v2053_v42  ;;  %2367 = vmatmul.bf16.gmra.mxu0 %v11478_v8  ;;  %v9825_v42 = vld [vmem:[%s14355_s1 + $0x184] sm:$0xf]  ;;  %v8632_v9 = vor.u32 %v9889_v28, %v8629_v43 }
 0x170   :  { %8965 = vmatmul.msk.bf16.gmra.mxu2 %vm1934_vm0, %v11482_v38  ;;  %v8376_v1 = vor.u32 %v9825_v42, %v8373_v46  ;;  %v9857_v38 = vld [vmem:[%s14355_s1 + $0x284] sm:$0xf]  ;;  %v8501_v42 = vld [vmem:[%s14355_s1 + $0x290] sm:$0xf0] }
 0x171   :  { %14758 = vst [vmem:[#allocation90_spill] sm:$0xff] %v11485_v60  ;;  %2456 = vmatmul.bf16.gmra.mxu1 %v11480_v3  ;;  %2876 = vmatpush.bf16.msra.mxu2 %v8632_v9  ;;  %v7887_v9 = vld [vmem:[%s14354_s0 + $0x128] sm:$0xf] }
 0x172   :  { %2698 = vmatpush.bf16.msra.mxu0 %v8376_v1  ;;  %v9706_v1 = vld [vmem:[%s14354_s0 + $0x148] sm:$0xf0] }
 0x173   :  { %2634 = vmatmul.bf16.gmra.mxu3 %v10699_v58  ;;  %v2230_v39 = vpop.f32.mrf.mxu2 }
 0x174   :  { %v2231_v44 = vadd.f32 %v2230_v39, %v2142_v37  ;;  %v2054_v45 = vpop.f32.mrf.mxu0  ;;  %v8504_v37 = vor.u32 %v9857_v38, %v8501_v42  ;;  %v7889_v39 = vld [vmem:[%s14354_s0 + $0x144] sm:$0xf0]  ;;  %v7895_v38 = vld [vmem:[%s14354_s0 + $0x130] sm:$0xf] }
 0x175   :  { %v2055_v28 = vadd.f32 %v2054_v45, %v10858_v13  ;;  %v11541_v42 = vor.u32 %v9706_v1, %v7895_v38 }
 0x176   :  { %v2319_v25 = vpop.f32.mrf.mxu3  ;;  %v2143_v43 = vpop.f32.mrf.mxu1  ;;  %2787 = vmatpush.bf16.msra.mxu1 %v8504_v37 }
 0x177   :  { %v11511_v58 = vadd.f32 %v2319_v25, %v2231_v44  ;;  %v2144_v46 = vadd.f32 %v2143_v43, %v2055_v28  ;;  %v11537_v44 = vor.u32 %v9705_v24, %v7887_v9  ;;  %v11539_v43 = vor.u32 %v9702_v0, %v7889_v39  ;;  %14762 = vst [vmem:[#allocation94_spill] sm:$0xff] %v11541_v42 }
 0x179   :  { %14759 = vst [vmem:[#allocation91_spill] sm:$0xff] %v11511_v58 }
 0x17a   :  { %14760 = vst [vmem:[#allocation92_spill] sm:$0xff] %v11537_v44 }
 0x17b   :  { %v2232_v33 = vpop.f32.mrf.mxu2  ;;  %14761 = vst [vmem:[#allocation93_spill] sm:$0xff] %v11539_v43 }
 0x17c   :  { %v2233_v25 = vadd.f32 %v2232_v33, %v2144_v46  ;;  %v2057_v28 = vpop.f32.mrf.mxu0  ;;  %v7917_v33 = vld [vmem:[%s14354_s0 + $0x17c] sm:$0xf0] }
 0x17d   :  { %v2058_v3 = vadd.f32 %v2057_v28, %v10858_v13 }
 0x17e   :  { %v2321_v45 = vpop.f32.mrf.mxu3  ;;  %v2146_v8 = vpop.f32.mrf.mxu1 }
 0x17f   :  { %v11544_v58 = vadd.f32 %v2321_v45, %v2233_v25  ;;  %v2147_v60 = vadd.f32 %v2146_v8, %v2058_v3  ;;  %2372 = vmatmul.bf16.gmra.mxu0 %v11537_v44  ;;  %v7915_v8 = vld [vmem:[%s14354_s0 + $0x160] sm:$0xf]  ;;  %v9712_v3 = vld [vmem:[%s14354_s0 + $0x178] sm:$0xf0]  ;;  %v7923_v25 = vld [vmem:[%s14354_s0 + $0x168] sm:$0xf] }
 0x180   :  { %8966 = vmatmul.msk.bf16.gmra.mxu2 %vm1934_vm0, %v11541_v42  ;;  %v9713_v45 = vld [vmem:[%s14354_s0 + $0x180] sm:$0xf0] }
 0x181   :  { %2461 = vmatmul.bf16.gmra.mxu1 %v11539_v43 }
 0x183   :  { %2639 = vmatmul.bf16.gmra.mxu3 %v10753_v19  ;;  %v2235_v46 = vpop.f32.mrf.mxu2 }
 0x184   :  { %v2236_v37 = vadd.f32 %v2235_v46, %v2147_v60  ;;  %v2059_v24 = vpop.f32.mrf.mxu0  ;;  %v9709_v60 = vld [vmem:[%s14354_s0 + $0x164] sm:$0xf]  ;;  %v11572_v46 = vor.u32 %v9712_v3, %v7915_v8  ;;  %v8613_v8 = vld [vmem:[%s14355_s1 + $0x370] sm:$0xf0] }
 0x185   :  { %v2060_v0 = vadd.f32 %v2059_v24, %v10858_v13  ;;  %v8357_v3 = vld [vmem:[%s14355_s1 + $0x170] sm:$0xf0] }
 0x186   :  { %v2324_v9 = vpop.f32.mrf.mxu3  ;;  %v2148_v39 = vpop.f32.mrf.mxu1  ;;  %14763 = vst [vmem:[#allocation95_spill] sm:$0xff] %v11572_v46 }
 0x187   :  { %v11552_v38 = vadd.f32 %v2324_v9, %v2236_v37  ;;  %v2149_v1 = vadd.f32 %v2148_v39, %v2060_v0  ;;  %v11574_v0 = vor.u32 %v9709_v60, %v7917_v33  ;;  %v11576_v39 = vor.u32 %v9713_v45, %v7923_v25  ;;  %v9917_v60 = vld [vmem:[%s14355_s1 + $0x464] sm:$0xf]  ;;  %v8741_v33 = vld [vmem:[%s14355_s1 + $0x470] sm:$0xf0] }
 0x189   :  { %14764 = vst [vmem:[#allocation96_spill] sm:$0xff] %v11574_v0 }
 0x18a   :  { %14765 = vst [vmem:[#allocation97_spill] sm:$0xff] %v11576_v39 }
 0x18b   :  { %v2237_v28 = vpop.f32.mrf.mxu2 }
 0x18c   :  { %v2238_v37 = vadd.f32 %v2237_v28, %v2149_v1  ;;  %v2062_v24 = vpop.f32.mrf.mxu0  ;;  %v9885_v1 = vld [vmem:[%s14355_s1 + $0x364] sm:$0xf]  ;;  %v8744_v28 = vor.u32 %v9917_v60, %v8741_v33  ;;  %v9719_v60 = vld [vmem:[%s14354_s0 + $0x1b0] sm:$0xf0]  ;;  %v9716_v33 = vld [vmem:[%s14354_s0 + $0x19c] sm:$0xf] }
 0x18d   :  { %v2063_v19 = vadd.f32 %v2062_v24, %v10858_v13 }
 0x18e   :  { %v2326_v9 = vpop.f32.mrf.mxu3  ;;  %v2151_v42 = vpop.f32.mrf.mxu1  ;;  %2966 = vmatpush.bf16.msra.mxu3 %v8744_v28 }
 0x18f   :  { %v11579_v43 = vadd.f32 %v2326_v9, %v2238_v37  ;;  %v2152_v44 = vadd.f32 %v2151_v42, %v2063_v19  ;;  %2377 = vmatmul.bf16.gmra.mxu0 %v11572_v46  ;;  %v9821_v19 = vld [vmem:[%s14355_s1 + $0x164] sm:$0xf]  ;;  %v8616_v42 = vor.u32 %v9885_v1, %v8613_v8 }
 0x190   :  { %8967 = vmatmul.msk.bf16.gmra.mxu2 %vm1934_vm0, %v11576_v39  ;;  %v8360_v45 = vor.u32 %v9821_v19, %v8357_v3  ;;  %v9853_v39 = vld [vmem:[%s14355_s1 + $0x264] sm:$0xf]  ;;  %v8485_v19 = vld [vmem:[%s14355_s1 + $0x270] sm:$0xf0] }
 0x191   :  { %14766 = vst [vmem:[#allocation98_spill] sm:$0xff] %v11579_v43  ;;  %2466 = vmatmul.bf16.gmra.mxu1 %v11574_v0  ;;  %2877 = vmatpush.bf16.msra.mxu2 %v8616_v42  ;;  %v7943_v42 = vld [vmem:[%s14354_s0 + $0x198] sm:$0xf] }
 0x192   :  { %2699 = vmatpush.bf16.msra.mxu0 %v8360_v45  ;;  %v9720_v45 = vld [vmem:[%s14354_s0 + $0x1b8] sm:$0xf0] }
 0x193   :  { %2644 = vmatmul.bf16.gmra.mxu3 %v10789_v35  ;;  %v2240_v25 = vpop.f32.mrf.mxu2 }
 0x194   :  { %v2241_v37 = vadd.f32 %v2240_v25, %v2152_v44  ;;  %v2064_v24 = vpop.f32.mrf.mxu0  ;;  %v8488_v44 = vor.u32 %v9853_v39, %v8485_v19  ;;  %v7945_v25 = vld [vmem:[%s14354_s0 + $0x1b4] sm:$0xf0]  ;;  %v7951_v39 = vld [vmem:[%s14354_s0 + $0x1a0] sm:$0xf] }
 0x195   :  { %v2065_v1 = vadd.f32 %v2064_v24, %v10858_v13  ;;  %v11635_v19 = vor.u32 %v9720_v45, %v7951_v39 }
 0x196   :  { %v2329_v9 = vpop.f32.mrf.mxu3  ;;  %v2153_v8 = vpop.f32.mrf.mxu1  ;;  %2788 = vmatpush.bf16.msra.mxu1 %v8488_v44 }
 0x197   :  { %v11605_v35 = vadd.f32 %v2329_v9, %v2241_v37  ;;  %v2154_v3 = vadd.f32 %v2153_v8, %v2065_v1  ;;  %v11631_v37 = vor.u32 %v9719_v60, %v7943_v42  ;;  %v11633_v8 = vor.u32 %v9716_v33, %v7945_v25  ;;  %14770 = vst [vmem:[#allocation102_spill] sm:$0xff] %v11635_v19 }
 0x199   :  { %14767 = vst [vmem:[#allocation99_spill] sm:$0xff] %v11605_v35 }
 0x19a   :  { %14768 = vst [vmem:[#allocation100_spill] sm:$0xff] %v11631_v37 }
 0x19b   :  { %v2242_v28 = vpop.f32.mrf.mxu2  ;;  %14769 = vst [vmem:[#allocation101_spill] sm:$0xff] %v11633_v8 }
 0x19c   :  { %v2243_v9 = vadd.f32 %v2242_v28, %v2154_v3  ;;  %v2067_v1 = vpop.f32.mrf.mxu0  ;;  %v7979_v28 = vld [vmem:[%s14354_s0 + $0x1d8] sm:$0xf] }
 0x19d   :  { %v2068_v0 = vadd.f32 %v2067_v1, %v10858_v13 }
 0x19e   :  { %v2331_v24 = vpop.f32.mrf.mxu3  ;;  %v2156_v46 = vpop.f32.mrf.mxu1 }
 0x19f   :  { %v11638_v35 = vadd.f32 %v2331_v24, %v2243_v9  ;;  %v2157_v43 = vadd.f32 %v2156_v46, %v2068_v0  ;;  %2382 = vmatmul.bf16.gmra.mxu0 %v11631_v37  ;;  %v7971_v46 = vld [vmem:[%s14354_s0 + $0x1d0] sm:$0xf]  ;;  %v9726_v0 = vld [vmem:[%s14354_s0 + $0x1e8] sm:$0xf0]  ;;  %v9727_v9 = vld [vmem:[%s14354_s0 + $0x1f0] sm:$0xf0] }
 0x1a0   :  { %8968 = vmatmul.msk.bf16.gmra.mxu2 %vm1934_vm0, %v11635_v19  ;;  %v11666_v1 = vor.u32 %v9726_v0, %v7971_v46  ;;  %v8341_v0 = vld [vmem:[%s14355_s1 + $0x150] sm:$0xf0] }
 0x1a1   :  { %2471 = vmatmul.bf16.gmra.mxu1 %v11633_v8 }
 0x1a2   :  { %14771 = vst [vmem:[#allocation103_spill] sm:$0xff] %v11666_v1 }
 0x1a3   :  { %2649 = vmatmul.bf16.gmra.mxu3 %v10843_v4  ;;  %v2245_v3 = vpop.f32.mrf.mxu2 }
 0x1a4   :  { %v2246_v44 = vadd.f32 %v2245_v3, %v2157_v43  ;;  %v2069_v60 = vpop.f32.mrf.mxu0  ;;  %v9723_v43 = vld [vmem:[%s14354_s0 + $0x1d4] sm:$0xf] }
 0x1a5   :  { %v2070_v33 = vadd.f32 %v2069_v60, %v10858_v13  ;;  %v7973_v13 = vld [vmem:[%s14354_s0 + $0x1ec] sm:$0xf0] }
 0x1a6   :  { %v2334_v42 = vpop.f32.mrf.mxu3  ;;  %v2158_v25 = vpop.f32.mrf.mxu1  ;;  %v11668_v60 = vor.u32 %v9723_v43, %v7973_v13  ;;  %v9913_v43 = vld [vmem:[%s14355_s1 + $0x444] sm:$0xf]  ;;  %v8725_v13 = vld [vmem:[%s14355_s1 + $0x450] sm:$0xf0] }
 0x1a7   :  { %v11646_v39 = vadd.f32 %v2334_v42, %v2246_v44  ;;  %v2159_v45 = vadd.f32 %v2158_v25, %v2070_v33  ;;  %v11670_v33 = vor.u32 %v9727_v9, %v7979_v28 }
 0x1a8   :  { %14772 = vst [vmem:[#allocation104_spill] sm:$0xff] %v11668_v60 }
 0x1a9   :  { %14773 = vst [vmem:[#allocation105_spill] sm:$0xff] %v11670_v33 }
 0x1ab   :  { %v2247_v24 = vpop.f32.mrf.mxu2 }
 0x1ac   :  { %v2248_v3 = vadd.f32 %v2247_v24, %v2159_v45  ;;  %v2348_v42 = vpop.f32.mrf.mxu0  ;;  %v9881_v45 = vld [vmem:[%s14355_s1 + $0x344] sm:$0xf]  ;;  %v8728_v24 = vor.u32 %v9913_v43, %v8725_v13  ;;  %v8001_v43 = vld [vmem:[%s14354_s0 + $0x224] sm:$0xf0]  ;;  %v9734_v13 = vld [vmem:[%s14354_s0 + $0x228] sm:$0xf0] }
 0x1ad   :  { %v2349_v25 = vadd.f32 %v2348_v42, %v10910_v2  ;;  %v8597_v2 = vld [vmem:[%s14355_s1 + $0x350] sm:$0xf0] }
 0x1ae   :  { %v2336_v44 = vpop.f32.mrf.mxu3  ;;  %v2437_v4 = vpop.f32.mrf.mxu1  ;;  %v8600_v46 = vor.u32 %v9881_v45, %v8597_v2  ;;  %2967 = vmatpush.bf16.msra.mxu3 %v8728_v24  ;;  %v9849_v2 = vld [vmem:[%s14355_s1 + $0x244] sm:$0xf] }
 0x1af   :  { %v11673_v19 = vadd.f32 %v2336_v44, %v2248_v3  ;;  %v2438_v8 = vadd.f32 %v2437_v4, %v2349_v25  ;;  %2387 = vmatmul.bf16.gmra.mxu0 %v11666_v1  ;;  %v9817_v4 = vld [vmem:[%s14355_s1 + $0x144] sm:$0xf] }
 0x1b0   :  { %8969 = vmatmul.msk.bf16.gmra.mxu2 %vm1934_vm0, %v11670_v33  ;;  %v8344_v9 = vor.u32 %v9817_v4, %v8341_v0 }
 0x1b1   :  { %14774 = vst [vmem:[#allocation106_spill] sm:$0xff] %v11673_v19  ;;  %2476 = vmatmul.bf16.gmra.mxu1 %v11668_v60  ;;  %2878 = vmatpush.bf16.msra.mxu2 %v8600_v46  ;;  %v9730_v46 = vld [vmem:[%s14354_s0 + $0x20c] sm:$0xf] }
 0x1b2   :  { %2700 = vmatpush.bf16.msra.mxu0 %v8344_v9 }
 0x1b3   :  { %2654 = vmatmul.bf16.gmra.mxu3 %v10884_v30  ;;  %v2526_v28 = vpop.f32.mrf.mxu2  ;;  %v8469_v30 = vld [vmem:[%s14355_s1 + $0x250] sm:$0xf0] }
 0x1b4   :  { %v2527_v3 = vadd.f32 %v2526_v28, %v2438_v8  ;;  %v2350_v42 = vpop.f32.mrf.mxu0  ;;  %v8472_v0 = vor.u32 %v9849_v2, %v8469_v30  ;;  %v7999_v8 = vld [vmem:[%s14354_s0 + $0x208] sm:$0xf]  ;;  %v8007_v30 = vld [vmem:[%s14354_s0 + $0x210] sm:$0xf] }
 0x1b5   :  { %v2351_v25 = vadd.f32 %v2350_v42, %v10951_v62  ;;  %v9733_v62 = vld [vmem:[%s14354_s0 + $0x220] sm:$0xf0]  ;;  %v11731_v2 = vor.u32 %v9734_v13, %v8007_v30 }
 0x1b6   :  { %v11698_v44 = vpop.f32.mrf.mxu3  ;;  %v2439_v45 = vpop.f32.mrf.mxu1  ;;  %2789 = vmatpush.bf16.msra.mxu1 %v8472_v0  ;;  %v11725_v9 = vor.u32 %v9733_v62, %v7999_v8  ;;  %v4475_v1 = vmax.f32 %v2527_v3, 0.0 }
 0x1b7   :  { %14775 = vst [vmem:[#allocation107_spill] sm:$0xff] %v11698_v44  ;;  %v2440_v4 = vadd.f32 %v2439_v45, %v2351_v25  ;;  %v11729_v45 = vor.u32 %v9730_v46, %v8001_v43  ;;  %v9741_v43 = vld [vmem:[%s14354_s0 + $0x260] sm:$0xf0] }
 0x1b8   :  { %14776 = vst [vmem:[#allocation108_spill] sm:$0xff] %v11725_v9 }
 0x1b9   :  { %14777 = vst [vmem:[#allocation109_spill] sm:$0xff] %v11729_v45 }
 0x1ba   :  { %14778 = vst [vmem:[#allocation110_spill] sm:$0xff] %v11731_v2 }
 0x1bb   :  { %v2528_v28 = vpop.f32.mrf.mxu2 }
 0x1bc   :  { %v2529_v24 = vadd.f32 %v2528_v28, %v2440_v4  ;;  %v2353_v25 = vpop.f32.mrf.mxu0 }
 0x1bd   :  { %v2354_v33 = vadd.f32 %v2353_v25, %v10958_v16 }
 0x1be   :  { %v11727_v42 = vpop.f32.mrf.mxu3  ;;  %v2442_v60 = vpop.f32.mrf.mxu1  ;;  %v4479_v44 = vmax.f32 %v2529_v24, 0.0 }
 0x1bf   :  { %v2443_v19 = vadd.f32 %v2442_v60, %v2354_v33  ;;  %2392 = vmatmul.bf16.gmra.mxu0 %v11725_v9  ;;  %v9740_v33 = vld [vmem:[%s14354_s0 + $0x258] sm:$0xf0] }
 0x1c0   :  { %v11735_v0 = vpack.c.bf16 %v4479_v44, %v4475_v1  ;;  %8970 = vmatmul.msk.bf16.gmra.mxu2 %vm1934_vm0, %v11731_v2  ;;  %v8027_v1 = vld [vmem:[%s14354_s0 + $0x240] sm:$0xf]  ;;  %v9737_v44 = vld [vmem:[%s14354_s0 + $0x244] sm:$0xf] }
 0x1c1   :  { %2481 = vmatmul.bf16.gmra.mxu1 %v11729_v45  ;;  %v11762_v13 = vor.u32 %v9740_v33, %v8027_v1  ;;  %v9909_v1 = vld [vmem:[%s14355_s1 + $0x424] sm:$0xf]  ;;  %v8709_v33 = vld [vmem:[%s14355_s1 + $0x430] sm:$0xf0] }
 0x1c2   :  { %14779 = vst [vmem:[#allocation111_spill] sm:$0xff] %v11735_v0 }
 0x1c3   :  { %2659 = vmatmul.bf16.gmra.mxu3 %v10942_v41  ;;  %v2531_v4 = vpop.f32.mrf.mxu2  ;;  %14780 = vst [vmem:[#allocation112_spill] sm:$0xff] %v11762_v13 }
 0x1c4   :  { %v2532_v8 = vadd.f32 %v2531_v4, %v2443_v19  ;;  %v2355_v16 = vpop.f32.mrf.mxu0  ;;  %v8029_v19 = vld [vmem:[%s14354_s0 + $0x25c] sm:$0xf0] }
 0x1c5   :  { %v2356_v3 = vadd.f32 %v2355_v16, %v10993_v15  ;;  %v8035_v15 = vld [vmem:[%s14354_s0 + $0x248] sm:$0xf]  ;;  %v11766_v4 = vor.u32 %v9737_v44, %v8029_v19 }
 0x1c6   :  { %v11741_v62 = vpop.f32.mrf.mxu3  ;;  %v2444_v46 = vpop.f32.mrf.mxu1  ;;  %v11768_v16 = vor.u32 %v9741_v43, %v8035_v15  ;;  %v4483_v0 = vmax.f32 %v2532_v8, 0.0  ;;  %v8325_v8 = vld [vmem:[%s14355_s1 + $0x130] sm:$0xf0]  ;;  %v8712_v15 = vor.u32 %v9909_v1, %v8709_v33  ;;  %v8063_v1 = vld [vmem:[%s14354_s0 + $0x280] sm:$0xf] }
 0x1c7   :  { %v2445_v60 = vadd.f32 %v2444_v46, %v2356_v3  ;;  %14781 = vst [vmem:[#allocation113_spill] sm:$0xff] %v11766_v4  ;;  %v9748_v33 = vld [vmem:[%s14354_s0 + $0x298] sm:$0xf0] }
 0x1c8   :  { %14782 = vst [vmem:[#allocation114_spill] sm:$0xff] %v11768_v16  ;;  %2968 = vmatpush.bf16.msra.mxu3 %v8712_v15 }
 0x1cb   :  { %v2533_v30 = vpop.f32.mrf.mxu2 }
 0x1cc   :  { %v2534_v28 = vadd.f32 %v2533_v30, %v2445_v60  ;;  %v2358_v25 = vpop.f32.mrf.mxu0  ;;  %v9877_v60 = vld [vmem:[%s14355_s1 + $0x324] sm:$0xf] }
 0x1cd   :  { %v2359_v3 = vadd.f32 %v2358_v25, %v11012_v63  ;;  %v8581_v63 = vld [vmem:[%s14355_s1 + $0x330] sm:$0xf0] }
 0x1ce   :  { %v11764_v24 = vpop.f32.mrf.mxu3  ;;  %v2447_v46 = vpop.f32.mrf.mxu1  ;;  %v4487_v41 = vmax.f32 %v2534_v28, 0.0 }
 0x1cf   :  { %v2448_v2 = vadd.f32 %v2447_v46, %v2359_v3  ;;  %2397 = vmatmul.bf16.gmra.mxu0 %v11762_v13  ;;  %v9845_v46 = vld [vmem:[%s14355_s1 + $0x224] sm:$0xf] }
 0x1d0   :  { %v11772_v45 = vpack.c.bf16 %v4487_v41, %v4483_v0  ;;  %8971 = vmatmul.msk.bf16.gmra.mxu2 %vm1934_vm0, %v11768_v16  ;;  %v9813_v41 = vld [vmem:[%s14355_s1 + $0x124] sm:$0xf]  ;;  %v8584_v0 = vor.u32 %v9877_v60, %v8581_v63  ;;  %v8453_v60 = vld [vmem:[%s14355_s1 + $0x230] sm:$0xf0] }
 0x1d1   :  { %2486 = vmatmul.bf16.gmra.mxu1 %v11766_v4  ;;  %v8328_v19 = vor.u32 %v9813_v41, %v8325_v8  ;;  %v8456_v41 = vor.u32 %v9845_v46, %v8453_v60  ;;  %v8057_v8 = vld [vmem:[%s14354_s0 + $0x294] sm:$0xf0]  ;;  %v11829_v46 = vor.u32 %v9748_v33, %v8063_v1  ;;  %v9755_v1 = vld [vmem:[%s14354_s0 + $0x2d0] sm:$0xf0] }
 0x1d2   :  { %14783 = vst [vmem:[#allocation115_spill] sm:$0xff] %v11772_v45  ;;  %2879 = vmatpush.bf16.msra.mxu2 %v8584_v0  ;;  %v9744_v0 = vld [vmem:[%s14354_s0 + $0x27c] sm:$0xf] }
 0x1d3   :  { %2664 = vmatmul.bf16.gmra.mxu3 %v10984_v49  ;;  %v2536_v44 = vpop.f32.mrf.mxu2  ;;  %2701 = vmatpush.bf16.msra.mxu0 %v8328_v19  ;;  %14786 = vst [vmem:[#allocation118_spill] sm:$0xff] %v11829_v46 }
 0x1d4   :  { %v2537_v43 = vadd.f32 %v2536_v44, %v2448_v2  ;;  %v2360_v28 = vpop.f32.mrf.mxu0  ;;  %v8055_v2 = vld [vmem:[%s14354_s0 + $0x278] sm:$0xf]  ;;  %2790 = vmatpush.bf16.msra.mxu1 %v8456_v41 }
 0x1d5   :  { %v2361_v25 = vadd.f32 %v2360_v28, %v11053_v50  ;;  %v9747_v50 = vld [vmem:[%s14354_s0 + $0x290] sm:$0xf0] }
 0x1d6   :  { %v11796_v30 = vpop.f32.mrf.mxu3  ;;  %v2449_v3 = vpop.f32.mrf.mxu1  ;;  %v11823_v19 = vor.u32 %v9747_v50, %v8055_v2  ;;  %v4491_v49 = vmax.f32 %v2537_v43, 0.0 }
 0x1d7   :  { %v2450_v63 = vadd.f32 %v2449_v3, %v2361_v25  ;;  %v11827_v3 = vor.u32 %v9744_v0, %v8057_v8  ;;  %v9751_v8 = vld [vmem:[%s14354_s0 + $0x2b4] sm:$0xf] }
 0x1d8   :  { %14784 = vst [vmem:[#allocation116_spill] sm:$0xff] %v11823_v19 }
 0x1d9   :  { %14785 = vst [vmem:[#allocation117_spill] sm:$0xff] %v11827_v3 }
 0x1db   :  { %v2538_v44 = vpop.f32.mrf.mxu2 }
 0x1dc   :  { %v2539_v15 = vadd.f32 %v2538_v44, %v2450_v63  ;;  %v2363_v25 = vpop.f32.mrf.mxu0 }
 0x1dd   :  { %v2364_v60 = vadd.f32 %v2363_v25, %v11060_v34 }
 0x1de   :  { %v11825_v28 = vpop.f32.mrf.mxu3  ;;  %v2452_v45 = vpop.f32.mrf.mxu1  ;;  %v4495_v16 = vmax.f32 %v2539_v15, 0.0 }
 0x1df   :  { %v2453_v4 = vadd.f32 %v2452_v45, %v2364_v60  ;;  %2402 = vmatmul.bf16.gmra.mxu0 %v11823_v19 }
 0x1e0   :  { %v11833_v41 = vpack.c.bf16 %v4495_v16, %v4491_v49  ;;  %8972 = vmatmul.msk.bf16.gmra.mxu2 %vm1934_vm0, %v11829_v46  ;;  %v8083_v49 = vld [vmem:[%s14354_s0 + $0x2b0] sm:$0xf]  ;;  %v9754_v16 = vld [vmem:[%s14354_s0 + $0x2c8] sm:$0xf0] }
 0x1e1   :  { %2491 = vmatmul.bf16.gmra.mxu1 %v11827_v3  ;;  %v11860_v44 = vor.u32 %v9754_v16, %v8083_v49  ;;  %v9905_v49 = vld [vmem:[%s14355_s1 + $0x404] sm:$0xf]  ;;  %v8693_v16 = vld [vmem:[%s14355_s1 + $0x410] sm:$0xf0] }
 0x1e2   :  { %14787 = vst [vmem:[#allocation119_spill] sm:$0xff] %v11833_v41 }
 0x1e3   :  { %2669 = vmatmul.bf16.gmra.mxu3 %v11044_v55  ;;  %v2541_v63 = vpop.f32.mrf.mxu2  ;;  %14788 = vst [vmem:[#allocation120_spill] sm:$0xff] %v11860_v44 }
 0x1e4   :  { %v2542_v2 = vadd.f32 %v2541_v63, %v2453_v4  ;;  %v2365_v34 = vpop.f32.mrf.mxu0  ;;  %v8085_v4 = vld [vmem:[%s14354_s0 + $0x2cc] sm:$0xf0] }
 0x1e5   :  { %v2366_v43 = vadd.f32 %v2365_v34, %v11095_v32  ;;  %v8091_v32 = vld [vmem:[%s14354_s0 + $0x2b8] sm:$0xf]  ;;  %v11864_v63 = vor.u32 %v9751_v8, %v8085_v4 }
 0x1e6   :  { %v11839_v50 = vpop.f32.mrf.mxu3  ;;  %v2454_v0 = vpop.f32.mrf.mxu1  ;;  %v11866_v34 = vor.u32 %v9755_v1, %v8091_v32  ;;  %v4499_v41 = vmax.f32 %v2542_v2, 0.0  ;;  %v8309_v2 = vld [vmem:[%s14355_s1 + $0x110] sm:$0xf0]  ;;  %v8696_v32 = vor.u32 %v9905_v49, %v8693_v16  ;;  %v8119_v49 = vld [vmem:[%s14354_s0 + $0x2f0] sm:$0xf] }
 0x1e7   :  { %v2455_v45 = vadd.f32 %v2454_v0, %v2366_v43  ;;  %14789 = vst [vmem:[#allocation121_spill] sm:$0xff] %v11864_v63  ;;  %v9762_v16 = vld [vmem:[%s14354_s0 + $0x308] sm:$0xf0] }
 0x1e8   :  { %14790 = vst [vmem:[#allocation122_spill] sm:$0xff] %v11866_v34  ;;  %2969 = vmatpush.bf16.msra.mxu3 %v8696_v32 }
 0x1eb   :  { %v2543_v33 = vpop.f32.mrf.mxu2 }
 0x1ec   :  { %v2544_v15 = vadd.f32 %v2543_v33, %v2455_v45  ;;  %v2368_v60 = vpop.f32.mrf.mxu0  ;;  %v9873_v45 = vld [vmem:[%s14355_s1 + $0x304] sm:$0xf] }
 0x1ed   :  { %v2369_v43 = vadd.f32 %v2368_v60, %v11114_v27  ;;  %v8565_v27 = vld [vmem:[%s14355_s1 + $0x310] sm:$0xf0] }
 0x1ee   :  { %v11862_v25 = vpop.f32.mrf.mxu3  ;;  %v2457_v0 = vpop.f32.mrf.mxu1  ;;  %v4503_v55 = vmax.f32 %v2544_v15, 0.0 }
 0x1ef   :  { %v2458_v46 = vadd.f32 %v2457_v0, %v2369_v43  ;;  %2407 = vmatmul.bf16.gmra.mxu0 %v11860_v44  ;;  %v9841_v0 = vld [vmem:[%s14355_s1 + $0x204] sm:$0xf] }
 0x1f0   :  { %v11870_v3 = vpack.c.bf16 %v4503_v55, %v4499_v41  ;;  %8973 = vmatmul.msk.bf16.gmra.mxu2 %vm1934_vm0, %v11866_v34  ;;  %v9809_v55 = vld [vmem:[%s14355_s1 + $0x104] sm:$0xf]  ;;  %v8568_v41 = vor.u32 %v9873_v45, %v8565_v27  ;;  %v8437_v45 = vld [vmem:[%s14355_s1 + $0x210] sm:$0xf0] }
 0x1f1   :  { %2496 = vmatmul.bf16.gmra.mxu1 %v11864_v63  ;;  %v8312_v4 = vor.u32 %v9809_v55, %v8309_v2  ;;  %v8440_v55 = vor.u32 %v9841_v0, %v8437_v45  ;;  %v8113_v2 = vld [vmem:[%s14354_s0 + $0x304] sm:$0xf0]  ;;  %v11927_v0 = vor.u32 %v9762_v16, %v8119_v49  ;;  %v9769_v49 = vld [vmem:[%s14354_s0 + $0x340] sm:$0xf0] }
 0x1f2   :  { %14791 = vst [vmem:[#allocation123_spill] sm:$0xff] %v11870_v3  ;;  %2880 = vmatpush.bf16.msra.mxu2 %v8568_v41  ;;  %v9758_v41 = vld [vmem:[%s14354_s0 + $0x2ec] sm:$0xf] }
 0x1f3   :  { %2674 = vmatmul.bf16.gmra.mxu3 %v11086_v57  ;;  %v2546_v8 = vpop.f32.mrf.mxu2  ;;  %2702 = vmatpush.bf16.msra.mxu0 %v8312_v4  ;;  %14794 = vst [vmem:[#allocation126_spill] sm:$0xff] %v11927_v0 }
 0x1f4   :  { %v2547_v1 = vadd.f32 %v2546_v8, %v2458_v46  ;;  %v2370_v15 = vpop.f32.mrf.mxu0  ;;  %v8111_v46 = vld [vmem:[%s14354_s0 + $0x2e8] sm:$0xf]  ;;  %2791 = vmatpush.bf16.msra.mxu1 %v8440_v55 }
 0x1f5   :  { %v2371_v60 = vadd.f32 %v2370_v15, %v11155_v5  ;;  %v9761_v5 = vld [vmem:[%s14354_s0 + $0x300] sm:$0xf0] }
 0x1f6   :  { %v11894_v33 = vpop.f32.mrf.mxu3  ;;  %v2459_v43 = vpop.f32.mrf.mxu1  ;;  %v11921_v4 = vor.u32 %v9761_v5, %v8111_v46  ;;  %v4507_v57 = vmax.f32 %v2547_v1, 0.0 }
 0x1f7   :  { %v2460_v27 = vadd.f32 %v2459_v43, %v2371_v60  ;;  %v11925_v43 = vor.u32 %v9758_v41, %v8113_v2  ;;  %v9765_v2 = vld [vmem:[%s14354_s0 + $0x324] sm:$0xf] }
 0x1f8   :  { %14792 = vst [vmem:[#allocation124_spill] sm:$0xff] %v11921_v4 }
 0x1f9   :  { %14793 = vst [vmem:[#allocation125_spill] sm:$0xff] %v11925_v43 }
 0x1fb   :  { %v2548_v8 = vpop.f32.mrf.mxu2 }
 0x1fc   :  { %v2549_v32 = vadd.f32 %v2548_v8, %v2460_v27  ;;  %v2373_v60 = vpop.f32.mrf.mxu0 }
 0x1fd   :  { %v2374_v45 = vadd.f32 %v2373_v60, %v11162_v48 }
 0x1fe   :  { %v11923_v15 = vpop.f32.mrf.mxu3  ;;  %v2462_v3 = vpop.f32.mrf.mxu1  ;;  %v4511_v34 = vmax.f32 %v2549_v32, 0.0 }
 0x1ff   :  { %v2463_v63 = vadd.f32 %v2462_v3, %v2374_v45  ;;  %2412 = vmatmul.bf16.gmra.mxu0 %v11921_v4 }
 0x200   :  { %v11931_v55 = vpack.c.bf16 %v4511_v34, %v4507_v57  ;;  %8974 = vmatmul.msk.bf16.gmra.mxu2 %vm1934_vm0, %v11927_v0  ;;  %v8139_v57 = vld [vmem:[%s14354_s0 + $0x320] sm:$0xf]  ;;  %v9768_v34 = vld [vmem:[%s14354_s0 + $0x338] sm:$0xf0] }
 0x201   :  { %2501 = vmatmul.bf16.gmra.mxu1 %v11925_v43  ;;  %v11958_v8 = vor.u32 %v9768_v34, %v8139_v57  ;;  %v8427_v57 = vld [vmem:[%s14355_s1 + $0x1e8] sm:$0xf]  ;;  %v9840_v34 = vld [vmem:[%s14355_s1 + $0x1f4] sm:$0xf0] }
 0x202   :  { %14795 = vst [vmem:[#allocation127_spill] sm:$0xff] %v11931_v55 }
 0x203   :  { %2679 = vmatmul.bf16.gmra.mxu3 %v11146_v18  ;;  %v2551_v27 = vpop.f32.mrf.mxu2  ;;  %14796 = vst [vmem:[#allocation128_spill] sm:$0xff] %v11958_v8 }
 0x204   :  { %v2552_v46 = vadd.f32 %v2551_v27, %v2463_v63  ;;  %v2375_v48 = vpop.f32.mrf.mxu0  ;;  %v8141_v63 = vld [vmem:[%s14354_s0 + $0x33c] sm:$0xf0] }
 0x205   :  { %v2376_v1 = vadd.f32 %v2375_v48, %v11197_v36  ;;  %v8147_v36 = vld [vmem:[%s14354_s0 + $0x328] sm:$0xf]  ;;  %v11962_v27 = vor.u32 %v9765_v2, %v8141_v63 }
 0x206   :  { %v11937_v5 = vpop.f32.mrf.mxu3  ;;  %v2464_v41 = vpop.f32.mrf.mxu1  ;;  %v11964_v48 = vor.u32 %v9769_v49, %v8147_v36  ;;  %v4515_v55 = vmax.f32 %v2552_v46, 0.0  ;;  %v8933_v46 = vld [vmem:[%s14355_s1 + $0x5f0] sm:$0xf0]  ;;  %v8428_v36 = vor.u32 %v9840_v34, %v8427_v57  ;;  %v8175_v57 = vld [vmem:[%s14354_s0 + $0x360] sm:$0xf] }
 0x207   :  { %v2465_v3 = vadd.f32 %v2464_v41, %v2376_v1  ;;  %14797 = vst [vmem:[#allocation129_spill] sm:$0xff] %v11962_v27  ;;  %v9776_v34 = vld [vmem:[%s14354_s0 + $0x378] sm:$0xf0] }
 0x208   :  { %14798 = vst [vmem:[#allocation130_spill] sm:$0xff] %v11964_v48  ;;  %3318 = vmatpush.bf16.msrb.mxu3 %v8428_v36 }
 0x20b   :  { %v2553_v16 = vpop.f32.mrf.mxu2 }
 0x20c   :  { %v2554_v32 = vadd.f32 %v2553_v16, %v2465_v3  ;;  %v2378_v45 = vpop.f32.mrf.mxu0  ;;  %v8299_v3 = vld [vmem:[%s14355_s1 + $0xe8] sm:$0xf] }
 0x20d   :  { %v2379_v1 = vadd.f32 %v2378_v45, %v11222_v56  ;;  %v9808_v56 = vld [vmem:[%s14355_s1 + $0xf4] sm:$0xf0] }
 0x20e   :  { %v11960_v60 = vpop.f32.mrf.mxu3  ;;  %v2467_v41 = vpop.f32.mrf.mxu1  ;;  %v4519_v18 = vmax.f32 %v2554_v32, 0.0 }
 0x20f   :  { %v2468_v0 = vadd.f32 %v2467_v41, %v2379_v1  ;;  %2417 = vmatmul.bf16.gmra.mxu0 %v11958_v8  ;;  %v9969_v41 = vld [vmem:[%s14355_s1 + $0x604] sm:$0xf] }
 0x210   :  { %v11968_v43 = vpack.c.bf16 %v4519_v18, %v4515_v55  ;;  %8975 = vmatmul.msk.bf16.gmra.mxu2 %vm1934_vm0, %v11964_v48  ;;  %v9965_v18 = vld [vmem:[%s14355_s1 + $0x5e4] sm:$0xf]  ;;  %v8300_v55 = vor.u32 %v9808_v56, %v8299_v3  ;;  %v8949_v3 = vld [vmem:[%s14355_s1 + $0x610] sm:$0xf0] }
 0x211   :  { %2506 = vmatmul.bf16.gmra.mxu1 %v11962_v27  ;;  %v8936_v63 = vor.u32 %v9965_v18, %v8933_v46  ;;  %v8952_v18 = vor.u32 %v9969_v41, %v8949_v3  ;;  %v8169_v46 = vld [vmem:[%s14354_s0 + $0x374] sm:$0xf0]  ;;  %v12025_v41 = vor.u32 %v9776_v34, %v8175_v57 }
 0x212   :  { %14799 = vst [vmem:[#allocation131_spill] sm:$0xff] %v11968_v43  ;;  %3229 = vmatpush.bf16.msrb.mxu2 %v8300_v55  ;;  %v9772_v55 = vld [vmem:[%s14354_s0 + $0x35c] sm:$0xf] }
 0x213   :  { %2684 = vmatmul.bf16.gmra.mxu3 %v11188_v7  ;;  %v2556_v2 = vpop.f32.mrf.mxu2  ;;  %3051 = vmatpush.bf16.msrb.mxu0 %v8936_v63  ;;  %14802 = vst [vmem:[#allocation134_spill] sm:$0xff] %v12025_v41 }
 0x214   :  { %v2557_v49 = vadd.f32 %v2556_v2, %v2468_v0  ;;  %v2380_v32 = vpop.f32.mrf.mxu0  ;;  %v8167_v0 = vld [vmem:[%s14354_s0 + $0x358] sm:$0xf]  ;;  %3147 = vmatpush.bf16.msrb.mxu1 %v8952_v18 }
 0x215   :  { %v2381_v45 = vadd.f32 %v2380_v32, %v11263_v20  ;;  %v9775_v20 = vld [vmem:[%s14354_s0 + $0x370] sm:$0xf0] }
 0x216   :  { %v11992_v16 = vpop.f32.mrf.mxu3  ;;  %v2469_v1 = vpop.f32.mrf.mxu1  ;;  %v12019_v63 = vor.u32 %v9775_v20, %v8167_v0  ;;  %v4523_v7 = vmax.f32 %v2557_v49, 0.0 }
 0x217   :  { %v2470_v56 = vadd.f32 %v2469_v1, %v2381_v45  ;;  %v12023_v1 = vor.u32 %v9772_v55, %v8169_v46 }
 0x218   :  { %14800 = vst [vmem:[#allocation132_spill] sm:$0xff] %v12019_v63 }
 0x219   :  { %14801 = vst [vmem:[#allocation133_spill] sm:$0xff] %v12023_v1 }
 0x21b   :  { %v2558_v2 = vpop.f32.mrf.mxu2 }
 0x21c   :  { %v2559_v36 = vadd.f32 %v2558_v2, %v2470_v56  ;;  %v2383_v45 = vpop.f32.mrf.mxu0 }
 0x21d   :  { %v2384_v3 = vadd.f32 %v2383_v45, %v11270_v29 }
 0x21e   :  { %v12021_v32 = vpop.f32.mrf.mxu3  ;;  %v2472_v43 = vpop.f32.mrf.mxu1  ;;  %v4527_v48 = vmax.f32 %v2559_v36, 0.0 }
 0x21f   :  { %v2473_v27 = vadd.f32 %v2472_v43, %v2384_v3  ;;  %2422 = vmatmul.bf16.gmra.mxu0 %v12019_v63 }
 0x220   :  { %v12029_v18 = vpack.c.bf16 %v4527_v48, %v4523_v7  ;;  %8976 = vmatmul.msk.bf16.gmra.mxu2 %vm1934_vm0, %v12025_v41 }
 0x221   :  { %2511 = vmatmul.bf16.gmra.mxu1 %v12023_v1 }
 0x222   :  { %14803 = vst [vmem:[#allocation135_spill] sm:$0xff] %v12029_v18 }
 0x223   :  { %2689 = vmatmul.bf16.gmra.mxu3 %v11254_v14  ;;  %v2561_v56 = vpop.f32.mrf.mxu2 }
 0x224   :  { %v2562_v0 = vadd.f32 %v2561_v56, %v2473_v27  ;;  %v2385_v29 = vpop.f32.mrf.mxu0  ;;  %v9961_v56 = vld [vmem:[%s14355_s1 + $0x5c4] sm:$0xf] }
 0x225   :  { %v2386_v49 = vadd.f32 %v2385_v29, %v11297_v6  ;;  %v8283_v6 = vld [vmem:[%s14355_s1 + $0xc8] sm:$0xf]  ;;  %v8917_v29 = vld [vmem:[%s14355_s1 + $0x5d0] sm:$0xf0] }
 0x226   :  { %v12035_v20 = vpop.f32.mrf.mxu3  ;;  %v2474_v55 = vpop.f32.mrf.mxu1  ;;  %v4531_v36 = vmax.f32 %v2562_v0, 0.0 }
 0x227   :  { %v2475_v43 = vadd.f32 %v2474_v55, %v2386_v49  ;;  %v8411_v49 = vld [vmem:[%s14355_s1 + $0x1c8] sm:$0xf]  ;;  %v9836_v55 = vld [vmem:[%s14355_s1 + $0x1d4] sm:$0xf0] }
 0x22b   :  { %v2563_v46 = vpop.f32.mrf.mxu2 }
 0x22c   :  { %v2564_v57 = vadd.f32 %v2563_v46, %v2475_v43  ;;  %v2388_v48 = vpop.f32.mrf.mxu0  ;;  %v8920_v46 = vor.u32 %v9961_v56, %v8917_v29 }
 0x22d   :  { %v2389_v34 = vadd.f32 %v2388_v48, %v11323_v47  ;;  %v9804_v47 = vld [vmem:[%s14355_s1 + $0xd4] sm:$0xf0] }
 0x22e   :  { %v12038_v7 = vpop.f32.mrf.mxu3  ;;  %v2477_v2 = vpop.f32.mrf.mxu1  ;;  %v4535_v45 = vmax.f32 %v2564_v57, 0.0  ;;  %v8284_v0 = vor.u32 %v9804_v47, %v8283_v6  ;;  %v8412_v57 = vor.u32 %v9836_v55, %v8411_v49  ;;  %3052 = vmatpush.bf16.msrb.mxu0 %v8920_v46 }
 0x22f   :  { %v2478_v3 = vadd.f32 %v2477_v2, %v2389_v34  ;;  %2703 = vmatmul.bf16.vlgmr.msra.gmra.mxu0 %v10521_v51 }
 0x230   :  { %v12042_v27 = vpack.c.bf16 %v4535_v45, %v4531_v36  ;;  %2881 = vmatmul.bf16.vlgmr.msra.gmra.mxu2 %v10525_v53  ;;  %3319 = vmatpush.bf16.msrb.mxu3 %v8412_v57 }
 0x231   :  { %2792 = vmatmul.bf16.vlgmr.msra.gmra.mxu1 %v10523_v52  ;;  %3230 = vmatpush.bf16.msrb.mxu2 %v8284_v0  ;;  %v14828_v52 = vld [vmem:[#allocation36_spill] sm:$0xff] }
 0x232   :  { %14804 = vst [vmem:[#allocation136_spill] sm:$0xff] %v12042_v27 }
 0x233   :  { %2970 = vmatmul.bf16.vlgmr.msra.gmra.mxu3 %v11290_v26  ;;  %v2566_v43 = vpop.f32.mrf.mxu2 }
 0x234   :  { %v2567_v48 = vadd.f32 %v2566_v43, %v2478_v3  ;;  %v2390_v2 = vpop.f32.mrf.mxu0 }
 0x235   :  { %v2391_v36 = vadd.f32 %v2390_v2, %v11356_v59 }
 0x236   :  { %v12065_v34 = vpop.f32.mrf.mxu3  ;;  %v2479_v45 = vpop.f32.mrf.mxu1  ;;  %v4539_v29 = vmax.f32 %v2567_v48, 0.0 }
 0x237   :  { %v2480_v6 = vadd.f32 %v2479_v45, %v2391_v36 }
 0x23b   :  { %v2568_v47 = vpop.f32.mrf.mxu2 }
 0x23c   :  { %v2569_v27 = vadd.f32 %v2568_v47, %v2480_v6  ;;  %v2393_v26 = vpop.f32.mrf.mxu0 }
 0x23d   :  { %v2394_v53 = vadd.f32 %v2393_v26, %v11364_v17 }
 0x23e   :  { %v12068_v18 = vpop.f32.mrf.mxu3  ;;  %v2482_v56 = vpop.f32.mrf.mxu1  ;;  %v4543_v3 = vmax.f32 %v2569_v27, 0.0 }
 0x23f   :  { %v2483_v49 = vadd.f32 %v2482_v56, %v2394_v53  ;;  %2708 = vmatmul.bf16.gmra.mxu0 %v10575_v10 }
 0x240   :  { %v12072_v0 = vpack.c.bf16 %v4543_v3, %v4539_v29  ;;  %2886 = vmatmul.bf16.gmra.mxu2 %v10579_v12  ;;  %v14808_v3 = vld [vmem:[#allocation81_spill] sm:$0xff] }
 0x241   :  { %2797 = vmatmul.bf16.gmra.mxu1 %v10577_v11 }
 0x242   :  { %14805 = vst [vmem:[#allocation137_spill] sm:$0xff] %v12072_v0 }
 0x243   :  { %2975 = vmatmul.bf16.gmra.mxu3 %v11349_v54  ;;  %v2571_v59 = vpop.f32.mrf.mxu2 }
 0x244   :  { %v2572_v55 = vadd.f32 %v2571_v59, %v2483_v49  ;;  %v2395_v46 = vpop.f32.mrf.mxu0  ;;  %v8267_v49 = vld [vmem:[%s14355_s1 + $0xa8] sm:$0xf]  ;;  %v9957_v59 = vld [vmem:[%s14355_s1 + $0x5a4] sm:$0xf] }
 0x245   :  { %v2396_v26 = vadd.f32 %v2395_v46, %v11391_v40  ;;  %v14807_v40 = vld [vmem:[#allocation22_spill] sm:$0xff]  ;;  %v8901_v46 = vld [vmem:[%s14355_s1 + $0x5b0] sm:$0xf0] }
 0x246   :  { %v12077_v43 = vpop.f32.mrf.mxu3  ;;  %v2484_v17 = vpop.f32.mrf.mxu1  ;;  %v4547_v6 = vmax.f32 %v2572_v55, 0.0 }
 0x247   :  { %v2485_v27 = vadd.f32 %v2484_v17, %v2396_v26  ;;  %v8395_v26 = vld [vmem:[%s14355_s1 + $0x1a8] sm:$0xf]  ;;  %v9832_v17 = vld [vmem:[%s14355_s1 + $0x1b4] sm:$0xf0] }
 0x24b   :  { %v2573_v53 = vpop.f32.mrf.mxu2 }
 0x24c   :  { %v2574_v57 = vadd.f32 %v2573_v53, %v2485_v27  ;;  %v2398_v2 = vpop.f32.mrf.mxu0  ;;  %v8904_v53 = vor.u32 %v9957_v59, %v8901_v46 }
 0x24d   :  { %v2399_v36 = vadd.f32 %v2398_v2, %v11417_v21  ;;  %v9800_v21 = vld [vmem:[%s14355_s1 + $0xb4] sm:$0xf0] }
 0x24e   :  { %v12080_v48 = vpop.f32.mrf.mxu3  ;;  %v2487_v45 = vpop.f32.mrf.mxu1  ;;  %v4551_v47 = vmax.f32 %v2574_v57, 0.0  ;;  %v8268_v55 = vor.u32 %v9800_v21, %v8267_v49  ;;  %v8396_v57 = vor.u32 %v9832_v17, %v8395_v26  ;;  %3053 = vmatpush.bf16.msrb.mxu0 %v8904_v53  ;;  %v14809_v17 = vld [vmem:[#allocation24_spill] sm:$0xff] }
 0x24f   :  { %v2488_v56 = vadd.f32 %v2487_v45, %v2399_v36  ;;  %2713 = vmatmul.bf16.gmra.mxu0 %v10611_v22  ;;  %v14813_v53 = vld [vmem:[#allocation84_spill] sm:$0xff] }
 0x250   :  { %v12084_v29 = vpack.c.bf16 %v4551_v47, %v4547_v6  ;;  %2891 = vmatmul.bf16.gmra.mxu2 %v14807_v40  ;;  %3320 = vmatpush.bf16.msrb.mxu3 %v8396_v57 }
 0x251   :  { %2802 = vmatmul.bf16.gmra.mxu1 %v10613_v23  ;;  %3231 = vmatpush.bf16.msrb.mxu2 %v8268_v55  ;;  %v14816_v23 = vld [vmem:[#allocation28_spill] sm:$0xff] }
 0x252   :  { %14806 = vst [vmem:[#allocation138_spill] sm:$0xff] %v12084_v29 }
 0x253   :  { %2980 = vmatmul.bf16.gmra.mxu3 %v14808_v3  ;;  %v2576_v27 = vpop.f32.mrf.mxu2 }
 0x254   :  { %v2577_v2 = vadd.f32 %v2576_v27, %v2488_v56  ;;  %v2400_v45 = vpop.f32.mrf.mxu0  ;;  %v14812_v27 = vld [vmem:[#allocation26_spill] sm:$0xff] }
 0x255   :  { %v2401_v6 = vadd.f32 %v2400_v45, %v11450_v61  ;;  %v14811_v61 = vld [vmem:[#allocation25_spill] sm:$0xff] }
 0x256   :  { %v12107_v36 = vpop.f32.mrf.mxu3  ;;  %v2489_v47 = vpop.f32.mrf.mxu1  ;;  %v4555_v46 = vmax.f32 %v2577_v2, 0.0 }
 0x257   :  { %v2490_v49 = vadd.f32 %v2489_v47, %v2401_v6 }
 0x25b   :  { %v2578_v21 = vpop.f32.mrf.mxu2 }
 0x25c   :  { %v2579_v29 = vadd.f32 %v2578_v21, %v2490_v49  ;;  %v2403_v3 = vpop.f32.mrf.mxu0 }
 0x25d   :  { %v2404_v40 = vadd.f32 %v2403_v3, %v11458_v31  ;;  %v14814_v31 = vld [vmem:[#allocation90_spill] sm:$0xff] }
 0x25e   :  { %v12110_v0 = vpop.f32.mrf.mxu3  ;;  %v2492_v59 = vpop.f32.mrf.mxu1  ;;  %v4559_v56 = vmax.f32 %v2579_v29, 0.0 }
 0x25f   :  { %v2493_v26 = vadd.f32 %v2492_v59, %v2404_v40  ;;  %2718 = vmatmul.bf16.gmra.mxu0 %v14809_v17 }
 0x260   :  { %v12114_v55 = vpack.c.bf16 %v4559_v56, %v4555_v46  ;;  %2896 = vmatmul.bf16.gmra.mxu2 %v14812_v27  ;;  %v14815_v46 = vld [vmem:[#allocation91_spill] sm:$0xff] }
 0x261   :  { %2807 = vmatmul.bf16.gmra.mxu1 %v14811_v61 }
 0x262   :  { %14810 = vst [vmem:[#allocation139_spill] sm:$0xff] %v12114_v55 }
 0x263   :  { %2985 = vmatmul.bf16.gmra.mxu3 %v14813_v53  ;;  %v2581_v57 = vpop.f32.mrf.mxu2 }
 0x264   :  { %v2582_v45 = vadd.f32 %v2581_v57, %v2493_v26  ;;  %v2405_v47 = vpop.f32.mrf.mxu0  ;;  %v14818_v57 = vld [vmem:[#allocation29_spill] sm:$0xff] }
 0x265   :  { %v2406_v3 = vadd.f32 %v2405_v47, %v14814_v31  ;;  %v14819_v47 = vld [vmem:[#allocation30_spill] sm:$0xff]  ;;  %v14820_v31 = vld [vmem:[#allocation87_spill] sm:$0xff] }
 0x266   :  { %v12119_v6 = vpop.f32.mrf.mxu3  ;;  %v2494_v2 = vpop.f32.mrf.mxu1  ;;  %v4563_v27 = vmax.f32 %v2582_v45, 0.0  ;;  %v9796_v45 = vld [vmem:[%s14355_s1 + $0x94] sm:$0xf0] }
 0x267   :  { %v2495_v29 = vadd.f32 %v2494_v2, %v2406_v3  ;;  %v8251_v3 = vld [vmem:[%s14355_s1 + $0x88] sm:$0xf] }
 0x268   :  { %v8379_v2 = vld [vmem:[%s14355_s1 + $0x188] sm:$0xf] }
 0x26b   :  { %v2583_v40 = vpop.f32.mrf.mxu2 }
 0x26c   :  { %v2584_v49 = vadd.f32 %v2583_v40, %v2495_v29  ;;  %v2408_v59 = vpop.f32.mrf.mxu0  ;;  %v9828_v29 = vld [vmem:[%s14355_s1 + $0x194] sm:$0xf0] }
 0x26d   :  { %v2409_v56 = vadd.f32 %v2408_v59, %v14815_v46  ;;  %v8380_v59 = vor.u32 %v9828_v29, %v8379_v2  ;;  %v14821_v29 = vld [vmem:[#allocation32_spill] sm:$0xff] }
 0x26e   :  { %v12122_v21 = vpop.f32.mrf.mxu3  ;;  %v2497_v55 = vpop.f32.mrf.mxu1  ;;  %v4567_v61 = vmax.f32 %v2584_v49, 0.0 }
 0x26f   :  { %v2498_v53 = vadd.f32 %v2497_v55, %v2409_v56  ;;  %2723 = vmatmul.bf16.gmra.mxu0 %v14816_v23  ;;  %v9953_v55 = vld [vmem:[%s14355_s1 + $0x584] sm:$0xf]  ;;  %3321 = vmatpush.bf16.msrb.mxu3 %v8380_v59 }
 0x270   :  { %v12126_v26 = vpack.c.bf16 %v4567_v61, %v4563_v27  ;;  %2901 = vmatmul.bf16.gmra.mxu2 %v14819_v47  ;;  %v8252_v61 = vor.u32 %v9796_v45, %v8251_v3  ;;  %v8885_v27 = vld [vmem:[%s14355_s1 + $0x590] sm:$0xf0] }
 0x271   :  { %2812 = vmatmul.bf16.gmra.mxu1 %v14818_v57  ;;  %v8888_v49 = vor.u32 %v9953_v55, %v8885_v27 }
 0x272   :  { %14817 = vst [vmem:[#allocation90_spill] sm:$0xff] %v12126_v26  ;;  %3232 = vmatpush.bf16.msrb.mxu2 %v8252_v61 }
 0x273   :  { %2990 = vmatmul.bf16.gmra.mxu3 %v14820_v31  ;;  %v2586_v40 = vpop.f32.mrf.mxu2  ;;  %3054 = vmatpush.bf16.msrb.mxu0 %v8888_v49 }
 0x274   :  { %v2587_v46 = vadd.f32 %v2586_v40, %v2498_v53  ;;  %v2410_v26 = vpop.f32.mrf.mxu0  ;;  %v14825_v40 = vld [vmem:[#allocation92_spill] sm:$0xff] }
 0x275   :  { %v2411_v3 = vadd.f32 %v2410_v26, %v11544_v58  ;;  %v14823_v58 = vld [vmem:[#allocation33_spill] sm:$0xff]  ;;  %v14824_v26 = vld [vmem:[#allocation34_spill] sm:$0xff] }
 0x276   :  { %v12149_v56 = vpop.f32.mrf.mxu3  ;;  %v2499_v45 = vpop.f32.mrf.mxu1  ;;  %v4571_v27 = vmax.f32 %v2587_v46, 0.0 }
 0x277   :  { %v2500_v31 = vadd.f32 %v2499_v45, %v2411_v3 }
 0x27b   :  { %v2588_v47 = vpop.f32.mrf.mxu2 }
 0x27c   :  { %v2589_v57 = vadd.f32 %v2588_v47, %v2500_v31  ;;  %v2413_v12 = vpop.f32.mrf.mxu0 }
 0x27d   :  { %v2414_v11 = vadd.f32 %v2413_v12, %v11552_v38  ;;  %v14826_v12 = vld [vmem:[#allocation98_spill] sm:$0xff] }
 0x27e   :  { %v12152_v54 = vpop.f32.mrf.mxu3  ;;  %v2502_v55 = vpop.f32.mrf.mxu1  ;;  %v4575_v53 = vmax.f32 %v2589_v57, 0.0 }
 0x27f   :  { %v2503_v2 = vadd.f32 %v2502_v55, %v2414_v11  ;;  %2728 = vmatmul.bf16.gmra.mxu0 %v14821_v29 }
 0x280   :  { %v12156_v61 = vpack.c.bf16 %v4575_v53, %v4571_v27  ;;  %2906 = vmatmul.bf16.gmra.mxu2 %v14824_v26  ;;  %v14827_v27 = vld [vmem:[#allocation99_spill] sm:$0xff] }
 0x281   :  { %2817 = vmatmul.bf16.gmra.mxu1 %v14823_v58 }
 0x282   :  { %14822 = vst [vmem:[#allocation91_spill] sm:$0xff] %v12156_v61 }
 0x283   :  { %2995 = vmatmul.bf16.gmra.mxu3 %v14825_v40  ;;  %v2591_v47 = vpop.f32.mrf.mxu2 }
 0x284   :  { %v2592_v31 = vadd.f32 %v2591_v47, %v2503_v2  ;;  %v2415_v59 = vpop.f32.mrf.mxu0  ;;  %v14830_v47 = vld [vmem:[#allocation37_spill] sm:$0xff] }
 0x285   :  { %v2416_v38 = vadd.f32 %v2415_v59, %v14826_v12  ;;  %v14831_v59 = vld [vmem:[#allocation38_spill] sm:$0xff]  ;;  %v14832_v12 = vld [vmem:[#allocation95_spill] sm:$0xff] }
 0x286   :  { %v12161_v49 = vpop.f32.mrf.mxu3  ;;  %v2504_v46 = vpop.f32.mrf.mxu1  ;;  %v4579_v26 = vmax.f32 %v2592_v31, 0.0  ;;  %v9792_v31 = vld [vmem:[%s14355_s1 + $0x74] sm:$0xf0] }
 0x287   :  { %v2505_v57 = vadd.f32 %v2504_v46, %v2416_v38  ;;  %v8235_v38 = vld [vmem:[%s14355_s1 + $0x68] sm:$0xf] }
 0x288   :  { %v8363_v46 = vld [vmem:[%s14355_s1 + $0x168] sm:$0xf] }
 0x28b   :  { %v2593_v11 = vpop.f32.mrf.mxu2 }
 0x28c   :  { %v2594_v3 = vadd.f32 %v2593_v11, %v2505_v57  ;;  %v2418_v55 = vpop.f32.mrf.mxu0  ;;  %v9824_v57 = vld [vmem:[%s14355_s1 + $0x174] sm:$0xf0] }
 0x28d   :  { %v2419_v53 = vadd.f32 %v2418_v55, %v14827_v27  ;;  %v8364_v55 = vor.u32 %v9824_v57, %v8363_v46  ;;  %v14834_v57 = vld [vmem:[#allocation40_spill] sm:$0xff] }
 0x28e   :  { %v12164_v45 = vpop.f32.mrf.mxu3  ;;  %v2507_v61 = vpop.f32.mrf.mxu1  ;;  %v4583_v58 = vmax.f32 %v2594_v3, 0.0 }
 0x28f   :  { %v2508_v40 = vadd.f32 %v2507_v61, %v2419_v53  ;;  %2733 = vmatmul.bf16.gmra.mxu0 %v14828_v52  ;;  %v9949_v61 = vld [vmem:[%s14355_s1 + $0x564] sm:$0xf]  ;;  %3322 = vmatpush.bf16.msrb.mxu3 %v8364_v55 }
 0x290   :  { %v12168_v2 = vpack.c.bf16 %v4583_v58, %v4579_v26  ;;  %2911 = vmatmul.bf16.gmra.mxu2 %v14831_v59  ;;  %v8236_v58 = vor.u32 %v9792_v31, %v8235_v38  ;;  %v8869_v26 = vld [vmem:[%s14355_s1 + $0x570] sm:$0xf0] }
 0x291   :  { %2822 = vmatmul.bf16.gmra.mxu1 %v14830_v47  ;;  %v8872_v3 = vor.u32 %v9949_v61, %v8869_v26 }
 0x292   :  { %14829 = vst [vmem:[#allocation98_spill] sm:$0xff] %v12168_v2  ;;  %3233 = vmatpush.bf16.msrb.mxu2 %v8236_v58 }
 0x293   :  { %3000 = vmatmul.bf16.gmra.mxu3 %v14832_v12  ;;  %v2596_v11 = vpop.f32.mrf.mxu2  ;;  %3055 = vmatpush.bf16.msrb.mxu0 %v8872_v3 }
 0x294   :  { %v2597_v27 = vadd.f32 %v2596_v11, %v2508_v40  ;;  %v2420_v2 = vpop.f32.mrf.mxu0 }
 0x295   :  { %v2421_v38 = vadd.f32 %v2420_v2, %v11638_v35  ;;  %v14836_v35 = vld [vmem:[#allocation41_spill] sm:$0xff]  ;;  %v14837_v2 = vld [vmem:[#allocation42_spill] sm:$0xff] }
 0x296   :  { %v12191_v53 = vpop.f32.mrf.mxu3  ;;  %v2509_v31 = vpop.f32.mrf.mxu1  ;;  %v4587_v26 = vmax.f32 %v2597_v27, 0.0 }
 0x297   :  { %v2510_v12 = vadd.f32 %v2509_v31, %v2421_v38  ;;  %v14841_v38 = vld [vmem:[#allocation107_spill] sm:$0xff] }
 0x29b   :  { %v2598_v59 = vpop.f32.mrf.mxu2 }
 0x29c   :  { %v2599_v47 = vadd.f32 %v2598_v59, %v2510_v12  ;;  %v2423_v41 = vpop.f32.mrf.mxu0 }
 0x29d   :  { %v2424_v1 = vadd.f32 %v2423_v41, %v11646_v39  ;;  %v14839_v39 = vld [vmem:[#allocation106_spill] sm:$0xff] }
 0x29e   :  { %v12194_v14 = vpop.f32.mrf.mxu3  ;;  %v2512_v61 = vpop.f32.mrf.mxu1  ;;  %v4591_v40 = vmax.f32 %v2599_v47, 0.0 }
 0x29f   :  { %14833 = vst [vmem:[#allocation99_spill] sm:$0xff] %v12194_v14  ;;  %v2513_v46 = vadd.f32 %v2512_v61, %v2424_v1  ;;  %2738 = vmatmul.bf16.gmra.mxu0 %v14834_v57  ;;  %v12209_v1 = vld [vmem:[%s14356_s2] sm:$0xf] }
 0x2a0   :  { %v12198_v58 = vpack.c.bf16 %v4591_v40, %v4587_v26  ;;  %2916 = vmatmul.bf16.gmra.mxu2 %v14837_v2  ;;  %14840 = vst [vmem:[#allocation106_spill] sm:$0xff] %v12209_v1  ;;  %v12212_v47 = vperm.slane %v12209_v1, 1  ;;  %v14843_v2 = vld [vmem:[#allocation44_spill] sm:$0xff]  ;;  %v14845_v1 = vld [vmem:[#allocation45_spill] sm:$0xff] }
 0x2a1   :  { %2827 = vmatmul.bf16.gmra.mxu1 %v14836_v35 }
 0x2a2   :  { %14835 = vst [vmem:[#allocation140_spill] sm:$0xff] %v12198_v58  ;;  %v2616_v31 = vadd.f32 %v14841_v38, %v12212_v47  ;;  %v9945_v38 = vld [vmem:[%s14355_s1 + $0x544] sm:$0xf] }
 0x2a3   :  { %3005 = vmatmul.bf16.gmra.mxu3 %v11631_v37  ;;  %v2601_v59 = vpop.f32.mrf.mxu2 }
 0x2a4   :  { %v2602_v12 = vadd.f32 %v2601_v59, %v2513_v46  ;;  %v2425_v3 = vpop.f32.mrf.mxu0 }
 0x2a5   :  { %v2426_v41 = vadd.f32 %v2425_v3, %v14839_v39 }
 0x2a6   :  { %v12203_v11 = vpop.f32.mrf.mxu3  ;;  %v2514_v55 = vpop.f32.mrf.mxu1  ;;  %v4595_v39 = vmax.f32 %v2602_v12, 0.0  ;;  %v9788_v12 = vld [vmem:[%s14355_s1 + $0x54] sm:$0xf0] }
 0x2a7   :  { %14838 = vst [vmem:[#allocation141_spill] sm:$0xff] %v12203_v11  ;;  %v2515_v27 = vadd.f32 %v2514_v55, %v2426_v41  ;;  %v14846_v41 = vld [vmem:[#allocation46_spill] sm:$0xff]  ;;  %v14847_v55 = vld [vmem:[#allocation103_spill] sm:$0xff] }
 0x2ab   :  { %v2603_v61 = vpop.f32.mrf.mxu2 }
 0x2ac   :  { %v2604_v26 = vadd.f32 %v2603_v61, %v2515_v27  ;;  %v2704_v46 = vpop.f32.mrf.mxu0  ;;  %v8219_v27 = vld [vmem:[%s14355_s1 + $0x48] sm:$0xf] }
 0x2ad   :  { %v2705_v59 = vadd.f32 %v2704_v46, %v2616_v31  ;;  %v8853_v31 = vld [vmem:[%s14355_s1 + $0x550] sm:$0xf0]  ;;  %v8347_v61 = vld [vmem:[%s14355_s1 + $0x148] sm:$0xf]  ;;  %v2618_v46 = vadd.f32 %v11727_v42, %v12212_v47 }
 0x2ae   :  { %v12216_v40 = vpop.f32.mrf.mxu3  ;;  %v2793_v3 = vpop.f32.mrf.mxu1  ;;  %v4599_v58 = vmax.f32 %v2604_v26, 0.0  ;;  %v9820_v26 = vld [vmem:[%s14355_s1 + $0x154] sm:$0xf0] }
 0x2af   :  { %14842 = vst [vmem:[#allocation107_spill] sm:$0xff] %v12216_v40  ;;  %v2794_v37 = vadd.f32 %v2793_v3, %v2705_v59  ;;  %2743 = vmatmul.bf16.gmra.mxu0 %v14843_v2  ;;  %v8856_v3 = vor.u32 %v9945_v38, %v8853_v31  ;;  %v2621_v40 = vadd.f32 %v11741_v62, %v12212_v47 }
 0x2b0   :  { %v12219_v35 = vpack.c.bf16 %v4599_v58, %v4595_v39  ;;  %2921 = vmatmul.bf16.gmra.mxu2 %v14846_v41  ;;  %v8220_v58 = vor.u32 %v9788_v12, %v8219_v27  ;;  %v8348_v39 = vor.u32 %v9820_v26, %v8347_v61  ;;  %v14849_v26 = vld [vmem:[#allocation49_spill] sm:$0xff]  ;;  %v2623_v62 = vadd.f32 %v11764_v24, %v12212_v47 }
 0x2b1   :  { %2832 = vmatmul.bf16.gmra.mxu1 %v14845_v1  ;;  %3056 = vmatpush.bf16.msrb.mxu0 %v8856_v3 }
 0x2b2   :  { %14844 = vst [vmem:[#allocation142_spill] sm:$0xff] %v12219_v35  ;;  %3234 = vmatpush.bf16.msrb.mxu2 %v8220_v58  ;;  %3323 = vmatpush.bf16.msrb.mxu3 %v8348_v39  ;;  %v14848_v58 = vld [vmem:[#allocation48_spill] sm:$0xff] }
 0x2b3   :  { %3010 = vmatmul.bf16.gmra.mxu3 %v14847_v55  ;;  %v2882_v59 = vpop.f32.mrf.mxu2 }
 0x2b4   :  { %v2883_v35 = vadd.f32 %v2882_v59, %v2794_v37  ;;  %v2706_v12 = vpop.f32.mrf.mxu0  ;;  %v2626_v59 = vadd.f32 %v11796_v30, %v12212_v47  ;;  %v8203_v30 = vld [vmem:[%s14355_s1 + $0x28] sm:$0xf] }
 0x2b5   :  { %v2707_v55 = vadd.f32 %v2706_v12, %v2618_v46  ;;  %v14850_v46 = vld [vmem:[#allocation50_spill] sm:$0xff] }
 0x2b6   :  { %v2971_v27 = vpop.f32.mrf.mxu3  ;;  %v2795_v41 = vpop.f32.mrf.mxu1 }
 0x2b7   :  { %v12244_v1 = vadd.f32 %v2971_v27, %v2883_v35  ;;  %v2796_v2 = vadd.f32 %v2795_v41, %v2707_v55 }
 0x2bb   :  { %v2884_v57 = vpop.f32.mrf.mxu2 }
 0x2bc   :  { %v2885_v11 = vadd.f32 %v2884_v57, %v2796_v2  ;;  %v2709_v14 = vpop.f32.mrf.mxu0 }
 0x2bd   :  { %v2710_v38 = vadd.f32 %v2709_v14, %v2621_v40 }
 0x2be   :  { %v2973_v42 = vpop.f32.mrf.mxu3  ;;  %v2798_v31 = vpop.f32.mrf.mxu1 }
 0x2bf   :  { %v12248_v37 = vadd.f32 %v2973_v42, %v2885_v11  ;;  %v2799_v61 = vadd.f32 %v2798_v31, %v2710_v38  ;;  %2748 = vmatmul.bf16.gmra.mxu0 %v14848_v58 }
 0x2c0   :  { %2926 = vmatmul.bf16.gmra.mxu2 %v14850_v46 }
 0x2c1   :  { %2837 = vmatmul.bf16.gmra.mxu1 %v14849_v26 }
 0x2c3   :  { %3015 = vmatmul.bf16.gmra.mxu3 %v11725_v9  ;;  %v2887_v35 = vpop.f32.mrf.mxu2 }
 0x2c4   :  { %v2888_v57 = vadd.f32 %v2887_v35, %v2799_v61  ;;  %v2711_v41 = vpop.f32.mrf.mxu0  ;;  %v14851_v61 = vld [vmem:[#allocation52_spill] sm:$0xff]  ;;  %v14852_v35 = vld [vmem:[#allocation53_spill] sm:$0xff] }
 0x2c5   :  { %v2712_v14 = vadd.f32 %v2711_v41, %v2623_v62  ;;  %v14853_v62 = vld [vmem:[#allocation54_spill] sm:$0xff] }
 0x2c6   :  { %v2976_v2 = vpop.f32.mrf.mxu3  ;;  %v2800_v40 = vpop.f32.mrf.mxu1 }
 0x2c7   :  { %v12256_v11 = vadd.f32 %v2976_v2, %v2888_v57  ;;  %v2801_v55 = vadd.f32 %v2800_v40, %v2712_v14  ;;  %v9784_v57 = vld [vmem:[%s14355_s1 + $0x34] sm:$0xf0]  ;;  %v9941_v2 = vld [vmem:[%s14355_s1 + $0x524] sm:$0xf]  ;;  %v8837_v14 = vld [vmem:[%s14355_s1 + $0x530] sm:$0xf0] }
 0x2c8   :  { %v8204_v41 = vor.u32 %v9784_v57, %v8203_v30  ;;  %v8331_v40 = vld [vmem:[%s14355_s1 + $0x128] sm:$0xf] }
 0x2ca   :  { %3235 = vmatpush.bf16.msrb.mxu2 %v8204_v41  ;;  %v14854_v41 = vld [vmem:[#allocation56_spill] sm:$0xff] }
 0x2cb   :  { %v2889_v3 = vpop.f32.mrf.mxu2 }
 0x2cc   :  { %v2890_v39 = vadd.f32 %v2889_v3, %v2801_v55  ;;  %v2714_v12 = vpop.f32.mrf.mxu0  ;;  %v9816_v55 = vld [vmem:[%s14355_s1 + $0x134] sm:$0xf0] }
 0x2cd   :  { %v2715_v42 = vadd.f32 %v2714_v12, %v2626_v59  ;;  %v2628_v59 = vadd.f32 %v11825_v28, %v12212_v47 }
 0x2ce   :  { %v2978_v27 = vpop.f32.mrf.mxu3  ;;  %v2803_v38 = vpop.f32.mrf.mxu1 }
 0x2cf   :  { %v12260_v31 = vadd.f32 %v2978_v27, %v2890_v39  ;;  %v2804_v24 = vadd.f32 %v2803_v38, %v2715_v42  ;;  %2753 = vmatmul.bf16.gmra.mxu0 %v14851_v61  ;;  %v8840_v39 = vor.u32 %v9941_v2, %v8837_v14  ;;  %v8332_v27 = vor.u32 %v9816_v55, %v8331_v40  ;;  %v14855_v55 = vld [vmem:[#allocation57_spill] sm:$0xff] }
 0x2d0   :  { %2931 = vmatmul.bf16.gmra.mxu2 %v14853_v62 }
 0x2d1   :  { %2842 = vmatmul.bf16.gmra.mxu1 %v14852_v35  ;;  %3057 = vmatpush.bf16.msrb.mxu0 %v8840_v39  ;;  %v2631_v35 = vadd.f32 %v11839_v50, %v12212_v47  ;;  %v2633_v50 = vadd.f32 %v11862_v25, %v12212_v47 }
 0x2d2   :  { %3324 = vmatpush.bf16.msrb.mxu3 %v8332_v27 }
 0x2d3   :  { %3020 = vmatmul.bf16.gmra.mxu3 %v11762_v13  ;;  %v2892_v3 = vpop.f32.mrf.mxu2 }
 0x2d4   :  { %v2893_v12 = vadd.f32 %v2892_v3, %v2804_v24  ;;  %v2716_v38 = vpop.f32.mrf.mxu0 }
 0x2d5   :  { %v2717_v30 = vadd.f32 %v2716_v38, %v2628_v59  ;;  %v14856_v59 = vld [vmem:[#allocation58_spill] sm:$0xff] }
 0x2d6   :  { %v2981_v42 = vpop.f32.mrf.mxu3  ;;  %v2805_v57 = vpop.f32.mrf.mxu1 }
 0x2d7   :  { %v12286_v13 = vadd.f32 %v2981_v42, %v2893_v12  ;;  %v2806_v62 = vadd.f32 %v2805_v57, %v2717_v30  ;;  %v2636_v12 = vadd.f32 %v11894_v33, %v12212_v47  ;;  %v8187_v33 = vld [vmem:[%s14355_s1 + $0x8] sm:$0xf] }
 0x2db   :  { %v2894_v9 = vpop.f32.mrf.mxu2 }
 0x2dc   :  { %v2895_v46 = vadd.f32 %v2894_v9, %v2806_v62  ;;  %v2719_v26 = vpop.f32.mrf.mxu0 }
 0x2dd   :  { %v2720_v2 = vadd.f32 %v2719_v26, %v2631_v35 }
 0x2de   :  { %v2983_v28 = vpop.f32.mrf.mxu3  ;;  %v2808_v14 = vpop.f32.mrf.mxu1 }
 0x2df   :  { %v12290_v24 = vadd.f32 %v2983_v28, %v2895_v46  ;;  %v2809_v40 = vadd.f32 %v2808_v14, %v2720_v2  ;;  %2758 = vmatmul.bf16.gmra.mxu0 %v14854_v41 }
 0x2e0   :  { %2936 = vmatmul.bf16.gmra.mxu2 %v14856_v59 }
 0x2e1   :  { %2847 = vmatmul.bf16.gmra.mxu1 %v14855_v55 }
 0x2e3   :  { %3025 = vmatmul.bf16.gmra.mxu3 %v11823_v19  ;;  %v2897_v3 = vpop.f32.mrf.mxu2 }
 0x2e4   :  { %v2898_v9 = vadd.f32 %v2897_v3, %v2809_v40  ;;  %v2721_v39 = vpop.f32.mrf.mxu0  ;;  %v14857_v40 = vld [vmem:[#allocation60_spill] sm:$0xff]  ;;  %v14858_v3 = vld [vmem:[#allocation61_spill] sm:$0xff] }
 0x2e5   :  { %v2722_v26 = vadd.f32 %v2721_v39, %v2633_v50  ;;  %v14859_v50 = vld [vmem:[#allocation62_spill] sm:$0xff] }
 0x2e6   :  { %v2986_v62 = vpop.f32.mrf.mxu3  ;;  %v2810_v35 = vpop.f32.mrf.mxu1 }
 0x2e7   :  { %v12298_v46 = vadd.f32 %v2986_v62, %v2898_v9  ;;  %v2811_v27 = vadd.f32 %v2810_v35, %v2722_v26  ;;  %v9780_v9 = vld [vmem:[%s14355_s1 + $0x14] sm:$0xf0]  ;;  %v9937_v62 = vld [vmem:[%s14355_s1 + $0x504] sm:$0xf]  ;;  %v8821_v26 = vld [vmem:[%s14355_s1 + $0x510] sm:$0xf0] }
 0x2e8   :  { %v8188_v39 = vor.u32 %v9780_v9, %v8187_v33  ;;  %v8315_v35 = vld [vmem:[%s14355_s1 + $0x108] sm:$0xf] }
 0x2ea   :  { %3236 = vmatpush.bf16.msrb.mxu2 %v8188_v39  ;;  %v14860_v39 = vld [vmem:[#allocation64_spill] sm:$0xff] }
 0x2eb   :  { %v2899_v42 = vpop.f32.mrf.mxu2 }
 0x2ec   :  { %v2900_v38 = vadd.f32 %v2899_v42, %v2811_v27  ;;  %v2724_v57 = vpop.f32.mrf.mxu0  ;;  %v9812_v27 = vld [vmem:[%s14355_s1 + $0x114] sm:$0xf0] }
 0x2ed   :  { %v2725_v28 = vadd.f32 %v2724_v57, %v2636_v12  ;;  %v2638_v12 = vadd.f32 %v11923_v15, %v12212_v47 }
 0x2ee   :  { %v2988_v30 = vpop.f32.mrf.mxu3  ;;  %v2813_v2 = vpop.f32.mrf.mxu1 }
 0x2ef   :  { %v12302_v14 = vadd.f32 %v2988_v30, %v2900_v38  ;;  %v2814_v25 = vadd.f32 %v2813_v2, %v2725_v28  ;;  %2763 = vmatmul.bf16.gmra.mxu0 %v14857_v40  ;;  %v8824_v38 = vor.u32 %v9937_v62, %v8821_v26  ;;  %v8316_v30 = vor.u32 %v9812_v27, %v8315_v35  ;;  %v14861_v27 = vld [vmem:[#allocation65_spill] sm:$0xff] }
 0x2f0   :  { %2941 = vmatmul.bf16.gmra.mxu2 %v14859_v50 }
 0x2f1   :  { %2852 = vmatmul.bf16.gmra.mxu1 %v14858_v3  ;;  %3058 = vmatpush.bf16.msrb.mxu0 %v8824_v38  ;;  %v2641_v3 = vadd.f32 %v11937_v5, %v12212_v47  ;;  %v2643_v5 = vadd.f32 %v11960_v60, %v12212_v47 }
 0x2f2   :  { %3325 = vmatpush.bf16.msrb.mxu3 %v8316_v30 }
 0x2f3   :  { %3030 = vmatmul.bf16.gmra.mxu3 %v11860_v44  ;;  %v2902_v42 = vpop.f32.mrf.mxu2 }
 0x2f4   :  { %v2903_v57 = vadd.f32 %v2902_v42, %v2814_v25  ;;  %v2726_v2 = vpop.f32.mrf.mxu0 }
 0x2f5   :  { %v2727_v33 = vadd.f32 %v2726_v2, %v2638_v12  ;;  %v14862_v12 = vld [vmem:[#allocation66_spill] sm:$0xff] }
 0x2f6   :  { %v2991_v28 = vpop.f32.mrf.mxu3  ;;  %v2815_v9 = vpop.f32.mrf.mxu1 }
 0x2f7   :  { %v12328_v44 = vadd.f32 %v2991_v28, %v2903_v57  ;;  %v2816_v50 = vadd.f32 %v2815_v9, %v2727_v33  ;;  %v2646_v57 = vadd.f32 %v11992_v16, %v12212_v47  ;;  %v8811_v16 = vld [vmem:[%s14355_s1 + $0x4e8] sm:$0xf] }
 0x2fb   :  { %v2904_v19 = vpop.f32.mrf.mxu2 }
 0x2fc   :  { %v2905_v59 = vadd.f32 %v2904_v19, %v2816_v50  ;;  %v2729_v55 = vpop.f32.mrf.mxu0 }
 0x2fd   :  { %v2730_v62 = vadd.f32 %v2729_v55, %v2641_v3 }
 0x2fe   :  { %v2993_v15 = vpop.f32.mrf.mxu3  ;;  %v2818_v26 = vpop.f32.mrf.mxu1 }
 0x2ff   :  { %v12332_v25 = vadd.f32 %v2993_v15, %v2905_v59  ;;  %v2819_v35 = vadd.f32 %v2818_v26, %v2730_v62  ;;  %2768 = vmatmul.bf16.gmra.mxu0 %v14860_v39 }
 0x300   :  { %2946 = vmatmul.bf16.gmra.mxu2 %v14862_v12 }
 0x301   :  { %2857 = vmatmul.bf16.gmra.mxu1 %v14861_v27 }
 0x303   :  { %3035 = vmatmul.bf16.gmra.mxu3 %v11921_v4  ;;  %v2907_v42 = vpop.f32.mrf.mxu2  ;;  %v14893_v4 = vld [vmem:[#allocation102_spill] sm:$0xff] }
 0x304   :  { %v2908_v19 = vadd.f32 %v2907_v42, %v2819_v35  ;;  %v2731_v38 = vpop.f32.mrf.mxu0  ;;  %v14863_v35 = vld [vmem:[#allocation68_spill] sm:$0xff]  ;;  %v14864_v42 = vld [vmem:[#allocation69_spill] sm:$0xff] }
 0x305   :  { %v2732_v55 = vadd.f32 %v2731_v38, %v2643_v5  ;;  %v14865_v5 = vld [vmem:[#allocation70_spill] sm:$0xff] }
 0x306   :  { %v2996_v50 = vpop.f32.mrf.mxu3  ;;  %v2820_v3 = vpop.f32.mrf.mxu1 }
 0x307   :  { %v12340_v59 = vadd.f32 %v2996_v50, %v2908_v19  ;;  %v2821_v30 = vadd.f32 %v2820_v3, %v2732_v55  ;;  %v9936_v19 = vld [vmem:[%s14355_s1 + $0x4f4] sm:$0xf0]  ;;  %v8555_v50 = vld [vmem:[%s14355_s1 + $0x2e8] sm:$0xf] }
 0x308   :  { %v8812_v38 = vor.u32 %v9936_v19, %v8811_v16  ;;  %v9872_v55 = vld [vmem:[%s14355_s1 + $0x2f4] sm:$0xf0]  ;;  %v8939_v3 = vld [vmem:[%s14355_s1 + $0x5e8] sm:$0xf] }
 0x30a   :  { %3585 = vmatpush.bf16.msra.mxu2 %v8812_v38 }
 0x30b   :  { %v2909_v28 = vpop.f32.mrf.mxu2 }
 0x30c   :  { %v2910_v2 = vadd.f32 %v2909_v28, %v2821_v30  ;;  %v2734_v9 = vpop.f32.mrf.mxu0  ;;  %v9968_v30 = vld [vmem:[%s14355_s1 + $0x5f4] sm:$0xf0] }
 0x30d   :  { %v2735_v15 = vadd.f32 %v2734_v9, %v2646_v57  ;;  %v2648_v57 = vadd.f32 %v12021_v32, %v12212_v47  ;;  %v9904_v32 = vld [vmem:[%s14355_s1 + $0x3f4] sm:$0xf0] }
 0x30e   :  { %v2998_v33 = vpop.f32.mrf.mxu3  ;;  %v2823_v62 = vpop.f32.mrf.mxu1 }
 0x30f   :  { %v12344_v26 = vadd.f32 %v2998_v33, %v2910_v2  ;;  %v2824_v60 = vadd.f32 %v2823_v62, %v2735_v15  ;;  %2773 = vmatmul.bf16.gmra.mxu0 %v14863_v35  ;;  %v8556_v2 = vor.u32 %v9872_v55, %v8555_v50  ;;  %v8940_v33 = vor.u32 %v9968_v30, %v8939_v3 }
 0x310   :  { %2951 = vmatmul.bf16.gmra.mxu2 %v14865_v5  ;;  %v8683_v5 = vld [vmem:[%s14355_s1 + $0x3e8] sm:$0xf] }
 0x311   :  { %2862 = vmatmul.bf16.gmra.mxu1 %v14864_v42  ;;  %3407 = vmatpush.bf16.msra.mxu0 %v8556_v2  ;;  %v8684_v55 = vor.u32 %v9904_v32, %v8683_v5  ;;  %v14868_v42 = vld [vmem:[#allocation74_spill] sm:$0xff] }
 0x312   :  { %3674 = vmatpush.bf16.msra.mxu3 %v8940_v33 }
 0x313   :  { %3040 = vmatmul.bf16.gmra.mxu3 %v11958_v8  ;;  %v2912_v28 = vpop.f32.mrf.mxu2  ;;  %3496 = vmatpush.bf16.msra.mxu1 %v8684_v55 }
 0x314   :  { %v2913_v9 = vadd.f32 %v2912_v28, %v2824_v60  ;;  %v2736_v62 = vpop.f32.mrf.mxu0  ;;  %v2651_v60 = vadd.f32 %v12035_v20, %v12212_v47  ;;  %v2653_v20 = vadd.f32 %v12038_v7, %v12212_v47 }
 0x315   :  { %v2737_v16 = vadd.f32 %v2736_v62, %v2648_v57  ;;  %v14867_v62 = vld [vmem:[#allocation73_spill] sm:$0xff] }
 0x316   :  { %v3001_v15 = vpop.f32.mrf.mxu3  ;;  %v2825_v19 = vpop.f32.mrf.mxu1 }
 0x317   :  { %v12370_v8 = vadd.f32 %v3001_v15, %v2913_v9  ;;  %v2826_v50 = vadd.f32 %v2825_v19, %v2737_v16  ;;  %v14866_v15 = vld [vmem:[#allocation72_spill] sm:$0xff] }
 0x31b   :  { %v2914_v38 = vpop.f32.mrf.mxu2 }
 0x31c   :  { %v2915_v3 = vadd.f32 %v2914_v38, %v2826_v50  ;;  %v2739_v57 = vpop.f32.mrf.mxu0 }
 0x31d   :  { %v2740_v28 = vadd.f32 %v2739_v57, %v2651_v60 }
 0x31e   :  { %v3003_v30 = vpop.f32.mrf.mxu3  ;;  %v2828_v2 = vpop.f32.mrf.mxu1 }
 0x31f   :  { %v12380_v33 = vadd.f32 %v3003_v30, %v2915_v3  ;;  %v2829_v9 = vadd.f32 %v2828_v2, %v2740_v28  ;;  %2778 = vmatmul.bf16.gmra.mxu0 %v14866_v15  ;;  %v2656_v3 = vadd.f32 %v12065_v34, %v12212_v47  ;;  %v8795_v34 = vld [vmem:[%s14355_s1 + $0x4c8] sm:$0xf] }
 0x320   :  { %2956 = vmatmul.bf16.gmra.mxu2 %v14868_v42 }
 0x321   :  { %2867 = vmatmul.bf16.gmra.mxu1 %v14867_v62 }
 0x323   :  { %3045 = vmatmul.bf16.gmra.mxu3 %v12019_v63  ;;  %v2917_v5 = vpop.f32.mrf.mxu2 }
 0x324   :  { %v2918_v16 = vadd.f32 %v2917_v5, %v2829_v9  ;;  %v2741_v32 = vpop.f32.mrf.mxu0  ;;  %v14869_v9 = vld [vmem:[#allocation76_spill] sm:$0xff]  ;;  %v14870_v5 = vld [vmem:[#allocation77_spill] sm:$0xff] }
 0x325   :  { %v2742_v50 = vadd.f32 %v2741_v32, %v2653_v20  ;;  %v14871_v20 = vld [vmem:[#allocation11_spill] sm:$0xff]  ;;  %v8923_v32 = vld [vmem:[%s14355_s1 + $0x5c8] sm:$0xf] }
 0x326   :  { %v3006_v19 = vpop.f32.mrf.mxu3  ;;  %v2830_v55 = vpop.f32.mrf.mxu1 }
 0x327   :  { %v12388_v60 = vadd.f32 %v3006_v19, %v2918_v16  ;;  %v2831_v38 = vadd.f32 %v2830_v55, %v2742_v50  ;;  %v9932_v16 = vld [vmem:[%s14355_s1 + $0x4d4] sm:$0xf0]  ;;  %v2658_v55 = vadd.f32 %v12068_v18, %v12212_v47 }
 0x328   :  { %v9868_v19 = vld [vmem:[%s14355_s1 + $0x2d4] sm:$0xf0] }
 0x329   :  { %v9964_v50 = vld [vmem:[%s14355_s1 + $0x5d4] sm:$0xf0] }
 0x32a   :  { %v9900_v18 = vld [vmem:[%s14355_s1 + $0x3d4] sm:$0xf0] }
 0x32b   :  { %v2919_v30 = vpop.f32.mrf.mxu2 }
 0x32c   :  { %v2920_v57 = vadd.f32 %v2919_v30, %v2831_v38  ;;  %v2744_v2 = vpop.f32.mrf.mxu0  ;;  %v8924_v30 = vor.u32 %v9964_v50, %v8923_v32 }
 0x32d   :  { %v2745_v63 = vadd.f32 %v2744_v2, %v2656_v3 }
 0x32e   :  { %v3008_v28 = vpop.f32.mrf.mxu3  ;;  %v2833_v42 = vpop.f32.mrf.mxu1  ;;  %3675 = vmatpush.bf16.msra.mxu3 %v8924_v30 }
 0x32f   :  { %v12392_v62 = vadd.f32 %v3008_v28, %v2920_v57  ;;  %v2834_v7 = vadd.f32 %v2833_v42, %v2745_v63  ;;  %3059 = vmatmul.bf16.vlgmr.msrb.gmra.mxu0 %v14869_v9  ;;  %v8539_v63 = vld [vmem:[%s14355_s1 + $0x2c8] sm:$0xf]  ;;  %v8796_v42 = vor.u32 %v9932_v16, %v8795_v34 }
 0x330   :  { %3237 = vmatmul.bf16.vlgmr.msrb.gmra.mxu2 %v14871_v20  ;;  %v8540_v3 = vor.u32 %v9868_v19, %v8539_v63  ;;  %v8667_v20 = vld [vmem:[%s14355_s1 + $0x3c8] sm:$0xf] }
 0x331   :  { %8977 = vmatmul.msk.bf16.vlgmr.msrb.gmra.mxu1 %vm1934_vm0, %v14870_v5  ;;  %3586 = vmatpush.bf16.msra.mxu2 %v8796_v42  ;;  %v8668_v19 = vor.u32 %v9900_v18, %v8667_v20 }
 0x332   :  { %3408 = vmatpush.bf16.msra.mxu0 %v8540_v3 }
 0x333   :  { %3326 = vmatmul.bf16.vlgmr.msrb.gmra.mxu3 %v10521_v51  ;;  %v2922_v38 = vpop.f32.mrf.mxu2  ;;  %3497 = vmatpush.bf16.msra.mxu1 %v8668_v19 }
 0x334   :  { %v2923_v57 = vadd.f32 %v2922_v38, %v2834_v7  ;;  %v2746_v2 = vpop.f32.mrf.mxu0  ;;  %v2661_v7 = vadd.f32 %v12077_v43, %v12212_v47  ;;  %v2663_v43 = vadd.f32 %v12080_v48, %v12212_v47 }
 0x335   :  { %v2747_v34 = vadd.f32 %v2746_v2, %v2658_v55  ;;  %v14873_v2 = vld [vmem:[#allocation80_spill] sm:$0xff] }
 0x336   :  { %v3011_v28 = vpop.f32.mrf.mxu3  ;;  %v2835_v16 = vpop.f32.mrf.mxu1 }
 0x337   :  { %v12419_v51 = vadd.f32 %v3011_v28, %v2923_v57  ;;  %v2836_v63 = vadd.f32 %v2835_v16, %v2747_v34  ;;  %v14872_v28 = vld [vmem:[#allocation79_spill] sm:$0xff] }
 0x338   :  { %v14874_v34 = vld [vmem:[#allocation15_spill] sm:$0xff] }
 0x33b   :  { %v2924_v42 = vpop.f32.mrf.mxu2 }
 0x33c   :  { %v2925_v32 = vadd.f32 %v2924_v42, %v2836_v63  ;;  %v2749_v55 = vpop.f32.mrf.mxu0 }
 0x33d   :  { %v2750_v38 = vadd.f32 %v2749_v55, %v2661_v7 }
 0x33e   :  { %v3013_v50 = vpop.f32.mrf.mxu3  ;;  %v2838_v3 = vpop.f32.mrf.mxu1 }
 0x33f   :  { %v12429_v30 = vadd.f32 %v3013_v50, %v2925_v32  ;;  %v2839_v57 = vadd.f32 %v2838_v3, %v2750_v38  ;;  %3064 = vmatmul.bf16.gmra.mxu0 %v14872_v28  ;;  %v2666_v50 = vadd.f32 %v12107_v36, %v12212_v47  ;;  %v8779_v36 = vld [vmem:[%s14355_s1 + $0x4a8] sm:$0xf] }
 0x340   :  { %3242 = vmatmul.bf16.gmra.mxu2 %v14874_v34 }
 0x341   :  { %8978 = vmatmul.msk.bf16.gmra.mxu1 %vm1934_vm0, %v14873_v2 }
 0x343   :  { %3331 = vmatmul.bf16.gmra.mxu3 %v10575_v10  ;;  %v2927_v20 = vpop.f32.mrf.mxu2 }
 0x344   :  { %v2928_v16 = vadd.f32 %v2927_v20, %v2839_v57  ;;  %v2751_v63 = vpop.f32.mrf.mxu0  ;;  %v14875_v57 = vld [vmem:[#allocation82_spill] sm:$0xff]  ;;  %v14876_v20 = vld [vmem:[#allocation83_spill] sm:$0xff] }
 0x345   :  { %v2752_v19 = vadd.f32 %v2751_v63, %v2663_v43  ;;  %v14877_v43 = vld [vmem:[#allocation19_spill] sm:$0xff]  ;;  %v9960_v63 = vld [vmem:[%s14355_s1 + $0x5b4] sm:$0xf0] }
 0x346   :  { %v3016_v18 = vpop.f32.mrf.mxu3  ;;  %v2840_v7 = vpop.f32.mrf.mxu1 }
 0x347   :  { %v12438_v42 = vadd.f32 %v3016_v18, %v2928_v16  ;;  %v2841_v32 = vadd.f32 %v2840_v7, %v2752_v19  ;;  %v9864_v16 = vld [vmem:[%s14355_s1 + $0x2b4] sm:$0xf0]  ;;  %v8907_v18 = vld [vmem:[%s14355_s1 + $0x5a8] sm:$0xf]  ;;  %v2668_v19 = vadd.f32 %v12110_v0, %v12212_v47 }
 0x348   :  { %v9896_v0 = vld [vmem:[%s14355_s1 + $0x3b4] sm:$0xf0] }
 0x34b   :  { %v2929_v55 = vpop.f32.mrf.mxu2 }
 0x34c   :  { %v2930_v38 = vadd.f32 %v2929_v55, %v2841_v32  ;;  %v2754_v34 = vpop.f32.mrf.mxu0 }
 0x34d   :  { %v2755_v10 = vadd.f32 %v2754_v34, %v2666_v50  ;;  %v9928_v34 = vld [vmem:[%s14355_s1 + $0x4b4] sm:$0xf0]  ;;  %v8908_v50 = vor.u32 %v9960_v63, %v8907_v18 }
 0x34e   :  { %v3018_v3 = vpop.f32.mrf.mxu3  ;;  %v2843_v2 = vpop.f32.mrf.mxu1 }
 0x34f   :  { %v12442_v5 = vadd.f32 %v3018_v3, %v2930_v38  ;;  %v2844_v48 = vadd.f32 %v2843_v2, %v2755_v10  ;;  %3069 = vmatmul.bf16.gmra.mxu0 %v14875_v57  ;;  %v8523_v10 = vld [vmem:[%s14355_s1 + $0x2a8] sm:$0xf]  ;;  %v8780_v2 = vor.u32 %v9928_v34, %v8779_v36  ;;  %3676 = vmatpush.bf16.msra.mxu3 %v8908_v50 }
 0x350   :  { %3247 = vmatmul.bf16.gmra.mxu2 %v14877_v43  ;;  %v8524_v32 = vor.u32 %v9864_v16, %v8523_v10  ;;  %v8651_v43 = vld [vmem:[%s14355_s1 + $0x3a8] sm:$0xf] }
 0x351   :  { %8979 = vmatmul.msk.bf16.gmra.mxu1 %vm1934_vm0, %v14876_v20  ;;  %3587 = vmatpush.bf16.msra.mxu2 %v8780_v2  ;;  %v8652_v16 = vor.u32 %v9896_v0, %v8651_v43 }
 0x352   :  { %3409 = vmatpush.bf16.msra.mxu0 %v8524_v32 }
 0x353   :  { %3336 = vmatmul.bf16.gmra.mxu3 %v10611_v22  ;;  %v2932_v7 = vpop.f32.mrf.mxu2  ;;  %3498 = vmatpush.bf16.msra.mxu1 %v8652_v16 }
 0x354   :  { %v2933_v55 = vadd.f32 %v2932_v7, %v2844_v48  ;;  %v2756_v3 = vpop.f32.mrf.mxu0  ;;  %v2671_v48 = vadd.f32 %v12119_v6, %v12212_v47  ;;  %v2673_v6 = vadd.f32 %v12122_v21, %v12212_v47 }
 0x355   :  { %v2757_v36 = vadd.f32 %v2756_v3, %v2668_v19  ;;  %v14879_v3 = vld [vmem:[#allocation86_spill] sm:$0xff] }
 0x356   :  { %v3021_v38 = vpop.f32.mrf.mxu3  ;;  %v2845_v34 = vpop.f32.mrf.mxu1 }
 0x357   :  { %v12469_v22 = vadd.f32 %v3021_v38, %v2933_v55  ;;  %v2846_v10 = vadd.f32 %v2845_v34, %v2757_v36  ;;  %v14878_v38 = vld [vmem:[#allocation85_spill] sm:$0xff]  ;;  %v14880_v36 = vld [vmem:[#allocation23_spill] sm:$0xff] }
 0x35b   :  { %v2934_v2 = vpop.f32.mrf.mxu2 }
 0x35c   :  { %v2935_v18 = vadd.f32 %v2934_v2, %v2846_v10  ;;  %v2759_v19 = vpop.f32.mrf.mxu0 }
 0x35d   :  { %v2760_v7 = vadd.f32 %v2759_v19, %v2671_v48 }
 0x35e   :  { %v3023_v63 = vpop.f32.mrf.mxu3  ;;  %v2848_v32 = vpop.f32.mrf.mxu1 }
 0x35f   :  { %v12479_v50 = vadd.f32 %v3023_v63, %v2935_v18  ;;  %v2849_v55 = vadd.f32 %v2848_v32, %v2760_v7  ;;  %3074 = vmatmul.bf16.gmra.mxu0 %v14878_v38  ;;  %v2676_v63 = vadd.f32 %v12149_v56, %v12212_v47  ;;  %v8763_v56 = vld [vmem:[%s14355_s1 + $0x488] sm:$0xf] }
 0x360   :  { %3252 = vmatmul.bf16.gmra.mxu2 %v14880_v36 }
 0x361   :  { %8980 = vmatmul.msk.bf16.gmra.mxu1 %vm1934_vm0, %v14879_v3 }
 0x363   :  { %3341 = vmatmul.bf16.gmra.mxu3 %v14809_v17  ;;  %v2937_v43 = vpop.f32.mrf.mxu2 }
 0x364   :  { %v2938_v34 = vadd.f32 %v2937_v43, %v2849_v55  ;;  %v2761_v10 = vpop.f32.mrf.mxu0  ;;  %v14881_v55 = vld [vmem:[#allocation88_spill] sm:$0xff]  ;;  %v14882_v43 = vld [vmem:[#allocation89_spill] sm:$0xff] }
 0x365   :  { %v2762_v16 = vadd.f32 %v2761_v10, %v2673_v6  ;;  %v14883_v6 = vld [vmem:[#allocation27_spill] sm:$0xff]  ;;  %v9956_v10 = vld [vmem:[%s14355_s1 + $0x594] sm:$0xf0] }
 0x366   :  { %v3026_v0 = vpop.f32.mrf.mxu3  ;;  %v2850_v48 = vpop.f32.mrf.mxu1 }
 0x367   :  { %v12488_v2 = vadd.f32 %v3026_v0, %v2938_v34  ;;  %v2851_v18 = vadd.f32 %v2850_v48, %v2762_v16  ;;  %v9860_v34 = vld [vmem:[%s14355_s1 + $0x294] sm:$0xf0]  ;;  %v8891_v0 = vld [vmem:[%s14355_s1 + $0x588] sm:$0xf]  ;;  %v2678_v16 = vadd.f32 %v12152_v54, %v12212_v47 }
 0x368   :  { %v9892_v54 = vld [vmem:[%s14355_s1 + $0x394] sm:$0xf0] }
 0x36b   :  { %v2939_v19 = vpop.f32.mrf.mxu2 }
 0x36c   :  { %v2940_v7 = vadd.f32 %v2939_v19, %v2851_v18  ;;  %v2764_v36 = vpop.f32.mrf.mxu0 }
 0x36d   :  { %v2765_v17 = vadd.f32 %v2764_v36, %v2676_v63  ;;  %v9924_v36 = vld [vmem:[%s14355_s1 + $0x494] sm:$0xf0]  ;;  %v8892_v63 = vor.u32 %v9956_v10, %v8891_v0 }
 0x36e   :  { %v3028_v32 = vpop.f32.mrf.mxu3  ;;  %v2853_v3 = vpop.f32.mrf.mxu1 }
 0x36f   :  { %v12492_v20 = vadd.f32 %v3028_v32, %v2940_v7  ;;  %v2854_v21 = vadd.f32 %v2853_v3, %v2765_v17  ;;  %3079 = vmatmul.bf16.gmra.mxu0 %v14881_v55  ;;  %v8507_v17 = vld [vmem:[%s14355_s1 + $0x288] sm:$0xf]  ;;  %v8764_v3 = vor.u32 %v9924_v36, %v8763_v56  ;;  %3677 = vmatpush.bf16.msra.mxu3 %v8892_v63 }
 0x370   :  { %3257 = vmatmul.bf16.gmra.mxu2 %v14883_v6  ;;  %v8508_v18 = vor.u32 %v9860_v34, %v8507_v17  ;;  %v8635_v6 = vld [vmem:[%s14355_s1 + $0x388] sm:$0xf] }
 0x371   :  { %8981 = vmatmul.msk.bf16.gmra.mxu1 %vm1934_vm0, %v14882_v43  ;;  %3588 = vmatpush.bf16.msra.mxu2 %v8764_v3  ;;  %v8636_v34 = vor.u32 %v9892_v54, %v8635_v6 }
 0x372   :  { %3410 = vmatpush.bf16.msra.mxu0 %v8508_v18 }
 0x373   :  { %3346 = vmatmul.bf16.gmra.mxu3 %v14816_v23  ;;  %v2942_v48 = vpop.f32.mrf.mxu2  ;;  %3499 = vmatpush.bf16.msra.mxu1 %v8636_v34 }
 0x374   :  { %v2943_v19 = vadd.f32 %v2942_v48, %v2854_v21  ;;  %v2766_v32 = vpop.f32.mrf.mxu0  ;;  %v2681_v21 = vadd.f32 %v12161_v49, %v12212_v47  ;;  %v2683_v49 = vadd.f32 %v12164_v45, %v12212_v47 }
 0x375   :  { %v2767_v56 = vadd.f32 %v2766_v32, %v2678_v16  ;;  %v14885_v32 = vld [vmem:[#allocation94_spill] sm:$0xff] }
 0x376   :  { %v3031_v7 = vpop.f32.mrf.mxu3  ;;  %v2855_v36 = vpop.f32.mrf.mxu1 }
 0x377   :  { %v12519_v23 = vadd.f32 %v3031_v7, %v2943_v19  ;;  %v2856_v17 = vadd.f32 %v2855_v36, %v2767_v56  ;;  %v14884_v7 = vld [vmem:[#allocation93_spill] sm:$0xff]  ;;  %v14886_v56 = vld [vmem:[#allocation31_spill] sm:$0xff] }
 0x37b   :  { %v2944_v3 = vpop.f32.mrf.mxu2 }
 0x37c   :  { %v2945_v0 = vadd.f32 %v2944_v3, %v2856_v17  ;;  %v2769_v16 = vpop.f32.mrf.mxu0 }
 0x37d   :  { %v2770_v48 = vadd.f32 %v2769_v16, %v2681_v21 }
 0x37e   :  { %v3033_v10 = vpop.f32.mrf.mxu3  ;;  %v2858_v18 = vpop.f32.mrf.mxu1 }
 0x37f   :  { %v12529_v63 = vadd.f32 %v3033_v10, %v2945_v0  ;;  %v2859_v19 = vadd.f32 %v2858_v18, %v2770_v48  ;;  %3084 = vmatmul.bf16.gmra.mxu0 %v14884_v7  ;;  %v2686_v10 = vadd.f32 %v12191_v53, %v12212_v47  ;;  %v8747_v53 = vld [vmem:[%s14355_s1 + $0x468] sm:$0xf] }
 0x380   :  { %3262 = vmatmul.bf16.gmra.mxu2 %v14886_v56 }
 0x381   :  { %8982 = vmatmul.msk.bf16.gmra.mxu1 %vm1934_vm0, %v14885_v32 }
 0x383   :  { %3351 = vmatmul.bf16.gmra.mxu3 %v14821_v29  ;;  %v2947_v6 = vpop.f32.mrf.mxu2 }
 0x384   :  { %v2948_v36 = vadd.f32 %v2947_v6, %v2859_v19  ;;  %v2771_v17 = vpop.f32.mrf.mxu0  ;;  %v14887_v19 = vld [vmem:[#allocation96_spill] sm:$0xff]  ;;  %v14888_v6 = vld [vmem:[#allocation97_spill] sm:$0xff] }
 0x385   :  { %v2772_v34 = vadd.f32 %v2771_v17, %v2683_v49  ;;  %v14889_v49 = vld [vmem:[#allocation35_spill] sm:$0xff]  ;;  %v9952_v17 = vld [vmem:[%s14355_s1 + $0x574] sm:$0xf0] }
 0x386   :  { %v3036_v54 = vpop.f32.mrf.mxu3  ;;  %v2860_v21 = vpop.f32.mrf.mxu1 }
 0x387   :  { %v12538_v3 = vadd.f32 %v3036_v54, %v2948_v36  ;;  %v2861_v0 = vadd.f32 %v2860_v21, %v2772_v34  ;;  %v9856_v36 = vld [vmem:[%s14355_s1 + $0x274] sm:$0xf0]  ;;  %v8875_v54 = vld [vmem:[%s14355_s1 + $0x568] sm:$0xf]  ;;  %v14890_v34 = vld [vmem:[#allocation99_spill] sm:$0xff] }
 0x388   :  { %v2688_v21 = vadd.f32 %v14890_v34, %v12212_v47  ;;  %v9888_v34 = vld [vmem:[%s14355_s1 + $0x374] sm:$0xf0] }
 0x38b   :  { %v2949_v16 = vpop.f32.mrf.mxu2 }
 0x38c   :  { %v2950_v48 = vadd.f32 %v2949_v16, %v2861_v0  ;;  %v2774_v56 = vpop.f32.mrf.mxu0  ;;  %v8876_v16 = vor.u32 %v9952_v17, %v8875_v54 }
 0x38d   :  { %v2775_v29 = vadd.f32 %v2774_v56, %v2686_v10  ;;  %v9920_v56 = vld [vmem:[%s14355_s1 + $0x474] sm:$0xf0] }
 0x38e   :  { %v3038_v18 = vpop.f32.mrf.mxu3  ;;  %v2863_v32 = vpop.f32.mrf.mxu1  ;;  %3678 = vmatpush.bf16.msra.mxu3 %v8876_v16 }
 0x38f   :  { %v12542_v43 = vadd.f32 %v3038_v18, %v2950_v48  ;;  %v2864_v45 = vadd.f32 %v2863_v32, %v2775_v29  ;;  %3089 = vmatmul.bf16.gmra.mxu0 %v14887_v19  ;;  %v8491_v29 = vld [vmem:[%s14355_s1 + $0x268] sm:$0xf]  ;;  %v8748_v32 = vor.u32 %v9920_v56, %v8747_v53 }
 0x390   :  { %3267 = vmatmul.bf16.gmra.mxu2 %v14889_v49  ;;  %v8492_v10 = vor.u32 %v9856_v36, %v8491_v29 }
 0x391   :  { %8983 = vmatmul.msk.bf16.gmra.mxu1 %vm1934_vm0, %v14888_v6  ;;  %3589 = vmatpush.bf16.msra.mxu2 %v8748_v32  ;;  %v8619_v6 = vld [vmem:[%s14355_s1 + $0x368] sm:$0xf] }
 0x392   :  { %3411 = vmatpush.bf16.msra.mxu0 %v8492_v10  ;;  %v8620_v36 = vor.u32 %v9888_v34, %v8619_v6  ;;  %v14895_v6 = vld [vmem:[#allocation40_spill] sm:$0xff] }
 0x393   :  { %3356 = vmatmul.bf16.gmra.mxu3 %v14828_v52  ;;  %v2952_v0 = vpop.f32.mrf.mxu2 }
 0x394   :  { %v2953_v48 = vadd.f32 %v2952_v0, %v2864_v45  ;;  %v2776_v53 = vpop.f32.mrf.mxu0  ;;  %3500 = vmatpush.bf16.msra.mxu1 %v8620_v36  ;;  %v14891_v45 = vld [vmem:[#allocation141_spill] sm:$0xff] }
 0x395   :  { %v2777_v56 = vadd.f32 %v2776_v53, %v2688_v21  ;;  %v2691_v32 = vadd.f32 %v14891_v45, %v12212_v47  ;;  %v14892_v53 = vld [vmem:[#allocation101_spill] sm:$0xff] }
 0x396   :  { %v3041_v18 = vpop.f32.mrf.mxu3  ;;  %v2865_v52 = vpop.f32.mrf.mxu1 }
 0x397   :  { %v12569_v49 = vadd.f32 %v3041_v18, %v2953_v48  ;;  %v2866_v29 = vadd.f32 %v2865_v52, %v2777_v56  ;;  %v14894_v52 = vld [vmem:[#allocation39_spill] sm:$0xff] }
 0x398   :  { %v14896_v56 = vld [vmem:[#allocation107_spill] sm:$0xff] }
 0x399   :  { %v2693_v34 = vadd.f32 %v14896_v56, %v12212_v47  ;;  %v14897_v47 = vld [vmem:[#allocation104_spill] sm:$0xff]  ;;  %v14899_v56 = vld [vmem:[#allocation43_spill] sm:$0xff] }
 0x39b   :  { %v2954_v54 = vpop.f32.mrf.mxu2 }
 0x39c   :  { %v2955_v17 = vadd.f32 %v2954_v54, %v2866_v29  ;;  %v2779_v0 = vpop.f32.mrf.mxu0 }
 0x39d   :  { %v2780_v10 = vadd.f32 %v2779_v0, %v2691_v32 }
 0x39e   :  { %v3043_v21 = vpop.f32.mrf.mxu3  ;;  %v2868_v16 = vpop.f32.mrf.mxu1 }
 0x39f   :  { %v12579_v48 = vadd.f32 %v3043_v21, %v2955_v17  ;;  %v2869_v18 = vadd.f32 %v2868_v16, %v2780_v10  ;;  %3094 = vmatmul.bf16.gmra.mxu0 %v14892_v53 }
 0x3a0   :  { %3272 = vmatmul.bf16.gmra.mxu2 %v14894_v52 }
 0x3a1   :  { %8984 = vmatmul.msk.bf16.gmra.mxu1 %vm1934_vm0, %v14893_v4 }
 0x3a3   :  { %3361 = vmatmul.bf16.gmra.mxu3 %v14895_v6  ;;  %v2957_v29 = vpop.f32.mrf.mxu2 }
 0x3a4   :  { %v2958_v36 = vadd.f32 %v2957_v29, %v2869_v18  ;;  %v2781_v32 = vpop.f32.mrf.mxu0  ;;  %v14898_v18 = vld [vmem:[#allocation105_spill] sm:$0xff] }
 0x3a5   :  { %v2782_v54 = vadd.f32 %v2781_v32, %v2693_v34  ;;  %v14900_v34 = vld [vmem:[#allocation106_spill] sm:$0xff] }
 0x3a6   :  { %v3046_v45 = vpop.f32.mrf.mxu3  ;;  %v2870_v17 = vpop.f32.mrf.mxu1  ;;  %v12598_v29 = vperm.slane %v14900_v34, 2 }
 0x3a7   :  { %v12588_v21 = vadd.f32 %v3046_v45, %v2958_v36  ;;  %v2871_v0 = vadd.f32 %v2870_v17, %v2782_v54  ;;  %v14901_v36 = vld [vmem:[#allocation44_spill] sm:$0xff]  ;;  %v9948_v17 = vld [vmem:[%s14355_s1 + $0x554] sm:$0xf0] }
 0x3a8   :  { %v8859_v45 = vld [vmem:[%s14355_s1 + $0x548] sm:$0xf] }
 0x3a9   :  { %v8860_v34 = vor.u32 %v9948_v17, %v8859_v45 }
 0x3ab   :  { %v2959_v10 = vpop.f32.mrf.mxu2  ;;  %3679 = vmatpush.bf16.msra.mxu3 %v8860_v34 }
 0x3ac   :  { %v2960_v16 = vadd.f32 %v2959_v10, %v2871_v0  ;;  %v3060_v4 = vpop.f32.mrf.mxu0 }
 0x3ad   :  { %v3061_v52 = vadd.f32 %v3060_v4, %v12244_v1  ;;  %v8731_v4 = vld [vmem:[%s14355_s1 + $0x448] sm:$0xf]  ;;  %v9916_v1 = vld [vmem:[%s14355_s1 + $0x454] sm:$0xf0] }
 0x3ae   :  { %v3048_v12 = vpop.f32.mrf.mxu3  ;;  %v3149_v27 = vpop.f32.mrf.mxu1 }
 0x3af   :  { %v12591_v6 = vadd.f32 %v3048_v12, %v2960_v16  ;;  %v3150_v53 = vadd.f32 %v3149_v27, %v3061_v52  ;;  %3099 = vmatmul.bf16.gmra.mxu0 %v14897_v47  ;;  %v8732_v27 = vor.u32 %v9916_v1, %v8731_v4  ;;  %v8475_v12 = vld [vmem:[%s14355_s1 + $0x248] sm:$0xf]  ;;  %v9852_v52 = vld [vmem:[%s14355_s1 + $0x254] sm:$0xf0] }
 0x3b0   :  { %3277 = vmatmul.bf16.gmra.mxu2 %v14899_v56  ;;  %v8476_v54 = vor.u32 %v9852_v52, %v8475_v12  ;;  %v8603_v12 = vld [vmem:[%s14355_s1 + $0x348] sm:$0xf]  ;;  %v9884_v52 = vld [vmem:[%s14355_s1 + $0x354] sm:$0xf0] }
 0x3b1   :  { %8985 = vmatmul.msk.bf16.gmra.mxu1 %vm1934_vm0, %v14898_v18  ;;  %3590 = vmatpush.bf16.msra.mxu2 %v8732_v27  ;;  %v8604_v56 = vor.u32 %v9884_v52, %v8603_v12  ;;  %v4476_v18 = vmax.f32 %v3150_v53, 0.0  ;;  %v14906_v53 = vld [vmem:[#allocation47_spill] sm:$0xff] }
 0x3b2   :  { %3412 = vmatpush.bf16.msra.mxu0 %v8476_v54 }
 0x3b3   :  { %3366 = vmatmul.bf16.gmra.mxu3 %v14901_v36  ;;  %v3238_v32 = vpop.f32.mrf.mxu2  ;;  %3501 = vmatpush.bf16.msra.mxu1 %v8604_v56 }
 0x3b4   :  { %v3239_v0 = vadd.f32 %v3238_v32, %v12598_v29  ;;  %v3062_v16 = vpop.f32.mrf.mxu0 }
 0x3b5   :  { %v3063_v4 = vadd.f32 %v3062_v16, %v12248_v37 }
 0x3b6   :  { %v3327_v10 = vpop.f32.mrf.mxu3  ;;  %v3151_v1 = vpop.f32.mrf.mxu1 }
 0x3b7   :  { %v12621_v36 = vadd.f32 %v3327_v10, %v3239_v0  ;;  %v3152_v32 = vadd.f32 %v3151_v1, %v3063_v4  ;;  %v14905_v4 = vld [vmem:[#allocation110_spill] sm:$0xff] }
 0x3b9   :  { %14902 = vst [vmem:[#allocation99_spill] sm:$0xff] %v12621_v36  ;;  %v4480_v27 = vmax.f32 %v3152_v32, 0.0  ;;  %v14904_v36 = vld [vmem:[#allocation109_spill] sm:$0xff] }
 0x3bb   :  { %v12629_v45 = vpack.c.bf16 %v4480_v27, %v4476_v18  ;;  %v3240_v37 = vpop.f32.mrf.mxu2 }
 0x3bc   :  { %v3241_v54 = vadd.f32 %v3240_v37, %v12598_v29  ;;  %v3065_v0 = vpop.f32.mrf.mxu0 }
 0x3bd   :  { %14903 = vst [vmem:[#allocation141_spill] sm:$0xff] %v12629_v45  ;;  %v3066_v10 = vadd.f32 %v3065_v0, %v12256_v11 }
 0x3be   :  { %v3329_v17 = vpop.f32.mrf.mxu3  ;;  %v3154_v16 = vpop.f32.mrf.mxu1 }
 0x3bf   :  { %v12633_v34 = vadd.f32 %v3329_v17, %v3241_v54  ;;  %v3155_v47 = vadd.f32 %v3154_v16, %v3066_v10  ;;  %3104 = vmatmul.bf16.gmra.mxu0 %v14904_v36 }
 0x3c0   :  { %3282 = vmatmul.bf16.gmra.mxu2 %v14906_v53 }
 0x3c1   :  { %8986 = vmatmul.msk.bf16.gmra.mxu1 %vm1934_vm0, %v14905_v4  ;;  %v4484_v37 = vmax.f32 %v3155_v47, 0.0  ;;  %v14910_v47 = vld [vmem:[#allocation51_spill] sm:$0xff] }
 0x3c3   :  { %3371 = vmatmul.bf16.gmra.mxu3 %v14848_v58  ;;  %v3243_v18 = vpop.f32.mrf.mxu2 }
 0x3c4   :  { %v3244_v56 = vadd.f32 %v3243_v18, %v12598_v29  ;;  %v3067_v12 = vpop.f32.mrf.mxu0 }
 0x3c5   :  { %v3068_v11 = vadd.f32 %v3067_v12, %v12260_v31  ;;  %v14908_v31 = vld [vmem:[#allocation113_spill] sm:$0xff]  ;;  %v9848_v12 = vld [vmem:[%s14355_s1 + $0x234] sm:$0xf0] }
 0x3c6   :  { %v3332_v1 = vpop.f32.mrf.mxu3  ;;  %v3156_v52 = vpop.f32.mrf.mxu1 }
 0x3c7   :  { %v12642_v32 = vadd.f32 %v3332_v1, %v3244_v56  ;;  %v3157_v27 = vadd.f32 %v3156_v52, %v3068_v11  ;;  %v14909_v56 = vld [vmem:[#allocation114_spill] sm:$0xff]  ;;  %v8715_v1 = vld [vmem:[%s14355_s1 + $0x428] sm:$0xf] }
 0x3c8   :  { %v8843_v11 = vld [vmem:[%s14355_s1 + $0x528] sm:$0xf] }
 0x3c9   :  { %v4488_v54 = vmax.f32 %v3157_v27, 0.0 }
 0x3cb   :  { %v12644_v17 = vpack.c.bf16 %v4488_v54, %v4484_v37  ;;  %v3245_v0 = vpop.f32.mrf.mxu2  ;;  %v9944_v37 = vld [vmem:[%s14355_s1 + $0x534] sm:$0xf0] }
 0x3cc   :  { %v3246_v10 = vadd.f32 %v3245_v0, %v12598_v29  ;;  %v3070_v45 = vpop.f32.mrf.mxu0 }
 0x3cd   :  { %14907 = vst [vmem:[#allocation107_spill] sm:$0xff] %v12644_v17  ;;  %v3071_v58 = vadd.f32 %v3070_v45, %v12286_v13  ;;  %v9912_v13 = vld [vmem:[%s14355_s1 + $0x434] sm:$0xf0] }
 0x3ce   :  { %v3334_v16 = vpop.f32.mrf.mxu3  ;;  %v3159_v18 = vpop.f32.mrf.mxu1  ;;  %v8716_v45 = vor.u32 %v9912_v13, %v8715_v1 }
 0x3cf   :  { %v12648_v53 = vadd.f32 %v3334_v16, %v3246_v10  ;;  %v3160_v4 = vadd.f32 %v3159_v18, %v3071_v58  ;;  %3109 = vmatmul.bf16.gmra.mxu0 %v14908_v31  ;;  %v8459_v58 = vld [vmem:[%s14355_s1 + $0x228] sm:$0xf]  ;;  %v8844_v16 = vor.u32 %v9944_v37, %v8843_v11 }
 0x3d0   :  { %3287 = vmatmul.bf16.gmra.mxu2 %v14910_v47  ;;  %v8460_v27 = vor.u32 %v9848_v12, %v8459_v58  ;;  %v8587_v58 = vld [vmem:[%s14355_s1 + $0x328] sm:$0xf]  ;;  %v9880_v12 = vld [vmem:[%s14355_s1 + $0x334] sm:$0xf0] }
 0x3d1   :  { %8987 = vmatmul.msk.bf16.gmra.mxu1 %vm1934_vm0, %v14909_v56  ;;  %3591 = vmatpush.bf16.msra.mxu2 %v8716_v45  ;;  %v8588_v17 = vor.u32 %v9880_v12, %v8587_v58  ;;  %v14912_v56 = vld [vmem:[#allocation117_spill] sm:$0xff] }
 0x3d2   :  { %3413 = vmatpush.bf16.msra.mxu0 %v8460_v27  ;;  %3680 = vmatpush.bf16.msra.mxu3 %v8844_v16 }
 0x3d3   :  { %3376 = vmatmul.bf16.gmra.mxu3 %v14851_v61  ;;  %v3248_v52 = vpop.f32.mrf.mxu2  ;;  %v4492_v61 = vmax.f32 %v3160_v4, 0.0  ;;  %3502 = vmatpush.bf16.msra.mxu1 %v8588_v17  ;;  %v14914_v4 = vld [vmem:[#allocation55_spill] sm:$0xff] }
 0x3d4   :  { %v3249_v54 = vadd.f32 %v3248_v52, %v12598_v29  ;;  %v3072_v10 = vpop.f32.mrf.mxu0 }
 0x3d5   :  { %v3073_v18 = vadd.f32 %v3072_v10, %v12290_v24 }
 0x3d6   :  { %v3337_v0 = vpop.f32.mrf.mxu3  ;;  %v3161_v1 = vpop.f32.mrf.mxu1 }
 0x3d7   :  { %v12675_v13 = vadd.f32 %v3337_v0, %v3249_v54  ;;  %v3162_v52 = vadd.f32 %v3161_v1, %v3073_v18  ;;  %v14913_v18 = vld [vmem:[#allocation118_spill] sm:$0xff] }
 0x3d9   :  { %v4496_v45 = vmax.f32 %v3162_v52, 0.0 }
 0x3db   :  { %v12683_v11 = vpack.c.bf16 %v4496_v45, %v4492_v61  ;;  %v3250_v24 = vpop.f32.mrf.mxu2 }
 0x3dc   :  { %v3251_v27 = vadd.f32 %v3250_v24, %v12598_v29  ;;  %v3075_v54 = vpop.f32.mrf.mxu0 }
 0x3dd   :  { %14911 = vst [vmem:[#allocation106_spill] sm:$0xff] %v12683_v11  ;;  %v3076_v0 = vadd.f32 %v3075_v54, %v12298_v46 }
 0x3de   :  { %v3339_v37 = vpop.f32.mrf.mxu3  ;;  %v3164_v10 = vpop.f32.mrf.mxu1 }
 0x3df   :  { %v12687_v16 = vadd.f32 %v3339_v37, %v3251_v27  ;;  %v3165_v47 = vadd.f32 %v3164_v10, %v3076_v0  ;;  %3114 = vmatmul.bf16.gmra.mxu0 %v14912_v56 }
 0x3e0   :  { %3292 = vmatmul.bf16.gmra.mxu2 %v14914_v4 }
 0x3e1   :  { %8988 = vmatmul.msk.bf16.gmra.mxu1 %vm1934_vm0, %v14913_v18  ;;  %v4500_v24 = vmax.f32 %v3165_v47, 0.0  ;;  %v14918_v47 = vld [vmem:[#allocation59_spill] sm:$0xff] }
 0x3e3   :  { %3381 = vmatmul.bf16.gmra.mxu3 %v14854_v41  ;;  %v3253_v61 = vpop.f32.mrf.mxu2 }
 0x3e4   :  { %v3254_v17 = vadd.f32 %v3253_v61, %v12598_v29  ;;  %v3077_v58 = vpop.f32.mrf.mxu0 }
 0x3e5   :  { %v3078_v46 = vadd.f32 %v3077_v58, %v12302_v14  ;;  %v14916_v14 = vld [vmem:[#allocation121_spill] sm:$0xff]  ;;  %v9844_v58 = vld [vmem:[%s14355_s1 + $0x214] sm:$0xf0] }
 0x3e6   :  { %v3342_v1 = vpop.f32.mrf.mxu3  ;;  %v3166_v12 = vpop.f32.mrf.mxu1 }
 0x3e7   :  { %v12696_v52 = vadd.f32 %v3342_v1, %v3254_v17  ;;  %v3167_v45 = vadd.f32 %v3166_v12, %v3078_v46  ;;  %v14917_v17 = vld [vmem:[#allocation122_spill] sm:$0xff]  ;;  %v8699_v1 = vld [vmem:[%s14355_s1 + $0x408] sm:$0xf] }
 0x3e8   :  { %v8827_v46 = vld [vmem:[%s14355_s1 + $0x508] sm:$0xf] }
 0x3e9   :  { %v4504_v27 = vmax.f32 %v3167_v45, 0.0 }
 0x3eb   :  { %v12698_v37 = vpack.c.bf16 %v4504_v27, %v4500_v24  ;;  %v3255_v54 = vpop.f32.mrf.mxu2  ;;  %v9940_v24 = vld [vmem:[%s14355_s1 + $0x514] sm:$0xf0] }
 0x3ec   :  { %v3256_v0 = vadd.f32 %v3255_v54, %v12598_v29  ;;  %v3080_v11 = vpop.f32.mrf.mxu0 }
 0x3ed   :  { %14915 = vst [vmem:[#allocation143_spill] sm:$0xff] %v12698_v37  ;;  %v3081_v41 = vadd.f32 %v3080_v11, %v12328_v44  ;;  %v9908_v44 = vld [vmem:[%s14355_s1 + $0x414] sm:$0xf0] }
 0x3ee   :  { %v3344_v10 = vpop.f32.mrf.mxu3  ;;  %v3169_v61 = vpop.f32.mrf.mxu1  ;;  %v8700_v11 = vor.u32 %v9908_v44, %v8699_v1 }
 0x3ef   :  { %v12702_v4 = vadd.f32 %v3344_v10, %v3256_v0  ;;  %v3170_v18 = vadd.f32 %v3169_v61, %v3081_v41  ;;  %3119 = vmatmul.bf16.gmra.mxu0 %v14916_v14  ;;  %v8443_v41 = vld [vmem:[%s14355_s1 + $0x208] sm:$0xf]  ;;  %v8828_v10 = vor.u32 %v9940_v24, %v8827_v46 }
 0x3f0   :  { %3297 = vmatmul.bf16.gmra.mxu2 %v14918_v47  ;;  %v8444_v45 = vor.u32 %v9844_v58, %v8443_v41  ;;  %v8571_v41 = vld [vmem:[%s14355_s1 + $0x308] sm:$0xf]  ;;  %v9876_v58 = vld [vmem:[%s14355_s1 + $0x314] sm:$0xf0] }
 0x3f1   :  { %8989 = vmatmul.msk.bf16.gmra.mxu1 %vm1934_vm0, %v14917_v17  ;;  %3592 = vmatpush.bf16.msra.mxu2 %v8700_v11  ;;  %v8572_v37 = vor.u32 %v9876_v58, %v8571_v41  ;;  %v14920_v17 = vld [vmem:[#allocation125_spill] sm:$0xff] }
 0x3f2   :  { %3414 = vmatpush.bf16.msra.mxu0 %v8444_v45  ;;  %3681 = vmatpush.bf16.msra.mxu3 %v8828_v10 }
 0x3f3   :  { %3386 = vmatmul.bf16.gmra.mxu3 %v14857_v40  ;;  %v3258_v12 = vpop.f32.mrf.mxu2  ;;  %v4508_v40 = vmax.f32 %v3170_v18, 0.0  ;;  %3503 = vmatpush.bf16.msra.mxu1 %v8572_v37  ;;  %v14922_v18 = vld [vmem:[#allocation63_spill] sm:$0xff] }
 0x3f4   :  { %v3259_v27 = vadd.f32 %v3258_v12, %v12598_v29  ;;  %v3082_v0 = vpop.f32.mrf.mxu0 }
 0x3f5   :  { %v3083_v61 = vadd.f32 %v3082_v0, %v12332_v25 }
 0x3f6   :  { %v3347_v54 = vpop.f32.mrf.mxu3  ;;  %v3171_v1 = vpop.f32.mrf.mxu1 }
 0x3f7   :  { %v12729_v44 = vadd.f32 %v3347_v54, %v3259_v27  ;;  %v3172_v12 = vadd.f32 %v3171_v1, %v3083_v61  ;;  %v14921_v61 = vld [vmem:[#allocation126_spill] sm:$0xff] }
 0x3f9   :  { %v4512_v11 = vmax.f32 %v3172_v12, 0.0 }
 0x3fb   :  { %v12737_v46 = vpack.c.bf16 %v4512_v11, %v4508_v40  ;;  %v3260_v25 = vpop.f32.mrf.mxu2 }
 0x3fc   :  { %v3261_v45 = vadd.f32 %v3260_v25, %v12598_v29  ;;  %v3085_v27 = vpop.f32.mrf.mxu0 }
 0x3fd   :  { %14919 = vst [vmem:[#allocation144_spill] sm:$0xff] %v12737_v46  ;;  %v3086_v54 = vadd.f32 %v3085_v27, %v12340_v59 }
 0x3fe   :  { %v3349_v24 = vpop.f32.mrf.mxu3  ;;  %v3174_v0 = vpop.f32.mrf.mxu1 }
 0x3ff   :  { %v12741_v10 = vadd.f32 %v3349_v24, %v3261_v45  ;;  %v3175_v47 = vadd.f32 %v3174_v0, %v3086_v54  ;;  %3124 = vmatmul.bf16.gmra.mxu0 %v14920_v17 }
 0x400   :  { %3302 = vmatmul.bf16.gmra.mxu2 %v14922_v18 }
 0x401   :  { %8990 = vmatmul.msk.bf16.gmra.mxu1 %vm1934_vm0, %v14921_v61  ;;  %v4516_v25 = vmax.f32 %v3175_v47, 0.0  ;;  %v14926_v47 = vld [vmem:[#allocation67_spill] sm:$0xff] }
 0x403   :  { %3391 = vmatmul.bf16.gmra.mxu3 %v14860_v39  ;;  %v3263_v40 = vpop.f32.mrf.mxu2 }
 0x404   :  { %v3264_v37 = vadd.f32 %v3263_v40, %v12598_v29  ;;  %v3087_v41 = vpop.f32.mrf.mxu0 }
 0x405   :  { %v3088_v59 = vadd.f32 %v3087_v41, %v12344_v26  ;;  %v14924_v26 = vld [vmem:[#allocation129_spill] sm:$0xff]  ;;  %v9972_v41 = vld [vmem:[%s14355_s1 + $0x614] sm:$0xf0] }
 0x406   :  { %v3352_v1 = vpop.f32.mrf.mxu3  ;;  %v3176_v58 = vpop.f32.mrf.mxu1 }
 0x407   :  { %v12750_v12 = vadd.f32 %v3352_v1, %v3264_v37  ;;  %v3177_v11 = vadd.f32 %v3176_v58, %v3088_v59  ;;  %v14925_v37 = vld [vmem:[#allocation130_spill] sm:$0xff]  ;;  %v9838_v1 = vld [vmem:[%s14355_s1 + $0x1ec] sm:$0xf] }
 0x408   :  { %v9870_v59 = vld [vmem:[%s14355_s1 + $0x2ec] sm:$0xf] }
 0x409   :  { %v4520_v45 = vmax.f32 %v3177_v11, 0.0 }
 0x40b   :  { %v12752_v24 = vpack.c.bf16 %v4520_v45, %v4516_v25  ;;  %v3265_v27 = vpop.f32.mrf.mxu2  ;;  %v8557_v25 = vld [vmem:[%s14355_s1 + $0x2f8] sm:$0xf0] }
 0x40c   :  { %v3266_v54 = vadd.f32 %v3265_v27, %v12598_v29  ;;  %v3090_v46 = vpop.f32.mrf.mxu0 }
 0x40d   :  { %14923 = vst [vmem:[#allocation145_spill] sm:$0xff] %v12752_v24  ;;  %v3091_v39 = vadd.f32 %v3090_v46, %v12370_v8  ;;  %v8429_v8 = vld [vmem:[%s14355_s1 + $0x1f8] sm:$0xf0] }
 0x40e   :  { %v3354_v0 = vpop.f32.mrf.mxu3  ;;  %v3179_v40 = vpop.f32.mrf.mxu1  ;;  %v8432_v46 = vor.u32 %v9838_v1, %v8429_v8 }
 0x40f   :  { %v12756_v18 = vadd.f32 %v3354_v0, %v3266_v54  ;;  %v3180_v61 = vadd.f32 %v3179_v40, %v3091_v39  ;;  %3129 = vmatmul.bf16.gmra.mxu0 %v14924_v26  ;;  %v8955_v39 = vld [vmem:[%s14355_s1 + $0x608] sm:$0xf]  ;;  %v8560_v0 = vor.u32 %v9870_v59, %v8557_v25 }
 0x410   :  { %3307 = vmatmul.bf16.gmra.mxu2 %v14926_v47  ;;  %v8956_v11 = vor.u32 %v9972_v41, %v8955_v39  ;;  %v9806_v39 = vld [vmem:[%s14355_s1 + $0xec] sm:$0xf]  ;;  %v8301_v41 = vld [vmem:[%s14355_s1 + $0xf8] sm:$0xf0] }
 0x411   :  { %8991 = vmatmul.msk.bf16.gmra.mxu1 %vm1934_vm0, %v14925_v37  ;;  %3941 = vmatpush.bf16.msrb.mxu2 %v8432_v46  ;;  %v8304_v24 = vor.u32 %v9806_v39, %v8301_v41  ;;  %v14928_v37 = vld [vmem:[#allocation133_spill] sm:$0xff] }
 0x412   :  { %3770 = vmatpush.bf16.msrb.mxu0 %v8956_v11  ;;  %4030 = vmatpush.bf16.msrb.mxu3 %v8560_v0 }
 0x413   :  { %3396 = vmatmul.bf16.gmra.mxu3 %v14863_v35  ;;  %v3268_v58 = vpop.f32.mrf.mxu2  ;;  %v4524_v35 = vmax.f32 %v3180_v61, 0.0  ;;  %3852 = vmatpush.bf16.msrb.mxu1 %v8304_v24  ;;  %v14930_v61 = vld [vmem:[#allocation71_spill] sm:$0xff] }
 0x414   :  { %v3269_v45 = vadd.f32 %v3268_v58, %v12598_v29  ;;  %v3092_v54 = vpop.f32.mrf.mxu0 }
 0x415   :  { %v3093_v40 = vadd.f32 %v3092_v54, %v12380_v33 }
 0x416   :  { %v3357_v27 = vpop.f32.mrf.mxu3  ;;  %v3181_v1 = vpop.f32.mrf.mxu1 }
 0x417   :  { %v12783_v8 = vadd.f32 %v3357_v27, %v3269_v45  ;;  %v3182_v58 = vadd.f32 %v3181_v1, %v3093_v40  ;;  %v14929_v40 = vld [vmem:[#allocation134_spill] sm:$0xff] }
 0x419   :  { %v4528_v46 = vmax.f32 %v3182_v58, 0.0 }
 0x41b   :  { %v12791_v59 = vpack.c.bf16 %v4528_v46, %v4524_v35  ;;  %v3270_v33 = vpop.f32.mrf.mxu2 }
 0x41c   :  { %v3271_v11 = vadd.f32 %v3270_v33, %v12598_v29  ;;  %v3095_v45 = vpop.f32.mrf.mxu0 }
 0x41d   :  { %14927 = vst [vmem:[#allocation146_spill] sm:$0xff] %v12791_v59  ;;  %v3096_v27 = vadd.f32 %v3095_v45, %v12388_v60 }
 0x41e   :  { %v3359_v25 = vpop.f32.mrf.mxu3  ;;  %v3184_v54 = vpop.f32.mrf.mxu1 }
 0x41f   :  { %v12795_v0 = vadd.f32 %v3359_v25, %v3271_v11  ;;  %v3185_v47 = vadd.f32 %v3184_v54, %v3096_v27  ;;  %3134 = vmatmul.bf16.gmra.mxu0 %v14928_v37 }
 0x420   :  { %3312 = vmatmul.bf16.gmra.mxu2 %v14930_v61 }
 0x421   :  { %8992 = vmatmul.msk.bf16.gmra.mxu1 %vm1934_vm0, %v14929_v40  ;;  %v4532_v33 = vmax.f32 %v3185_v47, 0.0  ;;  %v9834_v47 = vld [vmem:[%s14355_s1 + $0x1cc] sm:$0xf] }
 0x423   :  { %3401 = vmatmul.bf16.gmra.mxu3 %v14866_v15  ;;  %v3273_v35 = vpop.f32.mrf.mxu2 }
 0x424   :  { %v3274_v24 = vadd.f32 %v3273_v35, %v12598_v29  ;;  %v3097_v39 = vpop.f32.mrf.mxu0 }
 0x425   :  { %v3098_v60 = vadd.f32 %v3097_v39, %v12392_v62  ;;  %v14932_v62 = vld [vmem:[#allocation13_spill] sm:$0xff]  ;;  %v8541_v39 = vld [vmem:[%s14355_s1 + $0x2d8] sm:$0xf0] }
 0x426   :  { %v3362_v1 = vpop.f32.mrf.mxu3  ;;  %v3186_v41 = vpop.f32.mrf.mxu1 }
 0x427   :  { %v12804_v58 = vadd.f32 %v3362_v1, %v3274_v24  ;;  %v3187_v46 = vadd.f32 %v3186_v41, %v3098_v60  ;;  %v14933_v24 = vld [vmem:[#allocation14_spill] sm:$0xff]  ;;  %v14934_v1 = vld [vmem:[#allocation75_spill] sm:$0xff] }
 0x429   :  { %v4536_v11 = vmax.f32 %v3187_v46, 0.0 }
 0x42b   :  { %v12806_v25 = vpack.c.bf16 %v4536_v11, %v4532_v33  ;;  %v3275_v45 = vpop.f32.mrf.mxu2 }
 0x42c   :  { %v3276_v27 = vadd.f32 %v3275_v45, %v12598_v29  ;;  %v3100_v59 = vpop.f32.mrf.mxu0 }
 0x42d   :  { %14931 = vst [vmem:[#allocation147_spill] sm:$0xff] %v12806_v25  ;;  %v3101_v15 = vadd.f32 %v3100_v59, %v12419_v51  ;;  %v8413_v51 = vld [vmem:[%s14355_s1 + $0x1d8] sm:$0xf0] }
 0x42e   :  { %v3364_v54 = vpop.f32.mrf.mxu3  ;;  %v3189_v35 = vpop.f32.mrf.mxu1  ;;  %v8416_v59 = vor.u32 %v9834_v47, %v8413_v51  ;;  %v8285_v47 = vld [vmem:[%s14355_s1 + $0xd8] sm:$0xf0] }
 0x42f   :  { %v12810_v61 = vadd.f32 %v3364_v54, %v3276_v27  ;;  %v3190_v40 = vadd.f32 %v3189_v35, %v3101_v15  ;;  %3415 = vmatmul.bf16.vlgmr.msra.gmra.mxu0 %v14932_v62  ;;  %v9866_v15 = vld [vmem:[%s14355_s1 + $0x2cc] sm:$0xf] }
 0x430   :  { %3593 = vmatmul.bf16.vlgmr.msra.gmra.mxu2 %v14934_v1  ;;  %v8544_v41 = vor.u32 %v9866_v15, %v8541_v39  ;;  %v9802_v35 = vld [vmem:[%s14355_s1 + $0xcc] sm:$0xf] }
 0x431   :  { %3504 = vmatmul.bf16.vlgmr.msra.gmra.mxu1 %v14933_v24  ;;  %3942 = vmatpush.bf16.msrb.mxu2 %v8416_v59  ;;  %v8288_v15 = vor.u32 %v9802_v35, %v8285_v47  ;;  %v4540_v39 = vmax.f32 %v3190_v40, 0.0  ;;  %v14936_v24 = vld [vmem:[#allocation17_spill] sm:$0xff]  ;;  %v14938_v40 = vld [vmem:[#allocation78_spill] sm:$0xff] }
 0x432   :  { %4031 = vmatpush.bf16.msrb.mxu3 %v8544_v41 }
 0x433   :  { %3682 = vmatmul.bf16.vlgmr.msra.gmra.mxu3 %v14869_v9  ;;  %v3278_v60 = vpop.f32.mrf.mxu2  ;;  %3853 = vmatpush.bf16.msrb.mxu1 %v8288_v15 }
 0x434   :  { %v3279_v46 = vadd.f32 %v3278_v60, %v12598_v29  ;;  %v3102_v11 = vpop.f32.mrf.mxu0 }
 0x435   :  { %v3103_v45 = vadd.f32 %v3102_v11, %v12429_v30 }
 0x436   :  { %v3367_v33 = vpop.f32.mrf.mxu3  ;;  %v3191_v27 = vpop.f32.mrf.mxu1 }
 0x437   :  { %v12830_v54 = vadd.f32 %v3367_v33, %v3279_v46  ;;  %v3192_v51 = vadd.f32 %v3191_v27, %v3103_v45  ;;  %v14937_v45 = vld [vmem:[#allocation18_spill] sm:$0xff] }
 0x439   :  { %v4544_v60 = vmax.f32 %v3192_v51, 0.0 }
 0x43b   :  { %v12838_v59 = vpack.c.bf16 %v4544_v60, %v4540_v39  ;;  %v3280_v30 = vpop.f32.mrf.mxu2 }
 0x43c   :  { %v3281_v41 = vadd.f32 %v3280_v30, %v12598_v29  ;;  %v3105_v33 = vpop.f32.mrf.mxu0 }
 0x43d   :  { %14935 = vst [vmem:[#allocation13_spill] sm:$0xff] %v12838_v59  ;;  %v3106_v11 = vadd.f32 %v3105_v33, %v12438_v42 }
 0x43e   :  { %v3369_v46 = vpop.f32.mrf.mxu3  ;;  %v3194_v25 = vpop.f32.mrf.mxu1 }
 0x43f   :  { %v12842_v9 = vadd.f32 %v3369_v46, %v3281_v41  ;;  %v3195_v1 = vadd.f32 %v3194_v25, %v3106_v11  ;;  %3420 = vmatmul.bf16.gmra.mxu0 %v14936_v24 }
 0x440   :  { %3598 = vmatmul.bf16.gmra.mxu2 %v14938_v40 }
 0x441   :  { %3509 = vmatmul.bf16.gmra.mxu1 %v14937_v45  ;;  %v4548_v25 = vmax.f32 %v3195_v1, 0.0  ;;  %v9830_v1 = vld [vmem:[%s14355_s1 + $0x1ac] sm:$0xf] }
 0x443   :  { %3687 = vmatmul.bf16.gmra.mxu3 %v14872_v28  ;;  %v3283_v27 = vpop.f32.mrf.mxu2 }
 0x444   :  { %v3284_v35 = vadd.f32 %v3283_v27, %v12598_v29  ;;  %v3107_v51 = vpop.f32.mrf.mxu0 }
 0x445   :  { %v3108_v15 = vadd.f32 %v3107_v51, %v12442_v5  ;;  %v14940_v5 = vld [vmem:[#allocation21_spill] sm:$0xff]  ;;  %v8525_v51 = vld [vmem:[%s14355_s1 + $0x2b8] sm:$0xf0] }
 0x446   :  { %v3372_v47 = vpop.f32.mrf.mxu3  ;;  %v3196_v42 = vpop.f32.mrf.mxu1 }
 0x447   :  { %v12850_v39 = vadd.f32 %v3372_v47, %v3284_v35  ;;  %v3197_v60 = vadd.f32 %v3196_v42, %v3108_v15  ;;  %v14941_v35 = vld [vmem:[#allocation22_spill] sm:$0xff]  ;;  %v14942_v47 = vld [vmem:[#allocation81_spill] sm:$0xff] }
 0x449   :  { %v4552_v30 = vmax.f32 %v3197_v60, 0.0 }
 0x44b   :  { %v12852_v41 = vpack.c.bf16 %v4552_v30, %v4548_v25  ;;  %v3285_v46 = vpop.f32.mrf.mxu2 }
 0x44c   :  { %v3286_v33 = vadd.f32 %v3285_v46, %v12598_v29  ;;  %v3110_v59 = vpop.f32.mrf.mxu0 }
 0x44d   :  { %14939 = vst [vmem:[#allocation17_spill] sm:$0xff] %v12852_v41  ;;  %v3111_v28 = vadd.f32 %v3110_v59, %v12469_v22  ;;  %v8397_v22 = vld [vmem:[%s14355_s1 + $0x1b8] sm:$0xf0] }
 0x44e   :  { %v3374_v11 = vpop.f32.mrf.mxu3  ;;  %v3199_v27 = vpop.f32.mrf.mxu1  ;;  %v8400_v59 = vor.u32 %v9830_v1, %v8397_v22  ;;  %v8269_v1 = vld [vmem:[%s14355_s1 + $0xb8] sm:$0xf0] }
 0x44f   :  { %v12856_v40 = vadd.f32 %v3374_v11, %v3286_v33  ;;  %v3200_v45 = vadd.f32 %v3199_v27, %v3111_v28  ;;  %3425 = vmatmul.bf16.gmra.mxu0 %v14940_v5  ;;  %v9862_v28 = vld [vmem:[%s14355_s1 + $0x2ac] sm:$0xf] }
 0x450   :  { %3603 = vmatmul.bf16.gmra.mxu2 %v14942_v47  ;;  %v8528_v42 = vor.u32 %v9862_v28, %v8525_v51  ;;  %v9798_v27 = vld [vmem:[%s14355_s1 + $0xac] sm:$0xf] }
 0x451   :  { %3514 = vmatmul.bf16.gmra.mxu1 %v14941_v35  ;;  %3943 = vmatpush.bf16.msrb.mxu2 %v8400_v59  ;;  %v8272_v28 = vor.u32 %v9798_v27, %v8269_v1  ;;  %v4556_v51 = vmax.f32 %v3200_v45, 0.0  ;;  %v14944_v35 = vld [vmem:[#allocation25_spill] sm:$0xff]  ;;  %v14946_v45 = vld [vmem:[#allocation84_spill] sm:$0xff] }
 0x452   :  { %4032 = vmatpush.bf16.msrb.mxu3 %v8528_v42 }
 0x453   :  { %3692 = vmatmul.bf16.gmra.mxu3 %v14875_v57  ;;  %v3288_v15 = vpop.f32.mrf.mxu2  ;;  %3854 = vmatpush.bf16.msrb.mxu1 %v8272_v28 }
 0x454   :  { %v3289_v60 = vadd.f32 %v3288_v15, %v12598_v29  ;;  %v3112_v30 = vpop.f32.mrf.mxu0 }
 0x455   :  { %v3113_v46 = vadd.f32 %v3112_v30, %v12479_v50 }
 0x456   :  { %v3377_v25 = vpop.f32.mrf.mxu3  ;;  %v3201_v33 = vpop.f32.mrf.mxu1 }
 0x457   :  { %v12876_v11 = vadd.f32 %v3377_v25, %v3289_v60  ;;  %v3202_v22 = vadd.f32 %v3201_v33, %v3113_v46  ;;  %v14945_v46 = vld [vmem:[#allocation26_spill] sm:$0xff] }
 0x459   :  { %v4560_v15 = vmax.f32 %v3202_v22, 0.0 }
 0x45b   :  { %v12884_v59 = vpack.c.bf16 %v4560_v15, %v4556_v51  ;;  %v3290_v50 = vpop.f32.mrf.mxu2 }
 0x45c   :  { %v3291_v42 = vadd.f32 %v3290_v50, %v12598_v29  ;;  %v3115_v25 = vpop.f32.mrf.mxu0 }
 0x45d   :  { %14943 = vst [vmem:[#allocation21_spill] sm:$0xff] %v12884_v59  ;;  %v3116_v30 = vadd.f32 %v3115_v25, %v12488_v2 }
 0x45e   :  { %v3379_v60 = vpop.f32.mrf.mxu3  ;;  %v3204_v41 = vpop.f32.mrf.mxu1 }
 0x45f   :  { %v12888_v57 = vadd.f32 %v3379_v60, %v3291_v42  ;;  %v3205_v47 = vadd.f32 %v3204_v41, %v3116_v30  ;;  %3430 = vmatmul.bf16.gmra.mxu0 %v14944_v35 }
 0x460   :  { %3608 = vmatmul.bf16.gmra.mxu2 %v14946_v45 }
 0x461   :  { %3519 = vmatmul.bf16.gmra.mxu1 %v14945_v46  ;;  %v4564_v41 = vmax.f32 %v3205_v47, 0.0  ;;  %v9826_v47 = vld [vmem:[%s14355_s1 + $0x18c] sm:$0xf] }
 0x463   :  { %3697 = vmatmul.bf16.gmra.mxu3 %v14878_v38  ;;  %v3293_v33 = vpop.f32.mrf.mxu2 }
 0x464   :  { %v3294_v27 = vadd.f32 %v3293_v33, %v12598_v29  ;;  %v3117_v22 = vpop.f32.mrf.mxu0 }
 0x465   :  { %v3118_v28 = vadd.f32 %v3117_v22, %v12492_v20  ;;  %v14948_v20 = vld [vmem:[#allocation29_spill] sm:$0xff]  ;;  %v8509_v22 = vld [vmem:[%s14355_s1 + $0x298] sm:$0xf0] }
 0x466   :  { %v3382_v1 = vpop.f32.mrf.mxu3  ;;  %v3206_v2 = vpop.f32.mrf.mxu1 }
 0x467   :  { %v12896_v51 = vadd.f32 %v3382_v1, %v3294_v27  ;;  %v3207_v15 = vadd.f32 %v3206_v2, %v3118_v28  ;;  %v14949_v27 = vld [vmem:[#allocation30_spill] sm:$0xff]  ;;  %v14950_v1 = vld [vmem:[#allocation87_spill] sm:$0xff] }
 0x469   :  { %v4568_v50 = vmax.f32 %v3207_v15, 0.0 }
 0x46b   :  { %v12898_v42 = vpack.c.bf16 %v4568_v50, %v4564_v41  ;;  %v3295_v60 = vpop.f32.mrf.mxu2 }
 0x46c   :  { %v3296_v25 = vadd.f32 %v3295_v60, %v12598_v29  ;;  %v3120_v59 = vpop.f32.mrf.mxu0 }
 0x46d   :  { %14947 = vst [vmem:[#allocation25_spill] sm:$0xff] %v12898_v42  ;;  %v3121_v38 = vadd.f32 %v3120_v59, %v12519_v23  ;;  %v8381_v23 = vld [vmem:[%s14355_s1 + $0x198] sm:$0xf0] }
 0x46e   :  { %v3384_v30 = vpop.f32.mrf.mxu3  ;;  %v3209_v33 = vpop.f32.mrf.mxu1  ;;  %v8384_v59 = vor.u32 %v9826_v47, %v8381_v23  ;;  %v8253_v47 = vld [vmem:[%s14355_s1 + $0x98] sm:$0xf0] }
 0x46f   :  { %v12902_v45 = vadd.f32 %v3384_v30, %v3296_v25  ;;  %v3210_v46 = vadd.f32 %v3209_v33, %v3121_v38  ;;  %3435 = vmatmul.bf16.gmra.mxu0 %v14948_v20  ;;  %v9858_v38 = vld [vmem:[%s14355_s1 + $0x28c] sm:$0xf] }
 0x470   :  { %3613 = vmatmul.bf16.gmra.mxu2 %v14950_v1  ;;  %v8512_v2 = vor.u32 %v9858_v38, %v8509_v22  ;;  %v9794_v33 = vld [vmem:[%s14355_s1 + $0x8c] sm:$0xf] }
 0x471   :  { %3524 = vmatmul.bf16.gmra.mxu1 %v14949_v27  ;;  %3944 = vmatpush.bf16.msrb.mxu2 %v8384_v59  ;;  %v8256_v38 = vor.u32 %v9794_v33, %v8253_v47  ;;  %v4572_v22 = vmax.f32 %v3210_v46, 0.0  ;;  %v14952_v27 = vld [vmem:[#allocation33_spill] sm:$0xff]  ;;  %v14954_v46 = vld [vmem:[#allocation92_spill] sm:$0xff] }
 0x472   :  { %4033 = vmatpush.bf16.msrb.mxu3 %v8512_v2 }
 0x473   :  { %3702 = vmatmul.bf16.gmra.mxu3 %v14881_v55  ;;  %v3298_v28 = vpop.f32.mrf.mxu2  ;;  %3855 = vmatpush.bf16.msrb.mxu1 %v8256_v38 }
 0x474   :  { %v3299_v15 = vadd.f32 %v3298_v28, %v12598_v29  ;;  %v3122_v50 = vpop.f32.mrf.mxu0 }
 0x475   :  { %v3123_v60 = vadd.f32 %v3122_v50, %v12529_v63 }
 0x476   :  { %v3387_v41 = vpop.f32.mrf.mxu3  ;;  %v3211_v25 = vpop.f32.mrf.mxu1 }
 0x477   :  { %v12922_v30 = vadd.f32 %v3387_v41, %v3299_v15  ;;  %v3212_v23 = vadd.f32 %v3211_v25, %v3123_v60  ;;  %v14953_v60 = vld [vmem:[#allocation34_spill] sm:$0xff] }
 0x479   :  { %v4576_v28 = vmax.f32 %v3212_v23, 0.0 }
 0x47b   :  { %v12930_v59 = vpack.c.bf16 %v4576_v28, %v4572_v22  ;;  %v3300_v63 = vpop.f32.mrf.mxu2 }
 0x47c   :  { %v3301_v2 = vadd.f32 %v3300_v63, %v12598_v29  ;;  %v3125_v41 = vpop.f32.mrf.mxu0 }
 0x47d   :  { %14951 = vst [vmem:[#allocation29_spill] sm:$0xff] %v12930_v59  ;;  %v3126_v50 = vadd.f32 %v3125_v41, %v12538_v3 }
 0x47e   :  { %v3389_v15 = vpop.f32.mrf.mxu3  ;;  %v3214_v42 = vpop.f32.mrf.mxu1 }
 0x47f   :  { %v12934_v55 = vadd.f32 %v3389_v15, %v3301_v2  ;;  %v3215_v1 = vadd.f32 %v3214_v42, %v3126_v50  ;;  %3440 = vmatmul.bf16.gmra.mxu0 %v14952_v27 }
 0x480   :  { %3618 = vmatmul.bf16.gmra.mxu2 %v14954_v46 }
 0x481   :  { %3529 = vmatmul.bf16.gmra.mxu1 %v14953_v60  ;;  %v4580_v42 = vmax.f32 %v3215_v1, 0.0  ;;  %v9822_v1 = vld [vmem:[%s14355_s1 + $0x16c] sm:$0xf] }
 0x483   :  { %3707 = vmatmul.bf16.gmra.mxu3 %v14884_v7  ;;  %v3303_v25 = vpop.f32.mrf.mxu2 }
 0x484   :  { %v3304_v33 = vadd.f32 %v3303_v25, %v12598_v29  ;;  %v3127_v23 = vpop.f32.mrf.mxu0 }
 0x485   :  { %v3128_v38 = vadd.f32 %v3127_v23, %v12542_v43  ;;  %v14956_v43 = vld [vmem:[#allocation37_spill] sm:$0xff]  ;;  %v8493_v23 = vld [vmem:[%s14355_s1 + $0x278] sm:$0xf0] }
 0x486   :  { %v3392_v47 = vpop.f32.mrf.mxu3  ;;  %v3216_v3 = vpop.f32.mrf.mxu1 }
 0x487   :  { %v12942_v22 = vadd.f32 %v3392_v47, %v3304_v33  ;;  %v3217_v28 = vadd.f32 %v3216_v3, %v3128_v38  ;;  %v14957_v33 = vld [vmem:[#allocation38_spill] sm:$0xff]  ;;  %v14958_v47 = vld [vmem:[#allocation95_spill] sm:$0xff] }
 0x489   :  { %v4584_v63 = vmax.f32 %v3217_v28, 0.0 }
 0x48b   :  { %v12944_v2 = vpack.c.bf16 %v4584_v63, %v4580_v42  ;;  %v3305_v15 = vpop.f32.mrf.mxu2 }
 0x48c   :  { %v3306_v41 = vadd.f32 %v3305_v15, %v12598_v29  ;;  %v3130_v59 = vpop.f32.mrf.mxu0 }
 0x48d   :  { %14955 = vst [vmem:[#allocation33_spill] sm:$0xff] %v12944_v2  ;;  %v3131_v7 = vadd.f32 %v3130_v59, %v12569_v49  ;;  %v8365_v49 = vld [vmem:[%s14355_s1 + $0x178] sm:$0xf0] }
 0x48e   :  { %v3394_v50 = vpop.f32.mrf.mxu3  ;;  %v3219_v25 = vpop.f32.mrf.mxu1  ;;  %v8368_v59 = vor.u32 %v9822_v1, %v8365_v49  ;;  %v8237_v1 = vld [vmem:[%s14355_s1 + $0x78] sm:$0xf0] }
 0x48f   :  { %v12948_v46 = vadd.f32 %v3394_v50, %v3306_v41  ;;  %v3220_v60 = vadd.f32 %v3219_v25, %v3131_v7  ;;  %3445 = vmatmul.bf16.gmra.mxu0 %v14956_v43  ;;  %v9854_v7 = vld [vmem:[%s14355_s1 + $0x26c] sm:$0xf] }
 0x490   :  { %3623 = vmatmul.bf16.gmra.mxu2 %v14958_v47  ;;  %v8496_v3 = vor.u32 %v9854_v7, %v8493_v23  ;;  %v9790_v25 = vld [vmem:[%s14355_s1 + $0x6c] sm:$0xf] }
 0x491   :  { %3534 = vmatmul.bf16.gmra.mxu1 %v14957_v33  ;;  %3945 = vmatpush.bf16.msrb.mxu2 %v8368_v59  ;;  %v8240_v7 = vor.u32 %v9790_v25, %v8237_v1  ;;  %v4588_v23 = vmax.f32 %v3220_v60, 0.0  ;;  %v14961_v33 = vld [vmem:[#allocation41_spill] sm:$0xff]  ;;  %v14963_v60 = vld [vmem:[#allocation100_spill] sm:$0xff] }
 0x492   :  { %4034 = vmatpush.bf16.msrb.mxu3 %v8496_v3 }
 0x493   :  { %3712 = vmatmul.bf16.gmra.mxu3 %v14887_v19  ;;  %v3308_v38 = vpop.f32.mrf.mxu2  ;;  %3856 = vmatpush.bf16.msrb.mxu1 %v8240_v7 }
 0x494   :  { %v3309_v28 = vadd.f32 %v3308_v38, %v12598_v29  ;;  %v3132_v63 = vpop.f32.mrf.mxu0 }
 0x495   :  { %v3133_v15 = vadd.f32 %v3132_v63, %v12579_v48 }
 0x496   :  { %v3397_v42 = vpop.f32.mrf.mxu3  ;;  %v3221_v41 = vpop.f32.mrf.mxu1 }
 0x497   :  { %v12968_v50 = vadd.f32 %v3397_v42, %v3309_v28  ;;  %v3222_v49 = vadd.f32 %v3221_v41, %v3133_v15  ;;  %v14962_v15 = vld [vmem:[#allocation42_spill] sm:$0xff]  ;;  %v14964_v41 = vld [vmem:[#allocation101_spill] sm:$0xff] }
 0x499   :  { %v4592_v38 = vmax.f32 %v3222_v49, 0.0 }
 0x49b   :  { %v12976_v59 = vpack.c.bf16 %v4592_v38, %v4588_v23  ;;  %v3310_v48 = vpop.f32.mrf.mxu2 }
 0x49c   :  { %v3311_v3 = vadd.f32 %v3310_v48, %v12598_v29  ;;  %v3135_v42 = vpop.f32.mrf.mxu0 }
 0x49d   :  { %14959 = vst [vmem:[#allocation37_spill] sm:$0xff] %v12976_v59  ;;  %v3136_v63 = vadd.f32 %v3135_v42, %v12588_v21 }
 0x49e   :  { %v3399_v28 = vpop.f32.mrf.mxu3  ;;  %v3224_v2 = vpop.f32.mrf.mxu1 }
 0x49f   :  { %v12980_v19 = vadd.f32 %v3399_v28, %v3311_v3  ;;  %v3225_v47 = vadd.f32 %v3224_v2, %v3136_v63  ;;  %3450 = vmatmul.bf16.gmra.mxu0 %v14961_v33 }
 0x4a0   :  { %3628 = vmatmul.bf16.gmra.mxu2 %v14963_v60  ;;  %v14966_v60 = vld [vmem:[#allocation99_spill] sm:$0xff] }
 0x4a1   :  { %14960 = vst [vmem:[#allocation148_spill] sm:$0xff] %v12980_v19  ;;  %3539 = vmatmul.bf16.gmra.mxu1 %v14962_v15  ;;  %v4596_v2 = vmax.f32 %v3225_v47, 0.0  ;;  %v14970_v47 = vld [vmem:[#allocation104_spill] sm:$0xff] }
 0x4a3   :  { %3717 = vmatmul.bf16.gmra.mxu3 %v14964_v41  ;;  %v3313_v25 = vpop.f32.mrf.mxu2 }
 0x4a4   :  { %v3314_v1 = vadd.f32 %v3313_v25, %v12598_v29  ;;  %v3137_v7 = vpop.f32.mrf.mxu0 }
 0x4a5   :  { %v3138_v23 = vadd.f32 %v3137_v7, %v12591_v6  ;;  %v14967_v6 = vld [vmem:[#allocation45_spill] sm:$0xff] }
 0x4a6   :  { %v3402_v49 = vpop.f32.mrf.mxu3  ;;  %v3226_v21 = vpop.f32.mrf.mxu1 }
 0x4a7   :  { %v12988_v38 = vadd.f32 %v3402_v49, %v3314_v1  ;;  %v3227_v48 = vadd.f32 %v3226_v21, %v3138_v23  ;;  %v14968_v1 = vld [vmem:[#allocation46_spill] sm:$0xff]  ;;  %v14969_v49 = vld [vmem:[#allocation103_spill] sm:$0xff] }
 0x4a9   :  { %v4600_v3 = vmax.f32 %v3227_v48, 0.0 }
 0x4ab   :  { %v12990_v28 = vpack.c.bf16 %v4600_v3, %v4596_v2  ;;  %v3315_v42 = vpop.f32.mrf.mxu2 }
 0x4ac   :  { %v3316_v63 = vadd.f32 %v3315_v42, %v12598_v29  ;;  %v3416_v41 = vpop.f32.mrf.mxu0  ;;  %v9818_v29 = vld [vmem:[%s14355_s1 + $0x14c] sm:$0xf] }
 0x4ad   :  { %14965 = vst [vmem:[#allocation149_spill] sm:$0xff] %v12990_v28  ;;  %v3417_v15 = vadd.f32 %v3416_v41, %v14966_v60  ;;  %v8349_v60 = vld [vmem:[%s14355_s1 + $0x158] sm:$0xf0] }
 0x4ae   :  { %v3404_v59 = vpop.f32.mrf.mxu3  ;;  %v3505_v25 = vpop.f32.mrf.mxu1  ;;  %v8477_v41 = vld [vmem:[%s14355_s1 + $0x258] sm:$0xf0] }
 0x4af   :  { %v12994_v33 = vadd.f32 %v3404_v59, %v3316_v63  ;;  %v3506_v19 = vadd.f32 %v3505_v25, %v3417_v15  ;;  %3455 = vmatmul.bf16.gmra.mxu0 %v14967_v6  ;;  %v9850_v59 = vld [vmem:[%s14355_s1 + $0x24c] sm:$0xf]  ;;  %v8352_v15 = vor.u32 %v9818_v29, %v8349_v60  ;;  %v8221_v29 = vld [vmem:[%s14355_s1 + $0x58] sm:$0xf0] }
 0x4b0   :  { %3633 = vmatmul.bf16.gmra.mxu2 %v14969_v49  ;;  %v8480_v23 = vor.u32 %v9850_v59, %v8477_v41  ;;  %v9786_v25 = vld [vmem:[%s14355_s1 + $0x4c] sm:$0xf]  ;;  %v14972_v28 = vld [vmem:[#allocation50_spill] sm:$0xff]  ;;  %v14974_v49 = vld [vmem:[#allocation53_spill] sm:$0xff] }
 0x4b1   :  { %3544 = vmatmul.bf16.gmra.mxu1 %v14968_v1  ;;  %3946 = vmatpush.bf16.msrb.mxu2 %v8352_v15  ;;  %v8224_v59 = vor.u32 %v9786_v25, %v8221_v29 }
 0x4b2   :  { %4035 = vmatpush.bf16.msrb.mxu3 %v8480_v23 }
 0x4b3   :  { %3722 = vmatmul.bf16.gmra.mxu3 %v14970_v47  ;;  %v3594_v7 = vpop.f32.mrf.mxu2  ;;  %3857 = vmatpush.bf16.msrb.mxu1 %v8224_v59  ;;  %v14973_v47 = vld [vmem:[#allocation108_spill] sm:$0xff] }
 0x4b4   :  { %v3595_v21 = vadd.f32 %v3594_v7, %v3506_v19  ;;  %v3418_v2 = vpop.f32.mrf.mxu0 }
 0x4b5   :  { %v3419_v3 = vadd.f32 %v3418_v2, %v12633_v34  ;;  %v14971_v2 = vld [vmem:[#allocation49_spill] sm:$0xff] }
 0x4b6   :  { %v3683_v48 = vpop.f32.mrf.mxu3  ;;  %v3507_v42 = vpop.f32.mrf.mxu1 }
 0x4b7   :  { %v13013_v63 = vadd.f32 %v3683_v48, %v3595_v21  ;;  %v3508_v60 = vadd.f32 %v3507_v42, %v3419_v3 }
 0x4bb   :  { %v3596_v19 = vpop.f32.mrf.mxu2 }
 0x4bc   :  { %v3597_v41 = vadd.f32 %v3596_v19, %v3508_v60  ;;  %v3421_v7 = vpop.f32.mrf.mxu0 }
 0x4bd   :  { %v3422_v34 = vadd.f32 %v3421_v7, %v12642_v32 }
 0x4be   :  { %v3685_v15 = vpop.f32.mrf.mxu3  ;;  %v3510_v23 = vpop.f32.mrf.mxu1 }
 0x4bf   :  { %v13022_v21 = vadd.f32 %v3685_v15, %v3597_v41  ;;  %v3511_v48 = vadd.f32 %v3510_v23, %v3422_v34  ;;  %3460 = vmatmul.bf16.gmra.mxu0 %v14971_v2 }
 0x4c0   :  { %3638 = vmatmul.bf16.gmra.mxu2 %v14973_v47 }
 0x4c1   :  { %3549 = vmatmul.bf16.gmra.mxu1 %v14972_v28 }
 0x4c3   :  { %3727 = vmatmul.bf16.gmra.mxu3 %v14904_v36  ;;  %v3599_v3 = vpop.f32.mrf.mxu2 }
 0x4c4   :  { %v3600_v42 = vadd.f32 %v3599_v3, %v3511_v48  ;;  %v3423_v29 = vpop.f32.mrf.mxu0  ;;  %v14975_v48 = vld [vmem:[#allocation54_spill] sm:$0xff]  ;;  %v14976_v3 = vld [vmem:[#allocation112_spill] sm:$0xff] }
 0x4c5   :  { %v3424_v60 = vadd.f32 %v3423_v29, %v12648_v53  ;;  %v9814_v53 = vld [vmem:[%s14355_s1 + $0x12c] sm:$0xf] }
 0x4c6   :  { %v3688_v25 = vpop.f32.mrf.mxu3  ;;  %v3512_v59 = vpop.f32.mrf.mxu1 }
 0x4c7   :  { %v13029_v32 = vadd.f32 %v3688_v25, %v3600_v42  ;;  %v3513_v19 = vadd.f32 %v3512_v59, %v3424_v60  ;;  %v8461_v25 = vld [vmem:[%s14355_s1 + $0x238] sm:$0xf0] }
 0x4cb   :  { %v3601_v41 = vpop.f32.mrf.mxu2 }
 0x4cc   :  { %v3602_v15 = vadd.f32 %v3601_v41, %v3513_v19  ;;  %v3426_v34 = vpop.f32.mrf.mxu0 }
 0x4cd   :  { %v3427_v23 = vadd.f32 %v3426_v34, %v12675_v13  ;;  %v8333_v13 = vld [vmem:[%s14355_s1 + $0x138] sm:$0xf0] }
 0x4ce   :  { %v3690_v7 = vpop.f32.mrf.mxu3  ;;  %v3515_v28 = vpop.f32.mrf.mxu1  ;;  %v8336_v42 = vor.u32 %v9814_v53, %v8333_v13  ;;  %v8205_v53 = vld [vmem:[%s14355_s1 + $0x38] sm:$0xf0] }
 0x4cf   :  { %v13032_v47 = vadd.f32 %v3690_v7, %v3602_v15  ;;  %v3516_v36 = vadd.f32 %v3515_v28, %v3427_v23  ;;  %3465 = vmatmul.bf16.gmra.mxu0 %v14974_v49  ;;  %v9846_v28 = vld [vmem:[%s14355_s1 + $0x22c] sm:$0xf] }
 0x4d0   :  { %3643 = vmatmul.bf16.gmra.mxu2 %v14976_v3  ;;  %v8464_v60 = vor.u32 %v9846_v28, %v8461_v25  ;;  %v9782_v23 = vld [vmem:[%s14355_s1 + $0x2c] sm:$0xf] }
 0x4d1   :  { %3554 = vmatmul.bf16.gmra.mxu1 %v14975_v48  ;;  %3947 = vmatpush.bf16.msrb.mxu2 %v8336_v42  ;;  %v8208_v28 = vor.u32 %v9782_v23, %v8205_v53  ;;  %v14979_v3 = vld [vmem:[#allocation116_spill] sm:$0xff]  ;;  %v14980_v48 = vld [vmem:[#allocation61_spill] sm:$0xff] }
 0x4d2   :  { %4036 = vmatpush.bf16.msrb.mxu3 %v8464_v60 }
 0x4d3   :  { %3732 = vmatmul.bf16.gmra.mxu3 %v14908_v31  ;;  %v3604_v29 = vpop.f32.mrf.mxu2  ;;  %3858 = vmatpush.bf16.msrb.mxu1 %v8208_v28  ;;  %v14978_v31 = vld [vmem:[#allocation58_spill] sm:$0xff] }
 0x4d4   :  { %v3605_v59 = vadd.f32 %v3604_v29, %v3516_v36  ;;  %v3428_v41 = vpop.f32.mrf.mxu0 }
 0x4d5   :  { %v3429_v15 = vadd.f32 %v3428_v41, %v12687_v16  ;;  %v14977_v41 = vld [vmem:[#allocation57_spill] sm:$0xff] }
 0x4d6   :  { %v3693_v19 = vpop.f32.mrf.mxu3  ;;  %v3517_v7 = vpop.f32.mrf.mxu1 }
 0x4d7   :  { %v13051_v34 = vadd.f32 %v3693_v19, %v3605_v59  ;;  %v3518_v13 = vadd.f32 %v3517_v7, %v3429_v15 }
 0x4db   :  { %v3606_v36 = vpop.f32.mrf.mxu2 }
 0x4dc   :  { %v3607_v25 = vadd.f32 %v3606_v36, %v3518_v13  ;;  %v3431_v29 = vpop.f32.mrf.mxu0 }
 0x4dd   :  { %v3432_v16 = vadd.f32 %v3431_v29, %v12696_v52 }
 0x4de   :  { %v3695_v42 = vpop.f32.mrf.mxu3  ;;  %v3520_v60 = vpop.f32.mrf.mxu1 }
 0x4df   :  { %v13060_v59 = vadd.f32 %v3695_v42, %v3607_v25  ;;  %v3521_v19 = vadd.f32 %v3520_v60, %v3432_v16  ;;  %3470 = vmatmul.bf16.gmra.mxu0 %v14977_v41 }
 0x4e0   :  { %3648 = vmatmul.bf16.gmra.mxu2 %v14979_v3 }
 0x4e1   :  { %3559 = vmatmul.bf16.gmra.mxu1 %v14978_v31 }
 0x4e3   :  { %3737 = vmatmul.bf16.gmra.mxu3 %v14912_v56  ;;  %v3609_v15 = vpop.f32.mrf.mxu2 }
 0x4e4   :  { %v3610_v7 = vadd.f32 %v3609_v15, %v3521_v19  ;;  %v3433_v53 = vpop.f32.mrf.mxu0  ;;  %v14981_v19 = vld [vmem:[#allocation62_spill] sm:$0xff]  ;;  %v14982_v15 = vld [vmem:[#allocation120_spill] sm:$0xff] }
 0x4e5   :  { %v3434_v13 = vadd.f32 %v3433_v53, %v12702_v4  ;;  %v9810_v4 = vld [vmem:[%s14355_s1 + $0x10c] sm:$0xf] }
 0x4e6   :  { %v3698_v23 = vpop.f32.mrf.mxu3  ;;  %v3522_v28 = vpop.f32.mrf.mxu1 }
 0x4e7   :  { %v13067_v52 = vadd.f32 %v3698_v23, %v3610_v7  ;;  %v3523_v36 = vadd.f32 %v3522_v28, %v3434_v13  ;;  %v8445_v23 = vld [vmem:[%s14355_s1 + $0x218] sm:$0xf0] }
 0x4eb   :  { %v3611_v25 = vpop.f32.mrf.mxu2 }
 0x4ec   :  { %v3612_v42 = vadd.f32 %v3611_v25, %v3523_v36  ;;  %v3436_v16 = vpop.f32.mrf.mxu0 }
 0x4ed   :  { %v3437_v60 = vadd.f32 %v3436_v16, %v12729_v44  ;;  %v8317_v44 = vld [vmem:[%s14355_s1 + $0x118] sm:$0xf0] }
 0x4ee   :  { %v3700_v29 = vpop.f32.mrf.mxu3  ;;  %v3525_v31 = vpop.f32.mrf.mxu1  ;;  %v8320_v7 = vor.u32 %v9810_v4, %v8317_v44  ;;  %v8189_v4 = vld [vmem:[%s14355_s1 + $0x18] sm:$0xf0] }
 0x4ef   :  { %v13070_v3 = vadd.f32 %v3700_v29, %v3612_v42  ;;  %v3526_v56 = vadd.f32 %v3525_v31, %v3437_v60  ;;  %3475 = vmatmul.bf16.gmra.mxu0 %v14980_v48  ;;  %v9842_v31 = vld [vmem:[%s14355_s1 + $0x20c] sm:$0xf] }
 0x4f0   :  { %3653 = vmatmul.bf16.gmra.mxu2 %v14982_v15  ;;  %v8448_v13 = vor.u32 %v9842_v31, %v8445_v23  ;;  %v9778_v60 = vld [vmem:[%s14355_s1 + $0xc] sm:$0xf] }
 0x4f1   :  { %3564 = vmatmul.bf16.gmra.mxu1 %v14981_v19  ;;  %3948 = vmatpush.bf16.msrb.mxu2 %v8320_v7  ;;  %v8192_v31 = vor.u32 %v9778_v60, %v8189_v4  ;;  %v14985_v15 = vld [vmem:[#allocation124_spill] sm:$0xff]  ;;  %v14986_v19 = vld [vmem:[#allocation69_spill] sm:$0xff] }
 0x4f2   :  { %4037 = vmatpush.bf16.msrb.mxu3 %v8448_v13 }
 0x4f3   :  { %3742 = vmatmul.bf16.gmra.mxu3 %v14916_v14  ;;  %v3614_v53 = vpop.f32.mrf.mxu2  ;;  %3859 = vmatpush.bf16.msrb.mxu1 %v8192_v31  ;;  %v14984_v14 = vld [vmem:[#allocation66_spill] sm:$0xff] }
 0x4f4   :  { %v3615_v28 = vadd.f32 %v3614_v53, %v3526_v56  ;;  %v3438_v25 = vpop.f32.mrf.mxu0 }
 0x4f5   :  { %v3439_v42 = vadd.f32 %v3438_v25, %v12741_v10  ;;  %v14983_v25 = vld [vmem:[#allocation65_spill] sm:$0xff] }
 0x4f6   :  { %v3703_v36 = vpop.f32.mrf.mxu3  ;;  %v3527_v29 = vpop.f32.mrf.mxu1 }
 0x4f7   :  { %v13089_v16 = vadd.f32 %v3703_v36, %v3615_v28  ;;  %v3528_v44 = vadd.f32 %v3527_v29, %v3439_v42 }
 0x4fb   :  { %v3616_v56 = vpop.f32.mrf.mxu2 }
 0x4fc   :  { %v3617_v23 = vadd.f32 %v3616_v56, %v3528_v44  ;;  %v3441_v53 = vpop.f32.mrf.mxu0 }
 0x4fd   :  { %v3442_v10 = vadd.f32 %v3441_v53, %v12750_v12 }
 0x4fe   :  { %v3705_v7 = vpop.f32.mrf.mxu3  ;;  %v3530_v13 = vpop.f32.mrf.mxu1 }
 0x4ff   :  { %v13098_v28 = vadd.f32 %v3705_v7, %v3617_v23  ;;  %v3531_v36 = vadd.f32 %v3530_v13, %v3442_v10  ;;  %3480 = vmatmul.bf16.gmra.mxu0 %v14983_v25 }
 0x500   :  { %3658 = vmatmul.bf16.gmra.mxu2 %v14985_v15 }
 0x501   :  { %3569 = vmatmul.bf16.gmra.mxu1 %v14984_v14 }
 0x503   :  { %3747 = vmatmul.bf16.gmra.mxu3 %v14920_v17  ;;  %v3619_v42 = vpop.f32.mrf.mxu2 }
 0x504   :  { %v3620_v29 = vadd.f32 %v3619_v42, %v3531_v36  ;;  %v3443_v4 = vpop.f32.mrf.mxu0  ;;  %v14987_v36 = vld [vmem:[#allocation70_spill] sm:$0xff]  ;;  %v14988_v42 = vld [vmem:[#allocation128_spill] sm:$0xff] }
 0x505   :  { %v3444_v44 = vadd.f32 %v3443_v4, %v12756_v18  ;;  %v9966_v18 = vld [vmem:[%s14355_s1 + $0x5ec] sm:$0xf] }
 0x506   :  { %v3708_v60 = vpop.f32.mrf.mxu3  ;;  %v3532_v31 = vpop.f32.mrf.mxu1  ;;  %v9970_v4 = vld [vmem:[%s14355_s1 + $0x60c] sm:$0xf] }
 0x507   :  { %v13105_v12 = vadd.f32 %v3708_v60, %v3620_v29  ;;  %v3533_v56 = vadd.f32 %v3532_v31, %v3444_v44  ;;  %v8685_v60 = vld [vmem:[%s14355_s1 + $0x3f8] sm:$0xf0] }
 0x508   :  { %v8957_v44 = vld [vmem:[%s14355_s1 + $0x618] sm:$0xf0] }
 0x50b   :  { %v3621_v23 = vpop.f32.mrf.mxu2 }
 0x50c   :  { %v3622_v7 = vadd.f32 %v3621_v23, %v3533_v56  ;;  %v3446_v10 = vpop.f32.mrf.mxu0  ;;  %v8960_v23 = vor.u32 %v9970_v4, %v8957_v44 }
 0x50d   :  { %v3447_v13 = vadd.f32 %v3446_v10, %v12783_v8  ;;  %v8941_v8 = vld [vmem:[%s14355_s1 + $0x5f8] sm:$0xf0] }
 0x50e   :  { %v3710_v53 = vpop.f32.mrf.mxu3  ;;  %v3535_v14 = vpop.f32.mrf.mxu1  ;;  %v8944_v29 = vor.u32 %v9966_v18, %v8941_v8  ;;  %4393 = vmatpush.bf16.msra.mxu3 %v8960_v23 }
 0x50f   :  { %v13108_v15 = vadd.f32 %v3710_v53, %v3622_v7  ;;  %v3536_v17 = vadd.f32 %v3535_v14, %v3447_v13  ;;  %3485 = vmatmul.bf16.gmra.mxu0 %v14986_v19  ;;  %v9902_v14 = vld [vmem:[%s14355_s1 + $0x3ec] sm:$0xf] }
 0x510   :  { %3663 = vmatmul.bf16.gmra.mxu2 %v14988_v42  ;;  %v8688_v56 = vor.u32 %v9902_v14, %v8685_v60  ;;  %v8813_v14 = vld [vmem:[%s14355_s1 + $0x4f8] sm:$0xf0]  ;;  %v14991_v42 = vld [vmem:[#allocation132_spill] sm:$0xff] }
 0x511   :  { %3574 = vmatmul.bf16.gmra.mxu1 %v14987_v36  ;;  %4297 = vmatpush.bf16.msra.mxu2 %v8944_v29  ;;  %v14992_v36 = vld [vmem:[#allocation77_spill] sm:$0xff] }
 0x512   :  { %4119 = vmatpush.bf16.msra.mxu0 %v8688_v56 }
 0x513   :  { %3752 = vmatmul.bf16.gmra.mxu3 %v14924_v26  ;;  %v3624_v31 = vpop.f32.mrf.mxu2  ;;  %v9934_v26 = vld [vmem:[%s14355_s1 + $0x4ec] sm:$0xf] }
 0x514   :  { %v3625_v7 = vadd.f32 %v3624_v31, %v3536_v17  ;;  %v3448_v10 = vpop.f32.mrf.mxu0  ;;  %v8816_v17 = vor.u32 %v9934_v26, %v8813_v14 }
 0x515   :  { %v3449_v13 = vadd.f32 %v3448_v10, %v12795_v0  ;;  %v14990_v10 = vld [vmem:[#allocation74_spill] sm:$0xff] }
 0x516   :  { %v3713_v53 = vpop.f32.mrf.mxu3  ;;  %v3537_v18 = vpop.f32.mrf.mxu1  ;;  %4208 = vmatpush.bf16.msra.mxu1 %v8816_v17 }
 0x517   :  { %v13133_v8 = vadd.f32 %v3713_v53, %v3625_v7  ;;  %v3538_v60 = vadd.f32 %v3537_v18, %v3449_v13  ;;  %v14989_v53 = vld [vmem:[#allocation73_spill] sm:$0xff] }
 0x51b   :  { %v3626_v4 = vpop.f32.mrf.mxu2 }
 0x51c   :  { %v3627_v29 = vadd.f32 %v3626_v4, %v3538_v60  ;;  %v3451_v0 = vpop.f32.mrf.mxu0 }
 0x51d   :  { %v3452_v31 = vadd.f32 %v3451_v0, %v12804_v58 }
 0x51e   :  { %v3715_v44 = vpop.f32.mrf.mxu3  ;;  %v3540_v56 = vpop.f32.mrf.mxu1 }
 0x51f   :  { %v13142_v23 = vadd.f32 %v3715_v44, %v3627_v29  ;;  %v3541_v7 = vadd.f32 %v3540_v56, %v3452_v31  ;;  %3490 = vmatmul.bf16.gmra.mxu0 %v14989_v53 }
 0x520   :  { %3668 = vmatmul.bf16.gmra.mxu2 %v14991_v42 }
 0x521   :  { %3579 = vmatmul.bf16.gmra.mxu1 %v14990_v10 }
 0x523   :  { %3757 = vmatmul.bf16.gmra.mxu3 %v14928_v37  ;;  %v3629_v26 = vpop.f32.mrf.mxu2 }
 0x524   :  { %v3630_v13 = vadd.f32 %v3629_v26, %v3541_v7  ;;  %v3453_v14 = vpop.f32.mrf.mxu0  ;;  %v14993_v7 = vld [vmem:[#allocation11_spill] sm:$0xff]  ;;  %v9962_v26 = vld [vmem:[%s14355_s1 + $0x5cc] sm:$0xf] }
 0x525   :  { %v3454_v60 = vadd.f32 %v3453_v14, %v12810_v61  ;;  %v14994_v61 = vld [vmem:[#allocation12_spill] sm:$0xff] }
 0x526   :  { %v3718_v18 = vpop.f32.mrf.mxu3  ;;  %v3542_v17 = vpop.f32.mrf.mxu1 }
 0x527   :  { %v13149_v58 = vadd.f32 %v3718_v18, %v3630_v13  ;;  %v3543_v4 = vadd.f32 %v3542_v17, %v3454_v60  ;;  %v8669_v18 = vld [vmem:[%s14355_s1 + $0x3d8] sm:$0xf0] }
 0x52b   :  { %v3631_v29 = vpop.f32.mrf.mxu2 }
 0x52c   :  { %v3632_v44 = vadd.f32 %v3631_v29, %v3543_v4  ;;  %v3456_v31 = vpop.f32.mrf.mxu0 }
 0x52d   :  { %v3457_v56 = vadd.f32 %v3456_v31, %v12830_v54  ;;  %v8925_v54 = vld [vmem:[%s14355_s1 + $0x5d8] sm:$0xf0]  ;;  %v9930_v31 = vld [vmem:[%s14355_s1 + $0x4cc] sm:$0xf] }
 0x52e   :  { %v3720_v0 = vpop.f32.mrf.mxu3  ;;  %v3545_v10 = vpop.f32.mrf.mxu1  ;;  %v8928_v13 = vor.u32 %v9962_v26, %v8925_v54 }
 0x52f   :  { %v13152_v42 = vadd.f32 %v3720_v0, %v3632_v44  ;;  %v3546_v37 = vadd.f32 %v3545_v10, %v3457_v56  ;;  %8993 = vmatmul.msk.bf16.vlgmr.msrb.gmra.mxu0 %vm1934_vm0, %v14992_v36  ;;  %v9898_v10 = vld [vmem:[%s14355_s1 + $0x3cc] sm:$0xf]  ;;  %v8797_v56 = vld [vmem:[%s14355_s1 + $0x4d8] sm:$0xf0] }
 0x530   :  { %3949 = vmatmul.bf16.vlgmr.msrb.gmra.mxu2 %v14994_v61  ;;  %v8672_v60 = vor.u32 %v9898_v10, %v8669_v18  ;;  %v8800_v61 = vor.u32 %v9930_v31, %v8797_v56 }
 0x531   :  { %3860 = vmatmul.bf16.vlgmr.msrb.gmra.mxu1 %v14993_v7  ;;  %4298 = vmatpush.bf16.msra.mxu2 %v8928_v13 }
 0x532   :  { %4120 = vmatpush.bf16.msra.mxu0 %v8672_v60  ;;  %4209 = vmatpush.bf16.msra.mxu1 %v8800_v61  ;;  %v14995_v60 = vld [vmem:[#allocation80_spill] sm:$0xff] }
 0x533   :  { %4038 = vmatmul.bf16.vlgmr.msrb.gmra.mxu3 %v14932_v62  ;;  %v3634_v14 = vpop.f32.mrf.mxu2 }
 0x534   :  { %v3635_v62 = vadd.f32 %v3634_v14, %v3546_v37  ;;  %v3458_v4 = vpop.f32.mrf.mxu0 }
 0x535   :  { %v3459_v29 = vadd.f32 %v3458_v4, %v12842_v9 }
 0x536   :  { %v3723_v17 = vpop.f32.mrf.mxu3  ;;  %v3547_v44 = vpop.f32.mrf.mxu1 }
 0x537   :  { %v13172_v0 = vadd.f32 %v3723_v17, %v3635_v62  ;;  %v3548_v7 = vadd.f32 %v3547_v44, %v3459_v29  ;;  %v14996_v62 = vld [vmem:[#allocation15_spill] sm:$0xff]  ;;  %v14997_v17 = vld [vmem:[#allocation16_spill] sm:$0xff] }
 0x53b   :  { %v3636_v37 = vpop.f32.mrf.mxu2 }
 0x53c   :  { %v3637_v26 = vadd.f32 %v3636_v37, %v3548_v7  ;;  %v3461_v10 = vpop.f32.mrf.mxu0 }
 0x53d   :  { %v3462_v9 = vadd.f32 %v3461_v10, %v12850_v39 }
 0x53e   :  { %v3725_v54 = vpop.f32.mrf.mxu3  ;;  %v3550_v13 = vpop.f32.mrf.mxu1 }
 0x53f   :  { %v13181_v18 = vadd.f32 %v3725_v54, %v3637_v26  ;;  %v3551_v14 = vadd.f32 %v3550_v13, %v3462_v9  ;;  %8994 = vmatmul.msk.bf16.gmra.mxu0 %vm1934_vm0, %v14995_v60 }
 0x540   :  { %3954 = vmatmul.bf16.gmra.mxu2 %v14997_v17  ;;  %v14998_v17 = vld [vmem:[#allocation83_spill] sm:$0xff] }
 0x541   :  { %3865 = vmatmul.bf16.gmra.mxu1 %v14996_v62 }
 0x543   :  { %4043 = vmatmul.bf16.gmra.mxu3 %v14936_v24  ;;  %v3639_v4 = vpop.f32.mrf.mxu2 }
 0x544   :  { %v3640_v29 = vadd.f32 %v3639_v4, %v3551_v14  ;;  %v3463_v31 = vpop.f32.mrf.mxu0  ;;  %v14999_v14 = vld [vmem:[#allocation19_spill] sm:$0xff]  ;;  %v9958_v4 = vld [vmem:[%s14355_s1 + $0x5ac] sm:$0xf] }
 0x545   :  { %v3464_v56 = vadd.f32 %v3463_v31, %v12856_v40  ;;  %v15000_v40 = vld [vmem:[#allocation20_spill] sm:$0xff]  ;;  %v8653_v31 = vld [vmem:[%s14355_s1 + $0x3b8] sm:$0xf0] }
 0x546   :  { %v3728_v44 = vpop.f32.mrf.mxu3  ;;  %v3552_v39 = vpop.f32.mrf.mxu1 }
 0x547   :  { %v13189_v7 = vadd.f32 %v3728_v44, %v3640_v29  ;;  %v3553_v61 = vadd.f32 %v3552_v39, %v3464_v56  ;;  %v9894_v29 = vld [vmem:[%s14355_s1 + $0x3ac] sm:$0xf] }
 0x548   :  { %v8656_v39 = vor.u32 %v9894_v29, %v8653_v31 }
 0x54a   :  { %4121 = vmatpush.bf16.msra.mxu0 %v8656_v39  ;;  %v15001_v39 = vld [vmem:[#allocation86_spill] sm:$0xff] }
 0x54b   :  { %v3641_v37 = vpop.f32.mrf.mxu2 }
 0x54c   :  { %v3642_v26 = vadd.f32 %v3641_v37, %v3553_v61  ;;  %v3466_v10 = vpop.f32.mrf.mxu0 }
 0x54d   :  { %v3467_v9 = vadd.f32 %v3466_v10, %v12876_v11  ;;  %v8909_v11 = vld [vmem:[%s14355_s1 + $0x5b8] sm:$0xf0] }
 0x54e   :  { %v3730_v54 = vpop.f32.mrf.mxu3  ;;  %v3555_v13 = vpop.f32.mrf.mxu1  ;;  %v8912_v44 = vor.u32 %v9958_v4, %v8909_v11 }
 0x54f   :  { %v13192_v62 = vadd.f32 %v3730_v54, %v3642_v26  ;;  %v3556_v24 = vadd.f32 %v3555_v13, %v3467_v9  ;;  %8995 = vmatmul.msk.bf16.gmra.mxu0 %vm1934_vm0, %v14998_v17  ;;  %v9926_v9 = vld [vmem:[%s14355_s1 + $0x4ac] sm:$0xf]  ;;  %v8781_v13 = vld [vmem:[%s14355_s1 + $0x4b8] sm:$0xf0] }
 0x550   :  { %3959 = vmatmul.bf16.gmra.mxu2 %v15000_v40  ;;  %v8784_v40 = vor.u32 %v9926_v9, %v8781_v13 }
 0x551   :  { %3870 = vmatmul.bf16.gmra.mxu1 %v14999_v14  ;;  %4299 = vmatpush.bf16.msra.mxu2 %v8912_v44 }
 0x552   :  { %4210 = vmatpush.bf16.msra.mxu1 %v8784_v40 }
 0x553   :  { %4048 = vmatmul.bf16.gmra.mxu3 %v14940_v5  ;;  %v3644_v56 = vpop.f32.mrf.mxu2 }
 0x554   :  { %v3645_v5 = vadd.f32 %v3644_v56, %v3556_v24  ;;  %v3468_v37 = vpop.f32.mrf.mxu0 }
 0x555   :  { %v3469_v26 = vadd.f32 %v3468_v37, %v12888_v57 }
 0x556   :  { %v3733_v61 = vpop.f32.mrf.mxu3  ;;  %v3557_v54 = vpop.f32.mrf.mxu1 }
 0x557   :  { %v13212_v10 = vadd.f32 %v3733_v61, %v3645_v5  ;;  %v3558_v14 = vadd.f32 %v3557_v54, %v3469_v26  ;;  %v15002_v5 = vld [vmem:[#allocation23_spill] sm:$0xff]  ;;  %v15003_v61 = vld [vmem:[#allocation24_spill] sm:$0xff] }
 0x55b   :  { %v3646_v24 = vpop.f32.mrf.mxu2 }
 0x55c   :  { %v3647_v4 = vadd.f32 %v3646_v24, %v3558_v14  ;;  %v3471_v29 = vpop.f32.mrf.mxu0 }
 0x55d   :  { %v3472_v57 = vadd.f32 %v3471_v29, %v12896_v51 }
 0x55e   :  { %v3735_v11 = vpop.f32.mrf.mxu3  ;;  %v3560_v44 = vpop.f32.mrf.mxu1 }
 0x55f   :  { %v13221_v31 = vadd.f32 %v3735_v11, %v3647_v4  ;;  %v3561_v56 = vadd.f32 %v3560_v44, %v3472_v57  ;;  %8996 = vmatmul.msk.bf16.gmra.mxu0 %vm1934_vm0, %v15001_v39 }
 0x560   :  { %3964 = vmatmul.bf16.gmra.mxu2 %v15003_v61  ;;  %v15004_v61 = vld [vmem:[#allocation89_spill] sm:$0xff] }
 0x561   :  { %3875 = vmatmul.bf16.gmra.mxu1 %v15002_v5 }
 0x563   :  { %4053 = vmatmul.bf16.gmra.mxu3 %v14944_v35  ;;  %v3649_v37 = vpop.f32.mrf.mxu2 }
 0x564   :  { %v3650_v26 = vadd.f32 %v3649_v37, %v3561_v56  ;;  %v3473_v9 = vpop.f32.mrf.mxu0  ;;  %v15005_v56 = vld [vmem:[#allocation27_spill] sm:$0xff]  ;;  %v9954_v37 = vld [vmem:[%s14355_s1 + $0x58c] sm:$0xf] }
 0x565   :  { %v3474_v13 = vadd.f32 %v3473_v9, %v12902_v45  ;;  %v15006_v45 = vld [vmem:[#allocation28_spill] sm:$0xff]  ;;  %v8637_v9 = vld [vmem:[%s14355_s1 + $0x398] sm:$0xf0] }
 0x566   :  { %v3738_v54 = vpop.f32.mrf.mxu3  ;;  %v3562_v51 = vpop.f32.mrf.mxu1 }
 0x567   :  { %v13229_v14 = vadd.f32 %v3738_v54, %v3650_v26  ;;  %v3563_v40 = vadd.f32 %v3562_v51, %v3474_v13  ;;  %v9890_v26 = vld [vmem:[%s14355_s1 + $0x38c] sm:$0xf] }
 0x568   :  { %v8640_v51 = vor.u32 %v9890_v26, %v8637_v9 }
 0x56a   :  { %4122 = vmatpush.bf16.msra.mxu0 %v8640_v51  ;;  %v15007_v51 = vld [vmem:[#allocation94_spill] sm:$0xff] }
 0x56b   :  { %v3651_v24 = vpop.f32.mrf.mxu2 }
 0x56c   :  { %v3652_v4 = vadd.f32 %v3651_v24, %v3563_v40  ;;  %v3476_v29 = vpop.f32.mrf.mxu0 }
 0x56d   :  { %v3477_v57 = vadd.f32 %v3476_v29, %v12922_v30  ;;  %v8893_v30 = vld [vmem:[%s14355_s1 + $0x598] sm:$0xf0] }
 0x56e   :  { %v3740_v11 = vpop.f32.mrf.mxu3  ;;  %v3565_v44 = vpop.f32.mrf.mxu1  ;;  %v8896_v54 = vor.u32 %v9954_v37, %v8893_v30 }
 0x56f   :  { %v13232_v5 = vadd.f32 %v3740_v11, %v3652_v4  ;;  %v3566_v35 = vadd.f32 %v3565_v44, %v3477_v57  ;;  %8997 = vmatmul.msk.bf16.gmra.mxu0 %vm1934_vm0, %v15004_v61  ;;  %v9922_v57 = vld [vmem:[%s14355_s1 + $0x48c] sm:$0xf]  ;;  %v8765_v44 = vld [vmem:[%s14355_s1 + $0x498] sm:$0xf0] }
 0x570   :  { %3969 = vmatmul.bf16.gmra.mxu2 %v15006_v45  ;;  %v8768_v45 = vor.u32 %v9922_v57, %v8765_v44 }
 0x571   :  { %3880 = vmatmul.bf16.gmra.mxu1 %v15005_v56  ;;  %4300 = vmatpush.bf16.msra.mxu2 %v8896_v54 }
 0x572   :  { %4211 = vmatpush.bf16.msra.mxu1 %v8768_v45 }
 0x573   :  { %4058 = vmatmul.bf16.gmra.mxu3 %v14948_v20  ;;  %v3654_v13 = vpop.f32.mrf.mxu2 }
 0x574   :  { %v3655_v20 = vadd.f32 %v3654_v13, %v3566_v35  ;;  %v3478_v24 = vpop.f32.mrf.mxu0 }
 0x575   :  { %v3479_v4 = vadd.f32 %v3478_v24, %v12934_v55 }
 0x576   :  { %v3743_v40 = vpop.f32.mrf.mxu3  ;;  %v3567_v11 = vpop.f32.mrf.mxu1 }
 0x577   :  { %v13252_v29 = vadd.f32 %v3743_v40, %v3655_v20  ;;  %v3568_v56 = vadd.f32 %v3567_v11, %v3479_v4  ;;  %v15008_v20 = vld [vmem:[#allocation31_spill] sm:$0xff]  ;;  %v15009_v40 = vld [vmem:[#allocation32_spill] sm:$0xff] }
 0x57b   :  { %v3656_v35 = vpop.f32.mrf.mxu2 }
 0x57c   :  { %v3657_v37 = vadd.f32 %v3656_v35, %v3568_v56  ;;  %v3481_v26 = vpop.f32.mrf.mxu0 }
 0x57d   :  { %v3482_v55 = vadd.f32 %v3481_v26, %v12942_v22 }
 0x57e   :  { %v3745_v30 = vpop.f32.mrf.mxu3  ;;  %v3570_v54 = vpop.f32.mrf.mxu1 }
 0x57f   :  { %v13261_v9 = vadd.f32 %v3745_v30, %v3657_v37  ;;  %v3571_v13 = vadd.f32 %v3570_v54, %v3482_v55  ;;  %8998 = vmatmul.msk.bf16.gmra.mxu0 %vm1934_vm0, %v15007_v51 }
 0x580   :  { %3974 = vmatmul.bf16.gmra.mxu2 %v15009_v40  ;;  %v15010_v40 = vld [vmem:[#allocation97_spill] sm:$0xff] }
 0x581   :  { %3885 = vmatmul.bf16.gmra.mxu1 %v15008_v20 }
 0x583   :  { %4063 = vmatmul.bf16.gmra.mxu3 %v14952_v27  ;;  %v3659_v24 = vpop.f32.mrf.mxu2 }
 0x584   :  { %v3660_v4 = vadd.f32 %v3659_v24, %v3571_v13  ;;  %v3483_v57 = vpop.f32.mrf.mxu0  ;;  %v15011_v13 = vld [vmem:[#allocation35_spill] sm:$0xff]  ;;  %v9950_v24 = vld [vmem:[%s14355_s1 + $0x56c] sm:$0xf] }
 0x585   :  { %v3484_v44 = vadd.f32 %v3483_v57, %v12948_v46  ;;  %v15012_v46 = vld [vmem:[#allocation36_spill] sm:$0xff]  ;;  %v8621_v57 = vld [vmem:[%s14355_s1 + $0x378] sm:$0xf0] }
 0x586   :  { %v3748_v11 = vpop.f32.mrf.mxu3  ;;  %v3572_v22 = vpop.f32.mrf.mxu1 }
 0x587   :  { %v13269_v56 = vadd.f32 %v3748_v11, %v3660_v4  ;;  %v3573_v45 = vadd.f32 %v3572_v22, %v3484_v44  ;;  %v9886_v4 = vld [vmem:[%s14355_s1 + $0x36c] sm:$0xf] }
 0x588   :  { %v8624_v22 = vor.u32 %v9886_v4, %v8621_v57 }
 0x58a   :  { %4123 = vmatpush.bf16.msra.mxu0 %v8624_v22 }
 0x58b   :  { %v3661_v35 = vpop.f32.mrf.mxu2 }
 0x58c   :  { %v3662_v37 = vadd.f32 %v3661_v35, %v3573_v45  ;;  %v3486_v26 = vpop.f32.mrf.mxu0 }
 0x58d   :  { %v3487_v55 = vadd.f32 %v3486_v26, %v12968_v50  ;;  %v8877_v50 = vld [vmem:[%s14355_s1 + $0x578] sm:$0xf0] }
 0x58e   :  { %v3750_v30 = vpop.f32.mrf.mxu3  ;;  %v3575_v54 = vpop.f32.mrf.mxu1  ;;  %v8880_v11 = vor.u32 %v9950_v24, %v8877_v50 }
 0x58f   :  { %v13272_v20 = vadd.f32 %v3750_v30, %v3662_v37  ;;  %v3576_v27 = vadd.f32 %v3575_v54, %v3487_v55  ;;  %8999 = vmatmul.msk.bf16.gmra.mxu0 %vm1934_vm0, %v15010_v40  ;;  %v15013_v37 = vld [vmem:[#allocation148_spill] sm:$0xff] }
 0x590   :  { %3979 = vmatmul.bf16.gmra.mxu2 %v15012_v46  ;;  %v9918_v54 = vld [vmem:[%s14355_s1 + $0x46c] sm:$0xf] }
 0x591   :  { %3890 = vmatmul.bf16.gmra.mxu1 %v15011_v13  ;;  %4301 = vmatpush.bf16.msra.mxu2 %v8880_v11  ;;  %v8749_v13 = vld [vmem:[%s14355_s1 + $0x478] sm:$0xf0] }
 0x592   :  { %v8752_v24 = vor.u32 %v9918_v54, %v8749_v13 }
 0x593   :  { %4068 = vmatmul.bf16.gmra.mxu3 %v14956_v43  ;;  %v3664_v44 = vpop.f32.mrf.mxu2 }
 0x594   :  { %v3665_v43 = vadd.f32 %v3664_v44, %v3576_v27  ;;  %v3488_v35 = vpop.f32.mrf.mxu0  ;;  %4212 = vmatpush.bf16.msra.mxu1 %v8752_v24 }
 0x595   :  { %v3489_v30 = vadd.f32 %v3488_v35, %v15013_v37  ;;  %v15015_v35 = vld [vmem:[#allocation39_spill] sm:$0xff]  ;;  %v15016_v37 = vld [vmem:[#allocation40_spill] sm:$0xff] }
 0x596   :  { %v3753_v45 = vpop.f32.mrf.mxu3  ;;  %v3577_v26 = vpop.f32.mrf.mxu1 }
 0x597   :  { %v13292_v55 = vadd.f32 %v3753_v45, %v3665_v43  ;;  %v3578_v46 = vadd.f32 %v3577_v26, %v3489_v30  ;;  %v15014_v45 = vld [vmem:[#allocation102_spill] sm:$0xff]  ;;  %v15017_v30 = vld [vmem:[#allocation41_spill] sm:$0xff] }
 0x59b   :  { %v3666_v27 = vpop.f32.mrf.mxu2 }
 0x59c   :  { %v3667_v50 = vadd.f32 %v3666_v27, %v3578_v46  ;;  %v3491_v11 = vpop.f32.mrf.mxu0 }
 0x59d   :  { %v3492_v57 = vadd.f32 %v3491_v11, %v12988_v38 }
 0x59e   :  { %v3755_v4 = vpop.f32.mrf.mxu3  ;;  %v3580_v44 = vpop.f32.mrf.mxu1 }
 0x59f   :  { %v13301_v22 = vadd.f32 %v3755_v4, %v3667_v50  ;;  %v3581_v43 = vadd.f32 %v3580_v44, %v3492_v57  ;;  %9000 = vmatmul.msk.bf16.gmra.mxu0 %vm1934_vm0, %v15014_v45 }
 0x5a0   :  { %3984 = vmatmul.bf16.gmra.mxu2 %v15016_v37 }
 0x5a1   :  { %3895 = vmatmul.bf16.gmra.mxu1 %v15015_v35  ;;  %v10144_v35 = vld [vmem:[%s14356_s2] sm:$0xf] }
 0x5a2   :  { %v13314_v37 = vperm.slane %v10144_v35, 3 }
 0x5a3   :  { %4073 = vmatmul.bf16.gmra.mxu3 %v15017_v30  ;;  %v3669_v26 = vpop.f32.mrf.mxu2 }
 0x5a4   :  { %v3670_v54 = vadd.f32 %v3669_v26, %v3581_v43  ;;  %v3493_v46 = vpop.f32.mrf.mxu0 }
 0x5a5   :  { %v3494_v24 = vadd.f32 %v3493_v46, %v12994_v33  ;;  %v15018_v33 = vld [vmem:[#allocation105_spill] sm:$0xff]  ;;  %v15020_v46 = vld [vmem:[#allocation44_spill] sm:$0xff] }
 0x5a6   :  { %v3758_v13 = vpop.f32.mrf.mxu3  ;;  %v3582_v38 = vpop.f32.mrf.mxu1 }
 0x5a7   :  { %v13309_v27 = vadd.f32 %v3758_v13, %v3670_v54  ;;  %v3583_v50 = vadd.f32 %v3582_v38, %v3494_v24  ;;  %v15019_v13 = vld [vmem:[#allocation43_spill] sm:$0xff]  ;;  %v9946_v24 = vld [vmem:[%s14355_s1 + $0x54c] sm:$0xf] }
 0x5a8   :  { %v9882_v38 = vld [vmem:[%s14355_s1 + $0x34c] sm:$0xf] }
 0x5ab   :  { %v3671_v4 = vpop.f32.mrf.mxu2 }
 0x5ac   :  { %v3672_v11 = vadd.f32 %v3671_v4, %v3583_v50  ;;  %v3772_v44 = vpop.f32.mrf.mxu0  ;;  %v8605_v4 = vld [vmem:[%s14355_s1 + $0x358] sm:$0xf0] }
 0x5ad   :  { %v3773_v43 = vadd.f32 %v3772_v44, %v13013_v63  ;;  %v8861_v63 = vld [vmem:[%s14355_s1 + $0x558] sm:$0xf0] }
 0x5ae   :  { %v3760_v57 = vpop.f32.mrf.mxu3  ;;  %v3861_v30 = vpop.f32.mrf.mxu1  ;;  %v8864_v50 = vor.u32 %v9946_v24, %v8861_v63  ;;  %v9914_v24 = vld [vmem:[%s14355_s1 + $0x44c] sm:$0xf]  ;;  %v8733_v63 = vld [vmem:[%s14355_s1 + $0x458] sm:$0xf0] }
 0x5af   :  { %v13317_v26 = vadd.f32 %v3760_v57, %v3672_v11  ;;  %9001 = vmatmul.msk.bf16.gmra.mxu0 %vm1934_vm0, %v15018_v33  ;;  %v3862_v54 = vadd.f32 %v3861_v30, %v13314_v37  ;;  %v8608_v57 = vor.u32 %v9882_v38, %v8605_v4  ;;  %v4477_v33 = vmax.f32 %v3773_v43, 0.0 }
 0x5b0   :  { %3989 = vmatmul.bf16.gmra.mxu2 %v15020_v46 }
 0x5b1   :  { %3900 = vmatmul.bf16.gmra.mxu1 %v15019_v13  ;;  %4302 = vmatpush.bf16.msra.mxu2 %v8864_v50 }
 0x5b2   :  { %4124 = vmatpush.bf16.msra.mxu0 %v8608_v57 }
 0x5b3   :  { %4078 = vmatmul.bf16.gmra.mxu3 %v14967_v6  ;;  %v3950_v11 = vpop.f32.mrf.mxu2 }
 0x5b4   :  { %v3951_v6 = vadd.f32 %v3950_v11, %v3862_v54  ;;  %v3774_v35 = vpop.f32.mrf.mxu0  ;;  %v8736_v54 = vor.u32 %v9914_v24, %v8733_v63 }
 0x5b5   :  { %v3775_v30 = vadd.f32 %v3774_v35, %v13022_v21 }
 0x5b6   :  { %v4039_v44 = vpop.f32.mrf.mxu3  ;;  %v3863_v13 = vpop.f32.mrf.mxu1  ;;  %4213 = vmatpush.bf16.msra.mxu1 %v8736_v54 }
 0x5b7   :  { %v13338_v46 = vadd.f32 %v4039_v44, %v3951_v6  ;;  %v4481_v38 = vmax.f32 %v3775_v30, 0.0  ;;  %v3864_v21 = vadd.f32 %v3863_v13, %v13314_v37  ;;  %v15024_v30 = vld [vmem:[#allocation47_spill] sm:$0xff] }
 0x5b9   :  { %15021 = vst [vmem:[#allocation99_spill] sm:$0xff] %v13338_v46  ;;  %v13346_v4 = vpack.c.bf16 %v4481_v38, %v4477_v33  ;;  %v15023_v46 = vld [vmem:[#allocation110_spill] sm:$0xff]  ;;  %v15025_v33 = vld [vmem:[#allocation48_spill] sm:$0xff] }
 0x5bb   :  { %15022 = vst [vmem:[#allocation45_spill] sm:$0xff] %v13346_v4  ;;  %v3952_v50 = vpop.f32.mrf.mxu2 }
 0x5bc   :  { %v3953_v11 = vadd.f32 %v3952_v50, %v3864_v21  ;;  %v3777_v6 = vpop.f32.mrf.mxu0 }
 0x5bd   :  { %v3778_v44 = vadd.f32 %v3777_v6, %v13029_v32 }
 0x5be   :  { %v4041_v57 = vpop.f32.mrf.mxu3  ;;  %v3866_v35 = vpop.f32.mrf.mxu1 }
 0x5bf   :  { %v13350_v1 = vadd.f32 %v4041_v57, %v3953_v11  ;;  %9002 = vmatmul.msk.bf16.gmra.mxu0 %vm1934_vm0, %v15023_v46  ;;  %v3867_v43 = vadd.f32 %v3866_v35, %v13314_v37  ;;  %v4485_v50 = vmax.f32 %v3778_v44, 0.0  ;;  %v15027_v46 = vld [vmem:[#allocation114_spill] sm:$0xff]  ;;  %v15028_v44 = vld [vmem:[#allocation51_spill] sm:$0xff] }
 0x5c0   :  { %3994 = vmatmul.bf16.gmra.mxu2 %v15025_v33 }
 0x5c1   :  { %3905 = vmatmul.bf16.gmra.mxu1 %v15024_v30 }
 0x5c3   :  { %4083 = vmatmul.bf16.gmra.mxu3 %v14971_v2  ;;  %v3955_v13 = vpop.f32.mrf.mxu2 }
 0x5c4   :  { %v3956_v24 = vadd.f32 %v3955_v13, %v3867_v43  ;;  %v3779_v38 = vpop.f32.mrf.mxu0 }
 0x5c5   :  { %v3780_v32 = vadd.f32 %v3779_v38, %v13032_v47 }
 0x5c6   :  { %v4044_v63 = vpop.f32.mrf.mxu3  ;;  %v3868_v54 = vpop.f32.mrf.mxu1 }
 0x5c7   :  { %v13359_v21 = vadd.f32 %v4044_v63, %v3956_v24  ;;  %v4489_v11 = vmax.f32 %v3780_v32, 0.0  ;;  %v3869_v6 = vadd.f32 %v3868_v54, %v13314_v37  ;;  %v15029_v24 = vld [vmem:[#allocation52_spill] sm:$0xff]  ;;  %v8589_v32 = vld [vmem:[%s14355_s1 + $0x338] sm:$0xf0] }
 0x5c8   :  { %v9942_v63 = vld [vmem:[%s14355_s1 + $0x52c] sm:$0xf] }
 0x5c9   :  { %v13361_v57 = vpack.c.bf16 %v4489_v11, %v4485_v50 }
 0x5cb   :  { %15026 = vst [vmem:[#allocation49_spill] sm:$0xff] %v13361_v57  ;;  %v3957_v35 = vpop.f32.mrf.mxu2  ;;  %v15035_v57 = vld [vmem:[#allocation122_spill] sm:$0xff] }
 0x5cc   :  { %v3958_v30 = vadd.f32 %v3957_v35, %v3869_v6  ;;  %v3782_v4 = vpop.f32.mrf.mxu0 }
 0x5cd   :  { %v3783_v2 = vadd.f32 %v3782_v4, %v13051_v34  ;;  %v8845_v34 = vld [vmem:[%s14355_s1 + $0x538] sm:$0xf0]  ;;  %v9878_v4 = vld [vmem:[%s14355_s1 + $0x32c] sm:$0xf] }
 0x5ce   :  { %v4046_v33 = vpop.f32.mrf.mxu3  ;;  %v3871_v43 = vpop.f32.mrf.mxu1  ;;  %v8848_v38 = vor.u32 %v9942_v63, %v8845_v34  ;;  %v8592_v50 = vor.u32 %v9878_v4, %v8589_v32 }
 0x5cf   :  { %v13365_v13 = vadd.f32 %v4046_v33, %v3958_v30  ;;  %9003 = vmatmul.msk.bf16.gmra.mxu0 %vm1934_vm0, %v15027_v46  ;;  %v3872_v47 = vadd.f32 %v3871_v43, %v13314_v37  ;;  %v9910_v43 = vld [vmem:[%s14355_s1 + $0x42c] sm:$0xf] }
 0x5d0   :  { %3999 = vmatmul.bf16.gmra.mxu2 %v15029_v24  ;;  %4125 = vmatpush.bf16.msra.mxu0 %v8592_v50  ;;  %v4493_v24 = vmax.f32 %v3783_v2, 0.0 }
 0x5d1   :  { %3910 = vmatmul.bf16.gmra.mxu1 %v15028_v44  ;;  %4303 = vmatpush.bf16.msra.mxu2 %v8848_v38  ;;  %v8717_v44 = vld [vmem:[%s14355_s1 + $0x438] sm:$0xf0] }
 0x5d3   :  { %4088 = vmatmul.bf16.gmra.mxu3 %v14974_v49  ;;  %v3960_v54 = vpop.f32.mrf.mxu2 }
 0x5d4   :  { %v3961_v49 = vadd.f32 %v3960_v54, %v3872_v47  ;;  %v3784_v6 = vpop.f32.mrf.mxu0  ;;  %v8720_v47 = vor.u32 %v9910_v43, %v8717_v44  ;;  %v15033_v43 = vld [vmem:[#allocation56_spill] sm:$0xff] }
 0x5d5   :  { %v3785_v35 = vadd.f32 %v3784_v6, %v13060_v59  ;;  %v15031_v6 = vld [vmem:[#allocation118_spill] sm:$0xff] }
 0x5d6   :  { %v4049_v11 = vpop.f32.mrf.mxu3  ;;  %v3873_v30 = vpop.f32.mrf.mxu1  ;;  %4214 = vmatpush.bf16.msra.mxu1 %v8720_v47 }
 0x5d7   :  { %v13386_v33 = vadd.f32 %v4049_v11, %v3961_v49  ;;  %v4497_v63 = vmax.f32 %v3785_v35, 0.0  ;;  %v3874_v59 = vadd.f32 %v3873_v30, %v13314_v37  ;;  %v15032_v35 = vld [vmem:[#allocation55_spill] sm:$0xff] }
 0x5d9   :  { %v13394_v34 = vpack.c.bf16 %v4497_v63, %v4493_v24 }
 0x5db   :  { %15030 = vst [vmem:[#allocation53_spill] sm:$0xff] %v13394_v34  ;;  %v3962_v4 = vpop.f32.mrf.mxu2 }
 0x5dc   :  { %v3963_v38 = vadd.f32 %v3962_v4, %v3874_v59  ;;  %v3787_v54 = vpop.f32.mrf.mxu0 }
 0x5dd   :  { %v3788_v50 = vadd.f32 %v3787_v54, %v13067_v52 }
 0x5de   :  { %v4051_v32 = vpop.f32.mrf.mxu3  ;;  %v3876_v49 = vpop.f32.mrf.mxu1 }
 0x5df   :  { %v13398_v11 = vadd.f32 %v4051_v32, %v3963_v38  ;;  %9004 = vmatmul.msk.bf16.gmra.mxu0 %vm1934_vm0, %v15031_v6  ;;  %v3877_v2 = vadd.f32 %v3876_v49, %v13314_v37  ;;  %v4501_v4 = vmax.f32 %v3788_v50, 0.0  ;;  %v15036_v50 = vld [vmem:[#allocation59_spill] sm:$0xff] }
 0x5e0   :  { %4004 = vmatmul.bf16.gmra.mxu2 %v15033_v43 }
 0x5e1   :  { %3915 = vmatmul.bf16.gmra.mxu1 %v15032_v35 }
 0x5e3   :  { %4093 = vmatmul.bf16.gmra.mxu3 %v14977_v41  ;;  %v3965_v30 = vpop.f32.mrf.mxu2 }
 0x5e4   :  { %v3966_v44 = vadd.f32 %v3965_v30, %v3877_v2  ;;  %v3789_v63 = vpop.f32.mrf.mxu0 }
 0x5e5   :  { %v3790_v52 = vadd.f32 %v3789_v63, %v13070_v3 }
 0x5e6   :  { %v4054_v24 = vpop.f32.mrf.mxu3  ;;  %v3878_v47 = vpop.f32.mrf.mxu1 }
 0x5e7   :  { %v13407_v59 = vadd.f32 %v4054_v24, %v3966_v44  ;;  %v4505_v38 = vmax.f32 %v3790_v52, 0.0  ;;  %v3879_v54 = vadd.f32 %v3878_v47, %v13314_v37  ;;  %v15037_v44 = vld [vmem:[#allocation60_spill] sm:$0xff]  ;;  %v8573_v52 = vld [vmem:[%s14355_s1 + $0x318] sm:$0xf0] }
 0x5e8   :  { %v9938_v24 = vld [vmem:[%s14355_s1 + $0x50c] sm:$0xf] }
 0x5e9   :  { %v13409_v32 = vpack.c.bf16 %v4505_v38, %v4501_v4 }
 0x5eb   :  { %15034 = vst [vmem:[#allocation57_spill] sm:$0xff] %v13409_v32  ;;  %v3967_v49 = vpop.f32.mrf.mxu2  ;;  %v15044_v32 = vld [vmem:[#allocation130_spill] sm:$0xff] }
 0x5ec   :  { %v3968_v35 = vadd.f32 %v3967_v49, %v3879_v54  ;;  %v3792_v34 = vpop.f32.mrf.mxu0 }
 0x5ed   :  { %v3793_v41 = vadd.f32 %v3792_v34, %v13089_v16  ;;  %v8829_v16 = vld [vmem:[%s14355_s1 + $0x518] sm:$0xf0]  ;;  %v9874_v34 = vld [vmem:[%s14355_s1 + $0x30c] sm:$0xf] }
 0x5ee   :  { %v4056_v43 = vpop.f32.mrf.mxu3  ;;  %v3881_v2 = vpop.f32.mrf.mxu1  ;;  %v8832_v63 = vor.u32 %v9938_v24, %v8829_v16  ;;  %v8576_v4 = vor.u32 %v9874_v34, %v8573_v52 }
 0x5ef   :  { %v13413_v30 = vadd.f32 %v4056_v43, %v3968_v35  ;;  %9005 = vmatmul.msk.bf16.gmra.mxu0 %vm1934_vm0, %v15035_v57  ;;  %v3882_v3 = vadd.f32 %v3881_v2, %v13314_v37  ;;  %v9906_v2 = vld [vmem:[%s14355_s1 + $0x40c] sm:$0xf] }
 0x5f0   :  { %4009 = vmatmul.bf16.gmra.mxu2 %v15037_v44  ;;  %4126 = vmatpush.bf16.msra.mxu0 %v8576_v4  ;;  %v4509_v44 = vmax.f32 %v3793_v41, 0.0 }
 0x5f1   :  { %3920 = vmatmul.bf16.gmra.mxu1 %v15036_v50  ;;  %4304 = vmatpush.bf16.msra.mxu2 %v8832_v63  ;;  %v8701_v50 = vld [vmem:[%s14355_s1 + $0x418] sm:$0xf0] }
 0x5f3   :  { %4098 = vmatmul.bf16.gmra.mxu3 %v14980_v48  ;;  %v3970_v47 = vpop.f32.mrf.mxu2 }
 0x5f4   :  { %v3971_v48 = vadd.f32 %v3970_v47, %v3882_v3  ;;  %v3794_v54 = vpop.f32.mrf.mxu0  ;;  %v8704_v3 = vor.u32 %v9906_v2, %v8701_v50  ;;  %v15041_v2 = vld [vmem:[#allocation64_spill] sm:$0xff] }
 0x5f5   :  { %v3795_v49 = vadd.f32 %v3794_v54, %v13098_v28  ;;  %v15039_v54 = vld [vmem:[#allocation126_spill] sm:$0xff] }
 0x5f6   :  { %v4059_v38 = vpop.f32.mrf.mxu3  ;;  %v3883_v35 = vpop.f32.mrf.mxu1  ;;  %4215 = vmatpush.bf16.msra.mxu1 %v8704_v3 }
 0x5f7   :  { %v13434_v43 = vadd.f32 %v4059_v38, %v3971_v48  ;;  %v4513_v24 = vmax.f32 %v3795_v49, 0.0  ;;  %v3884_v28 = vadd.f32 %v3883_v35, %v13314_v37  ;;  %v15040_v49 = vld [vmem:[#allocation63_spill] sm:$0xff] }
 0x5f9   :  { %v13442_v16 = vpack.c.bf16 %v4513_v24, %v4509_v44 }
 0x5fb   :  { %15038 = vst [vmem:[#allocation61_spill] sm:$0xff] %v13442_v16  ;;  %v3972_v34 = vpop.f32.mrf.mxu2 }
 0x5fc   :  { %v3973_v63 = vadd.f32 %v3972_v34, %v3884_v28  ;;  %v3797_v47 = vpop.f32.mrf.mxu0 }
 0x5fd   :  { %v3798_v4 = vadd.f32 %v3797_v47, %v13105_v12 }
 0x5fe   :  { %v4061_v52 = vpop.f32.mrf.mxu3  ;;  %v3886_v48 = vpop.f32.mrf.mxu1 }
 0x5ff   :  { %v13446_v38 = vadd.f32 %v4061_v52, %v3973_v63  ;;  %9006 = vmatmul.msk.bf16.gmra.mxu0 %vm1934_vm0, %v15039_v54  ;;  %v3887_v41 = vadd.f32 %v3886_v48, %v13314_v37  ;;  %v4517_v34 = vmax.f32 %v3798_v4, 0.0  ;;  %v15045_v4 = vld [vmem:[#allocation67_spill] sm:$0xff] }
 0x600   :  { %4014 = vmatmul.bf16.gmra.mxu2 %v15041_v2 }
 0x601   :  { %3925 = vmatmul.bf16.gmra.mxu1 %v15040_v49 }
 0x603   :  { %4103 = vmatmul.bf16.gmra.mxu3 %v14983_v25  ;;  %v3975_v35 = vpop.f32.mrf.mxu2 }
 0x604   :  { %v3976_v50 = vadd.f32 %v3975_v35, %v3887_v41  ;;  %v3799_v24 = vpop.f32.mrf.mxu0 }
 0x605   :  { %v3800_v12 = vadd.f32 %v3799_v24, %v13108_v15  ;;  %v10067_v24 = vld [vmem:[#allocation2 + $0x2ec] sm:$0xf0] }
 0x606   :  { %v4064_v44 = vpop.f32.mrf.mxu3  ;;  %v3888_v3 = vpop.f32.mrf.mxu1 }
 0x607   :  { %v13455_v28 = vadd.f32 %v4064_v44, %v3976_v50  ;;  %v4521_v63 = vmax.f32 %v3800_v12, 0.0  ;;  %v3889_v47 = vadd.f32 %v3888_v3, %v13314_v37  ;;  %v15046_v50 = vld [vmem:[#allocation68_spill] sm:$0xff]  ;;  %v9395_v44 = vld [vmem:[#allocation2 + $0x2e0] sm:$0xf] }
 0x608   :  { %v9139_v12 = vld [vmem:[#allocation2 + $0xe0] sm:$0xf]  ;;  %v9396_v3 = vor.u32 %v10067_v24, %v9395_v44 }
 0x609   :  { %v13457_v52 = vpack.c.bf16 %v4521_v63, %v4517_v34  ;;  %v10003_v34 = vld [vmem:[#allocation2 + $0xec] sm:$0xf0] }
 0x60a   :  { %5623 = vmatpush.bf16.msrb.mxu2 %v9396_v3 }
 0x60b   :  { %15042 = vst [vmem:[#allocation65_spill] sm:$0xff] %v13457_v52  ;;  %v3977_v48 = vpop.f32.mrf.mxu2 }
 0x60c   :  { %v3978_v49 = vadd.f32 %v3977_v48, %v3889_v47  ;;  %v3802_v16 = vpop.f32.mrf.mxu0  ;;  %v9140_v47 = vor.u32 %v10003_v34, %v9139_v12 }
 0x60d   :  { %v3803_v25 = vadd.f32 %v3802_v16, %v13133_v8  ;;  %v9523_v8 = vld [vmem:[#allocation2 + $0x3e0] sm:$0xf]  ;;  %v10099_v16 = vld [vmem:[#allocation2 + $0x3ec] sm:$0xf0] }
 0x60e   :  { %v4066_v2 = vpop.f32.mrf.mxu3  ;;  %v3891_v41 = vpop.f32.mrf.mxu1  ;;  %v9524_v48 = vor.u32 %v10099_v16, %v9523_v8  ;;  %5445 = vmatpush.bf16.msrb.mxu0 %v9140_v47  ;;  %v15050_v47 = vld [vmem:[#allocation72_spill] sm:$0xff] }
 0x60f   :  { %v13461_v35 = vadd.f32 %v4066_v2, %v3978_v49  ;;  %9007 = vmatmul.msk.bf16.gmra.mxu0 %vm1934_vm0, %v15044_v32  ;;  %v3892_v15 = vadd.f32 %v3891_v41, %v13314_v37  ;;  %v10035_v32 = vld [vmem:[#allocation2 + $0x1ec] sm:$0xf0]  ;;  %v4525_v44 = vmax.f32 %v3803_v25, 0.0 }
 0x610   :  { %4019 = vmatmul.bf16.gmra.mxu2 %v15046_v50  ;;  %5712 = vmatpush.bf16.msrb.mxu3 %v9524_v48  ;;  %v9267_v50 = vld [vmem:[#allocation2 + $0x1e0] sm:$0xf] }
 0x611   :  { %15043 = vst [vmem:[#allocation69_spill] sm:$0xff] %v13461_v35  ;;  %3930 = vmatmul.bf16.gmra.mxu1 %v15045_v4  ;;  %v9268_v35 = vor.u32 %v10035_v32, %v9267_v50  ;;  %v15049_v32 = vld [vmem:[#allocation71_spill] sm:$0xff] }
 0x613   :  { %4108 = vmatmul.bf16.gmra.mxu3 %v14986_v19  ;;  %v3980_v63 = vpop.f32.mrf.mxu2  ;;  %5534 = vmatpush.bf16.msrb.mxu1 %v9268_v35 }
 0x614   :  { %v3981_v49 = vadd.f32 %v3980_v63, %v3892_v15  ;;  %v3804_v52 = vpop.f32.mrf.mxu0  ;;  %v15048_v63 = vld [vmem:[#allocation134_spill] sm:$0xff] }
 0x615   :  { %v3805_v41 = vadd.f32 %v3804_v52, %v13142_v23 }
 0x616   :  { %v4069_v2 = vpop.f32.mrf.mxu3  ;;  %v3893_v4 = vpop.f32.mrf.mxu1 }
 0x617   :  { %v13470_v19 = vadd.f32 %v4069_v2, %v3981_v49  ;;  %v4529_v24 = vmax.f32 %v3805_v41, 0.0  ;;  %v3894_v15 = vadd.f32 %v3893_v4, %v13314_v37 }
 0x619   :  { %v13472_v54 = vpack.c.bf16 %v4529_v24, %v4525_v44 }
 0x61b   :  { %15047 = vst [vmem:[#allocation73_spill] sm:$0xff] %v13472_v54  ;;  %v3982_v12 = vpop.f32.mrf.mxu2 }
 0x61c   :  { %v3983_v34 = vadd.f32 %v3982_v12, %v3894_v15  ;;  %v3807_v8 = vpop.f32.mrf.mxu0 }
 0x61d   :  { %v3808_v23 = vadd.f32 %v3807_v8, %v13149_v58 }
 0x61e   :  { %v4071_v3 = vpop.f32.mrf.mxu3  ;;  %v3896_v52 = vpop.f32.mrf.mxu1 }
 0x61f   :  { %v13476_v16 = vadd.f32 %v4071_v3, %v3983_v34  ;;  %9008 = vmatmul.msk.bf16.gmra.mxu0 %vm1934_vm0, %v15048_v63  ;;  %v3897_v25 = vadd.f32 %v3896_v52, %v13314_v37  ;;  %v4533_v50 = vmax.f32 %v3808_v23, 0.0  ;;  %v15054_v23 = vld [vmem:[#allocation76_spill] sm:$0xff] }
 0x620   :  { %4024 = vmatmul.bf16.gmra.mxu2 %v15050_v47  ;;  %v15053_v47 = vld [vmem:[#allocation75_spill] sm:$0xff] }
 0x621   :  { %3935 = vmatmul.bf16.gmra.mxu1 %v15049_v32  ;;  %v15052_v32 = vld [vmem:[#allocation14_spill] sm:$0xff] }
 0x623   :  { %4113 = vmatmul.bf16.gmra.mxu3 %v14989_v53  ;;  %v3985_v35 = vpop.f32.mrf.mxu2 }
 0x624   :  { %v3986_v48 = vadd.f32 %v3985_v35, %v3897_v25  ;;  %v3809_v2 = vpop.f32.mrf.mxu0  ;;  %v9379_v35 = vld [vmem:[#allocation2 + $0x2c0] sm:$0xf] }
 0x625   :  { %v3810_v58 = vadd.f32 %v3809_v2, %v13152_v42 }
 0x626   :  { %v4074_v49 = vpop.f32.mrf.mxu3  ;;  %v3898_v41 = vpop.f32.mrf.mxu1 }
 0x627   :  { %v13485_v4 = vadd.f32 %v4074_v49, %v3986_v48  ;;  %v4537_v44 = vmax.f32 %v3810_v58, 0.0  ;;  %v3899_v15 = vadd.f32 %v3898_v41, %v13314_v37  ;;  %v10063_v48 = vld [vmem:[#allocation2 + $0x2cc] sm:$0xf0]  ;;  %v9123_v49 = vld [vmem:[#allocation2 + $0xc0] sm:$0xf] }
 0x628   :  { %v9380_v2 = vor.u32 %v10063_v48, %v9379_v35  ;;  %v9999_v58 = vld [vmem:[#allocation2 + $0xcc] sm:$0xf0] }
 0x629   :  { %v13487_v24 = vpack.c.bf16 %v4537_v44, %v4533_v50  ;;  %v10095_v41 = vld [vmem:[#allocation2 + $0x3cc] sm:$0xf0]  ;;  %v9124_v44 = vor.u32 %v9999_v58, %v9123_v49 }
 0x62a   :  { %5624 = vmatpush.bf16.msrb.mxu2 %v9380_v2 }
 0x62b   :  { %15051 = vst [vmem:[#allocation77_spill] sm:$0xff] %v13487_v24  ;;  %v3987_v12 = vpop.f32.mrf.mxu2  ;;  %5446 = vmatpush.bf16.msrb.mxu0 %v9124_v44  ;;  %v15056_v44 = vld [vmem:[#allocation18_spill] sm:$0xff] }
 0x62c   :  { %v3988_v34 = vadd.f32 %v3987_v12, %v3899_v15  ;;  %v3812_v8 = vpop.f32.mrf.mxu0 }
 0x62d   :  { %v3813_v53 = vadd.f32 %v3812_v8, %v13172_v0  ;;  %v9507_v0 = vld [vmem:[#allocation2 + $0x3c0] sm:$0xf] }
 0x62e   :  { %v4076_v3 = vpop.f32.mrf.mxu3  ;;  %v3901_v52 = vpop.f32.mrf.mxu1  ;;  %v9508_v15 = vor.u32 %v10095_v41, %v9507_v0 }
 0x62f   :  { %v13491_v25 = vadd.f32 %v4076_v3, %v3988_v34  ;;  %4127 = vmatmul.bf16.vlgmr.msra.gmra.mxu0 %v15052_v32  ;;  %v3902_v42 = vadd.f32 %v3901_v52, %v13314_v37  ;;  %v9251_v32 = vld [vmem:[#allocation2 + $0x1c0] sm:$0xf] }
 0x630   :  { %4305 = vmatmul.bf16.vlgmr.msra.gmra.mxu2 %v15054_v23  ;;  %5713 = vmatpush.bf16.msrb.mxu3 %v9508_v15  ;;  %v4541_v23 = vmax.f32 %v3813_v53, 0.0  ;;  %v15057_v15 = vld [vmem:[#allocation78_spill] sm:$0xff] }
 0x631   :  { %4216 = vmatmul.bf16.vlgmr.msra.gmra.mxu1 %v15053_v47  ;;  %v10031_v47 = vld [vmem:[#allocation2 + $0x1cc] sm:$0xf0] }
 0x632   :  { %v9252_v48 = vor.u32 %v10031_v47, %v9251_v32 }
 0x633   :  { %9009 = vmatmul.msk.bf16.vlgmr.msra.gmra.mxu3 %vm1934_vm0, %v14992_v36  ;;  %v3990_v50 = vpop.f32.mrf.mxu2 }
 0x634   :  { %v3991_v12 = vadd.f32 %v3990_v50, %v3902_v42  ;;  %v3814_v3 = vpop.f32.mrf.mxu0  ;;  %5535 = vmatpush.bf16.msrb.mxu1 %v9252_v48 }
 0x635   :  { %v3815_v8 = vadd.f32 %v3814_v3, %v13181_v18 }
 0x636   :  { %v4079_v34 = vpop.f32.mrf.mxu3  ;;  %v3903_v52 = vpop.f32.mrf.mxu1 }
 0x637   :  { %v13500_v36 = vadd.f32 %v4079_v34, %v3991_v12  ;;  %v4545_v35 = vmax.f32 %v3815_v8, 0.0  ;;  %v3904_v42 = vadd.f32 %v3903_v52, %v13314_v37  ;;  %v15058_v12 = vld [vmem:[#allocation79_spill] sm:$0xff] }
 0x639   :  { %v13502_v24 = vpack.c.bf16 %v4545_v35, %v4541_v23 }
 0x63b   :  { %15055 = vst [vmem:[#allocation11_spill] sm:$0xff] %v13502_v24  ;;  %v3992_v49 = vpop.f32.mrf.mxu2 }
 0x63c   :  { %v3993_v58 = vadd.f32 %v3992_v49, %v3904_v42  ;;  %v3817_v0 = vpop.f32.mrf.mxu0 }
 0x63d   :  { %v3818_v18 = vadd.f32 %v3817_v0, %v13189_v7 }
 0x63e   :  { %v4081_v2 = vpop.f32.mrf.mxu3  ;;  %v3906_v41 = vpop.f32.mrf.mxu1 }
 0x63f   :  { %v13506_v50 = vadd.f32 %v4081_v2, %v3993_v58  ;;  %4132 = vmatmul.bf16.gmra.mxu0 %v15056_v44  ;;  %v3907_v53 = vadd.f32 %v3906_v41, %v13314_v37  ;;  %v4549_v23 = vmax.f32 %v3818_v18, 0.0  ;;  %v15061_v18 = vld [vmem:[#allocation82_spill] sm:$0xff] }
 0x640   :  { %4310 = vmatmul.bf16.gmra.mxu2 %v15058_v12  ;;  %v9363_v12 = vld [vmem:[#allocation2 + $0x2a0] sm:$0xf] }
 0x641   :  { %4221 = vmatmul.bf16.gmra.mxu1 %v15057_v15  ;;  %v15060_v15 = vld [vmem:[#allocation81_spill] sm:$0xff] }
 0x643   :  { %9010 = vmatmul.msk.bf16.gmra.mxu3 %vm1934_vm0, %v14995_v60  ;;  %v3995_v34 = vpop.f32.mrf.mxu2 }
 0x644   :  { %v3996_v3 = vadd.f32 %v3995_v34, %v3907_v53  ;;  %v3819_v52 = vpop.f32.mrf.mxu0  ;;  %v15059_v53 = vld [vmem:[#allocation22_spill] sm:$0xff]  ;;  %v10059_v34 = vld [vmem:[#allocation2 + $0x2ac] sm:$0xf0] }
 0x645   :  { %v3820_v7 = vadd.f32 %v3819_v52, %v13192_v62  ;;  %v9995_v52 = vld [vmem:[#allocation2 + $0xac] sm:$0xf0] }
 0x646   :  { %v4084_v8 = vpop.f32.mrf.mxu3  ;;  %v3908_v32 = vpop.f32.mrf.mxu1 }
 0x647   :  { %v13515_v47 = vadd.f32 %v4084_v8, %v3996_v3  ;;  %v4553_v35 = vmax.f32 %v3820_v7, 0.0  ;;  %v3909_v42 = vadd.f32 %v3908_v32, %v13314_v37  ;;  %v9107_v3 = vld [vmem:[#allocation2 + $0xa0] sm:$0xf]  ;;  %v9364_v8 = vor.u32 %v10059_v34, %v9363_v12  ;;  %v10091_v7 = vld [vmem:[#allocation2 + $0x3ac] sm:$0xf0] }
 0x649   :  { %v13517_v48 = vpack.c.bf16 %v4553_v35, %v4549_v23  ;;  %v9108_v23 = vor.u32 %v9995_v52, %v9107_v3  ;;  %5625 = vmatpush.bf16.msrb.mxu2 %v9364_v8 }
 0x64b   :  { %v3997_v49 = vpop.f32.mrf.mxu2  ;;  %5447 = vmatpush.bf16.msrb.mxu0 %v9108_v23  ;;  %v15063_v23 = vld [vmem:[#allocation26_spill] sm:$0xff] }
 0x64c   :  { %v3998_v58 = vadd.f32 %v3997_v49, %v3909_v42  ;;  %v3822_v0 = vpop.f32.mrf.mxu0 }
 0x64d   :  { %v3823_v60 = vadd.f32 %v3822_v0, %v13212_v10  ;;  %v9491_v10 = vld [vmem:[#allocation2 + $0x3a0] sm:$0xf] }
 0x64e   :  { %v4086_v2 = vpop.f32.mrf.mxu3  ;;  %v3911_v41 = vpop.f32.mrf.mxu1  ;;  %v9492_v35 = vor.u32 %v10091_v7, %v9491_v10 }
 0x64f   :  { %v13521_v44 = vadd.f32 %v4086_v2, %v3998_v58  ;;  %4137 = vmatmul.bf16.gmra.mxu0 %v15059_v53  ;;  %v3912_v62 = vadd.f32 %v3911_v41, %v13314_v37  ;;  %v9235_v41 = vld [vmem:[#allocation2 + $0x1a0] sm:$0xf]  ;;  %v10027_v53 = vld [vmem:[#allocation2 + $0x1ac] sm:$0xf0] }
 0x650   :  { %4315 = vmatmul.bf16.gmra.mxu2 %v15061_v18  ;;  %5714 = vmatpush.bf16.msrb.mxu3 %v9492_v35  ;;  %v9236_v12 = vor.u32 %v10027_v53, %v9235_v41  ;;  %v15064_v35 = vld [vmem:[#allocation84_spill] sm:$0xff] }
 0x651   :  { %4226 = vmatmul.bf16.gmra.mxu1 %v15060_v15  ;;  %v4557_v15 = vmax.f32 %v3823_v60, 0.0 }
 0x652   :  { %5536 = vmatpush.bf16.msrb.mxu1 %v9236_v12 }
 0x653   :  { %9011 = vmatmul.msk.bf16.gmra.mxu3 %vm1934_vm0, %v14998_v17  ;;  %v4000_v32 = vpop.f32.mrf.mxu2 }
 0x654   :  { %v4001_v42 = vadd.f32 %v4000_v32, %v3912_v62  ;;  %v3824_v58 = vpop.f32.mrf.mxu0 }
 0x655   :  { %v3825_v2 = vadd.f32 %v3824_v58, %v13221_v31 }
 0x656   :  { %v4089_v49 = vpop.f32.mrf.mxu3  ;;  %v3913_v0 = vpop.f32.mrf.mxu1 }
 0x657   :  { %v13530_v17 = vadd.f32 %v4089_v49, %v4001_v42  ;;  %v4561_v18 = vmax.f32 %v3825_v2, 0.0  ;;  %v3914_v62 = vadd.f32 %v3913_v0, %v13314_v37  ;;  %v15065_v42 = vld [vmem:[#allocation85_spill] sm:$0xff] }
 0x659   :  { %v13532_v34 = vpack.c.bf16 %v4561_v18, %v4557_v15 }
 0x65b   :  { %15062 = vst [vmem:[#allocation12_spill] sm:$0xff] %v13532_v34  ;;  %v4002_v3 = vpop.f32.mrf.mxu2 }
 0x65c   :  { %v4003_v52 = vadd.f32 %v4002_v3, %v3914_v62  ;;  %v3827_v10 = vpop.f32.mrf.mxu0 }
 0x65d   :  { %v3828_v31 = vadd.f32 %v3827_v10, %v13229_v14 }
 0x65e   :  { %v4091_v8 = vpop.f32.mrf.mxu3  ;;  %v3916_v7 = vpop.f32.mrf.mxu1 }
 0x65f   :  { %v13536_v32 = vadd.f32 %v4091_v8, %v4003_v52  ;;  %4142 = vmatmul.bf16.gmra.mxu0 %v15063_v23  ;;  %v3917_v60 = vadd.f32 %v3916_v7, %v13314_v37  ;;  %v4565_v15 = vmax.f32 %v3828_v31, 0.0  ;;  %v15068_v31 = vld [vmem:[#allocation88_spill] sm:$0xff] }
 0x660   :  { %4320 = vmatmul.bf16.gmra.mxu2 %v15065_v42  ;;  %v9347_v42 = vld [vmem:[#allocation2 + $0x280] sm:$0xf] }
 0x661   :  { %4231 = vmatmul.bf16.gmra.mxu1 %v15064_v35  ;;  %v15067_v35 = vld [vmem:[#allocation87_spill] sm:$0xff] }
 0x663   :  { %9012 = vmatmul.msk.bf16.gmra.mxu3 %vm1934_vm0, %v15001_v39  ;;  %v4005_v49 = vpop.f32.mrf.mxu2 }
 0x664   :  { %v4006_v58 = vadd.f32 %v4005_v49, %v3917_v60  ;;  %v3829_v0 = vpop.f32.mrf.mxu0  ;;  %v15066_v60 = vld [vmem:[#allocation30_spill] sm:$0xff]  ;;  %v10055_v49 = vld [vmem:[#allocation2 + $0x28c] sm:$0xf0] }
 0x665   :  { %v3830_v14 = vadd.f32 %v3829_v0, %v13232_v5  ;;  %v9991_v0 = vld [vmem:[#allocation2 + $0x8c] sm:$0xf0] }
 0x666   :  { %v4094_v2 = vpop.f32.mrf.mxu3  ;;  %v3918_v41 = vpop.f32.mrf.mxu1 }
 0x667   :  { %v13545_v53 = vadd.f32 %v4094_v2, %v4006_v58  ;;  %v4569_v18 = vmax.f32 %v3830_v14, 0.0  ;;  %v3919_v62 = vadd.f32 %v3918_v41, %v13314_v37  ;;  %v9091_v58 = vld [vmem:[#allocation2 + $0x80] sm:$0xf]  ;;  %v9348_v2 = vor.u32 %v10055_v49, %v9347_v42  ;;  %v10087_v14 = vld [vmem:[#allocation2 + $0x38c] sm:$0xf0] }
 0x669   :  { %v13547_v12 = vpack.c.bf16 %v4569_v18, %v4565_v15  ;;  %v9092_v15 = vor.u32 %v9991_v0, %v9091_v58  ;;  %5626 = vmatpush.bf16.msrb.mxu2 %v9348_v2 }
 0x66b   :  { %v4007_v3 = vpop.f32.mrf.mxu2  ;;  %5448 = vmatpush.bf16.msrb.mxu0 %v9092_v15  ;;  %v15070_v15 = vld [vmem:[#allocation34_spill] sm:$0xff] }
 0x66c   :  { %v4008_v52 = vadd.f32 %v4007_v3, %v3919_v62  ;;  %v3832_v10 = vpop.f32.mrf.mxu0 }
 0x66d   :  { %v3833_v39 = vadd.f32 %v3832_v10, %v13252_v29  ;;  %v9475_v29 = vld [vmem:[#allocation2 + $0x380] sm:$0xf] }
 0x66e   :  { %v4096_v8 = vpop.f32.mrf.mxu3  ;;  %v3921_v7 = vpop.f32.mrf.mxu1  ;;  %v9476_v18 = vor.u32 %v10087_v14, %v9475_v29 }
 0x66f   :  { %v13551_v23 = vadd.f32 %v4096_v8, %v4008_v52  ;;  %4147 = vmatmul.bf16.gmra.mxu0 %v15066_v60  ;;  %v3922_v5 = vadd.f32 %v3921_v7, %v13314_v37  ;;  %v9219_v7 = vld [vmem:[#allocation2 + $0x180] sm:$0xf]  ;;  %v10023_v60 = vld [vmem:[#allocation2 + $0x18c] sm:$0xf0] }
 0x670   :  { %4325 = vmatmul.bf16.gmra.mxu2 %v15068_v31  ;;  %5715 = vmatpush.bf16.msrb.mxu3 %v9476_v18  ;;  %v9220_v42 = vor.u32 %v10023_v60, %v9219_v7  ;;  %v15071_v18 = vld [vmem:[#allocation92_spill] sm:$0xff] }
 0x671   :  { %4236 = vmatmul.bf16.gmra.mxu1 %v15067_v35  ;;  %v4573_v35 = vmax.f32 %v3833_v39, 0.0 }
 0x672   :  { %5537 = vmatpush.bf16.msrb.mxu1 %v9220_v42 }
 0x673   :  { %9013 = vmatmul.msk.bf16.gmra.mxu3 %vm1934_vm0, %v15004_v61  ;;  %v4010_v41 = vpop.f32.mrf.mxu2 }
 0x674   :  { %v4011_v62 = vadd.f32 %v4010_v41, %v3922_v5  ;;  %v3834_v52 = vpop.f32.mrf.mxu0 }
 0x675   :  { %v3835_v8 = vadd.f32 %v3834_v52, %v13261_v9 }
 0x676   :  { %v4099_v3 = vpop.f32.mrf.mxu3  ;;  %v3923_v10 = vpop.f32.mrf.mxu1 }
 0x677   :  { %v13560_v61 = vadd.f32 %v4099_v3, %v4011_v62  ;;  %v4577_v31 = vmax.f32 %v3835_v8, 0.0  ;;  %v3924_v5 = vadd.f32 %v3923_v10, %v13314_v37  ;;  %v15072_v62 = vld [vmem:[#allocation93_spill] sm:$0xff] }
 0x679   :  { %v13562_v49 = vpack.c.bf16 %v4577_v31, %v4573_v35 }
 0x67b   :  { %15069 = vst [vmem:[#allocation80_spill] sm:$0xff] %v13562_v49  ;;  %v4012_v58 = vpop.f32.mrf.mxu2 }
 0x67c   :  { %v4013_v0 = vadd.f32 %v4012_v58, %v3924_v5  ;;  %v3837_v29 = vpop.f32.mrf.mxu0 }
 0x67d   :  { %v3838_v9 = vadd.f32 %v3837_v29, %v13269_v56 }
 0x67e   :  { %v4101_v2 = vpop.f32.mrf.mxu3  ;;  %v3926_v14 = vpop.f32.mrf.mxu1 }
 0x67f   :  { %v13566_v41 = vadd.f32 %v4101_v2, %v4013_v0  ;;  %4152 = vmatmul.bf16.gmra.mxu0 %v15070_v15  ;;  %v3927_v39 = vadd.f32 %v3926_v14, %v13314_v37  ;;  %v4581_v35 = vmax.f32 %v3838_v9, 0.0  ;;  %v15075_v9 = vld [vmem:[#allocation96_spill] sm:$0xff] }
 0x680   :  { %4330 = vmatmul.bf16.gmra.mxu2 %v15072_v62  ;;  %v9331_v62 = vld [vmem:[#allocation2 + $0x260] sm:$0xf] }
 0x681   :  { %4241 = vmatmul.bf16.gmra.mxu1 %v15071_v18  ;;  %v15074_v18 = vld [vmem:[#allocation95_spill] sm:$0xff] }
 0x683   :  { %9014 = vmatmul.msk.bf16.gmra.mxu3 %vm1934_vm0, %v15007_v51  ;;  %v4015_v3 = vpop.f32.mrf.mxu2 }
 0x684   :  { %v4016_v52 = vadd.f32 %v4015_v3, %v3927_v39  ;;  %v3839_v10 = vpop.f32.mrf.mxu0  ;;  %v15073_v39 = vld [vmem:[#allocation38_spill] sm:$0xff]  ;;  %v10051_v3 = vld [vmem:[#allocation2 + $0x26c] sm:$0xf0] }
 0x685   :  { %v3840_v56 = vadd.f32 %v3839_v10, %v13272_v20  ;;  %v9987_v10 = vld [vmem:[#allocation2 + $0x6c] sm:$0xf0] }
 0x686   :  { %v4104_v8 = vpop.f32.mrf.mxu3  ;;  %v3928_v7 = vpop.f32.mrf.mxu1 }
 0x687   :  { %v13575_v60 = vadd.f32 %v4104_v8, %v4016_v52  ;;  %v4585_v31 = vmax.f32 %v3840_v56, 0.0  ;;  %v3929_v5 = vadd.f32 %v3928_v7, %v13314_v37  ;;  %v9075_v52 = vld [vmem:[#allocation2 + $0x60] sm:$0xf]  ;;  %v9332_v8 = vor.u32 %v10051_v3, %v9331_v62  ;;  %v10083_v56 = vld [vmem:[#allocation2 + $0x36c] sm:$0xf0] }
 0x689   :  { %v13577_v42 = vpack.c.bf16 %v4585_v31, %v4581_v35  ;;  %v9076_v35 = vor.u32 %v9987_v10, %v9075_v52  ;;  %5627 = vmatpush.bf16.msrb.mxu2 %v9332_v8 }
 0x68b   :  { %v4017_v58 = vpop.f32.mrf.mxu2  ;;  %5449 = vmatpush.bf16.msrb.mxu0 %v9076_v35  ;;  %v15077_v35 = vld [vmem:[#allocation42_spill] sm:$0xff] }
 0x68c   :  { %v4018_v0 = vadd.f32 %v4017_v58, %v3929_v5  ;;  %v3842_v29 = vpop.f32.mrf.mxu0 }
 0x68d   :  { %v3843_v51 = vadd.f32 %v3842_v29, %v13292_v55  ;;  %v9459_v55 = vld [vmem:[#allocation2 + $0x360] sm:$0xf] }
 0x68e   :  { %v4106_v2 = vpop.f32.mrf.mxu3  ;;  %v3931_v14 = vpop.f32.mrf.mxu1  ;;  %v9460_v31 = vor.u32 %v10083_v56, %v9459_v55 }
 0x68f   :  { %v13581_v15 = vadd.f32 %v4106_v2, %v4018_v0  ;;  %4157 = vmatmul.bf16.gmra.mxu0 %v15073_v39  ;;  %v3932_v20 = vadd.f32 %v3931_v14, %v13314_v37  ;;  %v4589_v14 = vmax.f32 %v3843_v51, 0.0 }
 0x690   :  { %4335 = vmatmul.bf16.gmra.mxu2 %v15075_v9  ;;  %5716 = vmatpush.bf16.msrb.mxu3 %v9460_v31  ;;  %v10019_v9 = vld [vmem:[#allocation2 + $0x16c] sm:$0xf0]  ;;  %v15078_v31 = vld [vmem:[#allocation100_spill] sm:$0xff] }
 0x691   :  { %4246 = vmatmul.bf16.gmra.mxu1 %v15074_v18  ;;  %v9203_v18 = vld [vmem:[#allocation2 + $0x160] sm:$0xf] }
 0x692   :  { %v9204_v3 = vor.u32 %v10019_v9, %v9203_v18 }
 0x693   :  { %9015 = vmatmul.msk.bf16.gmra.mxu3 %vm1934_vm0, %v15010_v40  ;;  %v4020_v7 = vpop.f32.mrf.mxu2 }
 0x694   :  { %v4021_v5 = vadd.f32 %v4020_v7, %v3932_v20  ;;  %v3844_v0 = vpop.f32.mrf.mxu0  ;;  %5538 = vmatpush.bf16.msrb.mxu1 %v9204_v3 }
 0x695   :  { %v3845_v2 = vadd.f32 %v3844_v0, %v13301_v22 }
 0x696   :  { %v4109_v58 = vpop.f32.mrf.mxu3  ;;  %v3933_v29 = vpop.f32.mrf.mxu1 }
 0x697   :  { %v13590_v40 = vadd.f32 %v4109_v58, %v4021_v5  ;;  %v4593_v39 = vmax.f32 %v3845_v2, 0.0  ;;  %v3934_v52 = vadd.f32 %v3933_v29, %v13314_v37  ;;  %v15079_v5 = vld [vmem:[#allocation101_spill] sm:$0xff] }
 0x699   :  { %v13592_v62 = vpack.c.bf16 %v4593_v39, %v4589_v14 }
 0x69b   :  { %15076 = vst [vmem:[#allocation15_spill] sm:$0xff] %v13592_v62  ;;  %v4022_v20 = vpop.f32.mrf.mxu2 }
 0x69c   :  { %v4023_v10 = vadd.f32 %v4022_v20, %v3934_v52  ;;  %v3847_v55 = vpop.f32.mrf.mxu0 }
 0x69d   :  { %v3848_v22 = vadd.f32 %v3847_v55, %v13309_v27 }
 0x69e   :  { %v4111_v8 = vpop.f32.mrf.mxu3  ;;  %v3936_v56 = vpop.f32.mrf.mxu1 }
 0x69f   :  { %v13596_v7 = vadd.f32 %v4111_v8, %v4023_v10  ;;  %4162 = vmatmul.bf16.gmra.mxu0 %v15077_v35  ;;  %v3937_v51 = vadd.f32 %v3936_v56, %v13314_v37  ;;  %v4597_v18 = vmax.f32 %v3848_v22, 0.0  ;;  %v15084_v22 = vld [vmem:[#allocation104_spill] sm:$0xff] }
 0x6a0   :  { %4340 = vmatmul.bf16.gmra.mxu2 %v15079_v5  ;;  %v15083_v5 = vld [vmem:[#allocation103_spill] sm:$0xff] }
 0x6a1   :  { %4251 = vmatmul.bf16.gmra.mxu1 %v15078_v31 }
 0x6a3   :  { %9016 = vmatmul.msk.bf16.gmra.mxu3 %vm1934_vm0, %v15014_v45  ;;  %v4025_v58 = vpop.f32.mrf.mxu2  ;;  %v15081_v45 = vld [vmem:[#allocation99_spill] sm:$0xff] }
 0x6a4   :  { %v4026_v0 = vadd.f32 %v4025_v58, %v3937_v51  ;;  %v3849_v29 = vpop.f32.mrf.mxu0  ;;  %v15085_v58 = vld [vmem:[#allocation105_spill] sm:$0xff] }
 0x6a5   :  { %v3850_v27 = vadd.f32 %v3849_v29, %v13317_v26  ;;  %v15082_v26 = vld [vmem:[#allocation46_spill] sm:$0xff] }
 0x6a6   :  { %v4114_v2 = vpop.f32.mrf.mxu3  ;;  %v3938_v14 = vpop.f32.mrf.mxu1 }
 0x6a7   :  { %v13605_v39 = vadd.f32 %v4114_v2, %v4026_v0  ;;  %v4601_v9 = vmax.f32 %v3850_v27, 0.0  ;;  %v3939_v52 = vadd.f32 %v3938_v14, %v13314_v37  ;;  %v9315_v37 = vld [vmem:[#allocation2 + $0x240] sm:$0xf]  ;;  %v10047_v0 = vld [vmem:[#allocation2 + $0x24c] sm:$0xf0] }
 0x6a8   :  { %v9059_v2 = vld [vmem:[#allocation2 + $0x40] sm:$0xf]  ;;  %v9316_v27 = vor.u32 %v10047_v0, %v9315_v37  ;;  %v9983_v14 = vld [vmem:[#allocation2 + $0x4c] sm:$0xf0] }
 0x6a9   :  { %v13607_v3 = vpack.c.bf16 %v4601_v9, %v4597_v18  ;;  %v9443_v18 = vld [vmem:[#allocation2 + $0x340] sm:$0xf]  ;;  %v10079_v9 = vld [vmem:[#allocation2 + $0x34c] sm:$0xf0] }
 0x6aa   :  { %5628 = vmatpush.bf16.msrb.mxu2 %v9316_v27 }
 0x6ab   :  { %15080 = vst [vmem:[#allocation16_spill] sm:$0xff] %v13607_v3  ;;  %v4027_v20 = vpop.f32.mrf.mxu2 }
 0x6ac   :  { %v4028_v10 = vadd.f32 %v4027_v20, %v3939_v52  ;;  %v4128_v55 = vpop.f32.mrf.mxu0 }
 0x6ad   :  { %v4129_v56 = vadd.f32 %v4128_v55, %v15081_v45  ;;  %v9444_v55 = vor.u32 %v10079_v9, %v9443_v18 }
 0x6ae   :  { %v4116_v8 = vpop.f32.mrf.mxu3  ;;  %v4217_v35 = vpop.f32.mrf.mxu1 }
 0x6af   :  { %v13611_v51 = vadd.f32 %v4116_v8, %v4028_v10  ;;  %v4218_v31 = vadd.f32 %v4217_v35, %v4129_v56  ;;  %4167 = vmatmul.bf16.gmra.mxu0 %v15082_v26  ;;  %v9060_v8 = vor.u32 %v9983_v14, %v9059_v2  ;;  %5717 = vmatpush.bf16.msrb.mxu3 %v9444_v55 }
 0x6b0   :  { %4345 = vmatmul.bf16.gmra.mxu2 %v15084_v22  ;;  %v10015_v22 = vld [vmem:[#allocation2 + $0x14c] sm:$0xf0] }
 0x6b1   :  { %4256 = vmatmul.bf16.gmra.mxu1 %v15083_v5  ;;  %5450 = vmatpush.bf16.msrb.mxu0 %v9060_v8  ;;  %v9187_v5 = vld [vmem:[#allocation2 + $0x140] sm:$0xf] }
 0x6b3   :  { %9017 = vmatmul.msk.bf16.gmra.mxu3 %vm1934_vm0, %v15085_v58  ;;  %v4306_v29 = vpop.f32.mrf.mxu2  ;;  %v9188_v58 = vor.u32 %v10015_v22, %v9187_v5 }
 0x6b4   :  { %v4307_v52 = vadd.f32 %v4306_v29, %v4218_v31  ;;  %v4130_v10 = vpop.f32.mrf.mxu0 }
 0x6b5   :  { %v4131_v45 = vadd.f32 %v4130_v10, %v13350_v1  ;;  %5539 = vmatpush.bf16.msrb.mxu1 %v9188_v58  ;;  %v15086_v1 = vld [vmem:[#allocation50_spill] sm:$0xff] }
 0x6b6   :  { %v4395_v20 = vpop.f32.mrf.mxu3  ;;  %v4219_v56 = vpop.f32.mrf.mxu1  ;;  %v15089_v10 = vld [vmem:[#allocation110_spill] sm:$0xff] }
 0x6b7   :  { %v4396_v35 = vadd.f32 %v4395_v20, %v4307_v52  ;;  %v4220_v26 = vadd.f32 %v4219_v56, %v4131_v45  ;;  %v15087_v52 = vld [vmem:[#allocation108_spill] sm:$0xff]  ;;  %v15088_v20 = vld [vmem:[#allocation109_spill] sm:$0xff] }
 0x6b9   :  { %v4478_v27 = vmax.f32 %v4396_v35, 0.0 }
 0x6bb   :  { %v4308_v37 = vpop.f32.mrf.mxu2 }
 0x6bc   :  { %v4309_v0 = vadd.f32 %v4308_v37, %v4220_v26  ;;  %v4133_v31 = vpop.f32.mrf.mxu0 }
 0x6bd   :  { %v4134_v29 = vadd.f32 %v4133_v31, %v13359_v21 }
 0x6be   :  { %v4397_v3 = vpop.f32.mrf.mxu3  ;;  %v4222_v2 = vpop.f32.mrf.mxu1 }
 0x6bf   :  { %v4398_v14 = vadd.f32 %v4397_v3, %v4309_v0  ;;  %v4223_v18 = vadd.f32 %v4222_v2, %v4134_v29  ;;  %4172 = vmatmul.bf16.gmra.mxu0 %v15086_v1  ;;  %v15091_v1 = vld [vmem:[#allocation54_spill] sm:$0xff] }
 0x6c0   :  { %4350 = vmatmul.bf16.gmra.mxu2 %v15088_v20  ;;  %v9299_v20 = vld [vmem:[#allocation2 + $0x220] sm:$0xf] }
 0x6c1   :  { %v4482_v9 = vmax.f32 %v4398_v14, 0.0  ;;  %4261 = vmatmul.bf16.gmra.mxu1 %v15087_v52  ;;  %v15093_v52 = vld [vmem:[#allocation113_spill] sm:$0xff] }
 0x6c3   :  { %9018 = vmatmul.msk.bf16.gmra.mxu3 %vm1934_vm0, %v15089_v10  ;;  %v13625_v8 = vpack.c.bf16 %v4482_v9, %v4478_v27  ;;  %v4311_v55 = vpop.f32.mrf.mxu2  ;;  %v15092_v9 = vld [vmem:[#allocation112_spill] sm:$0xff]  ;;  %v10043_v10 = vld [vmem:[#allocation2 + $0x22c] sm:$0xf0] }
 0x6c4   :  { %v4312_v45 = vadd.f32 %v4311_v55, %v4223_v18  ;;  %v4135_v21 = vpop.f32.mrf.mxu0  ;;  %v9043_v55 = vld [vmem:[#allocation2 + $0x20] sm:$0xf] }
 0x6c5   :  { %15090 = vst [vmem:[#allocation83_spill] sm:$0xff] %v13625_v8  ;;  %v4136_v3 = vadd.f32 %v4135_v21, %v13365_v13  ;;  %v9427_v21 = vld [vmem:[#allocation2 + $0x320] sm:$0xf] }
 0x6c6   :  { %v4400_v56 = vpop.f32.mrf.mxu3  ;;  %v4224_v26 = vpop.f32.mrf.mxu1 }
 0x6c7   :  { %v4401_v5 = vadd.f32 %v4400_v56, %v4312_v45  ;;  %v4225_v22 = vadd.f32 %v4224_v26, %v4136_v3  ;;  %v9300_v45 = vor.u32 %v10043_v10, %v9299_v20  ;;  %v9979_v56 = vld [vmem:[#allocation2 + $0x2c] sm:$0xf0] }
 0x6c8   :  { %v10075_v3 = vld [vmem:[#allocation2 + $0x32c] sm:$0xf0] }
 0x6c9   :  { %v4486_v27 = vmax.f32 %v4401_v5, 0.0  ;;  %5629 = vmatpush.bf16.msrb.mxu2 %v9300_v45 }
 0x6cb   :  { %v4313_v35 = vpop.f32.mrf.mxu2 }
 0x6cc   :  { %v4314_v58 = vadd.f32 %v4313_v35, %v4225_v22  ;;  %v4138_v0 = vpop.f32.mrf.mxu0  ;;  %v9044_v35 = vor.u32 %v9979_v56, %v9043_v55  ;;  %v15095_v56 = vld [vmem:[#allocation116_spill] sm:$0xff] }
 0x6cd   :  { %v4139_v31 = vadd.f32 %v4138_v0, %v13386_v33 }
 0x6ce   :  { %v4402_v37 = vpop.f32.mrf.mxu3  ;;  %v4227_v29 = vpop.f32.mrf.mxu1  ;;  %5451 = vmatpush.bf16.msrb.mxu0 %v9044_v35 }
 0x6cf   :  { %v4403_v2 = vadd.f32 %v4402_v37, %v4314_v58  ;;  %v4228_v14 = vadd.f32 %v4227_v29, %v4139_v31  ;;  %4177 = vmatmul.bf16.gmra.mxu0 %v15091_v1  ;;  %v9428_v58 = vor.u32 %v10075_v3, %v9427_v21  ;;  %v9171_v29 = vld [vmem:[#allocation2 + $0x120] sm:$0xf]  ;;  %v15096_v21 = vld [vmem:[#allocation117_spill] sm:$0xff] }
 0x6d0   :  { %4355 = vmatmul.bf16.gmra.mxu2 %v15093_v52 }
 0x6d1   :  { %v4490_v18 = vmax.f32 %v4403_v2, 0.0  ;;  %4266 = vmatmul.bf16.gmra.mxu1 %v15092_v9  ;;  %5718 = vmatpush.bf16.msrb.mxu3 %v9428_v58  ;;  %v10011_v2 = vld [vmem:[#allocation2 + $0x12c] sm:$0xf0] }
 0x6d2   :  { %v9172_v1 = vor.u32 %v10011_v2, %v9171_v29 }
 0x6d3   :  { %9019 = vmatmul.msk.bf16.gmra.mxu3 %vm1934_vm0, %v15027_v46  ;;  %v13634_v13 = vpack.c.bf16 %v4490_v18, %v4486_v27  ;;  %v4316_v33 = vpop.f32.mrf.mxu2 }
 0x6d4   :  { %v4317_v26 = vadd.f32 %v4316_v33, %v4228_v14  ;;  %v4140_v22 = vpop.f32.mrf.mxu0  ;;  %5540 = vmatpush.bf16.msrb.mxu1 %v9172_v1 }
 0x6d5   :  { %v4141_v37 = vadd.f32 %v4140_v22, %v13398_v11  ;;  %v15094_v11 = vld [vmem:[#allocation58_spill] sm:$0xff] }
 0x6d6   :  { %v4405_v5 = vpop.f32.mrf.mxu3  ;;  %v4229_v0 = vpop.f32.mrf.mxu1 }
 0x6d7   :  { %v4406_v46 = vadd.f32 %v4405_v5, %v4317_v26  ;;  %v4230_v31 = vadd.f32 %v4229_v0, %v4141_v37 }
 0x6d9   :  { %v4494_v33 = vmax.f32 %v4406_v46, 0.0 }
 0x6db   :  { %v4318_v27 = vpop.f32.mrf.mxu2 }
 0x6dc   :  { %v4319_v18 = vadd.f32 %v4318_v27, %v4230_v31  ;;  %v4143_v14 = vpop.f32.mrf.mxu0 }
 0x6dd   :  { %v4144_v52 = vadd.f32 %v4143_v14, %v13407_v59 }
 0x6de   :  { %v4407_v9 = vpop.f32.mrf.mxu3  ;;  %v4232_v20 = vpop.f32.mrf.mxu1 }
 0x6df   :  { %v4408_v10 = vadd.f32 %v4407_v9, %v4319_v18  ;;  %v4233_v55 = vadd.f32 %v4232_v20, %v4144_v52  ;;  %4182 = vmatmul.bf16.gmra.mxu0 %v15094_v11  ;;  %v15097_v9 = vld [vmem:[#allocation62_spill] sm:$0xff]  ;;  %v15098_v20 = vld [vmem:[#allocation120_spill] sm:$0xff]  ;;  %v10039_v11 = vld [vmem:[#allocation2 + $0x20c] sm:$0xf0] }
 0x6e0   :  { %4360 = vmatmul.bf16.gmra.mxu2 %v15096_v21  ;;  %v9411_v21 = vld [vmem:[#allocation2 + $0x300] sm:$0xf] }
 0x6e1   :  { %v4498_v45 = vmax.f32 %v4408_v10, 0.0  ;;  %4271 = vmatmul.bf16.gmra.mxu1 %v15095_v56  ;;  %v15099_v10 = vld [vmem:[#allocation121_spill] sm:$0xff] }
 0x6e2   :  { %v9975_v56 = vld [vmem:[#allocation2 + $0xc] sm:$0xf0] }
 0x6e3   :  { %9020 = vmatmul.msk.bf16.gmra.mxu3 %vm1934_vm0, %v15031_v6  ;;  %v13643_v3 = vpack.c.bf16 %v4498_v45, %v4494_v33  ;;  %v4321_v26 = vpop.f32.mrf.mxu2  ;;  %v9027_v33 = vld [vmem:[#allocation2] sm:$0xf] }
 0x6e4   :  { %v4322_v5 = vadd.f32 %v4321_v26, %v4233_v55  ;;  %v4145_v59 = vpop.f32.mrf.mxu0  ;;  %v9283_v55 = vld [vmem:[#allocation2 + $0x200] sm:$0xf]  ;;  %v10071_v26 = vld [vmem:[#allocation2 + $0x30c] sm:$0xf0] }
 0x6e5   :  { %v4146_v35 = vadd.f32 %v4145_v59, %v13413_v30  ;;  %v9284_v45 = vor.u32 %v10039_v11, %v9283_v55  ;;  %v15101_v11 = vld [vmem:[#allocation124_spill] sm:$0xff] }
 0x6e6   :  { %v4410_v22 = vpop.f32.mrf.mxu3  ;;  %v4234_v58 = vpop.f32.mrf.mxu1 }
 0x6e7   :  { %v4411_v37 = vadd.f32 %v4410_v22, %v4322_v5  ;;  %v4235_v0 = vadd.f32 %v4234_v58, %v4146_v35  ;;  %v9028_v35 = vor.u32 %v9975_v56, %v9027_v33  ;;  %v9412_v58 = vor.u32 %v10071_v26, %v9411_v21  ;;  %5630 = vmatpush.bf16.msrb.mxu2 %v9284_v45  ;;  %v15102_v33 = vld [vmem:[#allocation125_spill] sm:$0xff] }
 0x6e9   :  { %v4502_v14 = vmax.f32 %v4411_v37, 0.0  ;;  %5452 = vmatpush.bf16.msrb.mxu0 %v9028_v35  ;;  %5719 = vmatpush.bf16.msrb.mxu3 %v9412_v58 }
 0x6eb   :  { %v4323_v46 = vpop.f32.mrf.mxu2 }
 0x6ec   :  { %v4324_v31 = vadd.f32 %v4323_v46, %v4235_v0  ;;  %v4148_v2 = vpop.f32.mrf.mxu0 }
 0x6ed   :  { %v4149_v1 = vadd.f32 %v4148_v2, %v13434_v43 }
 0x6ee   :  { %v4412_v29 = vpop.f32.mrf.mxu3  ;;  %v4237_v27 = vpop.f32.mrf.mxu1 }
 0x6ef   :  { %v4413_v18 = vadd.f32 %v4412_v29, %v4324_v31  ;;  %v4238_v6 = vadd.f32 %v4237_v27, %v4149_v1  ;;  %4187 = vmatmul.bf16.gmra.mxu0 %v15097_v9  ;;  %v9155_v31 = vld [vmem:[#allocation2 + $0x100] sm:$0xf]  ;;  %v10007_v29 = vld [vmem:[#allocation2 + $0x10c] sm:$0xf0] }
 0x6f0   :  { %4365 = vmatmul.bf16.gmra.mxu2 %v15099_v10  ;;  %v9156_v2 = vor.u32 %v10007_v29, %v9155_v31 }
 0x6f1   :  { %v4506_v52 = vmax.f32 %v4413_v18, 0.0  ;;  %4276 = vmatmul.bf16.gmra.mxu1 %v15098_v20 }
 0x6f2   :  { %5541 = vmatpush.bf16.msrb.mxu1 %v9156_v2 }
 0x6f3   :  { %9021 = vmatmul.msk.bf16.gmra.mxu3 %vm1934_vm0, %v15035_v57  ;;  %v13652_v30 = vpack.c.bf16 %v4506_v52, %v4502_v14  ;;  %v4326_v43 = vpop.f32.mrf.mxu2 }
 0x6f4   :  { %v4327_v5 = vadd.f32 %v4326_v43, %v4238_v6  ;;  %v4150_v59 = vpop.f32.mrf.mxu0  ;;  %v15103_v43 = vld [vmem:[#allocation126_spill] sm:$0xff] }
 0x6f5   :  { %v4151_v37 = vadd.f32 %v4150_v59, %v13446_v38  ;;  %v15100_v38 = vld [vmem:[#allocation66_spill] sm:$0xff] }
 0x6f6   :  { %v4415_v22 = vpop.f32.mrf.mxu3  ;;  %v4239_v0 = vpop.f32.mrf.mxu1 }
 0x6f7   :  { %v4416_v57 = vadd.f32 %v4415_v22, %v4327_v5  ;;  %v4240_v46 = vadd.f32 %v4239_v0, %v4151_v37  ;;  %v15104_v5 = vld [vmem:[#allocation69_spill] sm:$0xff] }
 0x6f9   :  { %v4510_v10 = vmax.f32 %v4416_v57, 0.0 }
 0x6fb   :  { %v4328_v1 = vpop.f32.mrf.mxu2 }
 0x6fc   :  { %v4329_v27 = vadd.f32 %v4328_v1, %v4240_v46  ;;  %v4153_v6 = vpop.f32.mrf.mxu0 }
 0x6fd   :  { %v4154_v9 = vadd.f32 %v4153_v6, %v13455_v28 }
 0x6fe   :  { %v4417_v18 = vpop.f32.mrf.mxu3  ;;  %v4242_v14 = vpop.f32.mrf.mxu1 }
 0x6ff   :  { %v4418_v52 = vadd.f32 %v4417_v18, %v4329_v27  ;;  %v4243_v20 = vadd.f32 %v4242_v14, %v4154_v9  ;;  %4192 = vmatmul.bf16.gmra.mxu0 %v15100_v38  ;;  %v15105_v27 = vld [vmem:[#allocation70_spill] sm:$0xff]  ;;  %v15106_v9 = vld [vmem:[#allocation128_spill] sm:$0xff]  ;;  %v15107_v14 = vld [vmem:[#allocation129_spill] sm:$0xff] }
 0x700   :  { %4370 = vmatmul.bf16.gmra.mxu2 %v15102_v33  ;;  %v10065_v38 = vld [vmem:[#allocation2 + $0x2e4] sm:$0xf]  ;;  %v9141_v33 = vld [vmem:[#allocation2 + $0xf0] sm:$0xf0] }
 0x701   :  { %v4514_v55 = vmax.f32 %v4418_v52, 0.0  ;;  %4281 = vmatmul.bf16.gmra.mxu1 %v15101_v11  ;;  %v15108_v52 = vld [vmem:[#allocation130_spill] sm:$0xff] }
 0x703   :  { %9022 = vmatmul.msk.bf16.gmra.mxu3 %vm1934_vm0, %v15103_v43  ;;  %v13661_v45 = vpack.c.bf16 %v4514_v55, %v4510_v10  ;;  %v4331_v56 = vpop.f32.mrf.mxu2  ;;  %v9397_v10 = vld [vmem:[#allocation2 + $0x2f0] sm:$0xf0]  ;;  %v10001_v55 = vld [vmem:[#allocation2 + $0xe4] sm:$0xf] }
 0x704   :  { %v4332_v21 = vadd.f32 %v4331_v56, %v4243_v20  ;;  %v4155_v28 = vpop.f32.mrf.mxu0  ;;  %v9400_v11 = vor.u32 %v10065_v38, %v9397_v10  ;;  %v10097_v43 = vld [vmem:[#allocation2 + $0x3e4] sm:$0xf]  ;;  %v9525_v56 = vld [vmem:[#allocation2 + $0x3f0] sm:$0xf0]  ;;  %v15110_v38 = vld [vmem:[#allocation132_spill] sm:$0xff] }
 0x705   :  { %v4156_v22 = vadd.f32 %v4155_v28, %v15104_v5  ;;  %v9144_v5 = vor.u32 %v10001_v55, %v9141_v33  ;;  %v15111_v10 = vld [vmem:[#allocation133_spill] sm:$0xff] }
 0x706   :  { %v4420_v26 = vpop.f32.mrf.mxu3  ;;  %v4244_v59 = vpop.f32.mrf.mxu1  ;;  %5979 = vmatpush.bf16.msra.mxu2 %v9400_v11 }
 0x707   :  { %v4421_v35 = vadd.f32 %v4420_v26, %v4332_v21  ;;  %v4245_v58 = vadd.f32 %v4244_v59, %v4156_v22  ;;  %v9528_v22 = vor.u32 %v10097_v43, %v9525_v56  ;;  %5801 = vmatpush.bf16.msra.mxu0 %v9144_v5 }
 0x709   :  { %v4518_v18 = vmax.f32 %v4421_v35, 0.0  ;;  %6068 = vmatpush.bf16.msra.mxu3 %v9528_v22 }
 0x70b   :  { %v4333_v37 = vpop.f32.mrf.mxu2 }
 0x70c   :  { %v4334_v0 = vadd.f32 %v4333_v37, %v4245_v58  ;;  %v4158_v46 = vpop.f32.mrf.mxu0 }
 0x70d   :  { %v4159_v31 = vadd.f32 %v4158_v46, %v13470_v19 }
 0x70e   :  { %v4422_v57 = vpop.f32.mrf.mxu3  ;;  %v4247_v29 = vpop.f32.mrf.mxu1 }
 0x70f   :  { %v4423_v2 = vadd.f32 %v4422_v57, %v4334_v0  ;;  %v4248_v1 = vadd.f32 %v4247_v29, %v4159_v31  ;;  %4197 = vmatmul.bf16.gmra.mxu0 %v15105_v27  ;;  %v10033_v0 = vld [vmem:[#allocation2 + $0x1e4] sm:$0xf]  ;;  %v9269_v57 = vld [vmem:[#allocation2 + $0x1f0] sm:$0xf0] }
 0x710   :  { %4375 = vmatmul.bf16.gmra.mxu2 %v15107_v14  ;;  %v9272_v46 = vor.u32 %v10033_v0, %v9269_v57  ;;  %v15113_v0 = vld [vmem:[#allocation111_spill] sm:$0xff] }
 0x711   :  { %v4522_v6 = vmax.f32 %v4423_v2, 0.0  ;;  %4286 = vmatmul.bf16.gmra.mxu1 %v15106_v9 }
 0x712   :  { %5890 = vmatpush.bf16.msra.mxu1 %v9272_v46 }
 0x713   :  { %9023 = vmatmul.msk.bf16.gmra.mxu3 %vm1934_vm0, %v15108_v52  ;;  %v13670_v20 = vpack.c.bf16 %v4522_v6, %v4518_v18  ;;  %v4336_v19 = vpop.f32.mrf.mxu2 }
 0x714   :  { %v4337_v21 = vadd.f32 %v4336_v19, %v4248_v1  ;;  %v4160_v28 = vpop.f32.mrf.mxu0 }
 0x715   :  { %v4161_v59 = vadd.f32 %v4160_v28, %v13476_v16  ;;  %v15109_v16 = vld [vmem:[#allocation74_spill] sm:$0xff] }
 0x716   :  { %v4425_v26 = vpop.f32.mrf.mxu3  ;;  %v4249_v35 = vpop.f32.mrf.mxu1 }
 0x717   :  { %v4426_v58 = vadd.f32 %v4425_v26, %v4337_v21  ;;  %v4250_v37 = vadd.f32 %v4249_v35, %v4161_v59 }
 0x719   :  { %v4526_v14 = vmax.f32 %v4426_v58, 0.0 }
 0x71b   :  { %v4338_v31 = vpop.f32.mrf.mxu2 }
 0x71c   :  { %v4339_v29 = vadd.f32 %v4338_v31, %v4250_v37  ;;  %v4163_v1 = vpop.f32.mrf.mxu0  ;;  %v15114_v31 = vld [vmem:[#allocation141_spill] sm:$0xff] }
 0x71d   :  { %v4164_v27 = vadd.f32 %v4163_v1, %v13485_v4  ;;  %v9381_v1 = vld [vmem:[#allocation2 + $0x2d0] sm:$0xf0] }
 0x71e   :  { %v4427_v2 = vpop.f32.mrf.mxu3  ;;  %v4252_v18 = vpop.f32.mrf.mxu1 }
 0x71f   :  { %v4428_v6 = vadd.f32 %v4427_v2, %v4339_v29  ;;  %v4253_v9 = vadd.f32 %v4252_v18, %v4164_v27  ;;  %4202 = vmatmul.bf16.gmra.mxu0 %v15109_v16  ;;  %v15115_v29 = vld [vmem:[#allocation45_spill] sm:$0xff]  ;;  %v10061_v2 = vld [vmem:[#allocation2 + $0x2c4] sm:$0xf] }
 0x720   :  { %4380 = vmatmul.bf16.gmra.mxu2 %v15111_v10  ;;  %v9997_v27 = vld [vmem:[#allocation2 + $0xc4] sm:$0xf]  ;;  %v9509_v16 = vld [vmem:[#allocation2 + $0x3d0] sm:$0xf0] }
 0x721   :  { %v4530_v52 = vmax.f32 %v4428_v6, 0.0  ;;  %4291 = vmatmul.bf16.gmra.mxu1 %v15110_v38  ;;  %v9125_v6 = vld [vmem:[#allocation2 + $0xd0] sm:$0xf0] }
 0x722   :  { %v9128_v10 = vor.u32 %v9997_v27, %v9125_v6 }
 0x723   :  { %9024 = vmatmul.msk.bf16.gmra.mxu3 %vm1934_vm0, %v15048_v63  ;;  %v13679_v55 = vpack.c.bf16 %v4530_v52, %v4526_v14  ;;  %v4341_v19 = vpop.f32.mrf.mxu2 }
 0x724   :  { %v4342_v11 = vadd.f32 %v4341_v19, %v4253_v9  ;;  %v4165_v4 = vpop.f32.mrf.mxu0  ;;  %v10093_v9 = vld [vmem:[#allocation2 + $0x3c4] sm:$0xf]  ;;  %5802 = vmatpush.bf16.msra.mxu0 %v9128_v10 }
 0x725   :  { %15112 = vst [vmem:[#allocation19_spill] sm:$0xff] %v13679_v55  ;;  %v4166_v43 = vadd.f32 %v4165_v4, %v13491_v25  ;;  %v9512_v19 = vor.u32 %v10093_v9, %v9509_v16 }
 0x726   :  { %v4430_v33 = vpop.f32.mrf.mxu3  ;;  %v4254_v56 = vpop.f32.mrf.mxu1 }
 0x727   :  { %v4431_v21 = vadd.f32 %v4430_v33, %v4342_v11  ;;  %v4255_v26 = vadd.f32 %v4254_v56, %v4166_v43  ;;  %6069 = vmatpush.bf16.msra.mxu3 %v9512_v19  ;;  %v10029_v56 = vld [vmem:[#allocation2 + $0x1c4] sm:$0xf] }
 0x729   :  { %v4534_v57 = vmax.f32 %v4431_v21, 0.0  ;;  %v9253_v21 = vld [vmem:[#allocation2 + $0x1d0] sm:$0xf0] }
 0x72b   :  { %v4343_v28 = vpop.f32.mrf.mxu2 }
 0x72c   :  { %v4344_v5 = vadd.f32 %v4343_v28, %v4255_v26  ;;  %v4168_v59 = vpop.f32.mrf.mxu0  ;;  %v9256_v26 = vor.u32 %v10029_v56, %v9253_v21  ;;  %v15121_v21 = vld [vmem:[#allocation119_spill] sm:$0xff] }
 0x72d   :  { %v4169_v35 = vadd.f32 %v4168_v59, %v13500_v36  ;;  %v9384_v36 = vor.u32 %v10061_v2, %v9381_v1  ;;  %v15118_v2 = vld [vmem:[#allocation107_spill] sm:$0xff]  ;;  %v15119_v1 = vld [vmem:[#allocation49_spill] sm:$0xff] }
 0x72e   :  { %v4432_v22 = vpop.f32.mrf.mxu3  ;;  %v4257_v58 = vpop.f32.mrf.mxu1  ;;  %5891 = vmatpush.bf16.msra.mxu1 %v9256_v26 }
 0x72f   :  { %v4433_v37 = vadd.f32 %v4432_v22, %v4344_v5  ;;  %v4258_v63 = vadd.f32 %v4257_v58, %v4169_v35  ;;  %5453 = vmatmul.bf16.vlgmr.msrb.gmra.mxu0 %v15113_v0  ;;  %5980 = vmatpush.bf16.msra.mxu2 %v9384_v36 }
 0x730   :  { %5631 = vmatmul.bf16.vlgmr.msrb.gmra.mxu2 %v15115_v29 }
 0x731   :  { %v4538_v46 = vmax.f32 %v4433_v37, 0.0  ;;  %5542 = vmatmul.bf16.vlgmr.msrb.gmra.mxu1 %v15114_v31 }
 0x733   :  { %5720 = vmatmul.bf16.vlgmr.msrb.gmra.mxu3 %v13625_v8  ;;  %v13687_v25 = vpack.c.bf16 %v4538_v46, %v4534_v57  ;;  %v4346_v18 = vpop.f32.mrf.mxu2 }
 0x734   :  { %v4347_v14 = vadd.f32 %v4346_v18, %v4258_v63  ;;  %v4170_v38 = vpop.f32.mrf.mxu0 }
 0x735   :  { %15116 = vst [vmem:[#allocation20_spill] sm:$0xff] %v13687_v25  ;;  %v4171_v11 = vadd.f32 %v4170_v38, %v13506_v50  ;;  %v15117_v50 = vld [vmem:[#allocation115_spill] sm:$0xff] }
 0x736   :  { %v4435_v52 = vpop.f32.mrf.mxu3  ;;  %v4259_v33 = vpop.f32.mrf.mxu1 }
 0x737   :  { %v4436_v4 = vadd.f32 %v4435_v52, %v4347_v14  ;;  %v4260_v43 = vadd.f32 %v4259_v33, %v4171_v11 }
 0x739   :  { %v4542_v57 = vmax.f32 %v4436_v4, 0.0 }
 0x73b   :  { %v4348_v28 = vpop.f32.mrf.mxu2 }
 0x73c   :  { %v4349_v5 = vadd.f32 %v4348_v28, %v4260_v43  ;;  %v4173_v59 = vpop.f32.mrf.mxu0 }
 0x73d   :  { %v4174_v35 = vadd.f32 %v4173_v59, %v13515_v47  ;;  %v10057_v59 = vld [vmem:[#allocation2 + $0x2a4] sm:$0xf] }
 0x73e   :  { %v4437_v22 = vpop.f32.mrf.mxu3  ;;  %v4262_v58 = vpop.f32.mrf.mxu1 }
 0x73f   :  { %v4438_v37 = vadd.f32 %v4437_v22, %v4349_v5  ;;  %v4263_v63 = vadd.f32 %v4262_v58, %v4174_v35  ;;  %5458 = vmatmul.bf16.gmra.mxu0 %v15117_v50  ;;  %v15122_v5 = vld [vmem:[#allocation106_spill] sm:$0xff]  ;;  %v15123_v22 = vld [vmem:[#allocation53_spill] sm:$0xff]  ;;  %v9993_v58 = vld [vmem:[#allocation2 + $0xa4] sm:$0xf] }
 0x740   :  { %5636 = vmatmul.bf16.gmra.mxu2 %v15119_v1  ;;  %v9365_v35 = vld [vmem:[#allocation2 + $0x2b0] sm:$0xf0] }
 0x741   :  { %v4546_v46 = vmax.f32 %v4438_v37, 0.0  ;;  %5547 = vmatmul.bf16.gmra.mxu1 %v15118_v2 }
 0x743   :  { %5725 = vmatmul.bf16.gmra.mxu3 %v13634_v13  ;;  %v13695_v27 = vpack.c.bf16 %v4546_v46, %v4542_v57  ;;  %v4351_v18 = vpop.f32.mrf.mxu2  ;;  %v10089_v57 = vld [vmem:[#allocation2 + $0x3a4] sm:$0xf]  ;;  %v9493_v46 = vld [vmem:[#allocation2 + $0x3b0] sm:$0xf0] }
 0x744   :  { %v4352_v36 = vadd.f32 %v4351_v18, %v4263_v63  ;;  %v4175_v9 = vpop.f32.mrf.mxu0  ;;  %v9109_v63 = vld [vmem:[#allocation2 + $0xb0] sm:$0xf0] }
 0x745   :  { %15120 = vst [vmem:[#allocation86_spill] sm:$0xff] %v13695_v27  ;;  %v4176_v47 = vadd.f32 %v4175_v9, %v13521_v44  ;;  %v9112_v9 = vor.u32 %v9993_v58, %v9109_v63  ;;  %v15127_v63 = vld [vmem:[#allocation57_spill] sm:$0xff] }
 0x746   :  { %v4440_v6 = vpop.f32.mrf.mxu3  ;;  %v4264_v16 = vpop.f32.mrf.mxu1 }
 0x747   :  { %v4441_v14 = vadd.f32 %v4440_v6, %v4352_v36  ;;  %v4265_v52 = vadd.f32 %v4264_v16, %v4176_v47  ;;  %v9496_v47 = vor.u32 %v10089_v57, %v9493_v46  ;;  %5803 = vmatpush.bf16.msra.mxu0 %v9112_v9 }
 0x749   :  { %v4550_v26 = vmax.f32 %v4441_v14, 0.0  ;;  %6070 = vmatpush.bf16.msra.mxu3 %v9496_v47 }
 0x74b   :  { %v4353_v38 = vpop.f32.mrf.mxu2 }
 0x74c   :  { %v4354_v10 = vadd.f32 %v4353_v38, %v4265_v52  ;;  %v4178_v11 = vpop.f32.mrf.mxu0 }
 0x74d   :  { %v4179_v33 = vadd.f32 %v4178_v11, %v13530_v17  ;;  %v9368_v17 = vor.u32 %v10057_v59, %v9365_v35 }
 0x74e   :  { %v4442_v19 = vpop.f32.mrf.mxu3  ;;  %v4267_v4 = vpop.f32.mrf.mxu1 }
 0x74f   :  { %v4443_v43 = vadd.f32 %v4442_v19, %v4354_v10  ;;  %v4268_v56 = vadd.f32 %v4267_v4, %v4179_v33  ;;  %5463 = vmatmul.bf16.gmra.mxu0 %v15121_v21  ;;  %5981 = vmatpush.bf16.msra.mxu2 %v9368_v17  ;;  %v10025_v10 = vld [vmem:[#allocation2 + $0x1a4] sm:$0xf]  ;;  %v9237_v19 = vld [vmem:[#allocation2 + $0x1b0] sm:$0xf0] }
 0x750   :  { %5641 = vmatmul.bf16.gmra.mxu2 %v15123_v22  ;;  %v9240_v11 = vor.u32 %v10025_v10, %v9237_v19  ;;  %v15126_v17 = vld [vmem:[#allocation143_spill] sm:$0xff] }
 0x751   :  { %v4554_v28 = vmax.f32 %v4443_v43, 0.0  ;;  %5552 = vmatmul.bf16.gmra.mxu1 %v15122_v5 }
 0x752   :  { %5892 = vmatpush.bf16.msra.mxu1 %v9240_v11 }
 0x753   :  { %5730 = vmatmul.bf16.gmra.mxu3 %v13643_v3  ;;  %v13703_v44 = vpack.c.bf16 %v4554_v28, %v4550_v26  ;;  %v4356_v37 = vpop.f32.mrf.mxu2 }
 0x754   :  { %v4357_v18 = vadd.f32 %v4356_v37, %v4268_v56  ;;  %v4180_v6 = vpop.f32.mrf.mxu0 }
 0x755   :  { %15124 = vst [vmem:[#allocation23_spill] sm:$0xff] %v13703_v44  ;;  %v4181_v16 = vadd.f32 %v4180_v6, %v13536_v32  ;;  %v15125_v32 = vld [vmem:[#allocation123_spill] sm:$0xff] }
 0x756   :  { %v4445_v36 = vpop.f32.mrf.mxu3  ;;  %v4269_v14 = vpop.f32.mrf.mxu1 }
 0x757   :  { %v4446_v52 = vadd.f32 %v4445_v36, %v4357_v18  ;;  %v4270_v38 = vadd.f32 %v4269_v14, %v4181_v16 }
 0x759   :  { %v4558_v58 = vmax.f32 %v4446_v52, 0.0 }
 0x75b   :  { %v4358_v33 = vpop.f32.mrf.mxu2 }
 0x75c   :  { %v4359_v4 = vadd.f32 %v4358_v33, %v4270_v38  ;;  %v4183_v56 = vpop.f32.mrf.mxu0 }
 0x75d   :  { %v4184_v26 = vadd.f32 %v4183_v56, %v13545_v53 }
 0x75e   :  { %v4447_v43 = vpop.f32.mrf.mxu3  ;;  %v4272_v28 = vpop.f32.mrf.mxu1 }
 0x75f   :  { %v4448_v59 = vadd.f32 %v4447_v43, %v4359_v4  ;;  %v4273_v35 = vadd.f32 %v4272_v28, %v4184_v26  ;;  %5468 = vmatmul.bf16.gmra.mxu0 %v15125_v32  ;;  %v15129_v43 = vld [vmem:[#allocation127_spill] sm:$0xff]  ;;  %v15130_v28 = vld [vmem:[#allocation144_spill] sm:$0xff] }
 0x760   :  { %5646 = vmatmul.bf16.gmra.mxu2 %v15127_v63 }
 0x761   :  { %v4562_v37 = vmax.f32 %v4448_v59, 0.0  ;;  %5557 = vmatmul.bf16.gmra.mxu1 %v15126_v17  ;;  %v15131_v59 = vld [vmem:[#allocation61_spill] sm:$0xff] }
 0x763   :  { %5735 = vmatmul.bf16.gmra.mxu3 %v13652_v30  ;;  %v13711_v57 = vpack.c.bf16 %v4562_v37, %v4558_v58  ;;  %v4361_v46 = vpop.f32.mrf.mxu2  ;;  %v9349_v58 = vld [vmem:[#allocation2 + $0x290] sm:$0xf0]  ;;  %v9989_v37 = vld [vmem:[#allocation2 + $0x84] sm:$0xf] }
 0x764   :  { %v4362_v18 = vadd.f32 %v4361_v46, %v4273_v35  ;;  %v4185_v6 = vpop.f32.mrf.mxu0  ;;  %v10053_v35 = vld [vmem:[#allocation2 + $0x284] sm:$0xf] }
 0x765   :  { %15128 = vst [vmem:[#allocation24_spill] sm:$0xff] %v13711_v57  ;;  %v4186_v53 = vadd.f32 %v4185_v6, %v13551_v23  ;;  %v9477_v6 = vld [vmem:[#allocation2 + $0x390] sm:$0xf0] }
 0x766   :  { %v4450_v36 = vpop.f32.mrf.mxu3  ;;  %v4274_v9 = vpop.f32.mrf.mxu1 }
 0x767   :  { %v4451_v47 = vadd.f32 %v4450_v36, %v4362_v18  ;;  %v4275_v16 = vadd.f32 %v4274_v9, %v4186_v53  ;;  %v9093_v18 = vld [vmem:[#allocation2 + $0x90] sm:$0xf0]  ;;  %v10085_v36 = vld [vmem:[#allocation2 + $0x384] sm:$0xf] }
 0x769   :  { %v4566_v56 = vmax.f32 %v4451_v47, 0.0 }
 0x76b   :  { %v4363_v14 = vpop.f32.mrf.mxu2 }
 0x76c   :  { %v4364_v52 = vadd.f32 %v4363_v14, %v4275_v16  ;;  %v4188_v10 = vpop.f32.mrf.mxu0  ;;  %v9096_v16 = vor.u32 %v9989_v37, %v9093_v18  ;;  %v9480_v14 = vor.u32 %v10085_v36, %v9477_v6 }
 0x76d   :  { %v4189_v19 = vadd.f32 %v4188_v10, %v13560_v61  ;;  %v9352_v61 = vor.u32 %v10053_v35, %v9349_v58 }
 0x76e   :  { %v4452_v38 = vpop.f32.mrf.mxu3  ;;  %v4277_v11 = vpop.f32.mrf.mxu1  ;;  %5804 = vmatpush.bf16.msra.mxu0 %v9096_v16  ;;  %6071 = vmatpush.bf16.msra.mxu3 %v9480_v14 }
 0x76f   :  { %v4453_v33 = vadd.f32 %v4452_v38, %v4364_v52  ;;  %v4278_v4 = vadd.f32 %v4277_v11, %v4189_v19  ;;  %5473 = vmatmul.bf16.gmra.mxu0 %v15129_v43  ;;  %5982 = vmatpush.bf16.msra.mxu2 %v9352_v61  ;;  %v10021_v11 = vld [vmem:[#allocation2 + $0x184] sm:$0xf] }
 0x770   :  { %5651 = vmatmul.bf16.gmra.mxu2 %v15131_v59 }
 0x771   :  { %v4570_v26 = vmax.f32 %v4453_v33, 0.0  ;;  %5562 = vmatmul.bf16.gmra.mxu1 %v15130_v28  ;;  %v9221_v33 = vld [vmem:[#allocation2 + $0x190] sm:$0xf0] }
 0x773   :  { %5740 = vmatmul.bf16.gmra.mxu3 %v13661_v45  ;;  %v13719_v23 = vpack.c.bf16 %v4570_v26, %v4566_v56  ;;  %v4366_v46 = vpop.f32.mrf.mxu2  ;;  %v9224_v56 = vor.u32 %v10021_v11, %v9221_v33 }
 0x774   :  { %v4367_v53 = vadd.f32 %v4366_v46, %v4278_v4  ;;  %v4190_v47 = vpop.f32.mrf.mxu0 }
 0x775   :  { %v4191_v52 = vadd.f32 %v4190_v47, %v13566_v41  ;;  %5893 = vmatpush.bf16.msra.mxu1 %v9224_v56  ;;  %v15132_v41 = vld [vmem:[#allocation131_spill] sm:$0xff] }
 0x776   :  { %v4455_v9 = vpop.f32.mrf.mxu3  ;;  %v4279_v38 = vpop.f32.mrf.mxu1 }
 0x777   :  { %v4456_v10 = vadd.f32 %v4455_v9, %v4367_v53  ;;  %v4280_v19 = vadd.f32 %v4279_v38, %v4191_v52  ;;  %v15133_v53 = vld [vmem:[#allocation145_spill] sm:$0xff] }
 0x778   :  { %v15134_v9 = vld [vmem:[#allocation65_spill] sm:$0xff] }
 0x779   :  { %v4574_v61 = vmax.f32 %v4456_v10, 0.0 }
 0x77b   :  { %v4368_v26 = vpop.f32.mrf.mxu2 }
 0x77c   :  { %v4369_v35 = vadd.f32 %v4368_v26, %v4280_v19  ;;  %v4193_v4 = vpop.f32.mrf.mxu0 }
 0x77d   :  { %v4194_v46 = vadd.f32 %v4193_v4, %v13575_v60 }
 0x77e   :  { %v4457_v58 = vpop.f32.mrf.mxu3  ;;  %v4282_v37 = vpop.f32.mrf.mxu1 }
 0x77f   :  { %v4458_v18 = vadd.f32 %v4457_v58, %v4369_v35  ;;  %v4283_v36 = vadd.f32 %v4282_v37, %v4194_v46  ;;  %5478 = vmatmul.bf16.gmra.mxu0 %v15132_v41 }
 0x780   :  { %5656 = vmatmul.bf16.gmra.mxu2 %v15134_v9 }
 0x781   :  { %v4578_v6 = vmax.f32 %v4458_v18, 0.0  ;;  %5567 = vmatmul.bf16.gmra.mxu1 %v15133_v53  ;;  %v15136_v18 = vld [vmem:[#allocation135_spill] sm:$0xff] }
 0x783   :  { %5745 = vmatmul.bf16.gmra.mxu3 %v13670_v20  ;;  %v13727_v47 = vpack.c.bf16 %v4578_v6, %v4574_v61  ;;  %v4371_v16 = vpop.f32.mrf.mxu2  ;;  %v15137_v6 = vld [vmem:[#allocation146_spill] sm:$0xff] }
 0x784   :  { %v4372_v14 = vadd.f32 %v4371_v16, %v4283_v36  ;;  %v4195_v38 = vpop.f32.mrf.mxu0  ;;  %v10049_v16 = vld [vmem:[#allocation2 + $0x264] sm:$0xf] }
 0x785   :  { %15135 = vst [vmem:[#allocation89_spill] sm:$0xff] %v13727_v47  ;;  %v4196_v60 = vadd.f32 %v4195_v38, %v13581_v15 }
 0x786   :  { %v4460_v52 = vpop.f32.mrf.mxu3  ;;  %v4284_v19 = vpop.f32.mrf.mxu1 }
 0x787   :  { %v4461_v11 = vadd.f32 %v4460_v52, %v4372_v14  ;;  %v4285_v33 = vadd.f32 %v4284_v19, %v4196_v60  ;;  %v9333_v14 = vld [vmem:[#allocation2 + $0x270] sm:$0xf0]  ;;  %v9985_v52 = vld [vmem:[#allocation2 + $0x64] sm:$0xf] }
 0x788   :  { %v9077_v60 = vld [vmem:[#allocation2 + $0x70] sm:$0xf0]  ;;  %v10081_v19 = vld [vmem:[#allocation2 + $0x364] sm:$0xf] }
 0x789   :  { %v4582_v61 = vmax.f32 %v4461_v11, 0.0 }
 0x78b   :  { %v4373_v56 = vpop.f32.mrf.mxu2 }
 0x78c   :  { %v4374_v10 = vadd.f32 %v4373_v56, %v4285_v33  ;;  %v4198_v35 = vpop.f32.mrf.mxu0  ;;  %v9461_v33 = vld [vmem:[#allocation2 + $0x370] sm:$0xf0] }
 0x78d   :  { %v4199_v58 = vadd.f32 %v4198_v35, %v13590_v40  ;;  %v9336_v40 = vor.u32 %v10049_v16, %v9333_v14  ;;  %v9464_v35 = vor.u32 %v10081_v19, %v9461_v33 }
 0x78e   :  { %v4462_v26 = vpop.f32.mrf.mxu3  ;;  %v4287_v4 = vpop.f32.mrf.mxu1 }
 0x78f   :  { %v4463_v46 = vadd.f32 %v4462_v26, %v4374_v10  ;;  %v4288_v37 = vadd.f32 %v4287_v4, %v4199_v58  ;;  %5483 = vmatmul.bf16.gmra.mxu0 %v15136_v18  ;;  %v9080_v26 = vor.u32 %v9985_v52, %v9077_v60  ;;  %5983 = vmatpush.bf16.msra.mxu2 %v9336_v40 }
 0x790   :  { %5661 = vmatmul.bf16.gmra.mxu2 %v13472_v54  ;;  %6072 = vmatpush.bf16.msra.mxu3 %v9464_v35 }
 0x791   :  { %v4586_v36 = vmax.f32 %v4463_v46, 0.0  ;;  %5572 = vmatmul.bf16.gmra.mxu1 %v15137_v6  ;;  %5805 = vmatpush.bf16.msra.mxu0 %v9080_v26 }
 0x793   :  { %5750 = vmatmul.bf16.gmra.mxu3 %v13679_v55  ;;  %v13735_v15 = vpack.c.bf16 %v4586_v36, %v4582_v61  ;;  %v4376_v38 = vpop.f32.mrf.mxu2  ;;  %v10017_v36 = vld [vmem:[#allocation2 + $0x164] sm:$0xf]  ;;  %v9205_v55 = vld [vmem:[#allocation2 + $0x170] sm:$0xf0] }
 0x794   :  { %v4377_v56 = vadd.f32 %v4376_v38, %v4288_v37  ;;  %v4200_v11 = vpop.f32.mrf.mxu0  ;;  %v9208_v54 = vor.u32 %v10017_v36, %v9205_v55 }
 0x795   :  { %v4201_v58 = vadd.f32 %v4200_v11, %v13596_v7  ;;  %v15138_v7 = vld [vmem:[#allocation136_spill] sm:$0xff] }
 0x796   :  { %v4465_v10 = vpop.f32.mrf.mxu3  ;;  %v4289_v4 = vpop.f32.mrf.mxu1  ;;  %5894 = vmatpush.bf16.msra.mxu1 %v9208_v54 }
 0x797   :  { %v4466_v46 = vadd.f32 %v4465_v10, %v4377_v56  ;;  %v4290_v61 = vadd.f32 %v4289_v4, %v4201_v58  ;;  %v15139_v56 = vld [vmem:[#allocation147_spill] sm:$0xff]  ;;  %v15140_v10 = vld [vmem:[#allocation77_spill] sm:$0xff] }
 0x798   :  { %v13749_v4 = vld [vmem:[%s14358_s4] sm:$0xf] }
 0x799   :  { %v4590_v40 = vmax.f32 %v4466_v46, 0.0  ;;  %15142 = vst [vmem:[#allocation28_spill] sm:$0xff] %v13749_v4 }
 0x79b   :  { %v4378_v16 = vpop.f32.mrf.mxu2 }
 0x79c   :  { %v4379_v14 = vadd.f32 %v4378_v16, %v4290_v61  ;;  %v4203_v37 = vpop.f32.mrf.mxu0  ;;  %v13752_v61 = vperm.slane %v13749_v4, 0 }
 0x79d   :  { %v4204_v38 = vadd.f32 %v4203_v37, %v13605_v39 }
 0x79e   :  { %v4467_v6 = vpop.f32.mrf.mxu3  ;;  %v4292_v52 = vpop.f32.mrf.mxu1 }
 0x79f   :  { %v4468_v60 = vadd.f32 %v4467_v6, %v4379_v14  ;;  %v4293_v19 = vadd.f32 %v4292_v52, %v4204_v38  ;;  %5488 = vmatmul.bf16.gmra.mxu0 %v15138_v7 }
 0x7a0   :  { %5666 = vmatmul.bf16.gmra.mxu2 %v15140_v10 }
 0x7a1   :  { %v4594_v33 = vmax.f32 %v4468_v60, 0.0  ;;  %5577 = vmatmul.bf16.gmra.mxu1 %v15139_v56 }
 0x7a3   :  { %5755 = vmatmul.bf16.gmra.mxu3 %v13687_v25  ;;  %v13743_v55 = vpack.c.bf16 %v4594_v33, %v4590_v40  ;;  %v4381_v54 = vpop.f32.mrf.mxu2 }
 0x7a4   :  { %v4382_v11 = vadd.f32 %v4381_v54, %v4293_v19  ;;  %v4205_v35 = vpop.f32.mrf.mxu0  ;;  %v15143_v19 = vld [vmem:[#allocation137_spill] sm:$0xff] }
 0x7a5   :  { %15141 = vst [vmem:[#allocation27_spill] sm:$0xff] %v13743_v55  ;;  %v4206_v39 = vadd.f32 %v4205_v35, %v13611_v51  ;;  %v15144_v54 = vld [vmem:[#allocation13_spill] sm:$0xff]  ;;  %v9981_v35 = vld [vmem:[#allocation2 + $0x44] sm:$0xf] }
 0x7a6   :  { %v4470_v26 = vpop.f32.mrf.mxu3  ;;  %v4294_v6 = vpop.f32.mrf.mxu1 }
 0x7a7   :  { %v4471_v58 = vadd.f32 %v4470_v26, %v4382_v11  ;;  %v4295_v46 = vadd.f32 %v4294_v6, %v4206_v39  ;;  %v10045_v11 = vld [vmem:[#allocation2 + $0x244] sm:$0xf]  ;;  %v9317_v26 = vld [vmem:[#allocation2 + $0x250] sm:$0xf0] }
 0x7a8   :  { %v9320_v6 = vor.u32 %v10045_v11, %v9317_v26 }
 0x7a9   :  { %v4598_v40 = vmax.f32 %v4471_v58, 0.0 }
 0x7aa   :  { %5984 = vmatpush.bf16.msra.mxu2 %v9320_v6 }
 0x7ab   :  { %v4383_v36 = vpop.f32.mrf.mxu2 }
 0x7ac   :  { %v4384_v16 = vadd.f32 %v4383_v36, %v4295_v46  ;;  %v5454_v37 = vpop.f32.mrf.mxu0  ;;  %v9061_v46 = vld [vmem:[#allocation2 + $0x50] sm:$0xf0]  ;;  %v10077_v36 = vld [vmem:[#allocation2 + $0x344] sm:$0xf] }
 0x7ad   :  { %v5455_v38 = vadd.f32 %v5454_v37, %v13752_v61  ;;  %v9064_v37 = vor.u32 %v9981_v35, %v9061_v46 }
 0x7ae   :  { %v4472_v14 = vpop.f32.mrf.mxu3  ;;  %v5543_v52 = vpop.f32.mrf.mxu1 }
 0x7af   :  { %v4473_v60 = vadd.f32 %v4472_v14, %v4384_v16  ;;  %v5544_v51 = vadd.f32 %v5543_v52, %v5455_v38  ;;  %5493 = vmatmul.bf16.gmra.mxu0 %v15143_v19  ;;  %v9445_v16 = vld [vmem:[#allocation2 + $0x350] sm:$0xf0] }
 0x7b0   :  { %5671 = vmatmul.bf16.gmra.mxu2 %v13502_v24  ;;  %v9448_v38 = vor.u32 %v10077_v36, %v9445_v16  ;;  %5806 = vmatpush.bf16.msra.mxu0 %v9064_v37  ;;  %v15145_v16 = vld [vmem:[#allocation138_spill] sm:$0xff] }
 0x7b1   :  { %v4602_v33 = vmax.f32 %v4473_v60, 0.0  ;;  %5582 = vmatmul.bf16.gmra.mxu1 %v15144_v54 }
 0x7b2   :  { %6073 = vmatpush.bf16.msra.mxu3 %v9448_v38  ;;  %v15146_v38 = vld [vmem:[#allocation17_spill] sm:$0xff] }
 0x7b3   :  { %5760 = vmatmul.bf16.gmra.mxu3 %v13695_v27  ;;  %v13759_v39 = vpack.c.bf16 %v4602_v33, %v4598_v40  ;;  %v5632_v14 = vpop.f32.mrf.mxu2  ;;  %v10013_v40 = vld [vmem:[#allocation2 + $0x144] sm:$0xf]  ;;  %v9189_v33 = vld [vmem:[#allocation2 + $0x150] sm:$0xf0] }
 0x7b4   :  { %v5633_v58 = vadd.f32 %v5632_v14, %v5544_v51  ;;  %v5456_v60 = vpop.f32.mrf.mxu0  ;;  %v9192_v11 = vor.u32 %v10013_v40, %v9189_v33 }
 0x7b5   :  { %v5457_v24 = vadd.f32 %v5456_v60, %v13752_v61 }
 0x7b6   :  { %v5721_v52 = vpop.f32.mrf.mxu3  ;;  %v5545_v54 = vpop.f32.mrf.mxu1  ;;  %5895 = vmatpush.bf16.msra.mxu1 %v9192_v11 }
 0x7b7   :  { %v5722_v27 = vadd.f32 %v5721_v52, %v5633_v58  ;;  %v5546_v19 = vadd.f32 %v5545_v54, %v5457_v24 }
 0x7b9   :  { %v6869_v14 = vmax.f32 %v5722_v27, 0.0 }
 0x7bb   :  { %v5634_v26 = vpop.f32.mrf.mxu2 }
 0x7bc   :  { %v5635_v4 = vadd.f32 %v5634_v26, %v5546_v19  ;;  %v5459_v35 = vpop.f32.mrf.mxu0 }
 0x7bd   :  { %v5460_v51 = vadd.f32 %v5459_v35, %v13752_v61 }
 0x7be   :  { %v5723_v25 = vpop.f32.mrf.mxu3  ;;  %v5548_v46 = vpop.f32.mrf.mxu1 }
 0x7bf   :  { %v5724_v36 = vadd.f32 %v5723_v25, %v5635_v4  ;;  %v5549_v6 = vadd.f32 %v5548_v46, %v5460_v51  ;;  %5498 = vmatmul.bf16.gmra.mxu0 %v15145_v16 }
 0x7c0   :  { %5676 = vmatmul.bf16.gmra.mxu2 %v13517_v48 }
 0x7c1   :  { %v6873_v37 = vmax.f32 %v5724_v36, 0.0  ;;  %5587 = vmatmul.bf16.gmra.mxu1 %v15146_v38 }
 0x7c3   :  { %5765 = vmatmul.bf16.gmra.mxu3 %v13703_v44  ;;  %v13767_v24 = vpack.c.bf16 %v6873_v37, %v6869_v14  ;;  %v5637_v19 = vpop.f32.mrf.mxu2  ;;  %v15148_v14 = vld [vmem:[#allocation139_spill] sm:$0xff] }
 0x7c4   :  { %v5638_v54 = vadd.f32 %v5637_v19, %v5549_v6  ;;  %v5461_v52 = vpop.f32.mrf.mxu0  ;;  %v15149_v19 = vld [vmem:[#allocation21_spill] sm:$0xff] }
 0x7c5   :  { %15147 = vst [vmem:[#allocation94_spill] sm:$0xff] %v13767_v24  ;;  %v5462_v60 = vadd.f32 %v5461_v52, %v13752_v61  ;;  %v9977_v52 = vld [vmem:[#allocation2 + $0x24] sm:$0xf] }
 0x7c6   :  { %v5726_v58 = vpop.f32.mrf.mxu3  ;;  %v5550_v25 = vpop.f32.mrf.mxu1 }
 0x7c7   :  { %v5727_v4 = vadd.f32 %v5726_v58, %v5638_v54  ;;  %v5551_v40 = vadd.f32 %v5550_v25, %v5462_v60  ;;  %v10041_v54 = vld [vmem:[#allocation2 + $0x224] sm:$0xf]  ;;  %v9301_v58 = vld [vmem:[#allocation2 + $0x230] sm:$0xf0] }
 0x7c8   :  { %v9304_v60 = vor.u32 %v10041_v54, %v9301_v58  ;;  %v9045_v25 = vld [vmem:[#allocation2 + $0x30] sm:$0xf0]  ;;  %v10009_v54 = vld [vmem:[#allocation2 + $0x124] sm:$0xf] }
 0x7c9   :  { %v6877_v37 = vmax.f32 %v5727_v4, 0.0  ;;  %v9173_v58 = vld [vmem:[#allocation2 + $0x130] sm:$0xf0] }
 0x7ca   :  { %5985 = vmatpush.bf16.msra.mxu2 %v9304_v60 }
 0x7cb   :  { %v5639_v33 = vpop.f32.mrf.mxu2 }
 0x7cc   :  { %v5640_v27 = vadd.f32 %v5639_v33, %v5551_v40  ;;  %v5464_v26 = vpop.f32.mrf.mxu0  ;;  %v10073_v40 = vld [vmem:[#allocation2 + $0x324] sm:$0xf]  ;;  %v9429_v33 = vld [vmem:[#allocation2 + $0x330] sm:$0xf0] }
 0x7cd   :  { %v5465_v35 = vadd.f32 %v5464_v26, %v13752_v61 }
 0x7ce   :  { %v5728_v11 = vpop.f32.mrf.mxu3  ;;  %v5553_v51 = vpop.f32.mrf.mxu1 }
 0x7cf   :  { %v5729_v46 = vadd.f32 %v5728_v11, %v5640_v27  ;;  %v5554_v36 = vadd.f32 %v5553_v51, %v5465_v35  ;;  %5503 = vmatmul.bf16.gmra.mxu0 %v15148_v14  ;;  %v9048_v11 = vor.u32 %v9977_v52, %v9045_v25  ;;  %v9432_v35 = vor.u32 %v10073_v40, %v9429_v33  ;;  %v15151_v33 = vld [vmem:[#allocation90_spill] sm:$0xff] }
 0x7d0   :  { %5681 = vmatmul.bf16.gmra.mxu2 %v13532_v34  ;;  %v9176_v14 = vor.u32 %v10009_v54, %v9173_v58 }
 0x7d1   :  { %v6881_v6 = vmax.f32 %v5729_v46, 0.0  ;;  %5592 = vmatmul.bf16.gmra.mxu1 %v15149_v19  ;;  %5807 = vmatpush.bf16.msra.mxu0 %v9048_v11 }
 0x7d2   :  { %6074 = vmatpush.bf16.msra.mxu3 %v9432_v35  ;;  %5896 = vmatpush.bf16.msra.mxu1 %v9176_v14  ;;  %v15152_v35 = vld [vmem:[#allocation25_spill] sm:$0xff] }
 0x7d3   :  { %5770 = vmatmul.bf16.gmra.mxu3 %v13711_v57  ;;  %v13775_v26 = vpack.c.bf16 %v6881_v6, %v6877_v37  ;;  %v5642_v27 = vpop.f32.mrf.mxu2 }
 0x7d4   :  { %v5643_v4 = vadd.f32 %v5642_v27, %v5554_v36  ;;  %v5466_v46 = vpop.f32.mrf.mxu0 }
 0x7d5   :  { %15150 = vst [vmem:[#allocation31_spill] sm:$0xff] %v13775_v26  ;;  %v5467_v24 = vadd.f32 %v5466_v46, %v13752_v61 }
 0x7d6   :  { %v5731_v51 = vpop.f32.mrf.mxu3  ;;  %v5555_v34 = vpop.f32.mrf.mxu1 }
 0x7d7   :  { %v5732_v57 = vadd.f32 %v5731_v51, %v5643_v4  ;;  %v5556_v19 = vadd.f32 %v5555_v34, %v5467_v24 }
 0x7d9   :  { %v6885_v27 = vmax.f32 %v5732_v57, 0.0 }
 0x7db   :  { %v5644_v44 = vpop.f32.mrf.mxu2 }
 0x7dc   :  { %v5645_v37 = vadd.f32 %v5644_v44, %v5556_v19  ;;  %v5469_v52 = vpop.f32.mrf.mxu0 }
 0x7dd   :  { %v5470_v36 = vadd.f32 %v5469_v52, %v13752_v61 }
 0x7de   :  { %v5733_v6 = vpop.f32.mrf.mxu3  ;;  %v5558_v25 = vpop.f32.mrf.mxu1 }
 0x7df   :  { %v5734_v40 = vadd.f32 %v5733_v6, %v5645_v37  ;;  %v5559_v60 = vadd.f32 %v5558_v25, %v5470_v36  ;;  %5508 = vmatmul.bf16.gmra.mxu0 %v15151_v33 }
 0x7e0   :  { %5686 = vmatmul.bf16.gmra.mxu2 %v13547_v12 }
 0x7e1   :  { %v6889_v11 = vmax.f32 %v5734_v40, 0.0  ;;  %5597 = vmatmul.bf16.gmra.mxu1 %v15152_v35 }
 0x7e3   :  { %5775 = vmatmul.bf16.gmra.mxu3 %v13719_v23  ;;  %v13783_v34 = vpack.c.bf16 %v6889_v11, %v6885_v27  ;;  %v5647_v44 = vpop.f32.mrf.mxu2  ;;  %v15154_v27 = vld [vmem:[#allocation91_spill] sm:$0xff] }
 0x7e4   :  { %v5648_v24 = vadd.f32 %v5647_v44, %v5559_v60  ;;  %v5471_v19 = vpop.f32.mrf.mxu0  ;;  %v15155_v44 = vld [vmem:[#allocation29_spill] sm:$0xff] }
 0x7e5   :  { %15153 = vst [vmem:[#allocation32_spill] sm:$0xff] %v13783_v34  ;;  %v5472_v4 = vadd.f32 %v5471_v19, %v13752_v61  ;;  %v9973_v19 = vld [vmem:[#allocation2 + $0x4] sm:$0xf] }
 0x7e6   :  { %v5736_v14 = vpop.f32.mrf.mxu3  ;;  %v5560_v51 = vpop.f32.mrf.mxu1 }
 0x7e7   :  { %v5737_v46 = vadd.f32 %v5736_v14, %v5648_v24  ;;  %v5561_v54 = vadd.f32 %v5560_v51, %v5472_v4  ;;  %v10037_v24 = vld [vmem:[#allocation2 + $0x204] sm:$0xf]  ;;  %v9285_v14 = vld [vmem:[#allocation2 + $0x210] sm:$0xf0] }
 0x7e8   :  { %v9288_v4 = vor.u32 %v10037_v24, %v9285_v14  ;;  %v9029_v51 = vld [vmem:[#allocation2 + $0x10] sm:$0xf0]  ;;  %v10005_v24 = vld [vmem:[#allocation2 + $0x104] sm:$0xf] }
 0x7e9   :  { %v6893_v11 = vmax.f32 %v5737_v46, 0.0  ;;  %v9157_v14 = vld [vmem:[#allocation2 + $0x110] sm:$0xf0] }
 0x7ea   :  { %5986 = vmatpush.bf16.msra.mxu2 %v9288_v4 }
 0x7eb   :  { %v5649_v58 = vpop.f32.mrf.mxu2 }
 0x7ec   :  { %v5650_v57 = vadd.f32 %v5649_v58, %v5561_v54  ;;  %v5474_v6 = vpop.f32.mrf.mxu0  ;;  %v10069_v54 = vld [vmem:[#allocation2 + $0x304] sm:$0xf]  ;;  %v9413_v58 = vld [vmem:[#allocation2 + $0x310] sm:$0xf0] }
 0x7ed   :  { %v5475_v52 = vadd.f32 %v5474_v6, %v13752_v61 }
 0x7ee   :  { %v5738_v37 = vpop.f32.mrf.mxu3  ;;  %v5563_v36 = vpop.f32.mrf.mxu1 }
 0x7ef   :  { %v5739_v25 = vadd.f32 %v5738_v37, %v5650_v57  ;;  %v5564_v40 = vadd.f32 %v5563_v36, %v5475_v52  ;;  %5513 = vmatmul.bf16.gmra.mxu0 %v15154_v27  ;;  %v9032_v37 = vor.u32 %v9973_v19, %v9029_v51  ;;  %v9416_v52 = vor.u32 %v10069_v54, %v9413_v58  ;;  %v15157_v58 = vld [vmem:[#allocation98_spill] sm:$0xff] }
 0x7f0   :  { %5691 = vmatmul.bf16.gmra.mxu2 %v13562_v49 }
 0x7f1   :  { %v6897_v60 = vmax.f32 %v5739_v25, 0.0  ;;  %5602 = vmatmul.bf16.gmra.mxu1 %v15155_v44  ;;  %5808 = vmatpush.bf16.msra.mxu0 %v9032_v37  ;;  %v9160_v44 = vor.u32 %v10005_v24, %v9157_v14 }
 0x7f2   :  { %6075 = vmatpush.bf16.msra.mxu3 %v9416_v52  ;;  %v15158_v52 = vld [vmem:[#allocation33_spill] sm:$0xff] }
 0x7f3   :  { %5780 = vmatmul.bf16.gmra.mxu3 %v13727_v47  ;;  %v13791_v6 = vpack.c.bf16 %v6897_v60, %v6893_v11  ;;  %v5652_v57 = vpop.f32.mrf.mxu2  ;;  %5897 = vmatpush.bf16.msra.mxu1 %v9160_v44 }
 0x7f4   :  { %v5653_v46 = vadd.f32 %v5652_v57, %v5564_v40  ;;  %v5476_v25 = vpop.f32.mrf.mxu0 }
 0x7f5   :  { %15156 = vst [vmem:[#allocation97_spill] sm:$0xff] %v13791_v6  ;;  %v5477_v34 = vadd.f32 %v5476_v25, %v13752_v61 }
 0x7f6   :  { %v5741_v36 = vpop.f32.mrf.mxu3  ;;  %v5565_v26 = vpop.f32.mrf.mxu1 }
 0x7f7   :  { %v5742_v47 = vadd.f32 %v5741_v36, %v5653_v46  ;;  %v5566_v49 = vadd.f32 %v5565_v26, %v5477_v34 }
 0x7f9   :  { %v6901_v57 = vmax.f32 %v5742_v47, 0.0 }
 0x7fb   :  { %v5654_v27 = vpop.f32.mrf.mxu2 }
 0x7fc   :  { %v5655_v11 = vadd.f32 %v5654_v27, %v5566_v49  ;;  %v5479_v19 = vpop.f32.mrf.mxu0 }
 0x7fd   :  { %v5480_v40 = vadd.f32 %v5479_v19, %v13752_v61 }
 0x7fe   :  { %v5743_v60 = vpop.f32.mrf.mxu3  ;;  %v5568_v51 = vpop.f32.mrf.mxu1 }
 0x7ff   :  { %v5744_v54 = vadd.f32 %v5743_v60, %v5655_v11  ;;  %v5569_v4 = vadd.f32 %v5568_v51, %v5480_v40  ;;  %5518 = vmatmul.bf16.gmra.mxu0 %v15157_v58 }
 0x800   :  { %5696 = vmatmul.bf16.gmra.mxu2 %v13577_v42 }
 0x801   :  { %v6905_v37 = vmax.f32 %v5744_v54, 0.0  ;;  %5607 = vmatmul.bf16.gmra.mxu1 %v15158_v52 }
 0x803   :  { %5785 = vmatmul.bf16.gmra.mxu3 %v13735_v15  ;;  %v13799_v26 = vpack.c.bf16 %v6905_v37, %v6901_v57  ;;  %v5657_v49 = vpop.f32.mrf.mxu2  ;;  %v15160_v57 = vld [vmem:[#allocation140_spill] sm:$0xff] }
 0x804   :  { %v5658_v34 = vadd.f32 %v5657_v49, %v5569_v4  ;;  %v5481_v44 = vpop.f32.mrf.mxu0  ;;  %v15161_v49 = vld [vmem:[#allocation37_spill] sm:$0xff] }
 0x805   :  { %15159 = vst [vmem:[#allocation35_spill] sm:$0xff] %v13799_v26  ;;  %v5482_v46 = vadd.f32 %v5481_v44, %v13752_v61  ;;  %v9147_v44 = vld [vmem:[#allocation2 + $0xe8] sm:$0xf] }
 0x806   :  { %v5746_v27 = vpop.f32.mrf.mxu3  ;;  %v5570_v36 = vpop.f32.mrf.mxu1 }
 0x807   :  { %v5747_v25 = vadd.f32 %v5746_v27, %v5658_v34  ;;  %v5571_v24 = vadd.f32 %v5570_v36, %v5482_v46  ;;  %v9403_v34 = vld [vmem:[#allocation2 + $0x2e8] sm:$0xf]  ;;  %v10068_v27 = vld [vmem:[#allocation2 + $0x2f4] sm:$0xf0] }
 0x808   :  { %v9404_v46 = vor.u32 %v10068_v27, %v9403_v34  ;;  %v10004_v36 = vld [vmem:[#allocation2 + $0xf4] sm:$0xf0]  ;;  %v9275_v34 = vld [vmem:[#allocation2 + $0x1e8] sm:$0xf] }
 0x809   :  { %v6909_v37 = vmax.f32 %v5747_v25, 0.0  ;;  %v10036_v27 = vld [vmem:[#allocation2 + $0x1f4] sm:$0xf0] }
 0x80a   :  { %6335 = vmatpush.bf16.msrb.mxu2 %v9404_v46 }
 0x80b   :  { %v5659_v14 = vpop.f32.mrf.mxu2 }
 0x80c   :  { %v5660_v47 = vadd.f32 %v5659_v14, %v5571_v24  ;;  %v5484_v60 = vpop.f32.mrf.mxu0  ;;  %v9531_v24 = vld [vmem:[#allocation2 + $0x3e8] sm:$0xf]  ;;  %v10100_v14 = vld [vmem:[#allocation2 + $0x3f4] sm:$0xf0] }
 0x80d   :  { %v5485_v19 = vadd.f32 %v5484_v60, %v13752_v61 }
 0x80e   :  { %v5748_v11 = vpop.f32.mrf.mxu3  ;;  %v5573_v40 = vpop.f32.mrf.mxu1 }
 0x80f   :  { %v5749_v51 = vadd.f32 %v5748_v11, %v5660_v47  ;;  %v5574_v54 = vadd.f32 %v5573_v40, %v5485_v19  ;;  %5523 = vmatmul.bf16.gmra.mxu0 %v15160_v57  ;;  %v9148_v11 = vor.u32 %v10004_v36, %v9147_v44  ;;  %v9532_v19 = vor.u32 %v10100_v14, %v9531_v24  ;;  %v15163_v14 = vld [vmem:[#allocation142_spill] sm:$0xff] }
 0x810   :  { %5701 = vmatmul.bf16.gmra.mxu2 %v13592_v62 }
 0x811   :  { %v6913_v4 = vmax.f32 %v5749_v51, 0.0  ;;  %5612 = vmatmul.bf16.gmra.mxu1 %v15161_v49  ;;  %6157 = vmatpush.bf16.msrb.mxu0 %v9148_v11  ;;  %v9276_v49 = vor.u32 %v10036_v27, %v9275_v34 }
 0x812   :  { %6424 = vmatpush.bf16.msrb.mxu3 %v9532_v19  ;;  %v15164_v19 = vld [vmem:[#allocation149_spill] sm:$0xff] }
 0x813   :  { %5790 = vmatmul.bf16.gmra.mxu3 %v13743_v55  ;;  %v13807_v60 = vpack.c.bf16 %v6913_v4, %v6909_v37  ;;  %v5662_v47 = vpop.f32.mrf.mxu2  ;;  %6246 = vmatpush.bf16.msrb.mxu1 %v9276_v49 }
 0x814   :  { %v5663_v25 = vadd.f32 %v5662_v47, %v5574_v54  ;;  %v5486_v51 = vpop.f32.mrf.mxu0 }
 0x815   :  { %15162 = vst [vmem:[#allocation36_spill] sm:$0xff] %v13807_v60  ;;  %v5487_v26 = vadd.f32 %v5486_v51, %v13752_v61 }
 0x816   :  { %v5751_v40 = vpop.f32.mrf.mxu3  ;;  %v5575_v6 = vpop.f32.mrf.mxu1 }
 0x817   :  { %v5752_v55 = vadd.f32 %v5751_v40, %v5663_v25  ;;  %v5576_v62 = vadd.f32 %v5575_v6, %v5487_v26  ;;  %v15165_v6 = vld [vmem:[#allocation16_spill] sm:$0xff] }
 0x819   :  { %v6917_v47 = vmax.f32 %v5752_v55, 0.0 }
 0x81b   :  { %v5664_v57 = vpop.f32.mrf.mxu2 }
 0x81c   :  { %v5665_v37 = vadd.f32 %v5664_v57, %v5576_v62  ;;  %v5489_v44 = vpop.f32.mrf.mxu0 }
 0x81d   :  { %v5490_v54 = vadd.f32 %v5489_v44, %v13752_v61 }
 0x81e   :  { %v5753_v4 = vpop.f32.mrf.mxu3  ;;  %v5578_v36 = vpop.f32.mrf.mxu1 }
 0x81f   :  { %v5754_v24 = vadd.f32 %v5753_v4, %v5665_v37  ;;  %v5579_v46 = vadd.f32 %v5578_v36, %v5490_v54  ;;  %5528 = vmatmul.bf16.gmra.mxu0 %v15163_v14 }
 0x820   :  { %5706 = vmatmul.bf16.gmra.mxu2 %v15165_v6 }
 0x821   :  { %v6921_v11 = vmax.f32 %v5754_v24, 0.0  ;;  %5617 = vmatmul.bf16.gmra.mxu1 %v15164_v19 }
 0x823   :  { %5795 = vmatmul.bf16.gmra.mxu3 %v13759_v39  ;;  %v13815_v26 = vpack.c.bf16 %v6921_v11, %v6917_v47  ;;  %v5667_v62 = vpop.f32.mrf.mxu2  ;;  %v9387_v11 = vld [vmem:[#allocation2 + $0x2c8] sm:$0xf] }
 0x824   :  { %v5668_v57 = vadd.f32 %v5667_v62, %v5579_v46  ;;  %v5491_v25 = vpop.f32.mrf.mxu0  ;;  %v10064_v62 = vld [vmem:[#allocation2 + $0x2d4] sm:$0xf0] }
 0x825   :  { %15166 = vst [vmem:[#allocation148_spill] sm:$0xff] %v13815_v26  ;;  %v5492_v40 = vadd.f32 %v5491_v25, %v13752_v61  ;;  %v10000_v25 = vld [vmem:[#allocation2 + $0xd4] sm:$0xf0] }
 0x826   :  { %v5756_v49 = vpop.f32.mrf.mxu3  ;;  %v5580_v51 = vpop.f32.mrf.mxu1 }
 0x827   :  { %v5757_v34 = vadd.f32 %v5756_v49, %v5668_v57  ;;  %v5581_v27 = vadd.f32 %v5580_v51, %v5492_v40  ;;  %v9131_v57 = vld [vmem:[#allocation2 + $0xc8] sm:$0xf]  ;;  %v9388_v49 = vor.u32 %v10064_v62, %v9387_v11  ;;  %v10096_v51 = vld [vmem:[#allocation2 + $0x3d4] sm:$0xf0] }
 0x828   :  { %v9515_v40 = vld [vmem:[#allocation2 + $0x3c8] sm:$0xf]  ;;  %v10032_v62 = vld [vmem:[#allocation2 + $0x1d4] sm:$0xf0] }
 0x829   :  { %v6925_v47 = vmax.f32 %v5757_v34, 0.0  ;;  %6336 = vmatpush.bf16.msrb.mxu2 %v9388_v49  ;;  %v9259_v11 = vld [vmem:[#allocation2 + $0x1c8] sm:$0xf] }
 0x82b   :  { %v5669_v37 = vpop.f32.mrf.mxu2 }
 0x82c   :  { %v5670_v55 = vadd.f32 %v5669_v37, %v5581_v27  ;;  %v5494_v44 = vpop.f32.mrf.mxu0 }
 0x82d   :  { %v5495_v54 = vadd.f32 %v5494_v44, %v13752_v61 }
 0x82e   :  { %v5758_v4 = vpop.f32.mrf.mxu3  ;;  %v5583_v36 = vpop.f32.mrf.mxu1 }
 0x82f   :  { %v5759_v24 = vadd.f32 %v5758_v4, %v5670_v55  ;;  %v5584_v60 = vadd.f32 %v5583_v36, %v5495_v54  ;;  %5809 = vmatmul.bf16.vlgmr.msra.gmra.mxu0 %v15113_v0  ;;  %v9132_v55 = vor.u32 %v10000_v25, %v9131_v57  ;;  %v9516_v4 = vor.u32 %v10096_v51, %v9515_v40 }
 0x830   :  { %5987 = vmatmul.bf16.vlgmr.msra.gmra.mxu2 %v15115_v29  ;;  %v9260_v29 = vor.u32 %v10032_v62, %v9259_v11 }
 0x831   :  { %v6929_v46 = vmax.f32 %v5759_v24, 0.0  ;;  %5898 = vmatmul.bf16.vlgmr.msra.gmra.mxu1 %v15114_v31  ;;  %6158 = vmatpush.bf16.msrb.mxu0 %v9132_v55 }
 0x832   :  { %6425 = vmatpush.bf16.msrb.mxu3 %v9516_v4  ;;  %6247 = vmatpush.bf16.msrb.mxu1 %v9260_v29 }
 0x833   :  { %6076 = vmatmul.bf16.vlgmr.msra.gmra.mxu3 %v13625_v8  ;;  %v13823_v27 = vpack.c.bf16 %v6929_v46, %v6925_v47  ;;  %v5672_v37 = vpop.f32.mrf.mxu2 }
 0x834   :  { %v5673_v34 = vadd.f32 %v5672_v37, %v5584_v60  ;;  %v5496_v54 = vpop.f32.mrf.mxu0 }
 0x835   :  { %15167 = vst [vmem:[#allocation102_spill] sm:$0xff] %v13823_v27  ;;  %v5497_v36 = vadd.f32 %v5496_v54, %v13752_v61 }
 0x836   :  { %v5761_v44 = vpop.f32.mrf.mxu3  ;;  %v5585_v24 = vpop.f32.mrf.mxu1 }
 0x837   :  { %v5762_v26 = vadd.f32 %v5761_v44, %v5673_v34  ;;  %v5586_v8 = vadd.f32 %v5585_v24, %v5497_v36 }
 0x839   :  { %v6933_v51 = vmax.f32 %v5762_v26, 0.0 }
 0x83b   :  { %v5674_v31 = vpop.f32.mrf.mxu2 }
 0x83c   :  { %v5675_v47 = vadd.f32 %v5674_v31, %v5586_v8  ;;  %v5499_v57 = vpop.f32.mrf.mxu0 }
 0x83d   :  { %v5500_v60 = vadd.f32 %v5499_v57, %v13752_v61 }
 0x83e   :  { %v5763_v46 = vpop.f32.mrf.mxu3  ;;  %v5588_v25 = vpop.f32.mrf.mxu1 }
 0x83f   :  { %v5764_v40 = vadd.f32 %v5763_v46, %v5675_v47  ;;  %v5589_v49 = vadd.f32 %v5588_v25, %v5500_v60  ;;  %5814 = vmatmul.bf16.gmra.mxu0 %v15117_v50 }
 0x840   :  { %5992 = vmatmul.bf16.gmra.mxu2 %v15119_v1 }
 0x841   :  { %v6937_v37 = vmax.f32 %v5764_v40, 0.0  ;;  %5903 = vmatmul.bf16.gmra.mxu1 %v15118_v2 }
 0x843   :  { %6081 = vmatmul.bf16.gmra.mxu3 %v13634_v13  ;;  %v13831_v55 = vpack.c.bf16 %v6937_v37, %v6933_v51  ;;  %v5677_v8 = vpop.f32.mrf.mxu2  ;;  %v10060_v51 = vld [vmem:[#allocation2 + $0x2b4] sm:$0xf0]  ;;  %v9115_v37 = vld [vmem:[#allocation2 + $0xa8] sm:$0xf] }
 0x844   :  { %v5678_v31 = vadd.f32 %v5677_v8, %v5589_v49  ;;  %v5501_v4 = vpop.f32.mrf.mxu0  ;;  %v9371_v49 = vld [vmem:[#allocation2 + $0x2a8] sm:$0xf] }
 0x845   :  { %15168 = vst [vmem:[#allocation39_spill] sm:$0xff] %v13831_v55  ;;  %v5502_v34 = vadd.f32 %v5501_v4, %v13752_v61  ;;  %v9372_v8 = vor.u32 %v10060_v51, %v9371_v49  ;;  %v10092_v4 = vld [vmem:[#allocation2 + $0x3b4] sm:$0xf0]  ;;  %v9243_v49 = vld [vmem:[#allocation2 + $0x1a8] sm:$0xf] }
 0x846   :  { %v5766_v29 = vpop.f32.mrf.mxu3  ;;  %v5590_v44 = vpop.f32.mrf.mxu1  ;;  %v10028_v51 = vld [vmem:[#allocation2 + $0x1b4] sm:$0xf0] }
 0x847   :  { %v5767_v54 = vadd.f32 %v5766_v29, %v5678_v31  ;;  %v5591_v36 = vadd.f32 %v5590_v44, %v5502_v34  ;;  %v9996_v31 = vld [vmem:[#allocation2 + $0xb4] sm:$0xf0]  ;;  %v9499_v29 = vld [vmem:[#allocation2 + $0x3a8] sm:$0xf]  ;;  %6337 = vmatpush.bf16.msrb.mxu2 %v9372_v8  ;;  %v9244_v55 = vor.u32 %v10028_v51, %v9243_v49 }
 0x849   :  { %v6941_v25 = vmax.f32 %v5767_v54, 0.0  ;;  %6248 = vmatpush.bf16.msrb.mxu1 %v9244_v55 }
 0x84b   :  { %v5679_v24 = vpop.f32.mrf.mxu2 }
 0x84c   :  { %v5680_v26 = vadd.f32 %v5679_v24, %v5591_v36  ;;  %v5504_v62 = vpop.f32.mrf.mxu0  ;;  %v9116_v36 = vor.u32 %v9996_v31, %v9115_v37  ;;  %v9500_v24 = vor.u32 %v10092_v4, %v9499_v29 }
 0x84d   :  { %v5505_v47 = vadd.f32 %v5504_v62, %v13752_v61 }
 0x84e   :  { %v5768_v11 = vpop.f32.mrf.mxu3  ;;  %v5593_v46 = vpop.f32.mrf.mxu1  ;;  %6159 = vmatpush.bf16.msrb.mxu0 %v9116_v36  ;;  %6426 = vmatpush.bf16.msrb.mxu3 %v9500_v24 }
 0x84f   :  { %v5769_v57 = vadd.f32 %v5768_v11, %v5680_v26  ;;  %v5594_v60 = vadd.f32 %v5593_v46, %v5505_v47  ;;  %5819 = vmatmul.bf16.gmra.mxu0 %v15121_v21 }
 0x850   :  { %5997 = vmatmul.bf16.gmra.mxu2 %v15123_v22 }
 0x851   :  { %v6945_v40 = vmax.f32 %v5769_v57, 0.0  ;;  %5908 = vmatmul.bf16.gmra.mxu1 %v15122_v5 }
 0x853   :  { %6086 = vmatmul.bf16.gmra.mxu3 %v13643_v3  ;;  %v13839_v34 = vpack.c.bf16 %v6945_v40, %v6941_v25  ;;  %v5682_v44 = vpop.f32.mrf.mxu2 }
 0x854   :  { %v5683_v54 = vadd.f32 %v5682_v44, %v5594_v60  ;;  %v5506_v11 = vpop.f32.mrf.mxu0 }
 0x855   :  { %15169 = vst [vmem:[#allocation40_spill] sm:$0xff] %v13839_v34  ;;  %v5507_v62 = vadd.f32 %v5506_v11, %v13752_v61 }
 0x856   :  { %v5771_v26 = vpop.f32.mrf.mxu3  ;;  %v5595_v47 = vpop.f32.mrf.mxu1 }
 0x857   :  { %v5772_v46 = vadd.f32 %v5771_v26, %v5683_v54  ;;  %v5596_v57 = vadd.f32 %v5595_v47, %v5507_v62 }
 0x859   :  { %v6949_v4 = vmax.f32 %v5772_v46, 0.0 }
 0x85b   :  { %v5684_v27 = vpop.f32.mrf.mxu2 }
 0x85c   :  { %v5685_v25 = vadd.f32 %v5684_v27, %v5596_v57  ;;  %v5509_v37 = vpop.f32.mrf.mxu0 }
 0x85d   :  { %v5510_v60 = vadd.f32 %v5509_v37, %v13752_v61 }
 0x85e   :  { %v5773_v40 = vpop.f32.mrf.mxu3  ;;  %v5598_v31 = vpop.f32.mrf.mxu1 }
 0x85f   :  { %v5774_v29 = vadd.f32 %v5773_v40, %v5685_v25  ;;  %v5599_v8 = vadd.f32 %v5598_v31, %v5510_v60  ;;  %5824 = vmatmul.bf16.gmra.mxu0 %v15125_v32 }
 0x860   :  { %6002 = vmatmul.bf16.gmra.mxu2 %v15127_v63 }
 0x861   :  { %v6953_v44 = vmax.f32 %v5774_v29, 0.0  ;;  %5913 = vmatmul.bf16.gmra.mxu1 %v15126_v17 }
 0x863   :  { %6091 = vmatmul.bf16.gmra.mxu3 %v13652_v30  ;;  %v13847_v36 = vpack.c.bf16 %v6953_v44, %v6949_v4  ;;  %v5687_v27 = vpop.f32.mrf.mxu2  ;;  %v10056_v4 = vld [vmem:[#allocation2 + $0x294] sm:$0xf0]  ;;  %v9099_v44 = vld [vmem:[#allocation2 + $0x88] sm:$0xf] }
 0x864   :  { %v5688_v55 = vadd.f32 %v5687_v27, %v5599_v8  ;;  %v5511_v54 = vpop.f32.mrf.mxu0  ;;  %v9355_v8 = vld [vmem:[#allocation2 + $0x288] sm:$0xf] }
 0x865   :  { %15170 = vst [vmem:[#allocation41_spill] sm:$0xff] %v13847_v36  ;;  %v5512_v26 = vadd.f32 %v5511_v54, %v13752_v61  ;;  %v9356_v27 = vor.u32 %v10056_v4, %v9355_v8  ;;  %v10088_v54 = vld [vmem:[#allocation2 + $0x394] sm:$0xf0]  ;;  %v9227_v8 = vld [vmem:[#allocation2 + $0x188] sm:$0xf] }
 0x866   :  { %v5776_v24 = vpop.f32.mrf.mxu3  ;;  %v5600_v11 = vpop.f32.mrf.mxu1  ;;  %v10024_v4 = vld [vmem:[#allocation2 + $0x194] sm:$0xf0] }
 0x867   :  { %v5777_v62 = vadd.f32 %v5776_v24, %v5688_v55  ;;  %v5601_v47 = vadd.f32 %v5600_v11, %v5512_v26  ;;  %v9992_v55 = vld [vmem:[#allocation2 + $0x94] sm:$0xf0]  ;;  %v9483_v24 = vld [vmem:[#allocation2 + $0x388] sm:$0xf]  ;;  %6338 = vmatpush.bf16.msrb.mxu2 %v9356_v27  ;;  %v9228_v36 = vor.u32 %v10024_v4, %v9227_v8 }
 0x869   :  { %v6957_v31 = vmax.f32 %v5777_v62, 0.0  ;;  %6249 = vmatpush.bf16.msrb.mxu1 %v9228_v36 }
 0x86b   :  { %v5689_v57 = vpop.f32.mrf.mxu2 }
 0x86c   :  { %v5690_v46 = vadd.f32 %v5689_v57, %v5601_v47  ;;  %v5514_v51 = vpop.f32.mrf.mxu0  ;;  %v9100_v47 = vor.u32 %v9992_v55, %v9099_v44  ;;  %v9484_v57 = vor.u32 %v10088_v54, %v9483_v24 }
 0x86d   :  { %v5515_v25 = vadd.f32 %v5514_v51, %v13752_v61 }
 0x86e   :  { %v5778_v49 = vpop.f32.mrf.mxu3  ;;  %v5603_v40 = vpop.f32.mrf.mxu1  ;;  %6160 = vmatpush.bf16.msrb.mxu0 %v9100_v47  ;;  %6427 = vmatpush.bf16.msrb.mxu3 %v9484_v57 }
 0x86f   :  { %v5779_v37 = vadd.f32 %v5778_v49, %v5690_v46  ;;  %v5604_v60 = vadd.f32 %v5603_v40, %v5515_v25  ;;  %5829 = vmatmul.bf16.gmra.mxu0 %v15129_v43 }
 0x870   :  { %6007 = vmatmul.bf16.gmra.mxu2 %v15131_v59 }
 0x871   :  { %v6961_v29 = vmax.f32 %v5779_v37, 0.0  ;;  %5918 = vmatmul.bf16.gmra.mxu1 %v15130_v28 }
 0x873   :  { %6096 = vmatmul.bf16.gmra.mxu3 %v13661_v45  ;;  %v13855_v26 = vpack.c.bf16 %v6961_v29, %v6957_v31  ;;  %v5692_v11 = vpop.f32.mrf.mxu2 }
 0x874   :  { %v5693_v62 = vadd.f32 %v5692_v11, %v5604_v60  ;;  %v5516_v49 = vpop.f32.mrf.mxu0 }
 0x875   :  { %15171 = vst [vmem:[#allocation43_spill] sm:$0xff] %v13855_v26  ;;  %v5517_v51 = vadd.f32 %v5516_v49, %v13752_v61 }
 0x876   :  { %v5781_v46 = vpop.f32.mrf.mxu3  ;;  %v5605_v25 = vpop.f32.mrf.mxu1 }
 0x877   :  { %v5782_v40 = vadd.f32 %v5781_v46, %v5693_v62  ;;  %v5606_v37 = vadd.f32 %v5605_v25, %v5517_v51 }
 0x879   :  { %v6965_v54 = vmax.f32 %v5782_v40, 0.0 }
 0x87b   :  { %v5694_v34 = vpop.f32.mrf.mxu2 }
 0x87c   :  { %v5695_v31 = vadd.f32 %v5694_v34, %v5606_v37  ;;  %v5519_v44 = vpop.f32.mrf.mxu0 }
 0x87d   :  { %v5520_v60 = vadd.f32 %v5519_v44, %v13752_v61 }
 0x87e   :  { %v5783_v29 = vpop.f32.mrf.mxu3  ;;  %v5608_v55 = vpop.f32.mrf.mxu1 }
 0x87f   :  { %v5784_v24 = vadd.f32 %v5783_v29, %v5695_v31  ;;  %v5609_v27 = vadd.f32 %v5608_v55, %v5520_v60  ;;  %5834 = vmatmul.bf16.gmra.mxu0 %v15132_v41 }
 0x880   :  { %6012 = vmatmul.bf16.gmra.mxu2 %v15134_v9 }
 0x881   :  { %v6969_v11 = vmax.f32 %v5784_v24, 0.0  ;;  %5923 = vmatmul.bf16.gmra.mxu1 %v15133_v53 }
 0x883   :  { %6101 = vmatmul.bf16.gmra.mxu3 %v13670_v20  ;;  %v13863_v47 = vpack.c.bf16 %v6969_v11, %v6965_v54  ;;  %v5697_v34 = vpop.f32.mrf.mxu2  ;;  %v15174_v54 = vld [vmem:[#allocation73_spill] sm:$0xff]  ;;  %v15175_v11 = vld [vmem:[#allocation19_spill] sm:$0xff] }
 0x884   :  { %v5698_v36 = vadd.f32 %v5697_v34, %v5609_v27  ;;  %v5521_v62 = vpop.f32.mrf.mxu0  ;;  %v15173_v27 = vld [vmem:[#allocation146_spill] sm:$0xff]  ;;  %v9339_v34 = vld [vmem:[#allocation2 + $0x268] sm:$0xf] }
 0x885   :  { %15172 = vst [vmem:[#allocation44_spill] sm:$0xff] %v13863_v47  ;;  %v5522_v46 = vadd.f32 %v5521_v62, %v13752_v61 }
 0x886   :  { %v5786_v57 = vpop.f32.mrf.mxu3  ;;  %v5610_v49 = vpop.f32.mrf.mxu1 }
 0x887   :  { %v5787_v51 = vadd.f32 %v5786_v57, %v5698_v36  ;;  %v5611_v25 = vadd.f32 %v5610_v49, %v5522_v46  ;;  %v10052_v36 = vld [vmem:[#allocation2 + $0x274] sm:$0xf0]  ;;  %v9083_v57 = vld [vmem:[#allocation2 + $0x68] sm:$0xf] }
 0x888   :  { %v9340_v62 = vor.u32 %v10052_v36, %v9339_v34  ;;  %v9988_v46 = vld [vmem:[#allocation2 + $0x74] sm:$0xf0]  ;;  %v9467_v49 = vld [vmem:[#allocation2 + $0x368] sm:$0xf] }
 0x889   :  { %v6973_v55 = vmax.f32 %v5787_v51, 0.0  ;;  %v9211_v34 = vld [vmem:[#allocation2 + $0x168] sm:$0xf]  ;;  %v10020_v36 = vld [vmem:[#allocation2 + $0x174] sm:$0xf0] }
 0x88a   :  { %6339 = vmatpush.bf16.msrb.mxu2 %v9340_v62 }
 0x88b   :  { %v5699_v37 = vpop.f32.mrf.mxu2 }
 0x88c   :  { %v5700_v40 = vadd.f32 %v5699_v37, %v5611_v25  ;;  %v5524_v4 = vpop.f32.mrf.mxu0  ;;  %v10084_v25 = vld [vmem:[#allocation2 + $0x374] sm:$0xf0] }
 0x88d   :  { %v5525_v31 = vadd.f32 %v5524_v4, %v13752_v61  ;;  %v9468_v4 = vor.u32 %v10084_v25, %v9467_v49 }
 0x88e   :  { %v5788_v8 = vpop.f32.mrf.mxu3  ;;  %v5613_v29 = vpop.f32.mrf.mxu1 }
 0x88f   :  { %v5789_v44 = vadd.f32 %v5788_v8, %v5700_v40  ;;  %v5614_v60 = vadd.f32 %v5613_v29, %v5525_v31  ;;  %5839 = vmatmul.bf16.gmra.mxu0 %v15136_v18  ;;  %v9084_v8 = vor.u32 %v9988_v46, %v9083_v57  ;;  %6428 = vmatpush.bf16.msrb.mxu3 %v9468_v4 }
 0x890   :  { %6017 = vmatmul.bf16.gmra.mxu2 %v15174_v54  ;;  %v9212_v54 = vor.u32 %v10020_v36, %v9211_v34  ;;  %v15179_v34 = vld [vmem:[#allocation28_spill] sm:$0xff] }
 0x891   :  { %v6977_v24 = vmax.f32 %v5789_v44, 0.0  ;;  %5928 = vmatmul.bf16.gmra.mxu1 %v15173_v27  ;;  %6161 = vmatpush.bf16.msrb.mxu0 %v9084_v8 }
 0x892   :  { %6250 = vmatpush.bf16.msrb.mxu1 %v9212_v54 }
 0x893   :  { %6106 = vmatmul.bf16.gmra.mxu3 %v15175_v11  ;;  %v13871_v37 = vpack.c.bf16 %v6977_v24, %v6973_v55  ;;  %v5702_v40 = vpop.f32.mrf.mxu2 }
 0x894   :  { %v5703_v51 = vadd.f32 %v5702_v40, %v5614_v60  ;;  %v5526_v29 = vpop.f32.mrf.mxu0 }
 0x895   :  { %15176 = vst [vmem:[#allocation47_spill] sm:$0xff] %v13871_v37  ;;  %v5527_v44 = vadd.f32 %v5526_v29, %v13752_v61 }
 0x896   :  { %v5791_v31 = vpop.f32.mrf.mxu3  ;;  %v5615_v47 = vpop.f32.mrf.mxu1 }
 0x897   :  { %v5792_v26 = vadd.f32 %v5791_v31, %v5703_v51  ;;  %v5616_v11 = vadd.f32 %v5615_v47, %v5527_v44  ;;  %v15177_v47 = vld [vmem:[#allocation20_spill] sm:$0xff] }
 0x899   :  { %v6981_v25 = vmax.f32 %v5792_v26, 0.0  ;;  %v13883_v26 = vperm.slane %v15179_v34, 1  ;;  %v9984_v34 = vld [vmem:[#allocation2 + $0x54] sm:$0xf0] }
 0x89b   :  { %v5704_v27 = vpop.f32.mrf.mxu2 }
 0x89c   :  { %v5705_v55 = vadd.f32 %v5704_v27, %v5616_v11  ;;  %v5529_v57 = vpop.f32.mrf.mxu0 }
 0x89d   :  { %v5530_v60 = vadd.f32 %v5529_v57, %v13752_v61 }
 0x89e   :  { %v5793_v24 = vpop.f32.mrf.mxu3  ;;  %v5618_v46 = vpop.f32.mrf.mxu1 }
 0x89f   :  { %v5794_v49 = vadd.f32 %v5793_v24, %v5705_v55  ;;  %v5619_v62 = vadd.f32 %v5618_v46, %v5530_v60  ;;  %5844 = vmatmul.bf16.gmra.mxu0 %v15138_v7 }
 0x8a0   :  { %6022 = vmatmul.bf16.gmra.mxu2 %v15140_v10 }
 0x8a1   :  { %v6985_v40 = vmax.f32 %v5794_v49, 0.0  ;;  %5933 = vmatmul.bf16.gmra.mxu1 %v15139_v56 }
 0x8a3   :  { %6111 = vmatmul.bf16.gmra.mxu3 %v15177_v47  ;;  %v13879_v8 = vpack.c.bf16 %v6985_v40, %v6981_v25  ;;  %v5707_v27 = vpop.f32.mrf.mxu2 }
 0x8a4   :  { %v5708_v54 = vadd.f32 %v5707_v27, %v5619_v62  ;;  %v5531_v4 = vpop.f32.mrf.mxu0  ;;  %v15180_v62 = vld [vmem:[#allocation137_spill] sm:$0xff] }
 0x8a5   :  { %15178 = vst [vmem:[#allocation48_spill] sm:$0xff] %v13879_v8  ;;  %v5532_v51 = vadd.f32 %v5531_v4, %v13752_v61  ;;  %v15181_v61 = vld [vmem:[#allocation13_spill] sm:$0xff]  ;;  %v9323_v4 = vld [vmem:[#allocation2 + $0x248] sm:$0xf] }
 0x8a6   :  { %v5796_v11 = vpop.f32.mrf.mxu3  ;;  %v5620_v31 = vpop.f32.mrf.mxu1 }
 0x8a7   :  { %v5797_v29 = vadd.f32 %v5796_v11, %v5708_v54  ;;  %v5621_v44 = vadd.f32 %v5620_v31, %v5532_v51  ;;  %v15182_v54 = vld [vmem:[#allocation11_spill] sm:$0xff]  ;;  %v15183_v11 = vld [vmem:[#allocation86_spill] sm:$0xff]  ;;  %v9067_v31 = vld [vmem:[#allocation2 + $0x48] sm:$0xf] }
 0x8a8   :  { %v10048_v51 = vld [vmem:[#allocation2 + $0x254] sm:$0xf0] }
 0x8a9   :  { %v6989_v40 = vmax.f32 %v5797_v29, 0.0 }
 0x8ab   :  { %v5709_v36 = vpop.f32.mrf.mxu2 }
 0x8ac   :  { %v5710_v55 = vadd.f32 %v5709_v36, %v5621_v44  ;;  %v5810_v57 = vpop.f32.mrf.mxu0  ;;  %v9324_v44 = vor.u32 %v10048_v51, %v9323_v4  ;;  %v9451_v36 = vld [vmem:[#allocation2 + $0x348] sm:$0xf]  ;;  %v10016_v51 = vld [vmem:[#allocation2 + $0x154] sm:$0xf0] }
 0x8ad   :  { %v5811_v60 = vadd.f32 %v5810_v57, %v13883_v26  ;;  %v10080_v57 = vld [vmem:[#allocation2 + $0x354] sm:$0xf0]  ;;  %v9195_v4 = vld [vmem:[#allocation2 + $0x148] sm:$0xf] }
 0x8ae   :  { %v5798_v24 = vpop.f32.mrf.mxu3  ;;  %v5899_v46 = vpop.f32.mrf.mxu1  ;;  %6340 = vmatpush.bf16.msrb.mxu2 %v9324_v44 }
 0x8af   :  { %v5799_v49 = vadd.f32 %v5798_v24, %v5710_v55  ;;  %v5900_v25 = vadd.f32 %v5899_v46, %v5811_v60  ;;  %5849 = vmatmul.bf16.gmra.mxu0 %v15180_v62  ;;  %v9068_v24 = vor.u32 %v9984_v34, %v9067_v31  ;;  %v9452_v60 = vor.u32 %v10080_v57, %v9451_v36 }
 0x8b0   :  { %6027 = vmatmul.bf16.gmra.mxu2 %v15182_v54  ;;  %v9196_v62 = vor.u32 %v10016_v51, %v9195_v4 }
 0x8b1   :  { %v6993_v27 = vmax.f32 %v5799_v49, 0.0  ;;  %5938 = vmatmul.bf16.gmra.mxu1 %v15181_v61  ;;  %6162 = vmatpush.bf16.msrb.mxu0 %v9068_v24 }
 0x8b2   :  { %6429 = vmatpush.bf16.msrb.mxu3 %v9452_v60  ;;  %6251 = vmatpush.bf16.msrb.mxu1 %v9196_v62 }
 0x8b3   :  { %6116 = vmatmul.bf16.gmra.mxu3 %v15183_v11  ;;  %v13890_v8 = vpack.c.bf16 %v6993_v27, %v6989_v40  ;;  %v5988_v55 = vpop.f32.mrf.mxu2 }
 0x8b4   :  { %v5989_v29 = vadd.f32 %v5988_v55, %v5900_v25  ;;  %v5812_v49 = vpop.f32.mrf.mxu0 }
 0x8b5   :  { %15184 = vst [vmem:[#allocation114_spill] sm:$0xff] %v13890_v8  ;;  %v5813_v37 = vadd.f32 %v5812_v49, %v13883_v26 }
 0x8b6   :  { %v6077_v46 = vpop.f32.mrf.mxu3  ;;  %v5901_v54 = vpop.f32.mrf.mxu1 }
 0x8b7   :  { %v6078_v11 = vadd.f32 %v6077_v46, %v5989_v29  ;;  %v5902_v61 = vadd.f32 %v5901_v54, %v5813_v37  ;;  %v15185_v37 = vld [vmem:[#allocation23_spill] sm:$0xff] }
 0x8b9   :  { %v6870_v57 = vmax.f32 %v6078_v11, 0.0 }
 0x8bb   :  { %v5990_v47 = vpop.f32.mrf.mxu2 }
 0x8bc   :  { %v5991_v40 = vadd.f32 %v5990_v47, %v5902_v61  ;;  %v5815_v31 = vpop.f32.mrf.mxu0 }
 0x8bd   :  { %v5816_v25 = vadd.f32 %v5815_v31, %v13883_v26 }
 0x8be   :  { %v6079_v27 = vpop.f32.mrf.mxu3  ;;  %v5904_v34 = vpop.f32.mrf.mxu1 }
 0x8bf   :  { %v6080_v36 = vadd.f32 %v6079_v27, %v5991_v40  ;;  %v5905_v44 = vadd.f32 %v5904_v34, %v5816_v25  ;;  %5854 = vmatmul.bf16.gmra.mxu0 %v15145_v16 }
 0x8c0   :  { %6032 = vmatmul.bf16.gmra.mxu2 %v13517_v48 }
 0x8c1   :  { %v6874_v55 = vmax.f32 %v6080_v36, 0.0  ;;  %5943 = vmatmul.bf16.gmra.mxu1 %v15146_v38  ;;  %v15187_v36 = vld [vmem:[#allocation139_spill] sm:$0xff] }
 0x8c3   :  { %6121 = vmatmul.bf16.gmra.mxu3 %v15185_v37  ;;  %v13898_v54 = vpack.c.bf16 %v6874_v55, %v6870_v57  ;;  %v5993_v47 = vpop.f32.mrf.mxu2  ;;  %v15188_v55 = vld [vmem:[#allocation21_spill] sm:$0xff] }
 0x8c4   :  { %v5994_v62 = vadd.f32 %v5993_v47, %v5905_v44  ;;  %v5817_v24 = vpop.f32.mrf.mxu0  ;;  %v15189_v47 = vld [vmem:[#allocation12_spill] sm:$0xff] }
 0x8c5   :  { %15186 = vst [vmem:[#allocation51_spill] sm:$0xff] %v13898_v54  ;;  %v5818_v60 = vadd.f32 %v5817_v24, %v13883_v26  ;;  %v15190_v24 = vld [vmem:[#allocation24_spill] sm:$0xff] }
 0x8c6   :  { %v6082_v61 = vpop.f32.mrf.mxu3  ;;  %v5906_v29 = vpop.f32.mrf.mxu1 }
 0x8c7   :  { %v6083_v46 = vadd.f32 %v6082_v61, %v5994_v62  ;;  %v5907_v49 = vadd.f32 %v5906_v29, %v5818_v60  ;;  %v9307_v62 = vld [vmem:[#allocation2 + $0x228] sm:$0xf]  ;;  %v10044_v61 = vld [vmem:[#allocation2 + $0x234] sm:$0xf0] }
 0x8c8   :  { %v9051_v60 = vld [vmem:[#allocation2 + $0x28] sm:$0xf]  ;;  %v9308_v29 = vor.u32 %v10044_v61, %v9307_v62  ;;  %v10012_v61 = vld [vmem:[#allocation2 + $0x134] sm:$0xf0] }
 0x8c9   :  { %v6878_v57 = vmax.f32 %v6083_v46, 0.0  ;;  %v9179_v62 = vld [vmem:[#allocation2 + $0x128] sm:$0xf] }
 0x8ca   :  { %6341 = vmatpush.bf16.msrb.mxu2 %v9308_v29 }
 0x8cb   :  { %v5995_v4 = vpop.f32.mrf.mxu2 }
 0x8cc   :  { %v5996_v11 = vadd.f32 %v5995_v4, %v5907_v49  ;;  %v5820_v40 = vpop.f32.mrf.mxu0  ;;  %v9980_v49 = vld [vmem:[#allocation2 + $0x34] sm:$0xf0]  ;;  %v9435_v4 = vld [vmem:[#allocation2 + $0x328] sm:$0xf] }
 0x8cd   :  { %v5821_v27 = vadd.f32 %v5820_v40, %v13883_v26  ;;  %v10076_v40 = vld [vmem:[#allocation2 + $0x334] sm:$0xf0] }
 0x8ce   :  { %v6084_v51 = vpop.f32.mrf.mxu3  ;;  %v5909_v31 = vpop.f32.mrf.mxu1 }
 0x8cf   :  { %v6085_v25 = vadd.f32 %v6084_v51, %v5996_v11  ;;  %v5910_v34 = vadd.f32 %v5909_v31, %v5821_v27  ;;  %5859 = vmatmul.bf16.gmra.mxu0 %v15187_v36  ;;  %v9052_v51 = vor.u32 %v9980_v49, %v9051_v60  ;;  %v9436_v27 = vor.u32 %v10076_v40, %v9435_v4 }
 0x8d0   :  { %6037 = vmatmul.bf16.gmra.mxu2 %v15189_v47  ;;  %v9180_v36 = vor.u32 %v10012_v61, %v9179_v62 }
 0x8d1   :  { %v6882_v44 = vmax.f32 %v6085_v25, 0.0  ;;  %5948 = vmatmul.bf16.gmra.mxu1 %v15188_v55  ;;  %6163 = vmatpush.bf16.msrb.mxu0 %v9052_v51 }
 0x8d2   :  { %6430 = vmatpush.bf16.msrb.mxu3 %v9436_v27  ;;  %6252 = vmatpush.bf16.msrb.mxu1 %v9180_v36 }
 0x8d3   :  { %6126 = vmatmul.bf16.gmra.mxu3 %v15190_v24  ;;  %v13906_v8 = vpack.c.bf16 %v6882_v44, %v6878_v57  ;;  %v5998_v11 = vpop.f32.mrf.mxu2 }
 0x8d4   :  { %v5999_v46 = vadd.f32 %v5998_v11, %v5910_v34  ;;  %v5822_v25 = vpop.f32.mrf.mxu0 }
 0x8d5   :  { %15191 = vst [vmem:[#allocation52_spill] sm:$0xff] %v13906_v8  ;;  %v5823_v54 = vadd.f32 %v5822_v25, %v13883_v26 }
 0x8d6   :  { %v6087_v31 = vpop.f32.mrf.mxu3  ;;  %v5911_v47 = vpop.f32.mrf.mxu1 }
 0x8d7   :  { %v6088_v24 = vadd.f32 %v6087_v31, %v5999_v46  ;;  %v5912_v55 = vadd.f32 %v5911_v47, %v5823_v54 }
 0x8d9   :  { %v6886_v40 = vmax.f32 %v6088_v24, 0.0 }
 0x8db   :  { %v6000_v37 = vpop.f32.mrf.mxu2 }
 0x8dc   :  { %v6001_v57 = vadd.f32 %v6000_v37, %v5912_v55  ;;  %v5825_v60 = vpop.f32.mrf.mxu0 }
 0x8dd   :  { %v5826_v34 = vadd.f32 %v5825_v60, %v13883_v26 }
 0x8de   :  { %v6089_v44 = vpop.f32.mrf.mxu3  ;;  %v5914_v49 = vpop.f32.mrf.mxu1 }
 0x8df   :  { %v6090_v4 = vadd.f32 %v6089_v44, %v6001_v57  ;;  %v5915_v29 = vadd.f32 %v5914_v49, %v5826_v34  ;;  %5864 = vmatmul.bf16.gmra.mxu0 %v15151_v33  ;;  %v15193_v49 = vld [vmem:[#allocation91_spill] sm:$0xff] }
 0x8e0   :  { %6042 = vmatmul.bf16.gmra.mxu2 %v13547_v12 }
 0x8e1   :  { %v6890_v11 = vmax.f32 %v6090_v4, 0.0  ;;  %5953 = vmatmul.bf16.gmra.mxu1 %v15152_v35 }
 0x8e3   :  { %6131 = vmatmul.bf16.gmra.mxu3 %v13719_v23  ;;  %v13914_v54 = vpack.c.bf16 %v6890_v11, %v6886_v40  ;;  %v6003_v37 = vpop.f32.mrf.mxu2  ;;  %v15194_v40 = vld [vmem:[#allocation29_spill] sm:$0xff]  ;;  %v15195_v11 = vld [vmem:[#allocation80_spill] sm:$0xff] }
 0x8e4   :  { %v6004_v36 = vadd.f32 %v6003_v37, %v5915_v29  ;;  %v5827_v47 = vpop.f32.mrf.mxu0  ;;  %v15196_v37 = vld [vmem:[#allocation89_spill] sm:$0xff] }
 0x8e5   :  { %15192 = vst [vmem:[#allocation118_spill] sm:$0xff] %v13914_v54  ;;  %v5828_v51 = vadd.f32 %v5827_v47, %v13883_v26  ;;  %v9035_v47 = vld [vmem:[#allocation2 + $0x8] sm:$0xf] }
 0x8e6   :  { %v6092_v55 = vpop.f32.mrf.mxu3  ;;  %v5916_v27 = vpop.f32.mrf.mxu1 }
 0x8e7   :  { %v6093_v46 = vadd.f32 %v6092_v55, %v6004_v36  ;;  %v5917_v31 = vadd.f32 %v5916_v27, %v5828_v51  ;;  %v9291_v36 = vld [vmem:[#allocation2 + $0x208] sm:$0xf]  ;;  %v10040_v55 = vld [vmem:[#allocation2 + $0x214] sm:$0xf0] }
 0x8e8   :  { %v9292_v51 = vor.u32 %v10040_v55, %v9291_v36  ;;  %v9976_v27 = vld [vmem:[#allocation2 + $0x14] sm:$0xf0]  ;;  %v9163_v36 = vld [vmem:[#allocation2 + $0x108] sm:$0xf] }
 0x8e9   :  { %v6894_v4 = vmax.f32 %v6093_v46, 0.0  ;;  %v10008_v55 = vld [vmem:[#allocation2 + $0x114] sm:$0xf0] }
 0x8ea   :  { %6342 = vmatpush.bf16.msrb.mxu2 %v9292_v51 }
 0x8eb   :  { %v6005_v25 = vpop.f32.mrf.mxu2 }
 0x8ec   :  { %v6006_v24 = vadd.f32 %v6005_v25, %v5917_v31  ;;  %v5830_v61 = vpop.f32.mrf.mxu0  ;;  %v9419_v31 = vld [vmem:[#allocation2 + $0x308] sm:$0xf]  ;;  %v10072_v25 = vld [vmem:[#allocation2 + $0x314] sm:$0xf0] }
 0x8ed   :  { %v5831_v57 = vadd.f32 %v5830_v61, %v13883_v26 }
 0x8ee   :  { %v6094_v62 = vpop.f32.mrf.mxu3  ;;  %v5919_v44 = vpop.f32.mrf.mxu1 }
 0x8ef   :  { %v6095_v60 = vadd.f32 %v6094_v62, %v6006_v24  ;;  %v5920_v34 = vadd.f32 %v5919_v44, %v5831_v57  ;;  %5869 = vmatmul.bf16.gmra.mxu0 %v15193_v49  ;;  %v9036_v62 = vor.u32 %v9976_v27, %v9035_v47  ;;  %v9420_v57 = vor.u32 %v10072_v25, %v9419_v31 }
 0x8f0   :  { %6047 = vmatmul.bf16.gmra.mxu2 %v15195_v11 }
 0x8f1   :  { %v6898_v29 = vmax.f32 %v6095_v60, 0.0  ;;  %5958 = vmatmul.bf16.gmra.mxu1 %v15194_v40  ;;  %6164 = vmatpush.bf16.msrb.mxu0 %v9036_v62  ;;  %v9164_v40 = vor.u32 %v10008_v55, %v9163_v36 }
 0x8f2   :  { %6431 = vmatpush.bf16.msrb.mxu3 %v9420_v57 }
 0x8f3   :  { %6136 = vmatmul.bf16.gmra.mxu3 %v15196_v37  ;;  %v13922_v61 = vpack.c.bf16 %v6898_v29, %v6894_v4  ;;  %v6008_v24 = vpop.f32.mrf.mxu2  ;;  %6253 = vmatpush.bf16.msrb.mxu1 %v9164_v40 }
 0x8f4   :  { %v6009_v46 = vadd.f32 %v6008_v24, %v5920_v34  ;;  %v5832_v60 = vpop.f32.mrf.mxu0 }
 0x8f5   :  { %15197 = vst [vmem:[#allocation55_spill] sm:$0xff] %v13922_v61  ;;  %v5833_v54 = vadd.f32 %v5832_v60, %v13883_v26 }
 0x8f6   :  { %v6097_v44 = vpop.f32.mrf.mxu3  ;;  %v5921_v8 = vpop.f32.mrf.mxu1 }
 0x8f7   :  { %v6098_v37 = vadd.f32 %v6097_v44, %v6009_v46  ;;  %v5922_v11 = vadd.f32 %v5921_v8, %v5833_v54 }
 0x8f9   :  { %v6902_v25 = vmax.f32 %v6098_v37, 0.0 }
 0x8fb   :  { %v6010_v49 = vpop.f32.mrf.mxu2 }
 0x8fc   :  { %v6011_v4 = vadd.f32 %v6010_v49, %v5922_v11  ;;  %v5835_v47 = vpop.f32.mrf.mxu0 }
 0x8fd   :  { %v5836_v34 = vadd.f32 %v5835_v47, %v13883_v26 }
 0x8fe   :  { %v6099_v29 = vpop.f32.mrf.mxu3  ;;  %v5924_v27 = vpop.f32.mrf.mxu1 }
 0x8ff   :  { %v6100_v31 = vadd.f32 %v6099_v29, %v6011_v4  ;;  %v5925_v51 = vadd.f32 %v5924_v27, %v5836_v34  ;;  %5874 = vmatmul.bf16.gmra.mxu0 %v15157_v58  ;;  %v15199_v27 = vld [vmem:[#allocation140_spill] sm:$0xff] }
 0x900   :  { %6052 = vmatmul.bf16.gmra.mxu2 %v13577_v42 }
 0x901   :  { %v6906_v24 = vmax.f32 %v6100_v31, 0.0  ;;  %5963 = vmatmul.bf16.gmra.mxu1 %v15158_v52 }
 0x903   :  { %6141 = vmatmul.bf16.gmra.mxu3 %v13735_v15  ;;  %v13930_v8 = vpack.c.bf16 %v6906_v24, %v6902_v25  ;;  %v6013_v54 = vpop.f32.mrf.mxu2  ;;  %v15200_v25 = vld [vmem:[#allocation37_spill] sm:$0xff]  ;;  %v15201_v24 = vld [vmem:[#allocation15_spill] sm:$0xff] }
 0x904   :  { %v6014_v49 = vadd.f32 %v6013_v54, %v5925_v51  ;;  %v5837_v11 = vpop.f32.mrf.mxu0  ;;  %v15202_v54 = vld [vmem:[#allocation27_spill] sm:$0xff] }
 0x905   :  { %15198 = vst [vmem:[#allocation56_spill] sm:$0xff] %v13930_v8  ;;  %v5838_v62 = vadd.f32 %v5837_v11, %v13883_v26  ;;  %v10002_v11 = vld [vmem:[#allocation2 + $0xec] sm:$0xf] }
 0x906   :  { %v6102_v40 = vpop.f32.mrf.mxu3  ;;  %v5926_v57 = vpop.f32.mrf.mxu1 }
 0x907   :  { %v6103_v46 = vadd.f32 %v6102_v40, %v6014_v49  ;;  %v5927_v44 = vadd.f32 %v5926_v57, %v5838_v62  ;;  %v10066_v49 = vld [vmem:[#allocation2 + $0x2ec] sm:$0xf]  ;;  %v9405_v40 = vld [vmem:[#allocation2 + $0x2f8] sm:$0xf0] }
 0x908   :  { %v9408_v62 = vor.u32 %v10066_v49, %v9405_v40  ;;  %v9149_v57 = vld [vmem:[#allocation2 + $0xf8] sm:$0xf0]  ;;  %v10034_v49 = vld [vmem:[#allocation2 + $0x1ec] sm:$0xf] }
 0x909   :  { %v6910_v31 = vmax.f32 %v6103_v46, 0.0  ;;  %v9277_v40 = vld [vmem:[#allocation2 + $0x1f8] sm:$0xf0] }
 0x90a   :  { %6691 = vmatpush.bf16.msra.mxu2 %v9408_v62 }
 0x90b   :  { %v6015_v60 = vpop.f32.mrf.mxu2 }
 0x90c   :  { %v6016_v37 = vadd.f32 %v6015_v60, %v5927_v44  ;;  %v5840_v55 = vpop.f32.mrf.mxu0  ;;  %v10098_v44 = vld [vmem:[#allocation2 + $0x3ec] sm:$0xf]  ;;  %v9533_v60 = vld [vmem:[#allocation2 + $0x3f8] sm:$0xf0] }
 0x90d   :  { %v5841_v4 = vadd.f32 %v5840_v55, %v13883_v26 }
 0x90e   :  { %v6104_v36 = vpop.f32.mrf.mxu3  ;;  %v5929_v29 = vpop.f32.mrf.mxu1 }
 0x90f   :  { %v6105_v47 = vadd.f32 %v6104_v36, %v6016_v37  ;;  %v5930_v34 = vadd.f32 %v5929_v29, %v5841_v4  ;;  %5879 = vmatmul.bf16.gmra.mxu0 %v15199_v27  ;;  %v9152_v36 = vor.u32 %v10002_v11, %v9149_v57  ;;  %v9536_v4 = vor.u32 %v10098_v44, %v9533_v60 }
 0x910   :  { %6057 = vmatmul.bf16.gmra.mxu2 %v15201_v24 }
 0x911   :  { %v6914_v51 = vmax.f32 %v6105_v47, 0.0  ;;  %5968 = vmatmul.bf16.gmra.mxu1 %v15200_v25  ;;  %6513 = vmatpush.bf16.msra.mxu0 %v9152_v36  ;;  %v9280_v25 = vor.u32 %v10034_v49, %v9277_v40 }
 0x912   :  { %6780 = vmatpush.bf16.msra.mxu3 %v9536_v4 }
 0x913   :  { %6146 = vmatmul.bf16.gmra.mxu3 %v15202_v54  ;;  %v13938_v55 = vpack.c.bf16 %v6914_v51, %v6910_v31  ;;  %v6018_v37 = vpop.f32.mrf.mxu2  ;;  %6602 = vmatpush.bf16.msra.mxu1 %v9280_v25 }
 0x914   :  { %v6019_v46 = vadd.f32 %v6018_v37, %v5930_v34  ;;  %v5842_v47 = vpop.f32.mrf.mxu0 }
 0x915   :  { %15203 = vst [vmem:[#allocation122_spill] sm:$0xff] %v13938_v55  ;;  %v5843_v8 = vadd.f32 %v5842_v47, %v13883_v26 }
 0x916   :  { %v6107_v29 = vpop.f32.mrf.mxu3  ;;  %v5931_v61 = vpop.f32.mrf.mxu1 }
 0x917   :  { %v6108_v54 = vadd.f32 %v6107_v29, %v6019_v46  ;;  %v5932_v24 = vadd.f32 %v5931_v61, %v5843_v8 }
 0x919   :  { %v6918_v60 = vmax.f32 %v6108_v54, 0.0 }
 0x91b   :  { %v6020_v27 = vpop.f32.mrf.mxu2 }
 0x91c   :  { %v6021_v31 = vadd.f32 %v6020_v27, %v5932_v24  ;;  %v5845_v11 = vpop.f32.mrf.mxu0 }
 0x91d   :  { %v5846_v34 = vadd.f32 %v5845_v11, %v13883_v26 }
 0x91e   :  { %v6109_v51 = vpop.f32.mrf.mxu3  ;;  %v5934_v57 = vpop.f32.mrf.mxu1 }
 0x91f   :  { %v6110_v44 = vadd.f32 %v6109_v51, %v6021_v31  ;;  %v5935_v62 = vadd.f32 %v5934_v57, %v5846_v34  ;;  %5884 = vmatmul.bf16.gmra.mxu0 %v15163_v14 }
 0x920   :  { %6062 = vmatmul.bf16.gmra.mxu2 %v15165_v6 }
 0x921   :  { %v6922_v37 = vmax.f32 %v6110_v44, 0.0  ;;  %5973 = vmatmul.bf16.gmra.mxu1 %v15164_v19 }
 0x923   :  { %6151 = vmatmul.bf16.gmra.mxu3 %v13759_v39  ;;  %v13946_v61 = vpack.c.bf16 %v6922_v37, %v6918_v60  ;;  %v6023_v8 = vpop.f32.mrf.mxu2  ;;  %v15206_v60 = vld [vmem:[#allocation45_spill] sm:$0xff]  ;;  %v15207_v37 = vld [vmem:[#allocation83_spill] sm:$0xff] }
 0x924   :  { %v6024_v27 = vadd.f32 %v6023_v8, %v5935_v62  ;;  %v5847_v24 = vpop.f32.mrf.mxu0  ;;  %v15205_v62 = vld [vmem:[#allocation141_spill] sm:$0xff]  ;;  %v10062_v8 = vld [vmem:[#allocation2 + $0x2cc] sm:$0xf] }
 0x925   :  { %15204 = vst [vmem:[#allocation59_spill] sm:$0xff] %v13946_v61  ;;  %v5848_v36 = vadd.f32 %v5847_v24, %v13883_v26 }
 0x926   :  { %v6112_v25 = vpop.f32.mrf.mxu3  ;;  %v5936_v4 = vpop.f32.mrf.mxu1 }
 0x927   :  { %v6113_v46 = vadd.f32 %v6112_v25, %v6024_v27  ;;  %v5937_v29 = vadd.f32 %v5936_v4, %v5848_v36  ;;  %v9389_v27 = vld [vmem:[#allocation2 + $0x2d8] sm:$0xf0]  ;;  %v9998_v25 = vld [vmem:[#allocation2 + $0xcc] sm:$0xf] }
 0x928   :  { %v9392_v24 = vor.u32 %v10062_v8, %v9389_v27  ;;  %v9133_v36 = vld [vmem:[#allocation2 + $0xd8] sm:$0xf0]  ;;  %v10094_v4 = vld [vmem:[#allocation2 + $0x3cc] sm:$0xf] }
 0x929   :  { %v6926_v57 = vmax.f32 %v6113_v46, 0.0  ;;  %v10030_v8 = vld [vmem:[#allocation2 + $0x1cc] sm:$0xf]  ;;  %v9261_v27 = vld [vmem:[#allocation2 + $0x1d8] sm:$0xf0] }
 0x92a   :  { %6692 = vmatpush.bf16.msra.mxu2 %v9392_v24 }
 0x92b   :  { %v6025_v47 = vpop.f32.mrf.mxu2 }
 0x92c   :  { %v6026_v54 = vadd.f32 %v6025_v47, %v5937_v29  ;;  %v5850_v40 = vpop.f32.mrf.mxu0  ;;  %v9517_v29 = vld [vmem:[#allocation2 + $0x3d8] sm:$0xf0] }
 0x92d   :  { %v5851_v31 = vadd.f32 %v5850_v40, %v13883_v26  ;;  %v9520_v40 = vor.u32 %v10094_v4, %v9517_v29 }
 0x92e   :  { %v6114_v49 = vpop.f32.mrf.mxu3  ;;  %v5939_v51 = vpop.f32.mrf.mxu1 }
 0x92f   :  { %v6115_v11 = vadd.f32 %v6114_v49, %v6026_v54  ;;  %v5940_v34 = vadd.f32 %v5939_v51, %v5851_v31  ;;  %6165 = vmatmul.bf16.vlgmr.msrb.gmra.mxu0 %v15113_v0  ;;  %v9136_v49 = vor.u32 %v9998_v25, %v9133_v36  ;;  %6781 = vmatpush.bf16.msra.mxu3 %v9520_v40 }
 0x930   :  { %6343 = vmatmul.bf16.vlgmr.msrb.gmra.mxu2 %v15206_v60  ;;  %v9264_v60 = vor.u32 %v10030_v8, %v9261_v27 }
 0x931   :  { %v6930_v44 = vmax.f32 %v6115_v11, 0.0  ;;  %6254 = vmatmul.bf16.vlgmr.msrb.gmra.mxu1 %v15205_v62  ;;  %6514 = vmatpush.bf16.msra.mxu0 %v9136_v49 }
 0x932   :  { %6603 = vmatpush.bf16.msra.mxu1 %v9264_v60 }
 0x933   :  { %6432 = vmatmul.bf16.vlgmr.msrb.gmra.mxu3 %v15207_v37  ;;  %v13954_v47 = vpack.c.bf16 %v6930_v44, %v6926_v57  ;;  %v6028_v54 = vpop.f32.mrf.mxu2 }
 0x934   :  { %v6029_v46 = vadd.f32 %v6028_v54, %v5940_v34  ;;  %v5852_v51 = vpop.f32.mrf.mxu0 }
 0x935   :  { %15208 = vst [vmem:[#allocation60_spill] sm:$0xff] %v13954_v47  ;;  %v5853_v11 = vadd.f32 %v5852_v51, %v13883_v26 }
 0x936   :  { %v6117_v31 = vpop.f32.mrf.mxu3  ;;  %v5941_v61 = vpop.f32.mrf.mxu1 }
 0x937   :  { %v6118_v55 = vadd.f32 %v6117_v31, %v6029_v46  ;;  %v5942_v37 = vadd.f32 %v5941_v61, %v5853_v11 }
 0x939   :  { %v6934_v29 = vmax.f32 %v6118_v55, 0.0 }
 0x93b   :  { %v6030_v62 = vpop.f32.mrf.mxu2 }
 0x93c   :  { %v6031_v57 = vadd.f32 %v6030_v62, %v5942_v37  ;;  %v5855_v25 = vpop.f32.mrf.mxu0 }
 0x93d   :  { %v5856_v34 = vadd.f32 %v5855_v25, %v13883_v26 }
 0x93e   :  { %v6119_v44 = vpop.f32.mrf.mxu3  ;;  %v5944_v36 = vpop.f32.mrf.mxu1 }
 0x93f   :  { %v6120_v4 = vadd.f32 %v6119_v44, %v6031_v57  ;;  %v5945_v24 = vadd.f32 %v5944_v36, %v5856_v34  ;;  %6170 = vmatmul.bf16.gmra.mxu0 %v15117_v50 }
 0x940   :  { %6348 = vmatmul.bf16.gmra.mxu2 %v15119_v1 }
 0x941   :  { %v6938_v54 = vmax.f32 %v6120_v4, 0.0  ;;  %6259 = vmatmul.bf16.gmra.mxu1 %v15118_v2 }
 0x943   :  { %6437 = vmatmul.bf16.gmra.mxu3 %v13634_v13  ;;  %v13962_v61 = vpack.c.bf16 %v6938_v54, %v6934_v29  ;;  %v6033_v62 = vpop.f32.mrf.mxu2  ;;  %v9373_v29 = vld [vmem:[#allocation2 + $0x2b8] sm:$0xf0]  ;;  %v9994_v54 = vld [vmem:[#allocation2 + $0xac] sm:$0xf] }
 0x944   :  { %v6034_v60 = vadd.f32 %v6033_v62, %v5945_v24  ;;  %v5857_v49 = vpop.f32.mrf.mxu0  ;;  %v10058_v24 = vld [vmem:[#allocation2 + $0x2ac] sm:$0xf] }
 0x945   :  { %15209 = vst [vmem:[#allocation63_spill] sm:$0xff] %v13962_v61  ;;  %v5858_v40 = vadd.f32 %v5857_v49, %v13883_v26  ;;  %v9376_v62 = vor.u32 %v10058_v24, %v9373_v29  ;;  %v9501_v49 = vld [vmem:[#allocation2 + $0x3b8] sm:$0xf0]  ;;  %v10026_v24 = vld [vmem:[#allocation2 + $0x1ac] sm:$0xf] }
 0x946   :  { %v6122_v37 = vpop.f32.mrf.mxu3  ;;  %v5946_v46 = vpop.f32.mrf.mxu1  ;;  %v9245_v29 = vld [vmem:[#allocation2 + $0x1b8] sm:$0xf0] }
 0x947   :  { %v6123_v31 = vadd.f32 %v6122_v37, %v6034_v60  ;;  %v5947_v51 = vadd.f32 %v5946_v46, %v5858_v40  ;;  %v9117_v60 = vld [vmem:[#allocation2 + $0xb8] sm:$0xf0]  ;;  %v10090_v37 = vld [vmem:[#allocation2 + $0x3ac] sm:$0xf]  ;;  %6693 = vmatpush.bf16.msra.mxu2 %v9376_v62  ;;  %v9248_v61 = vor.u32 %v10026_v24, %v9245_v29 }
 0x949   :  { %v6942_v36 = vmax.f32 %v6123_v31, 0.0  ;;  %6604 = vmatpush.bf16.msra.mxu1 %v9248_v61 }
 0x94b   :  { %v6035_v11 = vpop.f32.mrf.mxu2 }
 0x94c   :  { %v6036_v55 = vadd.f32 %v6035_v11, %v5947_v51  ;;  %v5860_v27 = vpop.f32.mrf.mxu0  ;;  %v9120_v51 = vor.u32 %v9994_v54, %v9117_v60  ;;  %v9504_v11 = vor.u32 %v10090_v37, %v9501_v49 }
 0x94d   :  { %v5861_v57 = vadd.f32 %v5860_v27, %v13883_v26 }
 0x94e   :  { %v6124_v8 = vpop.f32.mrf.mxu3  ;;  %v5949_v44 = vpop.f32.mrf.mxu1  ;;  %6515 = vmatpush.bf16.msra.mxu0 %v9120_v51  ;;  %6782 = vmatpush.bf16.msra.mxu3 %v9504_v11 }
 0x94f   :  { %v6125_v25 = vadd.f32 %v6124_v8, %v6036_v55  ;;  %v5950_v34 = vadd.f32 %v5949_v44, %v5861_v57  ;;  %6175 = vmatmul.bf16.gmra.mxu0 %v15121_v21 }
 0x950   :  { %6353 = vmatmul.bf16.gmra.mxu2 %v15123_v22 }
 0x951   :  { %v6946_v4 = vmax.f32 %v6125_v25, 0.0  ;;  %6264 = vmatmul.bf16.gmra.mxu1 %v15122_v5 }
 0x953   :  { %6442 = vmatmul.bf16.gmra.mxu3 %v13643_v3  ;;  %v13970_v40 = vpack.c.bf16 %v6946_v4, %v6942_v36  ;;  %v6038_v46 = vpop.f32.mrf.mxu2 }
 0x954   :  { %v6039_v31 = vadd.f32 %v6038_v46, %v5950_v34  ;;  %v5862_v8 = vpop.f32.mrf.mxu0 }
 0x955   :  { %15210 = vst [vmem:[#allocation64_spill] sm:$0xff] %v13970_v40  ;;  %v5863_v27 = vadd.f32 %v5862_v8, %v13883_v26 }
 0x956   :  { %v6127_v55 = vpop.f32.mrf.mxu3  ;;  %v5951_v57 = vpop.f32.mrf.mxu1 }
 0x957   :  { %v6128_v44 = vadd.f32 %v6127_v55, %v6039_v31  ;;  %v5952_v25 = vadd.f32 %v5951_v57, %v5863_v27 }
 0x959   :  { %v6950_v49 = vmax.f32 %v6128_v44, 0.0 }
 0x95b   :  { %v6040_v47 = vpop.f32.mrf.mxu2 }
 0x95c   :  { %v6041_v36 = vadd.f32 %v6040_v47, %v5952_v25  ;;  %v5865_v54 = vpop.f32.mrf.mxu0 }
 0x95d   :  { %v5866_v34 = vadd.f32 %v5865_v54, %v13883_v26 }
 0x95e   :  { %v6129_v4 = vpop.f32.mrf.mxu3  ;;  %v5954_v60 = vpop.f32.mrf.mxu1 }
 0x95f   :  { %v6130_v37 = vadd.f32 %v6129_v4, %v6041_v36  ;;  %v5955_v62 = vadd.f32 %v5954_v60, %v5866_v34  ;;  %6180 = vmatmul.bf16.gmra.mxu0 %v15125_v32 }
 0x960   :  { %6358 = vmatmul.bf16.gmra.mxu2 %v15127_v63 }
 0x961   :  { %v6954_v46 = vmax.f32 %v6130_v37, 0.0  ;;  %6269 = vmatmul.bf16.gmra.mxu1 %v15126_v17 }
 0x963   :  { %6447 = vmatmul.bf16.gmra.mxu3 %v13652_v30  ;;  %v13978_v51 = vpack.c.bf16 %v6954_v46, %v6950_v49  ;;  %v6043_v47 = vpop.f32.mrf.mxu2  ;;  %v9357_v49 = vld [vmem:[#allocation2 + $0x298] sm:$0xf0]  ;;  %v9990_v46 = vld [vmem:[#allocation2 + $0x8c] sm:$0xf] }
 0x964   :  { %v6044_v61 = vadd.f32 %v6043_v47, %v5955_v62  ;;  %v5867_v31 = vpop.f32.mrf.mxu0  ;;  %v10054_v62 = vld [vmem:[#allocation2 + $0x28c] sm:$0xf] }
 0x965   :  { %15211 = vst [vmem:[#allocation67_spill] sm:$0xff] %v13978_v51  ;;  %v5868_v55 = vadd.f32 %v5867_v31, %v13883_v26  ;;  %v9360_v47 = vor.u32 %v10054_v62, %v9357_v49  ;;  %v9485_v31 = vld [vmem:[#allocation2 + $0x398] sm:$0xf0]  ;;  %v10022_v62 = vld [vmem:[#allocation2 + $0x18c] sm:$0xf] }
 0x966   :  { %v6132_v11 = vpop.f32.mrf.mxu3  ;;  %v5956_v8 = vpop.f32.mrf.mxu1  ;;  %v9229_v49 = vld [vmem:[#allocation2 + $0x198] sm:$0xf0] }
 0x967   :  { %v6133_v27 = vadd.f32 %v6132_v11, %v6044_v61  ;;  %v5957_v57 = vadd.f32 %v5956_v8, %v5868_v55  ;;  %v9101_v61 = vld [vmem:[#allocation2 + $0x98] sm:$0xf0]  ;;  %v10086_v11 = vld [vmem:[#allocation2 + $0x38c] sm:$0xf]  ;;  %6694 = vmatpush.bf16.msra.mxu2 %v9360_v47  ;;  %v9232_v51 = vor.u32 %v10022_v62, %v9229_v49 }
 0x969   :  { %v6958_v60 = vmax.f32 %v6133_v27, 0.0  ;;  %6605 = vmatpush.bf16.msra.mxu1 %v9232_v51 }
 0x96b   :  { %v6045_v25 = vpop.f32.mrf.mxu2 }
 0x96c   :  { %v6046_v44 = vadd.f32 %v6045_v25, %v5957_v57  ;;  %v5870_v29 = vpop.f32.mrf.mxu0  ;;  %v9104_v57 = vor.u32 %v9990_v46, %v9101_v61  ;;  %v9488_v25 = vor.u32 %v10086_v11, %v9485_v31 }
 0x96d   :  { %v5871_v36 = vadd.f32 %v5870_v29, %v13883_v26 }
 0x96e   :  { %v6134_v24 = vpop.f32.mrf.mxu3  ;;  %v5959_v4 = vpop.f32.mrf.mxu1  ;;  %6516 = vmatpush.bf16.msra.mxu0 %v9104_v57  ;;  %6783 = vmatpush.bf16.msra.mxu3 %v9488_v25 }
 0x96f   :  { %v6135_v54 = vadd.f32 %v6134_v24, %v6046_v44  ;;  %v5960_v34 = vadd.f32 %v5959_v4, %v5871_v36  ;;  %6185 = vmatmul.bf16.gmra.mxu0 %v15129_v43 }
 0x970   :  { %6363 = vmatmul.bf16.gmra.mxu2 %v15131_v59 }
 0x971   :  { %v6962_v37 = vmax.f32 %v6135_v54, 0.0  ;;  %6274 = vmatmul.bf16.gmra.mxu1 %v15130_v28 }
 0x973   :  { %6452 = vmatmul.bf16.gmra.mxu3 %v13661_v45  ;;  %v13986_v55 = vpack.c.bf16 %v6962_v37, %v6958_v60  ;;  %v6048_v8 = vpop.f32.mrf.mxu2 }
 0x974   :  { %v6049_v27 = vadd.f32 %v6048_v8, %v5960_v34  ;;  %v5872_v24 = vpop.f32.mrf.mxu0 }
 0x975   :  { %15212 = vst [vmem:[#allocation68_spill] sm:$0xff] %v13986_v55  ;;  %v5873_v29 = vadd.f32 %v5872_v24, %v13883_v26 }
 0x976   :  { %v6137_v44 = vpop.f32.mrf.mxu3  ;;  %v5961_v36 = vpop.f32.mrf.mxu1 }
 0x977   :  { %v6138_v4 = vadd.f32 %v6137_v44, %v6049_v27  ;;  %v5962_v54 = vadd.f32 %v5961_v36, %v5873_v29 }
 0x979   :  { %v6966_v31 = vmax.f32 %v6138_v4, 0.0 }
 0x97b   :  { %v6050_v40 = vpop.f32.mrf.mxu2 }
 0x97c   :  { %v6051_v60 = vadd.f32 %v6050_v40, %v5962_v54  ;;  %v5875_v46 = vpop.f32.mrf.mxu0 }
 0x97d   :  { %v5876_v34 = vadd.f32 %v5875_v46, %v13883_v26 }
 0x97e   :  { %v6139_v37 = vpop.f32.mrf.mxu3  ;;  %v5964_v61 = vpop.f32.mrf.mxu1 }
 0x97f   :  { %v6140_v11 = vadd.f32 %v6139_v37, %v6051_v60  ;;  %v5965_v47 = vadd.f32 %v5964_v61, %v5876_v34  ;;  %6190 = vmatmul.bf16.gmra.mxu0 %v15132_v41 }
 0x980   :  { %6368 = vmatmul.bf16.gmra.mxu2 %v15134_v9 }
 0x981   :  { %v6970_v8 = vmax.f32 %v6140_v11, 0.0  ;;  %6279 = vmatmul.bf16.gmra.mxu1 %v15133_v53 }
 0x983   :  { %6457 = vmatmul.bf16.gmra.mxu3 %v13670_v20  ;;  %v13994_v57 = vpack.c.bf16 %v6970_v8, %v6966_v31  ;;  %v6053_v40 = vpop.f32.mrf.mxu2  ;;  %v15215_v31 = vld [vmem:[#allocation73_spill] sm:$0xff]  ;;  %v15216_v8 = vld [vmem:[#allocation19_spill] sm:$0xff] }
 0x984   :  { %v6054_v51 = vadd.f32 %v6053_v40, %v5965_v47  ;;  %v5877_v27 = vpop.f32.mrf.mxu0  ;;  %v15214_v47 = vld [vmem:[#allocation146_spill] sm:$0xff]  ;;  %v10050_v40 = vld [vmem:[#allocation2 + $0x26c] sm:$0xf] }
 0x985   :  { %15213 = vst [vmem:[#allocation134_spill] sm:$0xff] %v13994_v57  ;;  %v5878_v44 = vadd.f32 %v5877_v27, %v13883_v26 }
 0x986   :  { %v6142_v25 = vpop.f32.mrf.mxu3  ;;  %v5966_v24 = vpop.f32.mrf.mxu1 }
 0x987   :  { %v6143_v29 = vadd.f32 %v6142_v25, %v6054_v51  ;;  %v5967_v36 = vadd.f32 %v5966_v24, %v5878_v44  ;;  %v9341_v51 = vld [vmem:[#allocation2 + $0x278] sm:$0xf0]  ;;  %v9986_v25 = vld [vmem:[#allocation2 + $0x6c] sm:$0xf] }
 0x988   :  { %v9344_v27 = vor.u32 %v10050_v40, %v9341_v51  ;;  %v9085_v44 = vld [vmem:[#allocation2 + $0x78] sm:$0xf0]  ;;  %v10082_v24 = vld [vmem:[#allocation2 + $0x36c] sm:$0xf] }
 0x989   :  { %v6974_v61 = vmax.f32 %v6143_v29, 0.0  ;;  %v10018_v40 = vld [vmem:[#allocation2 + $0x16c] sm:$0xf]  ;;  %v9213_v51 = vld [vmem:[#allocation2 + $0x178] sm:$0xf0] }
 0x98a   :  { %6695 = vmatpush.bf16.msra.mxu2 %v9344_v27 }
 0x98b   :  { %v6055_v54 = vpop.f32.mrf.mxu2 }
 0x98c   :  { %v6056_v4 = vadd.f32 %v6055_v54, %v5967_v36  ;;  %v5880_v49 = vpop.f32.mrf.mxu0  ;;  %v9469_v36 = vld [vmem:[#allocation2 + $0x378] sm:$0xf0] }
 0x98d   :  { %v5881_v60 = vadd.f32 %v5880_v49, %v13883_v26  ;;  %v9472_v49 = vor.u32 %v10082_v24, %v9469_v36 }
 0x98e   :  { %v6144_v62 = vpop.f32.mrf.mxu3  ;;  %v5969_v37 = vpop.f32.mrf.mxu1 }
 0x98f   :  { %v6145_v46 = vadd.f32 %v6144_v62, %v6056_v4  ;;  %v5970_v34 = vadd.f32 %v5969_v37, %v5881_v60  ;;  %6195 = vmatmul.bf16.gmra.mxu0 %v15136_v18  ;;  %v9088_v62 = vor.u32 %v9986_v25, %v9085_v44  ;;  %6784 = vmatpush.bf16.msra.mxu3 %v9472_v49 }
 0x990   :  { %6373 = vmatmul.bf16.gmra.mxu2 %v15215_v31  ;;  %v9216_v31 = vor.u32 %v10018_v40, %v9213_v51 }
 0x991   :  { %v6978_v11 = vmax.f32 %v6145_v46, 0.0  ;;  %6284 = vmatmul.bf16.gmra.mxu1 %v15214_v47  ;;  %6517 = vmatpush.bf16.msra.mxu0 %v9088_v62 }
 0x992   :  { %6606 = vmatpush.bf16.msra.mxu1 %v9216_v31 }
 0x993   :  { %6462 = vmatmul.bf16.gmra.mxu3 %v15216_v8  ;;  %v14002_v54 = vpack.c.bf16 %v6978_v11, %v6974_v61  ;;  %v6058_v4 = vpop.f32.mrf.mxu2 }
 0x994   :  { %v6059_v29 = vadd.f32 %v6058_v4, %v5970_v34  ;;  %v5882_v37 = vpop.f32.mrf.mxu0 }
 0x995   :  { %15217 = vst [vmem:[#allocation71_spill] sm:$0xff] %v14002_v54  ;;  %v5883_v46 = vadd.f32 %v5882_v37, %v13883_v26 }
 0x996   :  { %v6147_v60 = vpop.f32.mrf.mxu3  ;;  %v5971_v57 = vpop.f32.mrf.mxu1 }
 0x997   :  { %v6148_v55 = vadd.f32 %v6147_v60, %v6059_v29  ;;  %v5972_v8 = vadd.f32 %v5971_v57, %v5883_v46  ;;  %v15218_v57 = vld [vmem:[#allocation20_spill] sm:$0xff] }
 0x999   :  { %v6982_v36 = vmax.f32 %v6148_v55, 0.0  ;;  %v14016_v55 = vld [vmem:[%s14358_s4] sm:$0xf] }
 0x99a   :  { %15220 = vst [vmem:[#allocation14_spill] sm:$0xff] %v14016_v55  ;;  %v14019_v40 = vperm.slane %v14016_v55, 2 }
 0x99b   :  { %v6060_v47 = vpop.f32.mrf.mxu2 }
 0x99c   :  { %v6061_v61 = vadd.f32 %v6060_v47, %v5972_v8  ;;  %v5885_v25 = vpop.f32.mrf.mxu0 }
 0x99d   :  { %v5886_v34 = vadd.f32 %v5885_v25, %v13883_v26 }
 0x99e   :  { %v6149_v11 = vpop.f32.mrf.mxu3  ;;  %v5974_v44 = vpop.f32.mrf.mxu1 }
 0x99f   :  { %v6150_v24 = vadd.f32 %v6149_v11, %v6061_v61  ;;  %v5975_v27 = vadd.f32 %v5974_v44, %v5886_v34  ;;  %6200 = vmatmul.bf16.gmra.mxu0 %v15138_v7 }
 0x9a0   :  { %6378 = vmatmul.bf16.gmra.mxu2 %v15140_v10 }
 0x9a1   :  { %v6986_v4 = vmax.f32 %v6150_v24, 0.0  ;;  %6289 = vmatmul.bf16.gmra.mxu1 %v15139_v56 }
 0x9a3   :  { %6467 = vmatmul.bf16.gmra.mxu3 %v15218_v57  ;;  %v14010_v62 = vpack.c.bf16 %v6986_v4, %v6982_v36  ;;  %v6063_v47 = vpop.f32.mrf.mxu2 }
 0x9a4   :  { %v6064_v31 = vadd.f32 %v6063_v47, %v5975_v27  ;;  %v5887_v49 = vpop.f32.mrf.mxu0  ;;  %v15221_v27 = vld [vmem:[#allocation137_spill] sm:$0xff] }
 0x9a5   :  { %15219 = vst [vmem:[#allocation72_spill] sm:$0xff] %v14010_v62  ;;  %v5888_v29 = vadd.f32 %v5887_v49, %v13883_v26  ;;  %v15222_v47 = vld [vmem:[#allocation13_spill] sm:$0xff]  ;;  %v10046_v49 = vld [vmem:[#allocation2 + $0x24c] sm:$0xf] }
 0x9a6   :  { %v6152_v8 = vpop.f32.mrf.mxu3  ;;  %v5976_v60 = vpop.f32.mrf.mxu1  ;;  %v10078_v62 = vld [vmem:[#allocation2 + $0x34c] sm:$0xf] }
 0x9a7   :  { %v6153_v37 = vadd.f32 %v6152_v8, %v6064_v31  ;;  %v5977_v46 = vadd.f32 %v5976_v60, %v5888_v29  ;;  %v15223_v31 = vld [vmem:[#allocation11_spill] sm:$0xff]  ;;  %v15224_v8 = vld [vmem:[#allocation86_spill] sm:$0xff]  ;;  %v9982_v60 = vld [vmem:[#allocation2 + $0x4c] sm:$0xf] }
 0x9a8   :  { %v9325_v29 = vld [vmem:[#allocation2 + $0x258] sm:$0xf0] }
 0x9a9   :  { %v6990_v36 = vmax.f32 %v6153_v37, 0.0 }
 0x9ab   :  { %v6065_v51 = vpop.f32.mrf.mxu2 }
 0x9ac   :  { %v6066_v61 = vadd.f32 %v6065_v51, %v5977_v46  ;;  %v6166_v25 = vpop.f32.mrf.mxu0  ;;  %v9328_v46 = vor.u32 %v10046_v49, %v9325_v29  ;;  %v9069_v51 = vld [vmem:[#allocation2 + $0x58] sm:$0xf0]  ;;  %v10014_v49 = vld [vmem:[#allocation2 + $0x14c] sm:$0xf] }
 0x9ad   :  { %v6167_v34 = vadd.f32 %v6166_v25, %v14019_v40  ;;  %v9453_v25 = vld [vmem:[#allocation2 + $0x358] sm:$0xf0] }
 0x9ae   :  { %v6154_v11 = vpop.f32.mrf.mxu3  ;;  %v6255_v44 = vpop.f32.mrf.mxu1  ;;  %6696 = vmatpush.bf16.msra.mxu2 %v9328_v46  ;;  %v9197_v29 = vld [vmem:[#allocation2 + $0x158] sm:$0xf0] }
 0x9af   :  { %v6155_v24 = vadd.f32 %v6154_v11, %v6066_v61  ;;  %v6256_v26 = vadd.f32 %v6255_v44, %v6167_v34  ;;  %6205 = vmatmul.bf16.gmra.mxu0 %v15221_v27  ;;  %v9072_v11 = vor.u32 %v9982_v60, %v9069_v51  ;;  %v9456_v34 = vor.u32 %v10078_v62, %v9453_v25 }
 0x9b0   :  { %6383 = vmatmul.bf16.gmra.mxu2 %v15223_v31  ;;  %v9200_v55 = vor.u32 %v10014_v49, %v9197_v29 }
 0x9b1   :  { %v6994_v4 = vmax.f32 %v6155_v24, 0.0  ;;  %6294 = vmatmul.bf16.gmra.mxu1 %v15222_v47  ;;  %6518 = vmatpush.bf16.msra.mxu0 %v9072_v11 }
 0x9b2   :  { %6785 = vmatpush.bf16.msra.mxu3 %v9456_v34  ;;  %6607 = vmatpush.bf16.msra.mxu1 %v9200_v55 }
 0x9b3   :  { %6472 = vmatmul.bf16.gmra.mxu3 %v15224_v8  ;;  %v14026_v54 = vpack.c.bf16 %v6994_v4, %v6990_v36  ;;  %v6344_v61 = vpop.f32.mrf.mxu2 }
 0x9b4   :  { %v6345_v37 = vadd.f32 %v6344_v61, %v6256_v26  ;;  %v6168_v24 = vpop.f32.mrf.mxu0 }
 0x9b5   :  { %15225 = vst [vmem:[#allocation75_spill] sm:$0xff] %v14026_v54  ;;  %v6169_v31 = vadd.f32 %v6168_v24, %v14019_v40 }
 0x9b6   :  { %v6433_v44 = vpop.f32.mrf.mxu3  ;;  %v6257_v47 = vpop.f32.mrf.mxu1 }
 0x9b7   :  { %v6434_v8 = vadd.f32 %v6433_v44, %v6345_v37  ;;  %v6258_v27 = vadd.f32 %v6257_v47, %v6169_v31  ;;  %v15226_v47 = vld [vmem:[#allocation23_spill] sm:$0xff] }
 0x9b9   :  { %v6871_v25 = vmax.f32 %v6434_v8, 0.0 }
 0x9bb   :  { %v6346_v57 = vpop.f32.mrf.mxu2 }
 0x9bc   :  { %v6347_v36 = vadd.f32 %v6346_v57, %v6258_v27  ;;  %v6171_v60 = vpop.f32.mrf.mxu0 }
 0x9bd   :  { %v6172_v62 = vadd.f32 %v6171_v60, %v14019_v40 }
 0x9be   :  { %v6435_v4 = vpop.f32.mrf.mxu3  ;;  %v6260_v26 = vpop.f32.mrf.mxu1 }
 0x9bf   :  { %v6436_v51 = vadd.f32 %v6435_v4, %v6347_v36  ;;  %v6261_v46 = vadd.f32 %v6260_v26, %v6172_v62  ;;  %6210 = vmatmul.bf16.gmra.mxu0 %v15145_v16 }
 0x9c0   :  { %6388 = vmatmul.bf16.gmra.mxu2 %v13517_v48 }
 0x9c1   :  { %v6875_v61 = vmax.f32 %v6436_v51, 0.0  ;;  %6299 = vmatmul.bf16.gmra.mxu1 %v15146_v38  ;;  %v15228_v51 = vld [vmem:[#allocation139_spill] sm:$0xff] }
 0x9c3   :  { %6477 = vmatmul.bf16.gmra.mxu3 %v15226_v47  ;;  %v14034_v31 = vpack.c.bf16 %v6875_v61, %v6871_v25  ;;  %v6349_v57 = vpop.f32.mrf.mxu2  ;;  %v15229_v61 = vld [vmem:[#allocation21_spill] sm:$0xff] }
 0x9c4   :  { %v6350_v55 = vadd.f32 %v6349_v57, %v6261_v46  ;;  %v6173_v11 = vpop.f32.mrf.mxu0  ;;  %v15230_v57 = vld [vmem:[#allocation12_spill] sm:$0xff] }
 0x9c5   :  { %15227 = vst [vmem:[#allocation76_spill] sm:$0xff] %v14034_v31  ;;  %v6174_v34 = vadd.f32 %v6173_v11, %v14019_v40  ;;  %v15231_v11 = vld [vmem:[#allocation24_spill] sm:$0xff] }
 0x9c6   :  { %v6438_v27 = vpop.f32.mrf.mxu3  ;;  %v6262_v37 = vpop.f32.mrf.mxu1 }
 0x9c7   :  { %v6439_v44 = vadd.f32 %v6438_v27, %v6350_v55  ;;  %v6263_v24 = vadd.f32 %v6262_v37, %v6174_v34  ;;  %v10042_v55 = vld [vmem:[#allocation2 + $0x22c] sm:$0xf]  ;;  %v9309_v27 = vld [vmem:[#allocation2 + $0x238] sm:$0xf0] }
 0x9c8   :  { %v9978_v34 = vld [vmem:[#allocation2 + $0x2c] sm:$0xf]  ;;  %v9312_v37 = vor.u32 %v10042_v55, %v9309_v27  ;;  %v9181_v27 = vld [vmem:[#allocation2 + $0x138] sm:$0xf0] }
 0x9c9   :  { %v6879_v25 = vmax.f32 %v6439_v44, 0.0  ;;  %v10010_v55 = vld [vmem:[#allocation2 + $0x12c] sm:$0xf] }
 0x9ca   :  { %6697 = vmatpush.bf16.msra.mxu2 %v9312_v37 }
 0x9cb   :  { %v6351_v49 = vpop.f32.mrf.mxu2 }
 0x9cc   :  { %v6352_v8 = vadd.f32 %v6351_v49, %v6263_v24  ;;  %v6176_v36 = vpop.f32.mrf.mxu0  ;;  %v9053_v24 = vld [vmem:[#allocation2 + $0x38] sm:$0xf0]  ;;  %v10074_v49 = vld [vmem:[#allocation2 + $0x32c] sm:$0xf] }
 0x9cd   :  { %v6177_v4 = vadd.f32 %v6176_v36, %v14019_v40  ;;  %v9437_v36 = vld [vmem:[#allocation2 + $0x338] sm:$0xf0] }
 0x9ce   :  { %v6440_v29 = vpop.f32.mrf.mxu3  ;;  %v6265_v60 = vpop.f32.mrf.mxu1 }
 0x9cf   :  { %v6441_v62 = vadd.f32 %v6440_v29, %v6352_v8  ;;  %v6266_v26 = vadd.f32 %v6265_v60, %v6177_v4  ;;  %6215 = vmatmul.bf16.gmra.mxu0 %v15228_v51  ;;  %v9056_v29 = vor.u32 %v9978_v34, %v9053_v24  ;;  %v9440_v4 = vor.u32 %v10074_v49, %v9437_v36 }
 0x9d0   :  { %6393 = vmatmul.bf16.gmra.mxu2 %v15230_v57  ;;  %v9184_v51 = vor.u32 %v10010_v55, %v9181_v27 }
 0x9d1   :  { %v6883_v46 = vmax.f32 %v6441_v62, 0.0  ;;  %6304 = vmatmul.bf16.gmra.mxu1 %v15229_v61  ;;  %6519 = vmatpush.bf16.msra.mxu0 %v9056_v29 }
 0x9d2   :  { %6786 = vmatpush.bf16.msra.mxu3 %v9440_v4  ;;  %6608 = vmatpush.bf16.msra.mxu1 %v9184_v51 }
 0x9d3   :  { %6482 = vmatmul.bf16.gmra.mxu3 %v15231_v11  ;;  %v14042_v54 = vpack.c.bf16 %v6883_v46, %v6879_v25  ;;  %v6354_v8 = vpop.f32.mrf.mxu2 }
 0x9d4   :  { %v6355_v44 = vadd.f32 %v6354_v8, %v6266_v26  ;;  %v6178_v62 = vpop.f32.mrf.mxu0 }
 0x9d5   :  { %15232 = vst [vmem:[#allocation18_spill] sm:$0xff] %v14042_v54  ;;  %v6179_v31 = vadd.f32 %v6178_v62, %v14019_v40 }
 0x9d6   :  { %v6443_v60 = vpop.f32.mrf.mxu3  ;;  %v6267_v57 = vpop.f32.mrf.mxu1 }
 0x9d7   :  { %v6444_v11 = vadd.f32 %v6443_v60, %v6355_v44  ;;  %v6268_v61 = vadd.f32 %v6267_v57, %v6179_v31 }
 0x9d9   :  { %v6887_v36 = vmax.f32 %v6444_v11, 0.0 }
 0x9db   :  { %v6356_v47 = vpop.f32.mrf.mxu2 }
 0x9dc   :  { %v6357_v25 = vadd.f32 %v6356_v47, %v6268_v61  ;;  %v6181_v34 = vpop.f32.mrf.mxu0 }
 0x9dd   :  { %v6182_v26 = vadd.f32 %v6181_v34, %v14019_v40 }
 0x9de   :  { %v6445_v46 = vpop.f32.mrf.mxu3  ;;  %v6270_v24 = vpop.f32.mrf.mxu1 }
 0x9df   :  { %v6446_v49 = vadd.f32 %v6445_v46, %v6357_v25  ;;  %v6271_v37 = vadd.f32 %v6270_v24, %v6182_v26  ;;  %6220 = vmatmul.bf16.gmra.mxu0 %v15151_v33  ;;  %v15234_v24 = vld [vmem:[#allocation91_spill] sm:$0xff] }
 0x9e0   :  { %6398 = vmatmul.bf16.gmra.mxu2 %v13547_v12 }
 0x9e1   :  { %v6891_v8 = vmax.f32 %v6446_v49, 0.0  ;;  %6309 = vmatmul.bf16.gmra.mxu1 %v15152_v35 }
 0x9e3   :  { %6487 = vmatmul.bf16.gmra.mxu3 %v13719_v23  ;;  %v14050_v31 = vpack.c.bf16 %v6891_v8, %v6887_v36  ;;  %v6359_v47 = vpop.f32.mrf.mxu2  ;;  %v15235_v36 = vld [vmem:[#allocation29_spill] sm:$0xff]  ;;  %v15236_v8 = vld [vmem:[#allocation80_spill] sm:$0xff] }
 0x9e4   :  { %v6360_v51 = vadd.f32 %v6359_v47, %v6271_v37  ;;  %v6183_v57 = vpop.f32.mrf.mxu0  ;;  %v15237_v47 = vld [vmem:[#allocation89_spill] sm:$0xff] }
 0x9e5   :  { %15233 = vst [vmem:[#allocation78_spill] sm:$0xff] %v14050_v31  ;;  %v6184_v29 = vadd.f32 %v6183_v57, %v14019_v40  ;;  %v9974_v57 = vld [vmem:[#allocation2 + $0xc] sm:$0xf] }
 0x9e6   :  { %v6448_v61 = vpop.f32.mrf.mxu3  ;;  %v6272_v4 = vpop.f32.mrf.mxu1 }
 0x9e7   :  { %v6449_v44 = vadd.f32 %v6448_v61, %v6360_v51  ;;  %v6273_v60 = vadd.f32 %v6272_v4, %v6184_v29  ;;  %v10038_v51 = vld [vmem:[#allocation2 + $0x20c] sm:$0xf]  ;;  %v9293_v61 = vld [vmem:[#allocation2 + $0x218] sm:$0xf0] }
 0x9e8   :  { %v9296_v29 = vor.u32 %v10038_v51, %v9293_v61  ;;  %v9037_v4 = vld [vmem:[#allocation2 + $0x18] sm:$0xf0]  ;;  %v10006_v51 = vld [vmem:[#allocation2 + $0x10c] sm:$0xf] }
 0x9e9   :  { %v6895_v49 = vmax.f32 %v6449_v44, 0.0  ;;  %v9165_v61 = vld [vmem:[#allocation2 + $0x118] sm:$0xf0] }
 0x9ea   :  { %6698 = vmatpush.bf16.msra.mxu2 %v9296_v29 }
 0x9eb   :  { %v6361_v62 = vpop.f32.mrf.mxu2 }
 0x9ec   :  { %v6362_v11 = vadd.f32 %v6361_v62, %v6273_v60  ;;  %v6186_v27 = vpop.f32.mrf.mxu0  ;;  %v10070_v60 = vld [vmem:[#allocation2 + $0x30c] sm:$0xf]  ;;  %v9421_v62 = vld [vmem:[#allocation2 + $0x318] sm:$0xf0] }
 0x9ed   :  { %v6187_v25 = vadd.f32 %v6186_v27, %v14019_v40 }
 0x9ee   :  { %v6450_v55 = vpop.f32.mrf.mxu3  ;;  %v6275_v46 = vpop.f32.mrf.mxu1 }
 0x9ef   :  { %v6451_v34 = vadd.f32 %v6450_v55, %v6362_v11  ;;  %v6276_v26 = vadd.f32 %v6275_v46, %v6187_v25  ;;  %6225 = vmatmul.bf16.gmra.mxu0 %v15234_v24  ;;  %v9040_v55 = vor.u32 %v9974_v57, %v9037_v4  ;;  %v9424_v25 = vor.u32 %v10070_v60, %v9421_v62 }
 0x9f0   :  { %6403 = vmatmul.bf16.gmra.mxu2 %v15236_v8 }
 0x9f1   :  { %v6899_v37 = vmax.f32 %v6451_v34, 0.0  ;;  %6314 = vmatmul.bf16.gmra.mxu1 %v15235_v36  ;;  %6520 = vmatpush.bf16.msra.mxu0 %v9040_v55  ;;  %v9168_v36 = vor.u32 %v10006_v51, %v9165_v61 }
 0x9f2   :  { %6787 = vmatpush.bf16.msra.mxu3 %v9424_v25 }
 0x9f3   :  { %6492 = vmatmul.bf16.gmra.mxu3 %v15237_v47  ;;  %v14058_v27 = vpack.c.bf16 %v6899_v37, %v6895_v49  ;;  %v6364_v11 = vpop.f32.mrf.mxu2  ;;  %6609 = vmatpush.bf16.msra.mxu1 %v9168_v36 }
 0x9f4   :  { %v6365_v44 = vadd.f32 %v6364_v11, %v6276_v26  ;;  %v6188_v34 = vpop.f32.mrf.mxu0 }
 0x9f5   :  { %15238 = vst [vmem:[#allocation79_spill] sm:$0xff] %v14058_v27  ;;  %v6189_v31 = vadd.f32 %v6188_v34, %v14019_v40 }
 0x9f6   :  { %v6453_v46 = vpop.f32.mrf.mxu3  ;;  %v6277_v54 = vpop.f32.mrf.mxu1 }
 0x9f7   :  { %v6454_v47 = vadd.f32 %v6453_v46, %v6365_v44  ;;  %v6278_v8 = vadd.f32 %v6277_v54, %v6189_v31 }
 0x9f9   :  { %v6903_v62 = vmax.f32 %v6454_v47, 0.0 }
 0x9fb   :  { %v6366_v24 = vpop.f32.mrf.mxu2 }
 0x9fc   :  { %v6367_v49 = vadd.f32 %v6366_v24, %v6278_v8  ;;  %v6191_v57 = vpop.f32.mrf.mxu0 }
 0x9fd   :  { %v6192_v26 = vadd.f32 %v6191_v57, %v14019_v40 }
 0x9fe   :  { %v6455_v37 = vpop.f32.mrf.mxu3  ;;  %v6280_v4 = vpop.f32.mrf.mxu1 }
 0x9ff   :  { %v6456_v60 = vadd.f32 %v6455_v37, %v6367_v49  ;;  %v6281_v29 = vadd.f32 %v6280_v4, %v6192_v26  ;;  %6230 = vmatmul.bf16.gmra.mxu0 %v15157_v58  ;;  %v15240_v4 = vld [vmem:[#allocation140_spill] sm:$0xff] }
 0xa00   :  { %6408 = vmatmul.bf16.gmra.mxu2 %v13577_v42 }
 0xa01   :  { %v6907_v11 = vmax.f32 %v6456_v60, 0.0  ;;  %6319 = vmatmul.bf16.gmra.mxu1 %v15158_v52 }
 0xa03   :  { %6497 = vmatmul.bf16.gmra.mxu3 %v13735_v15  ;;  %v14066_v54 = vpack.c.bf16 %v6907_v11, %v6903_v62  ;;  %v6369_v31 = vpop.f32.mrf.mxu2  ;;  %v15241_v62 = vld [vmem:[#allocation37_spill] sm:$0xff]  ;;  %v15242_v11 = vld [vmem:[#allocation15_spill] sm:$0xff] }
 0xa04   :  { %v6370_v24 = vadd.f32 %v6369_v31, %v6281_v29  ;;  %v6193_v8 = vpop.f32.mrf.mxu0  ;;  %v15243_v31 = vld [vmem:[#allocation27_spill] sm:$0xff] }
 0xa05   :  { %15239 = vst [vmem:[#allocation22_spill] sm:$0xff] %v14066_v54  ;;  %v6194_v55 = vadd.f32 %v6193_v8, %v14019_v40  ;;  %v10132_v8 = vld [vmem:[#allocation5 + $0xf8] sm:$0xff] }
 0xa06   :  { %v6458_v36 = vpop.f32.mrf.mxu3  ;;  %v6282_v25 = vpop.f32.mrf.mxu1  ;;  %7588 = vmatpush.bf16.msrb.mxu3 %v10132_v8 }
 0xa07   :  { %v6459_v44 = vadd.f32 %v6458_v36, %v6370_v24  ;;  %v6283_v46 = vadd.f32 %v6282_v25, %v6194_v55  ;;  %v10124_v24 = vld [vmem:[#allocation5 + $0xb8] sm:$0xff] }
 0xa08   :  { %v10108_v36 = vld [vmem:[#allocation5 + $0x38] sm:$0xff]  ;;  %7499 = vmatpush.bf16.msrb.mxu2 %v10124_v24 }
 0xa09   :  { %v6911_v60 = vmax.f32 %v6459_v44, 0.0  ;;  %7321 = vmatpush.bf16.msrb.mxu0 %v10108_v36 }
 0xa0b   :  { %v6371_v34 = vpop.f32.mrf.mxu2 }
 0xa0c   :  { %v6372_v47 = vadd.f32 %v6371_v34, %v6283_v46  ;;  %v6196_v61 = vpop.f32.mrf.mxu0 }
 0xa0d   :  { %v6197_v49 = vadd.f32 %v6196_v61, %v14019_v40 }
 0xa0e   :  { %v6460_v51 = vpop.f32.mrf.mxu3  ;;  %v6285_v37 = vpop.f32.mrf.mxu1 }
 0xa0f   :  { %v6461_v57 = vadd.f32 %v6460_v51, %v6372_v47  ;;  %v6286_v26 = vadd.f32 %v6285_v37, %v6197_v49  ;;  %6235 = vmatmul.bf16.gmra.mxu0 %v15240_v4  ;;  %v10116_v37 = vld [vmem:[#allocation5 + $0x78] sm:$0xff] }
 0xa10   :  { %6413 = vmatmul.bf16.gmra.mxu2 %v15242_v11  ;;  %7410 = vmatpush.bf16.msrb.mxu1 %v10116_v37 }
 0xa11   :  { %v6915_v29 = vmax.f32 %v6461_v57, 0.0  ;;  %6324 = vmatmul.bf16.gmra.mxu1 %v15241_v62 }
 0xa13   :  { %6502 = vmatmul.bf16.gmra.mxu3 %v15243_v31  ;;  %v14074_v55 = vpack.c.bf16 %v6915_v29, %v6911_v60  ;;  %v6374_v25 = vpop.f32.mrf.mxu2 }
 0xa14   :  { %v6375_v46 = vadd.f32 %v6374_v25, %v6286_v26  ;;  %v6198_v47 = vpop.f32.mrf.mxu0 }
 0xa15   :  { %15244 = vst [vmem:[#allocation81_spill] sm:$0xff] %v14074_v55  ;;  %v6199_v44 = vadd.f32 %v6198_v47, %v14019_v40 }
 0xa16   :  { %v6463_v34 = vpop.f32.mrf.mxu3  ;;  %v6287_v51 = vpop.f32.mrf.mxu1 }
 0xa17   :  { %v6464_v61 = vadd.f32 %v6463_v34, %v6375_v46  ;;  %v6288_v49 = vadd.f32 %v6287_v51, %v6199_v44 }
 0xa19   :  { %v6919_v26 = vmax.f32 %v6464_v61, 0.0 }
 0xa1b   :  { %v6376_v57 = vpop.f32.mrf.mxu2 }
 0xa1c   :  { %v6377_v54 = vadd.f32 %v6376_v57, %v6288_v49  ;;  %v6201_v31 = vpop.f32.mrf.mxu0 }
 0xa1d   :  { %v6202_v60 = vadd.f32 %v6201_v31, %v14019_v40 }
 0xa1e   :  { %v6465_v27 = vpop.f32.mrf.mxu3  ;;  %v6290_v29 = vpop.f32.mrf.mxu1 }
 0xa1f   :  { %v6466_v24 = vadd.f32 %v6465_v27, %v6377_v54  ;;  %v6291_v36 = vadd.f32 %v6290_v29, %v6202_v60  ;;  %6240 = vmatmul.bf16.gmra.mxu0 %v15163_v14 }
 0xa20   :  { %6418 = vmatmul.bf16.gmra.mxu2 %v15165_v6 }
 0xa21   :  { %v6923_v8 = vmax.f32 %v6466_v24, 0.0  ;;  %6329 = vmatmul.bf16.gmra.mxu1 %v15164_v19 }
 0xa23   :  { %6507 = vmatmul.bf16.gmra.mxu3 %v13759_v39  ;;  %v14082_v25 = vpack.c.bf16 %v6923_v8, %v6919_v26  ;;  %v6379_v46 = vpop.f32.mrf.mxu2  ;;  %v15245_v8 = vld [vmem:[#allocation141_spill] sm:$0xff] }
 0xa24   :  { %v6380_v34 = vadd.f32 %v6379_v46, %v6291_v36  ;;  %v6203_v44 = vpop.f32.mrf.mxu0  ;;  %v15246_v46 = vld [vmem:[#allocation45_spill] sm:$0xff] }
 0xa25   :  { %v6204_v31 = vadd.f32 %v6203_v44, %v14019_v40  ;;  %v15247_v44 = vld [vmem:[#allocation83_spill] sm:$0xff] }
 0xa26   :  { %v6468_v47 = vpop.f32.mrf.mxu3  ;;  %v6292_v27 = vpop.f32.mrf.mxu1 }
 0xa27   :  { %v6469_v54 = vadd.f32 %v6468_v47, %v6380_v34  ;;  %v6293_v51 = vadd.f32 %v6292_v27, %v6204_v31  ;;  %v10123_v34 = vld [vmem:[#allocation5 + $0xb0] sm:$0xff] }
 0xa28   :  { %v10107_v47 = vld [vmem:[#allocation5 + $0x30] sm:$0xff]  ;;  %7500 = vmatpush.bf16.msrb.mxu2 %v10123_v34 }
 0xa29   :  { %v6927_v26 = vmax.f32 %v6469_v54, 0.0  ;;  %v10131_v31 = vld [vmem:[#allocation5 + $0xf0] sm:$0xff]  ;;  %7322 = vmatpush.bf16.msrb.mxu0 %v10107_v47 }
 0xa2a   :  { %7589 = vmatpush.bf16.msrb.mxu3 %v10131_v31 }
 0xa2b   :  { %v6381_v49 = vpop.f32.mrf.mxu2 }
 0xa2c   :  { %v6382_v61 = vadd.f32 %v6381_v49, %v6293_v51  ;;  %v6206_v57 = vpop.f32.mrf.mxu0 }
 0xa2d   :  { %v6207_v60 = vadd.f32 %v6206_v57, %v14019_v40 }
 0xa2e   :  { %v6470_v37 = vpop.f32.mrf.mxu3  ;;  %v6295_v29 = vpop.f32.mrf.mxu1 }
 0xa2f   :  { %v6471_v24 = vadd.f32 %v6470_v37, %v6382_v61  ;;  %v6296_v55 = vadd.f32 %v6295_v29, %v6207_v60  ;;  %6521 = vmatmul.bf16.vlgmr.msra.gmra.mxu0 %v15113_v0  ;;  %v10115_v29 = vld [vmem:[#allocation5 + $0x70] sm:$0xff] }
 0xa30   :  { %6699 = vmatmul.bf16.vlgmr.msra.gmra.mxu2 %v15246_v46  ;;  %7411 = vmatpush.bf16.msrb.mxu1 %v10115_v29 }
 0xa31   :  { %v6931_v36 = vmax.f32 %v6471_v24, 0.0  ;;  %6610 = vmatmul.bf16.vlgmr.msra.gmra.mxu1 %v15245_v8 }
 0xa33   :  { %6788 = vmatmul.bf16.vlgmr.msra.gmra.mxu3 %v15247_v44  ;;  %v14090_v27 = vpack.c.bf16 %v6931_v36, %v6927_v26  ;;  %v6384_v51 = vpop.f32.mrf.mxu2 }
 0xa34   :  { %v6385_v49 = vadd.f32 %v6384_v51, %v6296_v55  ;;  %v6208_v37 = vpop.f32.mrf.mxu0 }
 0xa35   :  { %v6209_v0 = vadd.f32 %v6208_v37, %v14019_v40 }
 0xa36   :  { %v6473_v61 = vpop.f32.mrf.mxu3  ;;  %v6297_v54 = vpop.f32.mrf.mxu1 }
 0xa37   :  { %v6474_v57 = vadd.f32 %v6473_v61, %v6385_v49  ;;  %v6298_v60 = vadd.f32 %v6297_v54, %v6209_v0 }
 0xa39   :  { %v6935_v55 = vmax.f32 %v6474_v57, 0.0 }
 0xa3b   :  { %v6386_v24 = vpop.f32.mrf.mxu2 }
 0xa3c   :  { %v6387_v8 = vadd.f32 %v6386_v24, %v6298_v60  ;;  %v6211_v44 = vpop.f32.mrf.mxu0 }
 0xa3d   :  { %v6212_v26 = vadd.f32 %v6211_v44, %v14019_v40 }
 0xa3e   :  { %v6475_v46 = vpop.f32.mrf.mxu3  ;;  %v6300_v36 = vpop.f32.mrf.mxu1 }
 0xa3f   :  { %v6476_v34 = vadd.f32 %v6475_v46, %v6387_v8  ;;  %v6301_v47 = vadd.f32 %v6300_v36, %v6212_v26  ;;  %6526 = vmatmul.bf16.gmra.mxu0 %v15117_v50 }
 0xa40   :  { %6704 = vmatmul.bf16.gmra.mxu2 %v15119_v1 }
 0xa41   :  { %v6939_v31 = vmax.f32 %v6476_v34, 0.0  ;;  %6615 = vmatmul.bf16.gmra.mxu1 %v15118_v2  ;;  %v10122_v34 = vld [vmem:[#allocation5 + $0xa8] sm:$0xff] }
 0xa42   :  { %7501 = vmatpush.bf16.msrb.mxu2 %v10122_v34 }
 0xa43   :  { %6793 = vmatmul.bf16.gmra.mxu3 %v13634_v13  ;;  %v14098_v51 = vpack.c.bf16 %v6939_v31, %v6935_v55  ;;  %v6389_v49 = vpop.f32.mrf.mxu2  ;;  %v10130_v55 = vld [vmem:[#allocation5 + $0xe8] sm:$0xff] }
 0xa44   :  { %v6390_v61 = vadd.f32 %v6389_v49, %v6301_v47  ;;  %v6213_v0 = vpop.f32.mrf.mxu0  ;;  %v10106_v47 = vld [vmem:[#allocation5 + $0x28] sm:$0xff]  ;;  %7590 = vmatpush.bf16.msrb.mxu3 %v10130_v55 }
 0xa45   :  { %v6214_v54 = vadd.f32 %v6213_v0, %v14019_v40  ;;  %7323 = vmatpush.bf16.msrb.mxu0 %v10106_v47 }
 0xa46   :  { %v6478_v37 = vpop.f32.mrf.mxu3  ;;  %v6302_v60 = vpop.f32.mrf.mxu1 }
 0xa47   :  { %v6479_v29 = vadd.f32 %v6478_v37, %v6390_v61  ;;  %v6303_v24 = vadd.f32 %v6302_v60, %v6214_v54 }
 0xa49   :  { %v6943_v26 = vmax.f32 %v6479_v29, 0.0 }
 0xa4b   :  { %v6391_v50 = vpop.f32.mrf.mxu2 }
 0xa4c   :  { %v6392_v57 = vadd.f32 %v6391_v50, %v6303_v24  ;;  %v6216_v46 = vpop.f32.mrf.mxu0 }
 0xa4d   :  { %v6217_v2 = vadd.f32 %v6216_v46, %v14019_v40 }
 0xa4e   :  { %v6480_v8 = vpop.f32.mrf.mxu3  ;;  %v6305_v1 = vpop.f32.mrf.mxu1 }
 0xa4f   :  { %v6481_v44 = vadd.f32 %v6480_v8, %v6392_v57  ;;  %v6306_v13 = vadd.f32 %v6305_v1, %v6217_v2  ;;  %6531 = vmatmul.bf16.gmra.mxu0 %v15121_v21 }
 0xa50   :  { %6709 = vmatmul.bf16.gmra.mxu2 %v15123_v22  ;;  %v10114_v22 = vld [vmem:[#allocation5 + $0x68] sm:$0xff] }
 0xa51   :  { %v6947_v36 = vmax.f32 %v6481_v44, 0.0  ;;  %6620 = vmatmul.bf16.gmra.mxu1 %v15122_v5 }
 0xa52   :  { %7412 = vmatpush.bf16.msrb.mxu1 %v10114_v22 }
 0xa53   :  { %6798 = vmatmul.bf16.gmra.mxu3 %v13643_v3  ;;  %v14106_v31 = vpack.c.bf16 %v6947_v36, %v6943_v26  ;;  %v6394_v49 = vpop.f32.mrf.mxu2 }
 0xa54   :  { %v6395_v61 = vadd.f32 %v6394_v49, %v6306_v13  ;;  %v6218_v0 = vpop.f32.mrf.mxu0 }
 0xa55   :  { %v6219_v21 = vadd.f32 %v6218_v0, %v14019_v40 }
 0xa56   :  { %v6483_v37 = vpop.f32.mrf.mxu3  ;;  %v6307_v54 = vpop.f32.mrf.mxu1 }
 0xa57   :  { %v6484_v5 = vadd.f32 %v6483_v37, %v6395_v61  ;;  %v6308_v60 = vadd.f32 %v6307_v54, %v6219_v21 }
 0xa59   :  { %v6951_v1 = vmax.f32 %v6484_v5, 0.0 }
 0xa5b   :  { %v6396_v3 = vpop.f32.mrf.mxu2 }
 0xa5c   :  { %v6397_v29 = vadd.f32 %v6396_v3, %v6308_v60  ;;  %v6221_v50 = vpop.f32.mrf.mxu0  ;;  %v10121_v3 = vld [vmem:[#allocation5 + $0xa0] sm:$0xff] }
 0xa5d   :  { %v6222_v57 = vadd.f32 %v6221_v50, %v14019_v40  ;;  %7502 = vmatpush.bf16.msrb.mxu2 %v10121_v3 }
 0xa5e   :  { %v6485_v24 = vpop.f32.mrf.mxu3  ;;  %v6310_v8 = vpop.f32.mrf.mxu1 }
 0xa5f   :  { %v6486_v46 = vadd.f32 %v6485_v24, %v6397_v29  ;;  %v6311_v2 = vadd.f32 %v6310_v8, %v6222_v57  ;;  %6536 = vmatmul.bf16.gmra.mxu0 %v15125_v32  ;;  %v10105_v29 = vld [vmem:[#allocation5 + $0x20] sm:$0xff] }
 0xa60   :  { %6714 = vmatmul.bf16.gmra.mxu2 %v15127_v63  ;;  %v10129_v24 = vld [vmem:[#allocation5 + $0xe0] sm:$0xff]  ;;  %7324 = vmatpush.bf16.msrb.mxu0 %v10105_v29 }
 0xa61   :  { %v6955_v44 = vmax.f32 %v6486_v46, 0.0  ;;  %6625 = vmatmul.bf16.gmra.mxu1 %v15126_v17  ;;  %7591 = vmatpush.bf16.msrb.mxu3 %v10129_v24 }
 0xa63   :  { %6803 = vmatmul.bf16.gmra.mxu3 %v13652_v30  ;;  %v14114_v13 = vpack.c.bf16 %v6955_v44, %v6951_v1  ;;  %v6399_v26 = vpop.f32.mrf.mxu2 }
 0xa64   :  { %v6400_v36 = vadd.f32 %v6399_v26, %v6311_v2  ;;  %v6223_v47 = vpop.f32.mrf.mxu0 }
 0xa65   :  { %v6224_v55 = vadd.f32 %v6223_v47, %v14019_v40 }
 0xa66   :  { %v6488_v34 = vpop.f32.mrf.mxu3  ;;  %v6312_v49 = vpop.f32.mrf.mxu1 }
 0xa67   :  { %v6489_v61 = vadd.f32 %v6488_v34, %v6400_v36  ;;  %v6313_v37 = vadd.f32 %v6312_v49, %v6224_v55 }
 0xa69   :  { %v6959_v60 = vmax.f32 %v6489_v61, 0.0 }
 0xa6b   :  { %v6401_v32 = vpop.f32.mrf.mxu2 }
 0xa6c   :  { %v6402_v0 = vadd.f32 %v6401_v32, %v6313_v37  ;;  %v6226_v54 = vpop.f32.mrf.mxu0 }
 0xa6d   :  { %v6227_v17 = vadd.f32 %v6226_v54, %v14019_v40 }
 0xa6e   :  { %v6490_v21 = vpop.f32.mrf.mxu3  ;;  %v6315_v63 = vpop.f32.mrf.mxu1 }
 0xa6f   :  { %v6491_v5 = vadd.f32 %v6490_v21, %v6402_v0  ;;  %v6316_v30 = vadd.f32 %v6315_v63, %v6227_v17  ;;  %6541 = vmatmul.bf16.gmra.mxu0 %v15129_v43 }
 0xa70   :  { %6719 = vmatmul.bf16.gmra.mxu2 %v15131_v59  ;;  %v10113_v59 = vld [vmem:[#allocation5 + $0x60] sm:$0xff] }
 0xa71   :  { %v6963_v22 = vmax.f32 %v6491_v5, 0.0  ;;  %6630 = vmatmul.bf16.gmra.mxu1 %v15130_v28 }
 0xa72   :  { %7413 = vmatpush.bf16.msrb.mxu1 %v10113_v59  ;;  %v10128_v59 = vld [vmem:[#allocation5 + $0xd8] sm:$0xff] }
 0xa73   :  { %6808 = vmatmul.bf16.gmra.mxu3 %v13661_v45  ;;  %v14122_v50 = vpack.c.bf16 %v6963_v22, %v6959_v60  ;;  %v6404_v57 = vpop.f32.mrf.mxu2 }
 0xa74   :  { %v6405_v8 = vadd.f32 %v6404_v57, %v6316_v30  ;;  %v6228_v2 = vpop.f32.mrf.mxu0  ;;  %7592 = vmatpush.bf16.msrb.mxu3 %v10128_v59 }
 0xa75   :  { %v6229_v43 = vadd.f32 %v6228_v2, %v14019_v40  ;;  %v15248_v2 = vld [vmem:[#allocation146_spill] sm:$0xff] }
 0xa76   :  { %v6493_v46 = vpop.f32.mrf.mxu3  ;;  %v6317_v1 = vpop.f32.mrf.mxu1 }
 0xa77   :  { %v6494_v28 = vadd.f32 %v6493_v46, %v6405_v8  ;;  %v6318_v44 = vadd.f32 %v6317_v1, %v6229_v43  ;;  %v15249_v43 = vld [vmem:[#allocation73_spill] sm:$0xff]  ;;  %v15250_v1 = vld [vmem:[#allocation19_spill] sm:$0xff] }
 0xa79   :  { %v6967_v37 = vmax.f32 %v6494_v28, 0.0  ;;  %v10120_v28 = vld [vmem:[#allocation5 + $0x98] sm:$0xff] }
 0xa7a   :  { %7503 = vmatpush.bf16.msrb.mxu2 %v10120_v28 }
 0xa7b   :  { %v6406_v45 = vpop.f32.mrf.mxu2 }
 0xa7c   :  { %v6407_v26 = vadd.f32 %v6406_v45, %v6318_v44  ;;  %v6231_v34 = vpop.f32.mrf.mxu0  ;;  %v10104_v44 = vld [vmem:[#allocation5 + $0x18] sm:$0xff] }
 0xa7d   :  { %v6232_v47 = vadd.f32 %v6231_v34, %v14019_v40  ;;  %7325 = vmatpush.bf16.msrb.mxu0 %v10104_v44 }
 0xa7e   :  { %v6495_v36 = vpop.f32.mrf.mxu3  ;;  %v6320_v55 = vpop.f32.mrf.mxu1 }
 0xa7f   :  { %v6496_v49 = vadd.f32 %v6495_v36, %v6407_v26  ;;  %v6321_v61 = vadd.f32 %v6320_v55, %v6232_v47  ;;  %6546 = vmatmul.bf16.gmra.mxu0 %v15132_v41 }
 0xa80   :  { %6724 = vmatmul.bf16.gmra.mxu2 %v15134_v9 }
 0xa81   :  { %v6971_v32 = vmax.f32 %v6496_v49, 0.0  ;;  %6635 = vmatmul.bf16.gmra.mxu1 %v15133_v53 }
 0xa83   :  { %6813 = vmatmul.bf16.gmra.mxu3 %v13670_v20  ;;  %v14130_v0 = vpack.c.bf16 %v6971_v32, %v6967_v37  ;;  %v6409_v21 = vpop.f32.mrf.mxu2  ;;  %v10112_v37 = vld [vmem:[#allocation5 + $0x58] sm:$0xff] }
 0xa84   :  { %v6410_v54 = vadd.f32 %v6409_v21, %v6321_v61  ;;  %v6233_v63 = vpop.f32.mrf.mxu0  ;;  %7414 = vmatpush.bf16.msrb.mxu1 %v10112_v37  ;;  %v10103_v37 = vld [vmem:[#allocation5 + $0x10] sm:$0xff] }
 0xa85   :  { %v6234_v5 = vadd.f32 %v6233_v63, %v14019_v40  ;;  %7326 = vmatpush.bf16.msrb.mxu0 %v10103_v37 }
 0xa86   :  { %v6498_v17 = vpop.f32.mrf.mxu3  ;;  %v6322_v30 = vpop.f32.mrf.mxu1 }
 0xa87   :  { %v6499_v60 = vadd.f32 %v6498_v17, %v6410_v54  ;;  %v6323_v22 = vadd.f32 %v6322_v30, %v6234_v5 }
 0xa89   :  { %v6975_v8 = vmax.f32 %v6499_v60, 0.0 }
 0xa8b   :  { %v6411_v41 = vpop.f32.mrf.mxu2 }
 0xa8c   :  { %v6412_v3 = vadd.f32 %v6411_v41, %v6323_v22  ;;  %v6236_v24 = vpop.f32.mrf.mxu0 }
 0xa8d   :  { %v6237_v53 = vadd.f32 %v6236_v24, %v14019_v40 }
 0xa8e   :  { %v6500_v29 = vpop.f32.mrf.mxu3  ;;  %v6325_v9 = vpop.f32.mrf.mxu1 }
 0xa8f   :  { %v6501_v57 = vadd.f32 %v6500_v29, %v6412_v3  ;;  %v6326_v20 = vadd.f32 %v6325_v9, %v6237_v53  ;;  %6551 = vmatmul.bf16.gmra.mxu0 %v15136_v18  ;;  %v15251_v3 = vld [vmem:[#allocation20_spill] sm:$0xff] }
 0xa90   :  { %6729 = vmatmul.bf16.gmra.mxu2 %v15249_v43 }
 0xa91   :  { %v6979_v46 = vmax.f32 %v6501_v57, 0.0  ;;  %6640 = vmatmul.bf16.gmra.mxu1 %v15248_v2 }
 0xa93   :  { %6818 = vmatmul.bf16.gmra.mxu3 %v15250_v1  ;;  %v14138_v45 = vpack.c.bf16 %v6979_v46, %v6975_v8  ;;  %v6414_v26 = vpop.f32.mrf.mxu2 }
 0xa94   :  { %v6415_v36 = vadd.f32 %v6414_v26, %v6326_v20  ;;  %v6238_v47 = vpop.f32.mrf.mxu0 }
 0xa95   :  { %v6239_v18 = vadd.f32 %v6238_v47, %v14019_v40 }
 0xa96   :  { %v6503_v34 = vpop.f32.mrf.mxu3  ;;  %v6327_v55 = vpop.f32.mrf.mxu1 }
 0xa97   :  { %v6504_v49 = vadd.f32 %v6503_v34, %v6415_v36  ;;  %v6328_v61 = vadd.f32 %v6327_v55, %v6239_v18  ;;  %v15253_v34 = vld [vmem:[#allocation137_spill] sm:$0xff]  ;;  %v15255_v55 = vld [vmem:[#allocation11_spill] sm:$0xff] }
 0xa99   :  { %v6983_v22 = vmax.f32 %v6504_v49, 0.0  ;;  %v15256_v49 = vld [vmem:[#allocation86_spill] sm:$0xff] }
 0xa9b   :  { %v6416_v32 = vpop.f32.mrf.mxu2 }
 0xa9c   :  { %v6417_v21 = vadd.f32 %v6416_v32, %v6328_v61  ;;  %v6241_v17 = vpop.f32.mrf.mxu0  ;;  %v10119_v61 = vld [vmem:[#allocation5 + $0x90] sm:$0xff] }
 0xa9d   :  { %v6242_v63 = vadd.f32 %v6241_v17, %v14019_v40  ;;  %v10127_v32 = vld [vmem:[#allocation5 + $0xd0] sm:$0xff]  ;;  %7504 = vmatpush.bf16.msrb.mxu2 %v10119_v61 }
 0xa9e   :  { %v6505_v54 = vpop.f32.mrf.mxu3  ;;  %v6330_v5 = vpop.f32.mrf.mxu1  ;;  %7593 = vmatpush.bf16.msrb.mxu3 %v10127_v32  ;;  %v15258_v32 = vld [vmem:[#allocation139_spill] sm:$0xff] }
 0xa9f   :  { %v6506_v30 = vadd.f32 %v6505_v54, %v6417_v21  ;;  %v6331_v60 = vadd.f32 %v6330_v5, %v6242_v63  ;;  %6556 = vmatmul.bf16.gmra.mxu0 %v15138_v7  ;;  %v15252_v7 = vld [vmem:[#allocation14_spill] sm:$0xff] }
 0xaa0   :  { %6734 = vmatmul.bf16.gmra.mxu2 %v15140_v10  ;;  %v14150_v43 = vperm.slane %v15252_v7, 3 }
 0xaa1   :  { %v6987_v41 = vmax.f32 %v6506_v30, 0.0  ;;  %6645 = vmatmul.bf16.gmra.mxu1 %v15139_v56 }
 0xaa3   :  { %6823 = vmatmul.bf16.gmra.mxu3 %v15251_v3  ;;  %v14146_v29 = vpack.c.bf16 %v6987_v41, %v6983_v22  ;;  %v6419_v24 = vpop.f32.mrf.mxu2  ;;  %v10111_v3 = vld [vmem:[#allocation5 + $0x50] sm:$0xff] }
 0xaa4   :  { %v6420_v53 = vadd.f32 %v6419_v24, %v6331_v60  ;;  %v6243_v57 = vpop.f32.mrf.mxu0  ;;  %7415 = vmatpush.bf16.msrb.mxu1 %v10111_v3 }
 0xaa5   :  { %v6244_v20 = vadd.f32 %v6243_v57, %v14019_v40  ;;  %v15254_v40 = vld [vmem:[#allocation13_spill] sm:$0xff] }
 0xaa6   :  { %v6508_v9 = vpop.f32.mrf.mxu3  ;;  %v6332_v8 = vpop.f32.mrf.mxu1 }
 0xaa7   :  { %v6509_v46 = vadd.f32 %v6508_v9, %v6420_v53  ;;  %v6333_v2 = vadd.f32 %v6332_v8, %v6244_v20 }
 0xaa9   :  { %v6991_v47 = vmax.f32 %v6509_v46, 0.0 }
 0xaab   :  { %v6421_v1 = vpop.f32.mrf.mxu2 }
 0xaac   :  { %v6422_v56 = vadd.f32 %v6421_v1, %v6333_v2  ;;  %v6522_v10 = vpop.f32.mrf.mxu0 }
 0xaad   :  { %v6523_v44 = vadd.f32 %v6522_v10, %v14150_v43 }
 0xaae   :  { %v6510_v28 = vpop.f32.mrf.mxu3  ;;  %v6611_v59 = vpop.f32.mrf.mxu1 }
 0xaaf   :  { %v6511_v26 = vadd.f32 %v6510_v28, %v6422_v56  ;;  %v6612_v36 = vadd.f32 %v6611_v59, %v6523_v44  ;;  %6561 = vmatmul.bf16.gmra.mxu0 %v15253_v34  ;;  %v15257_v56 = vld [vmem:[#allocation23_spill] sm:$0xff] }
 0xab0   :  { %6739 = vmatmul.bf16.gmra.mxu2 %v15255_v55 }
 0xab1   :  { %v6995_v18 = vmax.f32 %v6511_v26, 0.0  ;;  %6650 = vmatmul.bf16.gmra.mxu1 %v15254_v40 }
 0xab3   :  { %6828 = vmatmul.bf16.gmra.mxu3 %v15256_v49  ;;  %v14157_v21 = vpack.c.bf16 %v6995_v18, %v6991_v47  ;;  %v6700_v54 = vpop.f32.mrf.mxu2 }
 0xab4   :  { %v6701_v17 = vadd.f32 %v6700_v54, %v6612_v36  ;;  %v6524_v5 = vpop.f32.mrf.mxu0 }
 0xab5   :  { %v6525_v30 = vadd.f32 %v6524_v5, %v14150_v43  ;;  %v15260_v5 = vld [vmem:[#allocation12_spill] sm:$0xff] }
 0xab6   :  { %v6789_v63 = vpop.f32.mrf.mxu3  ;;  %v6613_v60 = vpop.f32.mrf.mxu1 }
 0xab7   :  { %v6790_v22 = vadd.f32 %v6789_v63, %v6701_v17  ;;  %v6614_v41 = vadd.f32 %v6613_v60, %v6525_v30  ;;  %v15259_v63 = vld [vmem:[#allocation21_spill] sm:$0xff]  ;;  %v15261_v30 = vld [vmem:[#allocation24_spill] sm:$0xff] }
 0xab8   :  { %v10118_v60 = vld [vmem:[#allocation5 + $0x88] sm:$0xff] }
 0xab9   :  { %v6872_v7 = vmax.f32 %v6790_v22, 0.0  ;;  %v10102_v22 = vld [vmem:[#allocation5 + $0x8] sm:$0xff]  ;;  %7505 = vmatpush.bf16.msrb.mxu2 %v10118_v60 }
 0xaba   :  { %7327 = vmatpush.bf16.msrb.mxu0 %v10102_v22 }
 0xabb   :  { %v6702_v24 = vpop.f32.mrf.mxu2 }
 0xabc   :  { %v6703_v53 = vadd.f32 %v6702_v24, %v6614_v41  ;;  %v6527_v57 = vpop.f32.mrf.mxu0  ;;  %v10126_v41 = vld [vmem:[#allocation5 + $0xc8] sm:$0xff] }
 0xabd   :  { %v6528_v20 = vadd.f32 %v6527_v57, %v14150_v43  ;;  %7594 = vmatpush.bf16.msrb.mxu3 %v10126_v41  ;;  %v15263_v41 = vld [vmem:[#allocation29_spill] sm:$0xff] }
 0xabe   :  { %v6791_v9 = vpop.f32.mrf.mxu3  ;;  %v6616_v8 = vpop.f32.mrf.mxu1 }
 0xabf   :  { %v6792_v46 = vadd.f32 %v6791_v9, %v6703_v53  ;;  %v6617_v2 = vadd.f32 %v6616_v8, %v6528_v20  ;;  %6566 = vmatmul.bf16.gmra.mxu0 %v15145_v16 }
 0xac0   :  { %6744 = vmatmul.bf16.gmra.mxu2 %v13517_v48 }
 0xac1   :  { %v6876_v1 = vmax.f32 %v6792_v46, 0.0  ;;  %6655 = vmatmul.bf16.gmra.mxu1 %v15146_v38 }
 0xac3   :  { %6833 = vmatmul.bf16.gmra.mxu3 %v15257_v56  ;;  %v14165_v28 = vpack.c.bf16 %v6876_v1, %v6872_v7  ;;  %v6705_v10 = vpop.f32.mrf.mxu2  ;;  %v10110_v7 = vld [vmem:[#allocation5 + $0x48] sm:$0xff] }
 0xac4   :  { %v6706_v44 = vadd.f32 %v6705_v10, %v6617_v2  ;;  %v6529_v26 = vpop.f32.mrf.mxu0  ;;  %7416 = vmatpush.bf16.msrb.mxu1 %v10110_v7 }
 0xac5   :  { %v6530_v36 = vadd.f32 %v6529_v26, %v14150_v43 }
 0xac6   :  { %v6794_v59 = vpop.f32.mrf.mxu3  ;;  %v6618_v34 = vpop.f32.mrf.mxu1 }
 0xac7   :  { %v6795_v47 = vadd.f32 %v6794_v59, %v6706_v44  ;;  %v6619_v18 = vadd.f32 %v6618_v34, %v6530_v36 }
 0xac9   :  { %v6880_v54 = vmax.f32 %v6795_v47, 0.0 }
 0xacb   :  { %v6707_v16 = vpop.f32.mrf.mxu2 }
 0xacc   :  { %v6708_v40 = vadd.f32 %v6707_v16, %v6619_v18  ;;  %v6532_v49 = vpop.f32.mrf.mxu0 }
 0xacd   :  { %v6533_v38 = vadd.f32 %v6532_v49, %v14150_v43 }
 0xace   :  { %v6796_v55 = vpop.f32.mrf.mxu3  ;;  %v6621_v48 = vpop.f32.mrf.mxu1 }
 0xacf   :  { %v6797_v61 = vadd.f32 %v6796_v55, %v6708_v40  ;;  %v6622_v37 = vadd.f32 %v6621_v48, %v6533_v38  ;;  %6571 = vmatmul.bf16.gmra.mxu0 %v15258_v32 }
 0xad0   :  { %6749 = vmatmul.bf16.gmra.mxu2 %v15260_v5 }
 0xad1   :  { %v6884_v17 = vmax.f32 %v6797_v61, 0.0  ;;  %6660 = vmatmul.bf16.gmra.mxu1 %v15259_v63 }
 0xad3   :  { %6838 = vmatmul.bf16.gmra.mxu3 %v15261_v30  ;;  %v14173_v3 = vpack.c.bf16 %v6884_v17, %v6880_v54  ;;  %v6710_v24 = vpop.f32.mrf.mxu2  ;;  %v15262_v30 = vld [vmem:[#allocation91_spill] sm:$0xff] }
 0xad4   :  { %v6711_v53 = vadd.f32 %v6710_v24, %v6622_v37  ;;  %v6534_v57 = vpop.f32.mrf.mxu0  ;;  %v15264_v24 = vld [vmem:[#allocation80_spill] sm:$0xff] }
 0xad5   :  { %v6535_v20 = vadd.f32 %v6534_v57, %v14150_v43  ;;  %v10101_v57 = vld [vmem:[#allocation5] sm:$0xff] }
 0xad6   :  { %v6799_v9 = vpop.f32.mrf.mxu3  ;;  %v6623_v8 = vpop.f32.mrf.mxu1  ;;  %7328 = vmatpush.bf16.msrb.mxu0 %v10101_v57 }
 0xad7   :  { %v6800_v46 = vadd.f32 %v6799_v9, %v6711_v53  ;;  %v6624_v2 = vadd.f32 %v6623_v8, %v6535_v20  ;;  %v15265_v53 = vld [vmem:[#allocation89_spill] sm:$0xff]  ;;  %v10117_v9 = vld [vmem:[#allocation5 + $0x80] sm:$0xff] }
 0xad8   :  { %v10125_v20 = vld [vmem:[#allocation5 + $0xc0] sm:$0xff]  ;;  %7506 = vmatpush.bf16.msrb.mxu2 %v10117_v9 }
 0xad9   :  { %v6888_v47 = vmax.f32 %v6800_v46, 0.0  ;;  %7595 = vmatpush.bf16.msrb.mxu3 %v10125_v20 }
 0xadb   :  { %v6712_v1 = vpop.f32.mrf.mxu2 }
 0xadc   :  { %v6713_v56 = vadd.f32 %v6712_v1, %v6624_v2  ;;  %v6537_v44 = vpop.f32.mrf.mxu0 }
 0xadd   :  { %v6538_v59 = vadd.f32 %v6537_v44, %v14150_v43 }
 0xade   :  { %v6801_v10 = vpop.f32.mrf.mxu3  ;;  %v6626_v26 = vpop.f32.mrf.mxu1 }
 0xadf   :  { %v6802_v36 = vadd.f32 %v6801_v10, %v6713_v56  ;;  %v6627_v34 = vadd.f32 %v6626_v26, %v6538_v59  ;;  %6576 = vmatmul.bf16.gmra.mxu0 %v15151_v33  ;;  %v10109_v26 = vld [vmem:[#allocation5 + $0x40] sm:$0xff] }
 0xae0   :  { %6754 = vmatmul.bf16.gmra.mxu2 %v13547_v12  ;;  %7417 = vmatpush.bf16.msrb.mxu1 %v10109_v26 }
 0xae1   :  { %v6892_v18 = vmax.f32 %v6802_v36, 0.0  ;;  %6665 = vmatmul.bf16.gmra.mxu1 %v15152_v35 }
 0xae3   :  { %6843 = vmatmul.bf16.gmra.mxu3 %v13719_v23  ;;  %v14181_v16 = vpack.c.bf16 %v6892_v18, %v6888_v47  ;;  %v6715_v40 = vpop.f32.mrf.mxu2 }
 0xae4   :  { %v6716_v55 = vadd.f32 %v6715_v40, %v6627_v34  ;;  %v6539_v38 = vpop.f32.mrf.mxu0 }
 0xae5   :  { %v6540_v48 = vadd.f32 %v6539_v38, %v14150_v43 }
 0xae6   :  { %v6804_v49 = vpop.f32.mrf.mxu3  ;;  %v6628_v61 = vpop.f32.mrf.mxu1 }
 0xae7   :  { %v6805_v37 = vadd.f32 %v6804_v49, %v6716_v55  ;;  %v6629_v32 = vadd.f32 %v6628_v61, %v6540_v48 }
 0xae9   :  { %v6896_v60 = vmax.f32 %v6805_v37, 0.0 }
 0xaeb   :  { %v6717_v33 = vpop.f32.mrf.mxu2 }
 0xaec   :  { %v6718_v54 = vadd.f32 %v6717_v33, %v6629_v32  ;;  %v6542_v63 = vpop.f32.mrf.mxu0 }
 0xaed   :  { %v6543_v35 = vadd.f32 %v6542_v63, %v14150_v43 }
 0xaee   :  { %v6806_v17 = vpop.f32.mrf.mxu3  ;;  %v6631_v12 = vpop.f32.mrf.mxu1 }
 0xaef   :  { %v6807_v5 = vadd.f32 %v6806_v17, %v6718_v54  ;;  %v6632_v23 = vadd.f32 %v6631_v12, %v6543_v35  ;;  %6581 = vmatmul.bf16.gmra.mxu0 %v15262_v30 }
 0xaf0   :  { %6759 = vmatmul.bf16.gmra.mxu2 %v15264_v24 }
 0xaf1   :  { %v6900_v22 = vmax.f32 %v6807_v5, 0.0  ;;  %6670 = vmatmul.bf16.gmra.mxu1 %v15263_v41 }
 0xaf3   :  { %6848 = vmatmul.bf16.gmra.mxu3 %v15265_v53  ;;  %v14189_v8 = vpack.c.bf16 %v6900_v22, %v6896_v60  ;;  %v6720_v46 = vpop.f32.mrf.mxu2  ;;  %v15266_v53 = vld [vmem:[#allocation27_spill] sm:$0xff] }
 0xaf4   :  { %v6721_v2 = vadd.f32 %v6720_v46, %v6632_v23  ;;  %v6544_v1 = vpop.f32.mrf.mxu0 }
 0xaf5   :  { %v6545_v56 = vadd.f32 %v6544_v1, %v14150_v43 }
 0xaf6   :  { %v6809_v7 = vpop.f32.mrf.mxu3  ;;  %v6633_v10 = vpop.f32.mrf.mxu1 }
 0xaf7   :  { %v6810_v44 = vadd.f32 %v6809_v7, %v6721_v2  ;;  %v6634_v59 = vadd.f32 %v6633_v10, %v6545_v56 }
 0xaf9   :  { %v6904_v48 = vmax.f32 %v6810_v44, 0.0 }
 0xafb   :  { %v6722_v36 = vpop.f32.mrf.mxu2 }
 0xafc   :  { %v6723_v34 = vadd.f32 %v6722_v36, %v6634_v59  ;;  %v6547_v18 = vpop.f32.mrf.mxu0 }
 0xafd   :  { %v6548_v40 = vadd.f32 %v6547_v18, %v14150_v43 }
 0xafe   :  { %v6811_v47 = vpop.f32.mrf.mxu3  ;;  %v6636_v55 = vpop.f32.mrf.mxu1 }
 0xaff   :  { %v6812_v49 = vadd.f32 %v6811_v47, %v6723_v34  ;;  %v6637_v38 = vadd.f32 %v6636_v55, %v6548_v40  ;;  %6586 = vmatmul.bf16.gmra.mxu0 %v15157_v58 }
 0xb00   :  { %6764 = vmatmul.bf16.gmra.mxu2 %v13577_v42 }
 0xb01   :  { %v6908_v61 = vmax.f32 %v6812_v49, 0.0  ;;  %6675 = vmatmul.bf16.gmra.mxu1 %v15158_v52 }
 0xb03   :  { %6853 = vmatmul.bf16.gmra.mxu3 %v13735_v15  ;;  %v14197_v37 = vpack.c.bf16 %v6908_v61, %v6904_v48  ;;  %v6725_v32 = vpop.f32.mrf.mxu2 }
 0xb04   :  { %v6726_v33 = vadd.f32 %v6725_v32, %v6637_v38  ;;  %v6549_v17 = vpop.f32.mrf.mxu0 }
 0xb05   :  { %v6550_v63 = vadd.f32 %v6549_v17, %v14150_v43 }
 0xb06   :  { %v6814_v54 = vpop.f32.mrf.mxu3  ;;  %v6638_v35 = vpop.f32.mrf.mxu1 }
 0xb07   :  { %v6815_v12 = vadd.f32 %v6814_v54, %v6726_v33  ;;  %v6639_v5 = vadd.f32 %v6638_v35, %v6550_v63 }
 0xb09   :  { %v6912_v41 = vmax.f32 %v6815_v12, 0.0 }
 0xb0b   :  { %v6727_v58 = vpop.f32.mrf.mxu2 }
 0xb0c   :  { %v6728_v23 = vadd.f32 %v6727_v58, %v6639_v5  ;;  %v6552_v60 = vpop.f32.mrf.mxu0  ;;  %v15267_v5 = vld [vmem:[#allocation94_spill] sm:$0xff] }
 0xb0d   :  { %v6553_v52 = vadd.f32 %v6552_v60, %v14150_v43  ;;  %v15269_v60 = vld [vmem:[#allocation76_spill] sm:$0xff] }
 0xb0e   :  { %v6816_v30 = vpop.f32.mrf.mxu3  ;;  %v6641_v42 = vpop.f32.mrf.mxu1 }
 0xb0f   :  { %v6817_v22 = vadd.f32 %v6816_v30, %v6728_v23  ;;  %v6642_v15 = vadd.f32 %v6641_v42, %v6553_v52  ;;  %6591 = vmatmul.bf16.gmra.mxu0 %v15240_v4  ;;  %v15268_v30 = vld [vmem:[#allocation51_spill] sm:$0xff] }
 0xb10   :  { %6769 = vmatmul.bf16.gmra.mxu2 %v15242_v11 }
 0xb11   :  { %v6916_v24 = vmax.f32 %v6817_v22, 0.0  ;;  %6680 = vmatmul.bf16.gmra.mxu1 %v15241_v62 }
 0xb13   :  { %6858 = vmatmul.bf16.gmra.mxu3 %v15266_v53  ;;  %v14205_v9 = vpack.c.bf16 %v6916_v24, %v6912_v41  ;;  %v6730_v57 = vpop.f32.mrf.mxu2 }
 0xb14   :  { %v6731_v20 = vadd.f32 %v6730_v57, %v6642_v15  ;;  %v6554_v2 = vpop.f32.mrf.mxu0 }
 0xb15   :  { %v6555_v7 = vadd.f32 %v6554_v2, %v14150_v43 }
 0xb16   :  { %v6819_v46 = vpop.f32.mrf.mxu3  ;;  %v6643_v1 = vpop.f32.mrf.mxu1 }
 0xb17   :  { %v6820_v56 = vadd.f32 %v6819_v46, %v6731_v20  ;;  %v6644_v10 = vadd.f32 %v6643_v1, %v6555_v7 }
 0xb19   :  { %v6920_v47 = vmax.f32 %v6820_v56, 0.0 }
 0xb1b   :  { %v6732_v4 = vpop.f32.mrf.mxu2 }
 0xb1c   :  { %v6733_v44 = vadd.f32 %v6732_v4, %v6644_v10  ;;  %v6557_v26 = vpop.f32.mrf.mxu0 }
 0xb1d   :  { %v6558_v62 = vadd.f32 %v6557_v26, %v14150_v43 }
 0xb1e   :  { %v6821_v59 = vpop.f32.mrf.mxu3  ;;  %v6646_v11 = vpop.f32.mrf.mxu1 }
 0xb1f   :  { %v6822_v36 = vadd.f32 %v6821_v59, %v6733_v44  ;;  %v6647_v34 = vadd.f32 %v6646_v11, %v6558_v62  ;;  %6596 = vmatmul.bf16.gmra.mxu0 %v15163_v14  ;;  %v15270_v44 = vld [vmem:[#allocation31_spill] sm:$0xff]  ;;  %v15271_v62 = vld [vmem:[#allocation52_spill] sm:$0xff]  ;;  %v15272_v11 = vld [vmem:[#allocation18_spill] sm:$0xff] }
 0xb20   :  { %6774 = vmatmul.bf16.gmra.mxu2 %v15165_v6 }
 0xb21   :  { %v6924_v18 = vmax.f32 %v6822_v36, 0.0  ;;  %6685 = vmatmul.bf16.gmra.mxu1 %v15164_v19 }
 0xb23   :  { %6863 = vmatmul.bf16.gmra.mxu3 %v13759_v39  ;;  %v14213_v40 = vpack.c.bf16 %v6924_v18, %v6920_v47  ;;  %v6735_v55 = vpop.f32.mrf.mxu2 }
 0xb24   :  { %v6736_v49 = vadd.f32 %v6735_v55, %v6647_v34  ;;  %v6559_v48 = vpop.f32.mrf.mxu0 }
 0xb25   :  { %v6560_v61 = vadd.f32 %v6559_v48, %v14150_v43 }
 0xb26   :  { %v6824_v38 = vpop.f32.mrf.mxu3  ;;  %v6648_v32 = vpop.f32.mrf.mxu1 }
 0xb27   :  { %v6825_v33 = vadd.f32 %v6824_v38, %v6736_v49  ;;  %v6649_v54 = vadd.f32 %v6648_v32, %v6560_v61 }
 0xb29   :  { %v6928_v58 = vmax.f32 %v6825_v33, 0.0 }
 0xb2b   :  { %v6737_v14 = vpop.f32.mrf.mxu2 }
 0xb2c   :  { %v6738_v17 = vadd.f32 %v6737_v14, %v6649_v54  ;;  %v6562_v35 = vpop.f32.mrf.mxu0 }
 0xb2d   :  { %v6563_v19 = vadd.f32 %v6562_v35, %v14150_v43 }
 0xb2e   :  { %v6826_v63 = vpop.f32.mrf.mxu3  ;;  %v6651_v6 = vpop.f32.mrf.mxu1 }
 0xb2f   :  { %v6827_v12 = vadd.f32 %v6826_v63, %v6738_v17  ;;  %v6652_v39 = vadd.f32 %v6651_v6, %v6563_v19  ;;  %7329 = vmatmul.bf16.vlgmr.msrb.gmra.mxu0 %v15267_v5  ;;  %v15273_v19 = vld [vmem:[#allocation32_spill] sm:$0xff]  ;;  %v15275_v5 = vld [vmem:[#allocation78_spill] sm:$0xff] }
 0xb30   :  { %7507 = vmatmul.bf16.vlgmr.msrb.gmra.mxu2 %v15269_v60 }
 0xb31   :  { %v6932_v23 = vmax.f32 %v6827_v12, 0.0  ;;  %7418 = vmatmul.bf16.vlgmr.msrb.gmra.mxu1 %v15268_v30 }
 0xb33   :  { %7596 = vmatmul.bf16.vlgmr.msrb.gmra.mxu3 %v14165_v28  ;;  %v14221_v52 = vpack.c.bf16 %v6932_v23, %v6928_v58  ;;  %v6740_v42 = vpop.f32.mrf.mxu2 }
 0xb34   :  { %v6741_v22 = vadd.f32 %v6740_v42, %v6652_v39  ;;  %v6564_v41 = vpop.f32.mrf.mxu0  ;;  %v15274_v39 = vld [vmem:[#allocation118_spill] sm:$0xff] }
 0xb35   :  { %v6565_v24 = vadd.f32 %v6564_v41, %v14150_v43 }
 0xb36   :  { %v6829_v15 = vpop.f32.mrf.mxu3  ;;  %v6653_v53 = vpop.f32.mrf.mxu1 }
 0xb37   :  { %v6830_v57 = vadd.f32 %v6829_v15, %v6741_v22  ;;  %v6654_v20 = vadd.f32 %v6653_v53, %v6565_v24 }
 0xb39   :  { %v6936_v59 = vmax.f32 %v6830_v57, 0.0 }
 0xb3b   :  { %v6742_v46 = vpop.f32.mrf.mxu2 }
 0xb3c   :  { %v6743_v2 = vadd.f32 %v6742_v46, %v6654_v20  ;;  %v6567_v1 = vpop.f32.mrf.mxu0 }
 0xb3d   :  { %v6568_v56 = vadd.f32 %v6567_v1, %v14150_v43 }
 0xb3e   :  { %v6831_v7 = vpop.f32.mrf.mxu3  ;;  %v6656_v10 = vpop.f32.mrf.mxu1 }
 0xb3f   :  { %v6832_v4 = vadd.f32 %v6831_v7, %v6743_v2  ;;  %v6657_v28 = vadd.f32 %v6656_v10, %v6568_v56  ;;  %7334 = vmatmul.bf16.gmra.mxu0 %v15270_v44  ;;  %v15276_v56 = vld [vmem:[#allocation97_spill] sm:$0xff]  ;;  %v15278_v44 = vld [vmem:[#allocation79_spill] sm:$0xff] }
 0xb40   :  { %7512 = vmatmul.bf16.gmra.mxu2 %v15272_v11 }
 0xb41   :  { %v6940_v26 = vmax.f32 %v6832_v4, 0.0  ;;  %7423 = vmatmul.bf16.gmra.mxu1 %v15271_v62 }
 0xb43   :  { %7601 = vmatmul.bf16.gmra.mxu3 %v14173_v3  ;;  %v14229_v36 = vpack.c.bf16 %v6940_v26, %v6936_v59  ;;  %v6745_v34 = vpop.f32.mrf.mxu2 }
 0xb44   :  { %v6746_v47 = vadd.f32 %v6745_v34, %v6657_v28  ;;  %v6569_v55 = vpop.f32.mrf.mxu0  ;;  %v15277_v28 = vld [vmem:[#allocation55_spill] sm:$0xff] }
 0xb45   :  { %v6570_v49 = vadd.f32 %v6569_v55, %v14150_v43 }
 0xb46   :  { %v6834_v18 = vpop.f32.mrf.mxu3  ;;  %v6658_v38 = vpop.f32.mrf.mxu1 }
 0xb47   :  { %v6835_v48 = vadd.f32 %v6834_v18, %v6746_v47  ;;  %v6659_v61 = vadd.f32 %v6658_v38, %v6570_v49 }
 0xb49   :  { %v6944_v6 = vmax.f32 %v6835_v48, 0.0 }
 0xb4b   :  { %v6747_v32 = vpop.f32.mrf.mxu2 }
 0xb4c   :  { %v6748_v33 = vadd.f32 %v6747_v32, %v6659_v61  ;;  %v6572_v14 = vpop.f32.mrf.mxu0 }
 0xb4d   :  { %v6573_v17 = vadd.f32 %v6572_v14, %v14150_v43 }
 0xb4e   :  { %v6836_v54 = vpop.f32.mrf.mxu3  ;;  %v6661_v63 = vpop.f32.mrf.mxu1 }
 0xb4f   :  { %v6837_v35 = vadd.f32 %v6836_v54, %v6748_v33  ;;  %v6662_v3 = vadd.f32 %v6661_v63, %v6573_v17  ;;  %7339 = vmatmul.bf16.gmra.mxu0 %v15273_v19  ;;  %v15279_v17 = vld [vmem:[#allocation35_spill] sm:$0xff]  ;;  %v15281_v19 = vld [vmem:[#allocation22_spill] sm:$0xff] }
 0xb50   :  { %7517 = vmatmul.bf16.gmra.mxu2 %v15275_v5 }
 0xb51   :  { %v6948_v12 = vmax.f32 %v6837_v35, 0.0  ;;  %7428 = vmatmul.bf16.gmra.mxu1 %v15274_v39 }
 0xb53   :  { %7606 = vmatmul.bf16.gmra.mxu3 %v14181_v16  ;;  %v14237_v58 = vpack.c.bf16 %v6948_v12, %v6944_v6  ;;  %v6750_v23 = vpop.f32.mrf.mxu2 }
 0xb54   :  { %v6751_v30 = vadd.f32 %v6750_v23, %v6662_v3  ;;  %v6574_v42 = vpop.f32.mrf.mxu0  ;;  %v15280_v3 = vld [vmem:[#allocation56_spill] sm:$0xff] }
 0xb55   :  { %v6575_v22 = vadd.f32 %v6574_v42, %v14150_v43 }
 0xb56   :  { %v6839_v60 = vpop.f32.mrf.mxu3  ;;  %v6663_v15 = vpop.f32.mrf.mxu1 }
 0xb57   :  { %v6840_v41 = vadd.f32 %v6839_v60, %v6751_v30  ;;  %v6664_v24 = vadd.f32 %v6663_v15, %v6575_v22 }
 0xb59   :  { %v6952_v10 = vmax.f32 %v6840_v41, 0.0 }
 0xb5b   :  { %v6752_v53 = vpop.f32.mrf.mxu2 }
 0xb5c   :  { %v6753_v57 = vadd.f32 %v6752_v53, %v6664_v24  ;;  %v6577_v46 = vpop.f32.mrf.mxu0 }
 0xb5d   :  { %v6578_v2 = vadd.f32 %v6577_v46, %v14150_v43 }
 0xb5e   :  { %v6841_v20 = vpop.f32.mrf.mxu3  ;;  %v6666_v7 = vpop.f32.mrf.mxu1 }
 0xb5f   :  { %v6842_v1 = vadd.f32 %v6841_v20, %v6753_v57  ;;  %v6667_v16 = vadd.f32 %v6666_v7, %v6578_v2  ;;  %7344 = vmatmul.bf16.gmra.mxu0 %v15276_v56  ;;  %v15282_v2 = vld [vmem:[#allocation36_spill] sm:$0xff]  ;;  %v15284_v56 = vld [vmem:[#allocation81_spill] sm:$0xff] }
 0xb60   :  { %7522 = vmatmul.bf16.gmra.mxu2 %v15278_v44 }
 0xb61   :  { %v6956_v4 = vmax.f32 %v6842_v1, 0.0  ;;  %7433 = vmatmul.bf16.gmra.mxu1 %v15277_v28 }
 0xb63   :  { %7611 = vmatmul.bf16.gmra.mxu3 %v14189_v8  ;;  %v14245_v59 = vpack.c.bf16 %v6956_v4, %v6952_v10  ;;  %v6755_v26 = vpop.f32.mrf.mxu2 }
 0xb64   :  { %v6756_v62 = vadd.f32 %v6755_v26, %v6667_v16  ;;  %v6579_v34 = vpop.f32.mrf.mxu0  ;;  %v15283_v16 = vld [vmem:[#allocation122_spill] sm:$0xff] }
 0xb65   :  { %v6580_v47 = vadd.f32 %v6579_v34, %v14150_v43 }
 0xb66   :  { %v6844_v11 = vpop.f32.mrf.mxu3  ;;  %v6668_v18 = vpop.f32.mrf.mxu1 }
 0xb67   :  { %v6845_v55 = vadd.f32 %v6844_v11, %v6756_v62  ;;  %v6669_v49 = vadd.f32 %v6668_v18, %v6580_v47 }
 0xb69   :  { %v6960_v63 = vmax.f32 %v6845_v55, 0.0 }
 0xb6b   :  { %v6757_v38 = vpop.f32.mrf.mxu2 }
 0xb6c   :  { %v6758_v48 = vadd.f32 %v6757_v38, %v6669_v49  ;;  %v6582_v32 = vpop.f32.mrf.mxu0 }
 0xb6d   :  { %v6583_v33 = vadd.f32 %v6582_v32, %v14150_v43 }
 0xb6e   :  { %v6846_v61 = vpop.f32.mrf.mxu3  ;;  %v6671_v54 = vpop.f32.mrf.mxu1 }
 0xb6f   :  { %v6847_v14 = vadd.f32 %v6846_v61, %v6758_v48  ;;  %v6672_v8 = vadd.f32 %v6671_v54, %v6583_v33  ;;  %7349 = vmatmul.bf16.gmra.mxu0 %v15279_v17  ;;  %v15285_v33 = vld [vmem:[#allocation148_spill] sm:$0xff] }
 0xb70   :  { %7527 = vmatmul.bf16.gmra.mxu2 %v15281_v19 }
 0xb71   :  { %v6964_v35 = vmax.f32 %v6847_v14, 0.0  ;;  %7438 = vmatmul.bf16.gmra.mxu1 %v15280_v3 }
 0xb73   :  { %7616 = vmatmul.bf16.gmra.mxu3 %v14197_v37  ;;  %v14253_v6 = vpack.c.bf16 %v6964_v35, %v6960_v63  ;;  %v6760_v12 = vpop.f32.mrf.mxu2 }
 0xb74   :  { %v6761_v39 = vadd.f32 %v6760_v12, %v6672_v8  ;;  %v6584_v23 = vpop.f32.mrf.mxu0  ;;  %v15286_v8 = vld [vmem:[#allocation59_spill] sm:$0xff] }
 0xb75   :  { %v6585_v30 = vadd.f32 %v6584_v23, %v14150_v43 }
 0xb76   :  { %v6849_v5 = vpop.f32.mrf.mxu3  ;;  %v6673_v60 = vpop.f32.mrf.mxu1 }
 0xb77   :  { %v6850_v42 = vadd.f32 %v6849_v5, %v6761_v39  ;;  %v6674_v22 = vadd.f32 %v6673_v60, %v6585_v30 }
 0xb79   :  { %v6968_v7 = vmax.f32 %v6850_v42, 0.0 }
 0xb7b   :  { %v6762_v15 = vpop.f32.mrf.mxu2 }
 0xb7c   :  { %v6763_v41 = vadd.f32 %v6762_v15, %v6674_v22  ;;  %v6587_v53 = vpop.f32.mrf.mxu0 }
 0xb7d   :  { %v6588_v57 = vadd.f32 %v6587_v53, %v14150_v43 }
 0xb7e   :  { %v6851_v24 = vpop.f32.mrf.mxu3  ;;  %v6676_v20 = vpop.f32.mrf.mxu1 }
 0xb7f   :  { %v6852_v46 = vadd.f32 %v6851_v24, %v6763_v41  ;;  %v6677_v37 = vadd.f32 %v6676_v20, %v6588_v57  ;;  %7354 = vmatmul.bf16.gmra.mxu0 %v15282_v2  ;;  %v15287_v24 = vld [vmem:[#allocation102_spill] sm:$0xff]  ;;  %v15288_v20 = vld [vmem:[#allocation60_spill] sm:$0xff] }
 0xb80   :  { %7532 = vmatmul.bf16.gmra.mxu2 %v15284_v56 }
 0xb81   :  { %v6972_v1 = vmax.f32 %v6852_v46, 0.0  ;;  %7443 = vmatmul.bf16.gmra.mxu1 %v15283_v16 }
 0xb83   :  { %7621 = vmatmul.bf16.gmra.mxu3 %v14205_v9  ;;  %v14261_v10 = vpack.c.bf16 %v6972_v1, %v6968_v7  ;;  %v6765_v4 = vpop.f32.mrf.mxu2 }
 0xb84   :  { %v6766_v28 = vadd.f32 %v6765_v4, %v6677_v37  ;;  %v6589_v26 = vpop.f32.mrf.mxu0 }
 0xb85   :  { %v6590_v62 = vadd.f32 %v6589_v26, %v14150_v43 }
 0xb86   :  { %v6854_v44 = vpop.f32.mrf.mxu3  ;;  %v6678_v11 = vpop.f32.mrf.mxu1 }
 0xb87   :  { %v6855_v34 = vadd.f32 %v6854_v44, %v6766_v28  ;;  %v6679_v47 = vadd.f32 %v6678_v11, %v6590_v62  ;;  %v14283_v44 = vld [vmem:[%s14360_s6] ss:$0 sm:$0xff]  ;;  %s10230_s6 = smov [#allocation7]  }
 0xb88   :  { %s7713_s13 = sshll.u32 %s10230_s6, 4  ;;  %s7714_s13 = int_to_ptr.vmem [resolvable:$true] %s7713_s13 }
 0xb89   :  { %v6976_v54 = vmax.f32 %v6855_v34, 0.0 }
 0xb8b   :  { %v6767_v18 = vpop.f32.mrf.mxu2 }
 0xb8c   :  { %v6768_v55 = vadd.f32 %v6767_v18, %v6679_v47  ;;  %v6592_v38 = vpop.f32.mrf.mxu0  ;;  %v15289_v18 = vld [vmem:[#allocation39_spill] sm:$0xff] }
 0xb8d   :  { %v6593_v48 = vadd.f32 %v6592_v38, %v14150_v43 }
 0xb8e   :  { %v6856_v49 = vpop.f32.mrf.mxu3  ;;  %v6681_v61 = vpop.f32.mrf.mxu1 }
 0xb8f   :  { %v6857_v32 = vadd.f32 %v6856_v49, %v6768_v55  ;;  %v6682_v9 = vadd.f32 %v6681_v61, %v6593_v48  ;;  %7359 = vmatmul.bf16.gmra.mxu0 %v15285_v33  ;;  %v15290_v49 = vld [vmem:[#allocation63_spill] sm:$0xff] }
 0xb90   :  { %7537 = vmatmul.bf16.gmra.mxu2 %v14082_v25 }
 0xb91   :  { %v6980_v14 = vmax.f32 %v6857_v32, 0.0  ;;  %7448 = vmatmul.bf16.gmra.mxu1 %v15286_v8 }
 0xb93   :  { %7626 = vmatmul.bf16.gmra.mxu3 %v14213_v40  ;;  %v14269_v17 = vpack.c.bf16 %v6980_v14, %v6976_v54  ;;  %v6770_v63 = vpop.f32.mrf.mxu2 }
 0xb94   :  { %v6771_v35 = vadd.f32 %v6770_v63, %v6682_v9  ;;  %v6594_v19 = vpop.f32.mrf.mxu0 }
 0xb95   :  { %v6595_v12 = vadd.f32 %v6594_v19, %v14150_v43 }
 0xb96   :  { %v6859_v3 = vpop.f32.mrf.mxu3  ;;  %v6683_v39 = vpop.f32.mrf.mxu1 }
 0xb97   :  { %v6860_v5 = vadd.f32 %v6859_v3, %v6771_v35  ;;  %v6684_v23 = vadd.f32 %v6683_v39, %v6595_v12 }
 0xb99   :  { %v6984_v53 = vmax.f32 %v6860_v5, 0.0  ;;  %v15291_v5 = vld [vmem:[#allocation40_spill] sm:$0xff] }
 0xb9b   :  { %v6772_v30 = vpop.f32.mrf.mxu2 }
 0xb9c   :  { %v6773_v60 = vadd.f32 %v6772_v30, %v6684_v23  ;;  %v6597_v22 = vpop.f32.mrf.mxu0  ;;  %v15292_v23 = vld [vmem:[#allocation64_spill] sm:$0xff] }
 0xb9d   :  { %v6598_v15 = vadd.f32 %v6597_v22, %v14150_v43 }
 0xb9e   :  { %v6861_v42 = vpop.f32.mrf.mxu3  ;;  %v6686_v25 = vpop.f32.mrf.mxu1 }
 0xb9f   :  { %v6862_v41 = vadd.f32 %v6861_v42, %v6773_v60  ;;  %v6687_v40 = vadd.f32 %v6686_v25, %v6598_v15  ;;  %7364 = vmatmul.bf16.gmra.mxu0 %v15287_v24 }
 0xba0   :  { %7542 = vmatmul.bf16.gmra.mxu2 %v14090_v27 }
 0xba1   :  { %v6988_v57 = vmax.f32 %v6862_v41, 0.0  ;;  %7453 = vmatmul.bf16.gmra.mxu1 %v15288_v20 }
 0xba3   :  { %7631 = vmatmul.bf16.gmra.mxu3 %v14221_v52  ;;  %v14277_v46 = vpack.c.bf16 %v6988_v57, %v6984_v53  ;;  %v6775_v37 = vpop.f32.mrf.mxu2 }
 0xba4   :  { %v6776_v2 = vadd.f32 %v6775_v37, %v6687_v40  ;;  %v6599_v1 = vpop.f32.mrf.mxu0 }
 0xba5   :  { %v6600_v16 = vadd.f32 %v6599_v1, %v14150_v43  ;;  %v15294_v1 = vld [vmem:[#allocation67_spill] sm:$0xff] }
 0xba6   :  { %v6864_v7 = vpop.f32.mrf.mxu3  ;;  %v6688_v56 = vpop.f32.mrf.mxu1 }
 0xba7   :  { %v6865_v4 = vadd.f32 %v6864_v7, %v6776_v2  ;;  %v6689_v28 = vadd.f32 %v6688_v56, %v6600_v16 }
 0xba9   :  { %v6992_v55 = vmax.f32 %v6865_v4, 0.0 }
 0xbab   :  { %v6777_v26 = vpop.f32.mrf.mxu2 }
 0xbac   :  { %v6778_v27 = vadd.f32 %v6777_v26, %v6689_v28  ;;  %v7330_v52 = vpop.f32.mrf.mxu0 }
 0xbad   :  { %v7331_v47 = vadd.f32 %v14283_v44, %v7330_v52 }
 0xbae   :  { %v6866_v62 = vpop.f32.mrf.mxu3  ;;  %v7419_v11 = vpop.f32.mrf.mxu1 }
 0xbaf   :  { %v6867_v34 = vadd.f32 %v6866_v62, %v6778_v27  ;;  %7369 = vmatmul.bf16.gmra.mxu0 %v15289_v18  ;;  %v7420_v38 = vadd.f32 %v7419_v11, %v7331_v47 }
 0xbb0   :  { %7547 = vmatmul.bf16.gmra.mxu2 %v14098_v51 }
 0xbb1   :  { %v6996_v43 = vmax.f32 %v6867_v34, 0.0  ;;  %7458 = vmatmul.bf16.gmra.mxu1 %v15290_v49 }
 0xbb3   :  { %7636 = vmatmul.bf16.gmra.mxu3 %v14229_v36  ;;  %v14290_v48 = vpack.c.bf16 %v6996_v43, %v6992_v55  ;;  %v7508_v61 = vpop.f32.mrf.mxu2 }
 0xbb4   :  { %v7509_v32 = vadd.f32 %v7508_v61, %v7420_v38  ;;  %v7332_v33 = vpop.f32.mrf.mxu0  ;;  %v15296_v38 = vld [vmem:[#allocation68_spill] sm:$0xff] }
 0xbb5   :  { %v7333_v8 = vadd.f32 %v14283_v44, %v7332_v33 }
 0xbb6   :  { %v7597_v9 = vpop.f32.mrf.mxu3  ;;  %v7421_v54 = vpop.f32.mrf.mxu1 }
 0xbb7   :  { %v7598_v14 = vadd.f32 %v7597_v9, %v7509_v32  ;;  %v7422_v63 = vadd.f32 %v7421_v54, %v7333_v8 }
 0xbb9   :  { %7677 = vst [vmem:[#allocation7] sm:$0xff] %v7598_v14 }
 0xbbb   :  { %v7510_v35 = vpop.f32.mrf.mxu2 }
 0xbbc   :  { %v7511_v3 = vadd.f32 %v7510_v35, %v7422_v63  ;;  %v7335_v12 = vpop.f32.mrf.mxu0 }
 0xbbd   :  { %v7336_v36 = vadd.f32 %v14283_v44, %v7335_v12 }
 0xbbe   :  { %v7599_v19 = vpop.f32.mrf.mxu3  ;;  %v7424_v51 = vpop.f32.mrf.mxu1 }
 0xbbf   :  { %v7600_v39 = vadd.f32 %v7599_v19, %v7511_v3  ;;  %7374 = vmatmul.bf16.gmra.mxu0 %v15291_v5  ;;  %v7425_v30 = vadd.f32 %v7424_v51, %v7336_v36  ;;  %v15298_v5 = vld [vmem:[#allocation134_spill] sm:$0xff] }
 0xbc0   :  { %7552 = vmatmul.bf16.gmra.mxu2 %v14106_v31 }
 0xbc1   :  { %7678 = vst [vmem:[#allocation7 + $0x8] sm:$0xff] %v7600_v39  ;;  %7463 = vmatmul.bf16.gmra.mxu1 %v15292_v23 }
 0xbc3   :  { %7641 = vmatmul.bf16.gmra.mxu3 %v14237_v58  ;;  %v7513_v60 = vpop.f32.mrf.mxu2  ;;  %v15293_v58 = vld [vmem:[#allocation41_spill] sm:$0xff] }
 0xbc4   :  { %v7514_v42 = vadd.f32 %v7513_v60, %v7425_v30  ;;  %v7337_v15 = vpop.f32.mrf.mxu0 }
 0xbc5   :  { %v7338_v40 = vadd.f32 %v14283_v44, %v7337_v15 }
 0xbc6   :  { %v7602_v22 = vpop.f32.mrf.mxu3  ;;  %v7426_v25 = vpop.f32.mrf.mxu1 }
 0xbc7   :  { %v7603_v41 = vadd.f32 %v7602_v22, %v7514_v42  ;;  %v7427_v24 = vadd.f32 %v7426_v25, %v7338_v40 }
 0xbc9   :  { %7679 = vst [vmem:[#allocation7 + $0x10] sm:$0xff] %v7603_v41 }
 0xbcb   :  { %v7515_v53 = vpop.f32.mrf.mxu2 }
 0xbcc   :  { %v7516_v57 = vadd.f32 %v7515_v53, %v7427_v24  ;;  %v7340_v37 = vpop.f32.mrf.mxu0 }
 0xbcd   :  { %v7341_v31 = vadd.f32 %v14283_v44, %v7340_v37 }
 0xbce   :  { %v7604_v20 = vpop.f32.mrf.mxu3  ;;  %v7429_v2 = vpop.f32.mrf.mxu1 }
 0xbcf   :  { %v7605_v7 = vadd.f32 %v7604_v20, %v7516_v57  ;;  %7379 = vmatmul.bf16.gmra.mxu0 %v15293_v58  ;;  %v7430_v16 = vadd.f32 %v7429_v2, %v7341_v31 }
 0xbd0   :  { %7557 = vmatmul.bf16.gmra.mxu2 %v14114_v13 }
 0xbd1   :  { %7680 = vst [vmem:[#allocation7 + $0x18] sm:$0xff] %v7605_v7  ;;  %7468 = vmatmul.bf16.gmra.mxu1 %v15294_v1  ;;  %v15300_v7 = vld [vmem:[#allocation71_spill] sm:$0xff] }
 0xbd3   :  { %7646 = vmatmul.bf16.gmra.mxu3 %v14245_v59  ;;  %v7518_v56 = vpop.f32.mrf.mxu2  ;;  %v15295_v59 = vld [vmem:[#allocation43_spill] sm:$0xff] }
 0xbd4   :  { %v7519_v4 = vadd.f32 %v7518_v56, %v7430_v16  ;;  %v7342_v26 = vpop.f32.mrf.mxu0 }
 0xbd5   :  { %v7343_v52 = vadd.f32 %v14283_v44, %v7342_v26 }
 0xbd6   :  { %v7607_v28 = vpop.f32.mrf.mxu3  ;;  %v7431_v27 = vpop.f32.mrf.mxu1 }
 0xbd7   :  { %v7608_v62 = vadd.f32 %v7607_v28, %v7519_v4  ;;  %v7432_v11 = vadd.f32 %v7431_v27, %v7343_v52 }
 0xbd9   :  { %7681 = vst [vmem:[#allocation7 + $0x20] sm:$0xff] %v7608_v62 }
 0xbdb   :  { %v7520_v34 = vpop.f32.mrf.mxu2 }
 0xbdc   :  { %v7521_v47 = vadd.f32 %v7520_v34, %v7432_v11  ;;  %v7345_v55 = vpop.f32.mrf.mxu0 }
 0xbdd   :  { %v7346_v13 = vadd.f32 %v14283_v44, %v7345_v55  ;;  %v15302_v55 = vld [vmem:[#allocation72_spill] sm:$0xff] }
 0xbde   :  { %v7609_v18 = vpop.f32.mrf.mxu3  ;;  %v7434_v43 = vpop.f32.mrf.mxu1 }
 0xbdf   :  { %v7610_v49 = vadd.f32 %v7609_v18, %v7521_v47  ;;  %7384 = vmatmul.bf16.gmra.mxu0 %v15295_v59  ;;  %v7435_v61 = vadd.f32 %v7434_v43, %v7346_v13 }
 0xbe0   :  { %7562 = vmatmul.bf16.gmra.mxu2 %v14122_v50 }
 0xbe1   :  { %7682 = vst [vmem:[#allocation7 + $0x28] sm:$0xff] %v7610_v49  ;;  %7473 = vmatmul.bf16.gmra.mxu1 %v15296_v38 }
 0xbe3   :  { %7651 = vmatmul.bf16.gmra.mxu3 %v14253_v6  ;;  %v7523_v32 = vpop.f32.mrf.mxu2  ;;  %v15297_v6 = vld [vmem:[#allocation44_spill] sm:$0xff] }
 0xbe4   :  { %v7524_v9 = vadd.f32 %v7523_v32, %v7435_v61  ;;  %v7347_v54 = vpop.f32.mrf.mxu0 }
 0xbe5   :  { %v7348_v63 = vadd.f32 %v14283_v44, %v7347_v54 }
 0xbe6   :  { %v7612_v33 = vpop.f32.mrf.mxu3  ;;  %v7436_v14 = vpop.f32.mrf.mxu1 }
 0xbe7   :  { %v7613_v8 = vadd.f32 %v7612_v33, %v7524_v9  ;;  %v7437_v35 = vadd.f32 %v7436_v14, %v7348_v63 }
 0xbe9   :  { %7683 = vst [vmem:[#allocation7 + $0x30] sm:$0xff] %v7613_v8 }
 0xbeb   :  { %v7525_v3 = vpop.f32.mrf.mxu2 }
 0xbec   :  { %v7526_v19 = vadd.f32 %v7525_v3, %v7437_v35  ;;  %v7350_v51 = vpop.f32.mrf.mxu0 }
 0xbed   :  { %v7351_v50 = vadd.f32 %v14283_v44, %v7350_v51 }
 0xbee   :  { %v7614_v12 = vpop.f32.mrf.mxu3  ;;  %v7439_v39 = vpop.f32.mrf.mxu1 }
 0xbef   :  { %v7615_v36 = vadd.f32 %v7614_v12, %v7526_v19  ;;  %7389 = vmatmul.bf16.gmra.mxu0 %v15297_v6  ;;  %v7440_v23 = vadd.f32 %v7439_v39, %v7351_v50  ;;  %v15304_v19 = vld [vmem:[#allocation75_spill] sm:$0xff] }
 0xbf0   :  { %7567 = vmatmul.bf16.gmra.mxu2 %v14130_v0 }
 0xbf1   :  { %7684 = vst [vmem:[#allocation7 + $0x38] sm:$0xff] %v7615_v36  ;;  %7478 = vmatmul.bf16.gmra.mxu1 %v15298_v5 }
 0xbf3   :  { %7656 = vmatmul.bf16.gmra.mxu3 %v14261_v10  ;;  %v7528_v30 = vpop.f32.mrf.mxu2  ;;  %v15299_v10 = vld [vmem:[#allocation47_spill] sm:$0xff] }
 0xbf4   :  { %v7529_v60 = vadd.f32 %v7528_v30, %v7440_v23  ;;  %v7352_v22 = vpop.f32.mrf.mxu0 }
 0xbf5   :  { %v7353_v41 = vadd.f32 %v14283_v44, %v7352_v22 }
 0xbf6   :  { %v7617_v42 = vpop.f32.mrf.mxu3  ;;  %v7441_v15 = vpop.f32.mrf.mxu1 }
 0xbf7   :  { %v7618_v25 = vadd.f32 %v7617_v42, %v7529_v60  ;;  %v7442_v40 = vadd.f32 %v7441_v15, %v7353_v41 }
 0xbf9   :  { %7685 = vst [vmem:[#allocation7 + $0x40] sm:$0xff] %v7618_v25 }
 0xbfb   :  { %v7530_v24 = vpop.f32.mrf.mxu2 }
 0xbfc   :  { %v7531_v53 = vadd.f32 %v7530_v24, %v7442_v40  ;;  %v7355_v20 = vpop.f32.mrf.mxu0 }
 0xbfd   :  { %v7356_v0 = vadd.f32 %v14283_v44, %v7355_v20 }
 0xbfe   :  { %v7619_v57 = vpop.f32.mrf.mxu3  ;;  %v7444_v37 = vpop.f32.mrf.mxu1 }
 0xbff   :  { %v7620_v2 = vadd.f32 %v7619_v57, %v7531_v53  ;;  %7394 = vmatmul.bf16.gmra.mxu0 %v15299_v10  ;;  %v7445_v31 = vadd.f32 %v7444_v37, %v7356_v0 }
 0xc00   :  { %7572 = vmatmul.bf16.gmra.mxu2 %v14138_v45 }
 0xc01   :  { %7686 = vst [vmem:[#allocation7 + $0x48] sm:$0xff] %v7620_v2  ;;  %7483 = vmatmul.bf16.gmra.mxu1 %v15300_v7 }
 0xc03   :  { %7661 = vmatmul.bf16.gmra.mxu3 %v14269_v17  ;;  %v7533_v58 = vpop.f32.mrf.mxu2  ;;  %v15301_v17 = vld [vmem:[#allocation48_spill] sm:$0xff] }
 0xc04   :  { %v7534_v1 = vadd.f32 %v7533_v58, %v7445_v31  ;;  %v7357_v56 = vpop.f32.mrf.mxu0 }
 0xc05   :  { %v7358_v26 = vadd.f32 %v14283_v44, %v7357_v56 }
 0xc06   :  { %v7622_v16 = vpop.f32.mrf.mxu3  ;;  %v7446_v4 = vpop.f32.mrf.mxu1 }
 0xc07   :  { %v7623_v28 = vadd.f32 %v7622_v16, %v7534_v1  ;;  %v7447_v27 = vadd.f32 %v7446_v4, %v7358_v26 }
 0xc09   :  { %7687 = vst [vmem:[#allocation7 + $0x50] sm:$0xff] %v7623_v28 }
 0xc0b   :  { %v7535_v62 = vpop.f32.mrf.mxu2 }
 0xc0c   :  { %v7536_v52 = vadd.f32 %v7535_v62, %v7447_v27  ;;  %v7360_v34 = vpop.f32.mrf.mxu0 }
 0xc0d   :  { %v7361_v45 = vadd.f32 %v14283_v44, %v7360_v34 }
 0xc0e   :  { %v7624_v11 = vpop.f32.mrf.mxu3  ;;  %v7449_v47 = vpop.f32.mrf.mxu1 }
 0xc0f   :  { %v7625_v18 = vadd.f32 %v7624_v11, %v7536_v52  ;;  %7399 = vmatmul.bf16.gmra.mxu0 %v15301_v17  ;;  %v7450_v43 = vadd.f32 %v7449_v47, %v7361_v45 }
 0xc10   :  { %7577 = vmatmul.bf16.gmra.mxu2 %v14146_v29 }
 0xc11   :  { %7688 = vst [vmem:[#allocation7 + $0x58] sm:$0xff] %v7625_v18  ;;  %7488 = vmatmul.bf16.gmra.mxu1 %v15302_v55 }
 0xc13   :  { %7666 = vmatmul.bf16.gmra.mxu3 %v14277_v46  ;;  %v7538_v49 = vpop.f32.mrf.mxu2  ;;  %v15303_v46 = vld [vmem:[#allocation114_spill] sm:$0xff] }
 0xc14   :  { %v7539_v13 = vadd.f32 %v7538_v49, %v7450_v43  ;;  %v7362_v38 = vpop.f32.mrf.mxu0 }
 0xc15   :  { %v7363_v9 = vadd.f32 %v14283_v44, %v7362_v38 }
 0xc16   :  { %v7627_v59 = vpop.f32.mrf.mxu3  ;;  %v7451_v61 = vpop.f32.mrf.mxu1 }
 0xc17   :  { %v7628_v32 = vadd.f32 %v7627_v59, %v7539_v13  ;;  %v7452_v33 = vadd.f32 %v7451_v61, %v7363_v9 }
 0xc19   :  { %7689 = vst [vmem:[#allocation7 + $0x60] sm:$0xff] %v7628_v32 }
 0xc1b   :  { %v7540_v54 = vpop.f32.mrf.mxu2 }
 0xc1c   :  { %v7541_v14 = vadd.f32 %v7540_v54, %v7452_v33  ;;  %v7365_v63 = vpop.f32.mrf.mxu0 }
 0xc1d   :  { %v7366_v29 = vadd.f32 %v14283_v44, %v7365_v63 }
 0xc1e   :  { %v7629_v8 = vpop.f32.mrf.mxu3  ;;  %v7454_v35 = vpop.f32.mrf.mxu1 }
 0xc1f   :  { %v7630_v3 = vadd.f32 %v7629_v8, %v7541_v14  ;;  %7404 = vmatmul.bf16.gmra.mxu0 %v15303_v46  ;;  %v7455_v12 = vadd.f32 %v7454_v35, %v7366_v29 }
 0xc20   :  { %7582 = vmatmul.bf16.gmra.mxu2 %v14157_v21 }
 0xc21   :  { %7690 = vst [vmem:[#allocation7 + $0x68] sm:$0xff] %v7630_v3  ;;  %7493 = vmatmul.bf16.gmra.mxu1 %v15304_v19 }
 0xc23   :  { %7671 = vmatmul.bf16.gmra.mxu3 %v14290_v48  ;;  %v7543_v51 = vpop.f32.mrf.mxu2 }
 0xc24   :  { %v7544_v39 = vadd.f32 %v7543_v51, %v7455_v12  ;;  %v7367_v50 = vpop.f32.mrf.mxu0 }
 0xc25   :  { %v7368_v23 = vadd.f32 %v14283_v44, %v7367_v50 }
 0xc26   :  { %v7632_v36 = vpop.f32.mrf.mxu3  ;;  %v7456_v6 = vpop.f32.mrf.mxu1 }
 0xc27   :  { %v7633_v5 = vadd.f32 %v7632_v36, %v7544_v39  ;;  %v7457_v30 = vadd.f32 %v7456_v6, %v7368_v23 }
 0xc29   :  { %7691 = vst [vmem:[#allocation7 + $0x70] sm:$0xff] %v7633_v5 }
 0xc2b   :  { %v7545_v60 = vpop.f32.mrf.mxu2 }
 0xc2c   :  { %v7546_v42 = vadd.f32 %v7545_v60, %v7457_v30  ;;  %v7370_v15 = vpop.f32.mrf.mxu0 }
 0xc2d   :  { %v7371_v21 = vadd.f32 %v14283_v44, %v7370_v15 }
 0xc2e   :  { %v7634_v22 = vpop.f32.mrf.mxu3  ;;  %v7459_v25 = vpop.f32.mrf.mxu1 }
 0xc2f   :  { %v7635_v41 = vadd.f32 %v7634_v22, %v7546_v42  ;;  %v7460_v48 = vadd.f32 %v7459_v25, %v7371_v21 }
 0xc31   :  { %7692 = vst [vmem:[#allocation7 + $0x78] sm:$0xff] %v7635_v41 }
 0xc33   :  { %v7548_v40 = vpop.f32.mrf.mxu2 }
 0xc34   :  { %v7549_v24 = vadd.f32 %v7548_v40, %v7460_v48  ;;  %v7372_v57 = vpop.f32.mrf.mxu0 }
 0xc35   :  { %v7373_v2 = vadd.f32 %v14283_v44, %v7372_v57 }
 0xc36   :  { %v7637_v53 = vpop.f32.mrf.mxu3  ;;  %v7461_v20 = vpop.f32.mrf.mxu1 }
 0xc37   :  { %v7638_v37 = vadd.f32 %v7637_v53, %v7549_v24  ;;  %v7462_v0 = vadd.f32 %v7461_v20, %v7373_v2 }
 0xc39   :  { %7693 = vst [vmem:[#allocation7 + $0x80] sm:$0xff] %v7638_v37 }
 0xc3b   :  { %v7550_v10 = vpop.f32.mrf.mxu2 }
 0xc3c   :  { %v7551_v7 = vadd.f32 %v7550_v10, %v7462_v0  ;;  %v7375_v58 = vpop.f32.mrf.mxu0 }
 0xc3d   :  { %v7376_v56 = vadd.f32 %v14283_v44, %v7375_v58 }
 0xc3e   :  { %v7639_v31 = vpop.f32.mrf.mxu3  ;;  %v7464_v1 = vpop.f32.mrf.mxu1 }
 0xc3f   :  { %v7640_v16 = vadd.f32 %v7639_v31, %v7551_v7  ;;  %v7465_v4 = vadd.f32 %v7464_v1, %v7376_v56 }
 0xc41   :  { %7694 = vst [vmem:[#allocation7 + $0x88] sm:$0xff] %v7640_v16 }
 0xc43   :  { %v7553_v28 = vpop.f32.mrf.mxu2 }
 0xc44   :  { %v7554_v26 = vadd.f32 %v7553_v28, %v7465_v4  ;;  %v7377_v62 = vpop.f32.mrf.mxu0 }
 0xc45   :  { %v7378_v34 = vadd.f32 %v14283_v44, %v7377_v62 }
 0xc46   :  { %v7642_v27 = vpop.f32.mrf.mxu3  ;;  %v7466_v52 = vpop.f32.mrf.mxu1 }
 0xc47   :  { %v7643_v11 = vadd.f32 %v7642_v27, %v7554_v26  ;;  %v7467_v47 = vadd.f32 %v7466_v52, %v7378_v34 }
 0xc49   :  { %7695 = vst [vmem:[#allocation7 + $0x90] sm:$0xff] %v7643_v11 }
 0xc4b   :  { %v7555_v18 = vpop.f32.mrf.mxu2 }
 0xc4c   :  { %v7556_v45 = vadd.f32 %v7555_v18, %v7467_v47  ;;  %v7380_v55 = vpop.f32.mrf.mxu0 }
 0xc4d   :  { %v7381_v13 = vadd.f32 %v14283_v44, %v7380_v55 }
 0xc4e   :  { %v7644_v17 = vpop.f32.mrf.mxu3  ;;  %v7469_v43 = vpop.f32.mrf.mxu1 }
 0xc4f   :  { %v7645_v49 = vadd.f32 %v7644_v17, %v7556_v45  ;;  %v7470_v59 = vadd.f32 %v7469_v43, %v7381_v13 }
 0xc51   :  { %7696 = vst [vmem:[#allocation7 + $0x98] sm:$0xff] %v7645_v49 }
 0xc53   :  { %v7558_v38 = vpop.f32.mrf.mxu2 }
 0xc54   :  { %v7559_v61 = vadd.f32 %v7558_v38, %v7470_v59  ;;  %v7382_v9 = vpop.f32.mrf.mxu0 }
 0xc55   :  { %v7383_v14 = vadd.f32 %v14283_v44, %v7382_v9 }
 0xc56   :  { %v7647_v32 = vpop.f32.mrf.mxu3  ;;  %v7471_v33 = vpop.f32.mrf.mxu1 }
 0xc57   :  { %v7648_v54 = vadd.f32 %v7647_v32, %v7559_v61  ;;  %v7472_v8 = vadd.f32 %v7471_v33, %v7383_v14 }
 0xc59   :  { %7697 = vst [vmem:[#allocation7 + $0xa0] sm:$0xff] %v7648_v54 }
 0xc5b   :  { %v7560_v63 = vpop.f32.mrf.mxu2 }
 0xc5c   :  { %v7561_v35 = vadd.f32 %v7560_v63, %v7472_v8  ;;  %v7385_v29 = vpop.f32.mrf.mxu0 }
 0xc5d   :  { %v7386_v12 = vadd.f32 %v14283_v44, %v7385_v29 }
 0xc5e   :  { %v7649_v3 = vpop.f32.mrf.mxu3  ;;  %v7474_v46 = vpop.f32.mrf.mxu1 }
 0xc5f   :  { %v7650_v19 = vadd.f32 %v7649_v3, %v7561_v35  ;;  %v7475_v51 = vadd.f32 %v7474_v46, %v7386_v12 }
 0xc61   :  { %7698 = vst [vmem:[#allocation7 + $0xa8] sm:$0xff] %v7650_v19 }
 0xc63   :  { %v7563_v39 = vpop.f32.mrf.mxu2 }
 0xc64   :  { %v7564_v36 = vadd.f32 %v7563_v39, %v7475_v51  ;;  %v7387_v6 = vpop.f32.mrf.mxu0 }
 0xc65   :  { %v7388_v30 = vadd.f32 %v14283_v44, %v7387_v6 }
 0xc66   :  { %v7652_v50 = vpop.f32.mrf.mxu3  ;;  %v7476_v5 = vpop.f32.mrf.mxu1 }
 0xc67   :  { %v7653_v23 = vadd.f32 %v7652_v50, %v7564_v36  ;;  %v7477_v60 = vadd.f32 %v7476_v5, %v7388_v30 }
 0xc69   :  { %7699 = vst [vmem:[#allocation7 + $0xb0] sm:$0xff] %v7653_v23 }
 0xc6b   :  { %v7565_v42 = vpop.f32.mrf.mxu2 }
 0xc6c   :  { %v7566_v22 = vadd.f32 %v7565_v42, %v7477_v60  ;;  %v7390_v25 = vpop.f32.mrf.mxu0 }
 0xc6d   :  { %v7391_v48 = vadd.f32 %v14283_v44, %v7390_v25 }
 0xc6e   :  { %v7654_v15 = vpop.f32.mrf.mxu3  ;;  %v7479_v41 = vpop.f32.mrf.mxu1 }
 0xc6f   :  { %v7655_v21 = vadd.f32 %v7654_v15, %v7566_v22  ;;  %v7480_v40 = vadd.f32 %v7479_v41, %v7391_v48 }
 0xc71   :  { %7700 = vst [vmem:[#allocation7 + $0xb8] sm:$0xff] %v7655_v21 }
 0xc73   :  { %v7568_v24 = vpop.f32.mrf.mxu2 }
 0xc74   :  { %v7569_v53 = vadd.f32 %v7568_v24, %v7480_v40  ;;  %v7392_v20 = vpop.f32.mrf.mxu0 }
 0xc75   :  { %v7393_v0 = vadd.f32 %v14283_v44, %v7392_v20 }
 0xc76   :  { %v7657_v57 = vpop.f32.mrf.mxu3  ;;  %v7481_v37 = vpop.f32.mrf.mxu1 }
 0xc77   :  { %v7658_v2 = vadd.f32 %v7657_v57, %v7569_v53  ;;  %v7482_v10 = vadd.f32 %v7481_v37, %v7393_v0 }
 0xc79   :  { %7701 = vst [vmem:[#allocation7 + $0xc0] sm:$0xff] %v7658_v2 }
 0xc7b   :  { %v7570_v7 = vpop.f32.mrf.mxu2 }
 0xc7c   :  { %v7571_v31 = vadd.f32 %v7570_v7, %v7482_v10  ;;  %v7395_v1 = vpop.f32.mrf.mxu0 }
 0xc7d   :  { %v7396_v4 = vadd.f32 %v14283_v44, %v7395_v1 }
 0xc7e   :  { %v7659_v58 = vpop.f32.mrf.mxu3  ;;  %v7484_v16 = vpop.f32.mrf.mxu1 }
 0xc7f   :  { %v7660_v56 = vadd.f32 %v7659_v58, %v7571_v31  ;;  %v7485_v28 = vadd.f32 %v7484_v16, %v7396_v4 }
 0xc81   :  { %7702 = vst [vmem:[#allocation7 + $0xc8] sm:$0xff] %v7660_v56 }
 0xc83   :  { %v7573_v26 = vpop.f32.mrf.mxu2 }
 0xc84   :  { %v7574_v27 = vadd.f32 %v7573_v26, %v7485_v28  ;;  %v7397_v52 = vpop.f32.mrf.mxu0 }
 0xc85   :  { %v7398_v47 = vadd.f32 %v14283_v44, %v7397_v52 }
 0xc86   :  { %v7662_v62 = vpop.f32.mrf.mxu3  ;;  %v7486_v11 = vpop.f32.mrf.mxu1 }
 0xc87   :  { %v7663_v34 = vadd.f32 %v7662_v62, %v7574_v27  ;;  %v7487_v18 = vadd.f32 %v7486_v11, %v7398_v47 }
 0xc89   :  { %7703 = vst [vmem:[#allocation7 + $0xd0] sm:$0xff] %v7663_v34 }
 0xc8b   :  { %v7575_v45 = vpop.f32.mrf.mxu2 }
 0xc8c   :  { %v7576_v17 = vadd.f32 %v7575_v45, %v7487_v18  ;;  %v7400_v43 = vpop.f32.mrf.mxu0 }
 0xc8d   :  { %v7401_v59 = vadd.f32 %v14283_v44, %v7400_v43 }
 0xc8e   :  { %v7664_v55 = vpop.f32.mrf.mxu3  ;;  %v7489_v49 = vpop.f32.mrf.mxu1 }
 0xc8f   :  { %v7665_v13 = vadd.f32 %v7664_v55, %v7576_v17  ;;  %v7490_v38 = vadd.f32 %v7489_v49, %v7401_v59 }
 0xc91   :  { %7704 = vst [vmem:[#allocation7 + $0xd8] sm:$0xff] %v7665_v13 }
 0xc93   :  { %v7578_v61 = vpop.f32.mrf.mxu2 }
 0xc94   :  { %v7579_v32 = vadd.f32 %v7578_v61, %v7490_v38  ;;  %v7402_v33 = vpop.f32.mrf.mxu0 }
 0xc95   :  { %v7403_v8 = vadd.f32 %v14283_v44, %v7402_v33 }
 0xc96   :  { %v7667_v9 = vpop.f32.mrf.mxu3  ;;  %v7491_v54 = vpop.f32.mrf.mxu1 }
 0xc97   :  { %v7668_v14 = vadd.f32 %v7667_v9, %v7579_v32  ;;  %v7492_v63 = vadd.f32 %v7491_v54, %v7403_v8 }
 0xc99   :  { %7705 = vst [vmem:[#allocation7 + $0xe0] sm:$0xff] %v7668_v14 }
 0xc9b   :  { %v7580_v35 = vpop.f32.mrf.mxu2 }
 0xc9c   :  { %v7581_v3 = vadd.f32 %v7580_v35, %v7492_v63  ;;  %v7405_v46 = vpop.f32.mrf.mxu0 }
 0xc9d   :  { %v7406_v12 = vadd.f32 %v14283_v44, %v7405_v46 }
 0xc9e   :  { %v7669_v29 = vpop.f32.mrf.mxu3  ;;  %v7494_v51 = vpop.f32.mrf.mxu1 }
 0xc9f   :  { %v7670_v19 = vadd.f32 %v7669_v29, %v7581_v3  ;;  %v7495_v39 = vadd.f32 %v7494_v51, %v7406_v12 }
 0xca1   :  { %7706 = vst [vmem:[#allocation7 + $0xe8] sm:$0xff] %v7670_v19 }
 0xca3   :  { %v7583_v36 = vpop.f32.mrf.mxu2 }
 0xca4   :  { %v7584_v50 = vadd.f32 %v7583_v36, %v7495_v39  ;;  %v7407_v5 = vpop.f32.mrf.mxu0 }
 0xca5   :  { %v7408_v30 = vadd.f32 %v14283_v44, %v7407_v5 }
 0xca6   :  { %v7672_v6 = vpop.f32.mrf.mxu3  ;;  %v7496_v60 = vpop.f32.mrf.mxu1 }
 0xca7   :  { %v7673_v23 = vadd.f32 %v7672_v6, %v7584_v50  ;;  %v7497_v42 = vadd.f32 %v7496_v60, %v7408_v30 }
 0xca9   :  { %7707 = vst [vmem:[#allocation7 + $0xf0] sm:$0xff] %v7673_v23 }
 0xcab   :  { %v7585_v22 = vpop.f32.mrf.mxu2 }
 0xcac   :  { %v7586_v15 = vadd.f32 %v7585_v22, %v7497_v42 }
 0xcae   :  { %v7674_v25 = vpop.f32.mrf.mxu3 }
 0xcaf   :  { %v7675_v41 = vadd.f32 %v7674_v25, %v7586_v15 }
 0xcb1   :  { %7708 = vst [vmem:[#allocation7 + $0xf8] sm:$0xff] %v7675_v41 }
 0xcb2   :  { %7721 = dma.vmem_to_hbm [thread:$0]  %s7714_s13, 4096, %s7716_s15, [#allocation4], %s10231_s16, %s10231_s16, %s10232_s5  }
 0xcb3   :  { %10222 = dma.done.wait [#allocation4], 4096  }
 0xcb4   :  { %10223 = vsyncadd [#allocation4], 4294963200 }
 0xcb5   :  { %7726 = vsyncpa [#allocation3], 1 }
 0xcb6   :  { %7727 = vsyncpa [#allocation6], 1 }
 0xcb7   :  { %7728 = vsyncpa [#allocation4], 1 }

</bundles_post_ra>
